<compile_context>
chip_gen: v7x
topology: tpu7x:2x2x1
jax: 0.10.0
libtpu: 0.0.40
codegen_flags: <defaults>
</compile_context>

<pallas_src>
import jax
import jax.numpy as jnp
from jax import lax
from jax.experimental import pallas as pl
from jax.experimental.pallas import tpu as pltpu

D_BASIC = 300   # GloVe embedding size (typical 300-d GloVe file)
D_MODIF = 100   # nn.Embedding(len(corpus), 100)
D_OUT = D_BASIC + D_MODIF

ROWS_PER_STEP = 64   # output rows per grid step (multiple of 8; keeps grid>=2
                     # on v7x for batches > 64 while amortizing step overhead)
DMA_DEPTH = 16       # row DMAs kept in flight per semaphore bank

assert ROWS_PER_STEP % 8 == 0
assert ROWS_PER_STEP % DMA_DEPTH == 0 and ROWS_PER_STEP >= DMA_DEPTH


def _make_gather_kernel(pairwise: bool):
    """Row-gather kernel: DMA table rows from HBM straight into the output block.

    pairwise=False: one DMA per row   table[id]            -> out[r, :]
    pairwise=True : two DMAs per row  table[obj,  :300]    -> out[r, :300]
                                      table[attr, 300:400] -> out[r, 300:400]
    """

    def kernel(*args):
        if pairwise:
            nrows_ref, obj_ref, attr_ref, table_hbm, out_ref, sems = args
        else:
            nrows_ref, obj_ref, table_hbm, out_ref, sems = args
            attr_ref = obj_ref

        base = pl.program_id(0) * ROWS_PER_STEP
        # True number of rows this grid step must gather (>= 1 by construction).
        nrows = jnp.minimum(nrows_ref[0] - base, ROWS_PER_STEP)

        def read_ids(r):
            # SMEM scalar reads.  Call BEFORE any .wait(): waits break SMEM
            # sst->sld forwarding and stall the (binding) scalar core.
            if pairwise:
                return obj_ref[base + r], attr_ref[base + r]
            return obj_ref[base + r]

        def start(r, slot, ids):
            if pairwise:
                obj, attr = ids
                pltpu.make_async_copy(
                    table_hbm.at[obj, pl.ds(0, D_BASIC)],
                    out_ref.at[r, pl.ds(0, D_BASIC)],
                    sems.at[0, slot]).start()
                pltpu.make_async_copy(
                    table_hbm.at[attr, pl.ds(D_BASIC, D_MODIF)],
                    out_ref.at[r, pl.ds(D_BASIC, D_MODIF)],
                    sems.at[1, slot]).start()
            else:
                pltpu.make_async_copy(
                    table_hbm.at[ids], out_ref.at[r], sems.at[0, slot]).start()

        def wait(slot):
            # Wait descriptors only need the byte count; every row copy within
            # a bank has an identical, statically-fixed size, so row-0 views
            # built from the SAME slices as the starts are safe here.
            if pairwise:
                pltpu.make_async_copy(
                    table_hbm.at[0, pl.ds(0, D_BASIC)],
                    out_ref.at[0, pl.ds(0, D_BASIC)],
                    sems.at[0, slot]).wait()
                pltpu.make_async_copy(
                    table_hbm.at[0, pl.ds(D_BASIC, D_MODIF)],
                    out_ref.at[0, pl.ds(D_BASIC, D_MODIF)],
                    sems.at[1, slot]).wait()
            else:
                pltpu.make_async_copy(
                    table_hbm.at[0], out_ref.at[0], sems.at[0, slot]).wait()

        # -- Fast path: full step (all ROWS_PER_STEP rows are real).  Fully
        #    unrolled so the LLO scheduler can overlap descriptor builds.
        @pl.when(nrows == ROWS_PER_STEP)
        def _():
            for r in range(DMA_DEPTH):                   # prime
                start(r, r % DMA_DEPTH, read_ids(r))
            for r in range(DMA_DEPTH, ROWS_PER_STEP):    # steady state
                ids = read_ids(r)                        # SMEM read before wait
                slot = r % DMA_DEPTH
                wait(slot)
                start(r, slot, ids)
            for slot in range(DMA_DEPTH):                # drain
                wait(slot)

        # -- Slow path: partial (last) step.  Issues DMAs only for real rows,
        #    so small batches don't pay for the padded tail.
        @pl.when(nrows < ROWS_PER_STEP)
        def _():
            nprime = jnp.minimum(nrows, DMA_DEPTH)

            def prime_body(r, carry):
                start(r, r % DMA_DEPTH, read_ids(r))
                return carry

            lax.fori_loop(0, nprime, prime_body, 0)

            def steady_body(r, carry):
                ids = read_ids(r)                        # SMEM read before wait
                slot = r % DMA_DEPTH
                wait(slot)
                start(r, slot, ids)
                return carry

            lax.fori_loop(DMA_DEPTH, nrows, steady_body, 0)

            def drain_body(k, carry):
                wait((nrows - nprime + k) % DMA_DEPTH)
                return carry

            lax.fori_loop(0, nprime, drain_body, 0)

    return kernel


_single_kernel = _make_gather_kernel(pairwise=False)   # obj_id == attr_id paths
_pair_kernel = _make_gather_kernel(pairwise=True)      # (obj_id, attr_id) tuples


@jax.jit
def _encode_single_padded(nrows, ids, table):
    """ids: int32 [n_pad] (n_pad % ROWS_PER_STEP == 0); one row DMA per row."""
    n_pad = ids.shape[0]
    ids = jnp.clip(ids, 0, table.shape[0] - 1).astype(jnp.int32)
    return pl.pallas_call(
        _single_kernel,
        out_shape=jax.ShapeDtypeStruct((n_pad, D_OUT), jnp.float32),
        grid_spec=pltpu.PrefetchScalarGridSpec(
            num_scalar_prefetch=2,                       # nrows, ids -> SMEM
            grid=(n_pad // ROWS_PER_STEP,),
            in_specs=[pl.BlockSpec(memory_space=pl.ANY)],  # [V,400] table in HBM
            out_specs=pl.BlockSpec((ROWS_PER_STEP, D_OUT), lambda i, *_: (i, 0)),
            scratch_shapes=[pltpu.SemaphoreType.DMA((1, DMA_DEPTH))],
        ),
        compiler_params=pltpu.CompilerParams(
            dimension_semantics=("parallel",)),
    )(nrows, ids, table)


@jax.jit
def _encode_pair_padded(nrows, obj_ids, attr_ids, table):
    """obj/attr ids: int32 [n_pad]; two column-half DMAs per row."""
    n_pad = obj_ids.shape[0]
    obj_ids = jnp.clip(obj_ids, 0, table.shape[0] - 1).astype(jnp.int32)
    attr_ids = jnp.clip(attr_ids, 0, table.shape[0] - 1).astype(jnp.int32)
    return pl.pallas_call(
        _pair_kernel,
        out_shape=jax.ShapeDtypeStruct((n_pad, D_OUT), jnp.float32),
        grid_spec=pltpu.PrefetchScalarGridSpec(
            num_scalar_prefetch=3,                       # nrows, obj, attr -> SMEM
            grid=(n_pad // ROWS_PER_STEP,),
            in_specs=[pl.BlockSpec(memory_space=pl.ANY)],
            out_specs=pl.BlockSpec((ROWS_PER_STEP, D_OUT), lambda i, *_: (i, 0)),
            scratch_shapes=[pltpu.SemaphoreType.DMA((2, DMA_DEPTH))],
        ),
        compiler_params=pltpu.CompilerParams(
            dimension_semantics=("parallel",)),
    )(nrows, obj_ids, attr_ids, table)


def _padded_len(n):
    return max(ROWS_PER_STEP, -(-n // ROWS_PER_STEP) * ROWS_PER_STEP)


def _pad_ids(ids, n_pad):
    ids = jnp.asarray(ids, dtype=jnp.int32)
    return jnp.pad(ids, (0, n_pad - ids.shape[0]))


def _encode_ids(ids, table):
    """Gather table[ids] -> [N, 400] (obj_id == attr_id)."""
    n = len(ids)
    n_pad = _padded_len(n)
    nrows = jnp.asarray([n], dtype=jnp.int32)
    out = _encode_single_padded(nrows, _pad_ids(ids, n_pad), table)
    return out[:n]


def _encode_obj_attr(obj_ids, attr_ids, table):
    """Gather concat(table[obj, :300], table[attr, 300:]) -> [N, 400]."""
    n = len(obj_ids)
    n_pad = _padded_len(n)
    nrows = jnp.asarray([n], dtype=jnp.int32)
    out = _encode_pair_padded(nrows, _pad_ids(obj_ids, n_pad),
                              _pad_ids(attr_ids, n_pad), table)
    return out[:n]


def vocabulary_encoder_forward(word_ids, table):
    """Mirrors VocabularyEncoder.forward for the three accepted id formats.

    `table` is the pre-concatenated [V, 400] = [basic || modif] gather table
    (built once in make_params, analogous to registering the parameters).
    """
    if word_ids is None or not word_ids:
        return None
    if isinstance(word_ids[0], int):
        return _encode_ids(list(word_ids), table)
    elif isinstance(word_ids[0], tuple):
        obj = [o for o, _ in word_ids]
        attr = [a for _, a in word_ids]
        return _encode_obj_attr(obj, attr, table)
    elif isinstance(word_ids[0], list):
        lens = {len(ids) for ids in word_ids}
        assert len(lens) == 1, "torch.stack requires equal-length inner lists"
        flat = [i for ids in word_ids for i in ids]
        out = _encode_ids(flat, table)
        return out.reshape(len(word_ids), len(word_ids[0]), D_OUT)
    else:
        print("WARNING: Unknown input type in vocabulary encoder.")
        return None


def make_params(vocab_size, train_corpus_length):
    """Deterministic synthetic parameters matching __init__ semantics."""
    kb, km = jax.random.split(jax.random.PRNGKey(0))
    # self.basic: GloVe embeddings (float32)
    basic = jax.random.normal(kb, (vocab_size, D_BASIC), dtype=jnp.float32)
    # self.modif: uniform(-0.1, 0.1), rows past train_corpus_length zeroed
    modif = jax.random.uniform(
        km, (vocab_size, D_MODIF), dtype=jnp.float32, minval=-0.1, maxval=0.1)
    row_ids = jnp.arange(vocab_size)[:, None]
    modif = jnp.where(row_ids < train_corpus_length, modif, 0.0)
    # Pre-concatenated [V, 400] gather table: one 1.6 KB row DMA serves both
    # halves for the (common) obj_id == attr_id input formats.
    table = jnp.concatenate([basic, modif], axis=1)
    return basic, modif, table


if __name__ == "__main__":
    VOCAB = 32
    TRAIN_LEN = 24
    basic, modif, table = make_params(VOCAB, TRAIN_LEN)

    # --- case 1: list of ints (object embeddings) ---
    int_ids = [3, 7, 0, 25, 11, 30, 5, 19]
    out_int = jax.block_until_ready(vocabulary_encoder_forward(int_ids, table))
    ids = jnp.asarray(int_ids, dtype=jnp.int32)
    ref_int = jnp.concatenate([basic[ids], modif[ids]], axis=1)
    assert out_int.shape == (8, D_OUT)
    assert jnp.allclose(out_int, ref_int, atol=1e-6)

    # --- case 2: list of (obj_id, attr_id) tuples (attribute embeddings) ---
    tup_ids = [(1, 2), (4, 9), (16, 31), (8, 8)]
    out_tup = jax.block_until_ready(vocabulary_encoder_forward(tup_ids, table))
    obj = jnp.asarray([o for o, _ in tup_ids], dtype=jnp.int32)
    attr = jnp.asarray([a for _, a in tup_ids], dtype=jnp.int32)
    ref_tup = jnp.concatenate([basic[obj], modif[attr]], axis=1)
    assert out_tup.shape == (4, D_OUT)
    assert jnp.allclose(out_tup, ref_tup, atol=1e-6)

    # --- case 3: list of lists of ids (relation embeddings) ---
    list_ids = [[2, 5, 9], [10, 20, 30]]
    out_lst = jax.block_until_ready(vocabulary_encoder_forward(list_ids, table))
    flat = jnp.asarray([i for ids in list_ids for i in ids], dtype=jnp.int32)
    ref_lst = jnp.concatenate([basic[flat], modif[flat]], axis=1).reshape(2, 3, D_OUT)
    assert out_lst.shape == (2, 3, D_OUT)
    assert jnp.allclose(out_lst, ref_lst, atol=1e-6)

    # --- case 4: batch spanning several grid steps (full + partial paths) ---
    big_ids = list(range(VOCAB)) * 5          # 160 rows -> grid=(3,) at R=64
    out_big = jax.block_until_ready(vocabulary_encoder_forward(big_ids, table))
    big = jnp.asarray(big_ids, dtype=jnp.int32)
    ref_big = jnp.concatenate([basic[big], modif[big]], axis=1)
    assert out_big.shape == (160, D_OUT)
    assert jnp.allclose(out_big, ref_big, atol=1e-6)

    # TODO(synk): corpus construction / GloVe file parsing / spacy+nltk parsing
    # and pickle save/load are host-side string processing with no kernel
    # equivalent; omitted.  For corpus-sized vocabularies that fit VMEM, a
    # fully-resident table with a one-hot MXU gather would avoid DMAs entirely.
    print("KERNEL_OK")
</pallas_src>

<mosaic_0001>
module attributes {stable_mosaic.version = 11 : i64} {
  func.func @kernel(%arg0: i32, %arg1: memref<1xi32, #tpu.memory_space<smem>>, %arg2: memref<64xi32, #tpu.memory_space<smem>>, %arg3: memref<32x400xf32, #tpu.memory_space<any>>, %arg4: memref<64x400xf32, #tpu.memory_space<vmem>>, %arg5: memref<1x16x!tpu.dma_semaphore, #tpu.memory_space<semaphore_mem>>) attributes {dimension_semantics = [#tpu.dimension_semantics<parallel>], iteration_bounds = array<i64: 1>, scalar_prefetch = 2 : i64, scratch_operands = 1 : i64, tpu.core_type = #tpu.core_type<tc>, window_params = [{}, {transform_indices = @transform_1, window_bounds = array<i64: 64, 400>}]} {
    %c64_i32 = arith.constant 64 : i32
    %0 = arith.muli %arg0, %c64_i32 : i32
    %c0 = arith.constant 0 : index
    %1 = memref.load %arg1[%c0] : memref<1xi32, #tpu.memory_space<smem>>
    %2 = arith.subi %1, %0 : i32
    %c64_i32_0 = arith.constant 64 : i32
    %3 = arith.minsi %2, %c64_i32_0 : i32
    %c64_i32_1 = arith.constant 64 : i32
    %4 = arith.cmpi eq, %3, %c64_i32_1 : i32
    %5 = arith.extui %4 : i1 to i32
    %c0_i32 = arith.constant 0 : i32
    %6 = arith.cmpi ne, %5, %c0_i32 : i32
    scf.if %6 {
      %c0_i32_4 = arith.constant 0 : i32
      %10 = arith.addi %0, %c0_i32_4 : i32
      %11 = arith.index_cast %10 : i32 to index
      %12 = memref.load %arg2[%11] : memref<64xi32, #tpu.memory_space<smem>>
      %c0_i32_5 = arith.constant 0 : i32
      %c0_i32_6 = arith.constant 0 : i32
      %c0_i32_7 = arith.constant 0 : i32
      %c0_i32_8 = arith.constant 0 : i32
      %13 = tpu.memref_slice %arg3[%12, %c0_i32_8] : memref<32x400xf32, #tpu.memory_space<any>> -> memref<1x400xf32, #tpu.memory_space<any>>
      %14 = tpu.memref_squeeze %13 : memref<1x400xf32, #tpu.memory_space<any>> -> memref<400xf32, #tpu.memory_space<any>>
      %c0_i32_9 = arith.constant 0 : i32
      %15 = tpu.memref_slice %arg4[%c0_i32_5, %c0_i32_9] : memref<64x400xf32, #tpu.memory_space<vmem>> -> memref<1x400xf32, #tpu.memory_space<vmem>>
      %16 = tpu.memref_squeeze %15 : memref<1x400xf32, #tpu.memory_space<vmem>> -> memref<400xf32, #tpu.memory_space<vmem>>
      %17 = tpu.memref_slice %arg5[%c0_i32_6, %c0_i32_7] : memref<1x16x!tpu.dma_semaphore, #tpu.memory_space<semaphore_mem>> -> memref<1x1x!tpu.dma_semaphore, #tpu.memory_space<semaphore_mem>>
      %18 = tpu.memref_squeeze %17 : memref<1x1x!tpu.dma_semaphore, #tpu.memory_space<semaphore_mem>> -> memref<!tpu.dma_semaphore, #tpu.memory_space<semaphore_mem>>
      tpu.enqueue_dma source(%14 : memref<400xf32, #tpu.memory_space<any>>) target(%16 : memref<400xf32, #tpu.memory_space<vmem>>) target_semaphore(%18 : memref<!tpu.dma_semaphore, #tpu.memory_space<semaphore_mem>>)
      %c1_i32 = arith.constant 1 : i32
      %19 = arith.addi %0, %c1_i32 : i32
      %20 = arith.index_cast %19 : i32 to index
      %21 = memref.load %arg2[%20] : memref<64xi32, #tpu.memory_space<smem>>
      %c1_i32_10 = arith.constant 1 : i32
      %c0_i32_11 = arith.constant 0 : i32
      %c1_i32_12 = arith.constant 1 : i32
      %c0_i32_13 = arith.constant 0 : i32
      %22 = tpu.memref_slice %arg3[%21, %c0_i32_13] : memref<32x400xf32, #tpu.memory_space<any>> -> memref<1x400xf32, #tpu.memory_space<any>>
      %23 = tpu.memref_squeeze %22 : memref<1x400xf32, #tpu.memory_space<any>> -> memref<400xf32, #tpu.memory_space<any>>
      %c0_i32_14 = arith.constant 0 : i32
      %24 = tpu.memref_slice %arg4[%c1_i32_10, %c0_i32_14] : memref<64x400xf32, #tpu.memory_space<vmem>> -> memref<1x400xf32, #tpu.memory_space<vmem>>
      %25 = tpu.memref_squeeze %24 : memref<1x400xf32, #tpu.memory_space<vmem>> -> memref<400xf32, #tpu.memory_space<vmem>>
      %26 = tpu.memref_slice %arg5[%c0_i32_11, %c1_i32_12] : memref<1x16x!tpu.dma_semaphore, #tpu.memory_space<semaphore_mem>> -> memref<1x1x!tpu.dma_semaphore, #tpu.memory_space<semaphore_mem>>
      %27 = tpu.memref_squeeze %26 : memref<1x1x!tpu.dma_semaphore, #tpu.memory_space<semaphore_mem>> -> memref<!tpu.dma_semaphore, #tpu.memory_space<semaphore_mem>>
      tpu.enqueue_dma source(%23 : memref<400xf32, #tpu.memory_space<any>>) target(%25 : memref<400xf32, #tpu.memory_space<vmem>>) target_semaphore(%27 : memref<!tpu.dma_semaphore, #tpu.memory_space<semaphore_mem>>)
      %c2_i32 = arith.constant 2 : i32
      %28 = arith.addi %0, %c2_i32 : i32
      %29 = arith.index_cast %28 : i32 to index
      %30 = memref.load %arg2[%29] : memref<64xi32, #tpu.memory_space<smem>>
      %c2_i32_15 = arith.constant 2 : i32
      %c0_i32_16 = arith.constant 0 : i32
      %c2_i32_17 = arith.constant 2 : i32
      %c0_i32_18 = arith.constant 0 : i32
      %31 = tpu.memref_slice %arg3[%30, %c0_i32_18] : memref<32x400xf32, #tpu.memory_space<any>> -> memref<1x400xf32, #tpu.memory_space<any>>
      %32 = tpu.memref_squeeze %31 : memref<1x400xf32, #tpu.memory_space<any>> -> memref<400xf32, #tpu.memory_space<any>>
      %c0_i32_19 = arith.constant 0 : i32
      %33 = tpu.memref_slice %arg4[%c2_i32_15, %c0_i32_19] : memref<64x400xf32, #tpu.memory_space<vmem>> -> memref<1x400xf32, #tpu.memory_space<vmem>>
      %34 = tpu.memref_squeeze %33 : memref<1x400xf32, #tpu.memory_space<vmem>> -> memref<400xf32, #tpu.memory_space<vmem>>
      %35 = tpu.memref_slice %arg5[%c0_i32_16, %c2_i32_17] : memref<1x16x!tpu.dma_semaphore, #tpu.memory_space<semaphore_mem>> -> memref<1x1x!tpu.dma_semaphore, #tpu.memory_space<semaphore_mem>>
      %36 = tpu.memref_squeeze %35 : memref<1x1x!tpu.dma_semaphore, #tpu.memory_space<semaphore_mem>> -> memref<!tpu.dma_semaphore, #tpu.memory_space<semaphore_mem>>
      tpu.enqueue_dma source(%32 : memref<400xf32, #tpu.memory_space<any>>) target(%34 : memref<400xf32, #tpu.memory_space<vmem>>) target_semaphore(%36 : memref<!tpu.dma_semaphore, #tpu.memory_space<semaphore_mem>>)
      %c3_i32 = arith.constant 3 : i32
      %37 = arith.addi %0, %c3_i32 : i32
      %38 = arith.index_cast %37 : i32 to index
      %39 = memref.load %arg2[%38] : memref<64xi32, #tpu.memory_space<smem>>
      %c3_i32_20 = arith.constant 3 : i32
      %c0_i32_21 = arith.constant 0 : i32
      %c3_i32_22 = arith.constant 3 : i32
      %c0_i32_23 = arith.constant 0 : i32
      %40 = tpu.memref_slice %arg3[%39, %c0_i32_23] : memref<32x400xf32, #tpu.memory_space<any>> -> memref<1x400xf32, #tpu.memory_space<any>>
      %41 = tpu.memref_squeeze %40 : memref<1x400xf32, #tpu.memory_space<any>> -> memref<400xf32, #tpu.memory_space<any>>
      %c0_i32_24 = arith.constant 0 : i32
      %42 = tpu.memref_slice %arg4[%c3_i32_20, %c0_i32_24] : memref<64x400xf32, #tpu.memory_space<vmem>> -> memref<1x400xf32, #tpu.memory_space<vmem>>
      %43 = tpu.memref_squeeze %42 : memref<1x400xf32, #tpu.memory_space<vmem>> -> memref<400xf32, #tpu.memory_space<vmem>>
      %44 = tpu.memref_slice %arg5[%c0_i32_21, %c3_i32_22] : memref<1x16x!tpu.dma_semaphore, #tpu.memory_space<semaphore_mem>> -> memref<1x1x!tpu.dma_semaphore, #tpu.memory_space<semaphore_mem>>
      %45 = tpu.memref_squeeze %44 : memref<1x1x!tpu.dma_semaphore, #tpu.memory_space<semaphore_mem>> -> memref<!tpu.dma_semaphore, #tpu.memory_space<semaphore_mem>>
      tpu.enqueue_dma source(%41 : memref<400xf32, #tpu.memory_space<any>>) target(%43 : memref<400xf32, #tpu.memory_space<vmem>>) target_semaphore(%45 : memref<!tpu.dma_semaphore, #tpu.memory_space<semaphore_mem>>)
      %c4_i32 = arith.constant 4 : i32
      %46 = arith.addi %0, %c4_i32 : i32
      %47 = arith.index_cast %46 : i32 to index
      %48 = memref.load %arg2[%47] : memref<64xi32, #tpu.memory_space<smem>>
      %c4_i32_25 = arith.constant 4 : i32
      %c0_i32_26 = arith.constant 0 : i32
      %c4_i32_27 = arith.constant 4 : i32
      %c0_i32_28 = arith.constant 0 : i32
      %49 = tpu.memref_slice %arg3[%48, %c0_i32_28] : memref<32x400xf32, #tpu.memory_space<any>> -> memref<1x400xf32, #tpu.memory_space<any>>
      %50 = tpu.memref_squeeze %49 : memref<1x400xf32, #tpu.memory_space<any>> -> memref<400xf32, #tpu.memory_space<any>>
      %c0_i32_29 = arith.constant 0 : i32
      %51 = tpu.memref_slice %arg4[%c4_i32_25, %c0_i32_29] : memref<64x400xf32, #tpu.memory_space<vmem>> -> memref<1x400xf32, #tpu.memory_space<vmem>>
      %52 = tpu.memref_squeeze %51 : memref<1x400xf32, #tpu.memory_space<vmem>> -> memref<400xf32, #tpu.memory_space<vmem>>
      %53 = tpu.memref_slice %arg5[%c0_i32_26, %c4_i32_27] : memref<1x16x!tpu.dma_semaphore, #tpu.memory_space<semaphore_mem>> -> memref<1x1x!tpu.dma_semaphore, #tpu.memory_space<semaphore_mem>>
      %54 = tpu.memref_squeeze %53 : memref<1x1x!tpu.dma_semaphore, #tpu.memory_space<semaphore_mem>> -> memref<!tpu.dma_semaphore, #tpu.memory_space<semaphore_mem>>
      tpu.enqueue_dma source(%50 : memref<400xf32, #tpu.memory_space<any>>) target(%52 : memref<400xf32, #tpu.memory_space<vmem>>) target_semaphore(%54 : memref<!tpu.dma_semaphore, #tpu.memory_space<semaphore_mem>>)
      %c5_i32 = arith.constant 5 : i32
      %55 = arith.addi %0, %c5_i32 : i32
      %56 = arith.index_cast %55 : i32 to index
      %57 = memref.load %arg2[%56] : memref<64xi32, #tpu.memory_space<smem>>
      %c5_i32_30 = arith.constant 5 : i32
      %c0_i32_31 = arith.constant 0 : i32
      %c5_i32_32 = arith.constant 5 : i32
      %c0_i32_33 = arith.constant 0 : i32
      %58 = tpu.memref_slice %arg3[%57, %c0_i32_33] : memref<32x400xf32, #tpu.memory_space<any>> -> memref<1x400xf32, #tpu.memory_space<any>>
      %59 = tpu.memref_squeeze %58 : memref<1x400xf32, #tpu.memory_space<any>> -> memref<400xf32, #tpu.memory_space<any>>
      %c0_i32_34 = arith.constant 0 : i32
      %60 = tpu.memref_slice %arg4[%c5_i32_30, %c0_i32_34] : memref<64x400xf32, #tpu.memory_space<vmem>> -> memref<1x400xf32, #tpu.memory_space<vmem>>
      %61 = tpu.memref_squeeze %60 : memref<1x400xf32, #tpu.memory_space<vmem>> -> memref<400xf32, #tpu.memory_space<vmem>>
      %62 = tpu.memref_slice %arg5[%c0_i32_31, %c5_i32_32] : memref<1x16x!tpu.dma_semaphore, #tpu.memory_space<semaphore_mem>> -> memref<1x1x!tpu.dma_semaphore, #tpu.memory_space<semaphore_mem>>
      %63 = tpu.memref_squeeze %62 : memref<1x1x!tpu.dma_semaphore, #tpu.memory_space<semaphore_mem>> -> memref<!tpu.dma_semaphore, #tpu.memory_space<semaphore_mem>>
      tpu.enqueue_dma source(%59 : memref<400xf32, #tpu.memory_space<any>>) target(%61 : memref<400xf32, #tpu.memory_space<vmem>>) target_semaphore(%63 : memref<!tpu.dma_semaphore, #tpu.memory_space<semaphore_mem>>)
      %c6_i32 = arith.constant 6 : i32
      %64 = arith.addi %0, %c6_i32 : i32
      %65 = arith.index_cast %64 : i32 to index
      %66 = memref.load %arg2[%65] : memref<64xi32, #tpu.memory_space<smem>>
      %c6_i32_35 = arith.constant 6 : i32
      %c0_i32_36 = arith.constant 0 : i32
      %c6_i32_37 = arith.constant 6 : i32
      %c0_i32_38 = arith.constant 0 : i32
      %67 = tpu.memref_slice %arg3[%66, %c0_i32_38] : memref<32x400xf32, #tpu.memory_space<any>> -> memref<1x400xf32, #tpu.memory_space<any>>
      %68 = tpu.memref_squeeze %67 : memref<1x400xf32, #tpu.memory_space<any>> -> memref<400xf32, #tpu.memory_space<any>>
      %c0_i32_39 = arith.constant 0 : i32
      %69 = tpu.memref_slice %arg4[%c6_i32_35, %c0_i32_39] : memref<64x400xf32, #tpu.memory_space<vmem>> -> memref<1x400xf32, #tpu.memory_space<vmem>>
      %70 = tpu.memref_squeeze %69 : memref<1x400xf32, #tpu.memory_space<vmem>> -> memref<400xf32, #tpu.memory_space<vmem>>
      %71 = tpu.memref_slice %arg5[%c0_i32_36, %c6_i32_37] : memref<1x16x!tpu.dma_semaphore, #tpu.memory_space<semaphore_mem>> -> memref<1x1x!tpu.dma_semaphore, #tpu.memory_space<semaphore_mem>>
      %72 = tpu.memref_squeeze %71 : memref<1x1x!tpu.dma_semaphore, #tpu.memory_space<semaphore_mem>> -> memref<!tpu.dma_semaphore, #tpu.memory_space<semaphore_mem>>
      tpu.enqueue_dma source(%68 : memref<400xf32, #tpu.memory_space<any>>) target(%70 : memref<400xf32, #tpu.memory_space<vmem>>) target_semaphore(%72 : memref<!tpu.dma_semaphore, #tpu.memory_space<semaphore_mem>>)
      %c7_i32 = arith.constant 7 : i32
      %73 = arith.addi %0, %c7_i32 : i32
      %74 = arith.index_cast %73 : i32 to index
      %75 = memref.load %arg2[%74] : memref<64xi32, #tpu.memory_space<smem>>
      %c7_i32_40 = arith.constant 7 : i32
      %c0_i32_41 = arith.constant 0 : i32
      %c7_i32_42 = arith.constant 7 : i32
      %c0_i32_43 = arith.constant 0 : i32
      %76 = tpu.memref_slice %arg3[%75, %c0_i32_43] : memref<32x400xf32, #tpu.memory_space<any>> -> memref<1x400xf32, #tpu.memory_space<any>>
      %77 = tpu.memref_squeeze %76 : memref<1x400xf32, #tpu.memory_space<any>> -> memref<400xf32, #tpu.memory_space<any>>
      %c0_i32_44 = arith.constant 0 : i32
      %78 = tpu.memref_slice %arg4[%c7_i32_40, %c0_i32_44] : memref<64x400xf32, #tpu.memory_space<vmem>> -> memref<1x400xf32, #tpu.memory_space<vmem>>
      %79 = tpu.memref_squeeze %78 : memref<1x400xf32, #tpu.memory_space<vmem>> -> memref<400xf32, #tpu.memory_space<vmem>>
      %80 = tpu.memref_slice %arg5[%c0_i32_41, %c7_i32_42] : memref<1x16x!tpu.dma_semaphore, #tpu.memory_space<semaphore_mem>> -> memref<1x1x!tpu.dma_semaphore, #tpu.memory_space<semaphore_mem>>
      %81 = tpu.memref_squeeze %80 : memref<1x1x!tpu.dma_semaphore, #tpu.memory_space<semaphore_mem>> -> memref<!tpu.dma_semaphore, #tpu.memory_space<semaphore_mem>>
      tpu.enqueue_dma source(%77 : memref<400xf32, #tpu.memory_space<any>>) target(%79 : memref<400xf32, #tpu.memory_space<vmem>>) target_semaphore(%81 : memref<!tpu.dma_semaphore, #tpu.memory_space<semaphore_mem>>)
      %c8_i32 = arith.constant 8 : i32
      %82 = arith.addi %0, %c8_i32 : i32
      %83 = arith.index_cast %82 : i32 to index
      %84 = memref.load %arg2[%83] : memref<64xi32, #tpu.memory_space<smem>>
      %c8_i32_45 = arith.constant 8 : i32
      %c0_i32_46 = arith.constant 0 : i32
      %c8_i32_47 = arith.constant 8 : i32
      %c0_i32_48 = arith.constant 0 : i32
      %85 = tpu.memref_slice %arg3[%84, %c0_i32_48] : memref<32x400xf32, #tpu.memory_space<any>> -> memref<1x400xf32, #tpu.memory_space<any>>
      %86 = tpu.memref_squeeze %85 : memref<1x400xf32, #tpu.memory_space<any>> -> memref<400xf32, #tpu.memory_space<any>>
      %c0_i32_49 = arith.constant 0 : i32
      %87 = tpu.memref_slice %arg4[%c8_i32_45, %c0_i32_49] : memref<64x400xf32, #tpu.memory_space<vmem>> -> memref<1x400xf32, #tpu.memory_space<vmem>>
      %88 = tpu.memref_squeeze %87 : memref<1x400xf32, #tpu.memory_space<vmem>> -> memref<400xf32, #tpu.memory_space<vmem>>
      %89 = tpu.memref_slice %arg5[%c0_i32_46, %c8_i32_47] : memref<1x16x!tpu.dma_semaphore, #tpu.memory_space<semaphore_mem>> -> memref<1x1x!tpu.dma_semaphore, #tpu.memory_space<semaphore_mem>>
      %90 = tpu.memref_squeeze %89 : memref<1x1x!tpu.dma_semaphore, #tpu.memory_space<semaphore_mem>> -> memref<!tpu.dma_semaphore, #tpu.memory_space<semaphore_mem>>
      tpu.enqueue_dma source(%86 : memref<400xf32, #tpu.memory_space<any>>) target(%88 : memref<400xf32, #tpu.memory_space<vmem>>) target_semaphore(%90 : memref<!tpu.dma_semaphore, #tpu.memory_space<semaphore_mem>>)
      %c9_i32 = arith.constant 9 : i32
      %91 = arith.addi %0, %c9_i32 : i32
      %92 = arith.index_cast %91 : i32 to index
      %93 = memref.load %arg2[%92] : memref<64xi32, #tpu.memory_space<smem>>
      %c9_i32_50 = arith.constant 9 : i32
      %c0_i32_51 = arith.constant 0 : i32
      %c9_i32_52 = arith.constant 9 : i32
      %c0_i32_53 = arith.constant 0 : i32
      %94 = tpu.memref_slice %arg3[%93, %c0_i32_53] : memref<32x400xf32, #tpu.memory_space<any>> -> memref<1x400xf32, #tpu.memory_space<any>>
      %95 = tpu.memref_squeeze %94 : memref<1x400xf32, #tpu.memory_space<any>> -> memref<400xf32, #tpu.memory_space<any>>
      %c0_i32_54 = arith.constant 0 : i32
      %96 = tpu.memref_slice %arg4[%c9_i32_50, %c0_i32_54] : memref<64x400xf32, #tpu.memory_space<vmem>> -> memref<1x400xf32, #tpu.memory_space<vmem>>
      %97 = tpu.memref_squeeze %96 : memref<1x400xf32, #tpu.memory_space<vmem>> -> memref<400xf32, #tpu.memory_space<vmem>>
      %98 = tpu.memref_slice %arg5[%c0_i32_51, %c9_i32_52] : memref<1x16x!tpu.dma_semaphore, #tpu.memory_space<semaphore_mem>> -> memref<1x1x!tpu.dma_semaphore, #tpu.memory_space<semaphore_mem>>
      %99 = tpu.memref_squeeze %98 : memref<1x1x!tpu.dma_semaphore, #tpu.memory_space<semaphore_mem>> -> memref<!tpu.dma_semaphore, #tpu.memory_space<semaphore_mem>>
      tpu.enqueue_dma source(%95 : memref<400xf32, #tpu.memory_space<any>>) target(%97 : memref<400xf32, #tpu.memory_space<vmem>>) target_semaphore(%99 : memref<!tpu.dma_semaphore, #tpu.memory_space<semaphore_mem>>)
      %c10_i32 = arith.constant 10 : i32
      %100 = arith.addi %0, %c10_i32 : i32
      %101 = arith.index_cast %100 : i32 to index
      %102 = memref.load %arg2[%101] : memref<64xi32, #tpu.memory_space<smem>>
      %c10_i32_55 = arith.constant 10 : i32
      %c0_i32_56 = arith.constant 0 : i32
      %c10_i32_57 = arith.constant 10 : i32
      %c0_i32_58 = arith.constant 0 : i32
      %103 = tpu.memref_slice %arg3[%102, %c0_i32_58] : memref<32x400xf32, #tpu.memory_space<any>> -> memref<1x400xf32, #tpu.memory_space<any>>
      %104 = tpu.memref_squeeze %103 : memref<1x400xf32, #tpu.memory_space<any>> -> memref<400xf32, #tpu.memory_space<any>>
      %c0_i32_59 = arith.constant 0 : i32
      %105 = tpu.memref_slice %arg4[%c10_i32_55, %c0_i32_59] : memref<64x400xf32, #tpu.memory_space<vmem>> -> memref<1x400xf32, #tpu.memory_space<vmem>>
      %106 = tpu.memref_squeeze %105 : memref<1x400xf32, #tpu.memory_space<vmem>> -> memref<400xf32, #tpu.memory_space<vmem>>
      %107 = tpu.memref_slice %arg5[%c0_i32_56, %c10_i32_57] : memref<1x16x!tpu.dma_semaphore, #tpu.memory_space<semaphore_mem>> -> memref<1x1x!tpu.dma_semaphore, #tpu.memory_space<semaphore_mem>>
      %108 = tpu.memref_squeeze %107 : memref<1x1x!tpu.dma_semaphore, #tpu.memory_space<semaphore_mem>> -> memref<!tpu.dma_semaphore, #tpu.memory_space<semaphore_mem>>
      tpu.enqueue_dma source(%104 : memref<400xf32, #tpu.memory_space<any>>) target(%106 : memref<400xf32, #tpu.memory_space<vmem>>) target_semaphore(%108 : memref<!tpu.dma_semaphore, #tpu.memory_space<semaphore_mem>>)
      %c11_i32 = arith.constant 11 : i32
      %109 = arith.addi %0, %c11_i32 : i32
      %110 = arith.index_cast %109 : i32 to index
      %111 = memref.load %arg2[%110] : memref<64xi32, #tpu.memory_space<smem>>
      %c11_i32_60 = arith.constant 11 : i32
      %c0_i32_61 = arith.constant 0 : i32
      %c11_i32_62 = arith.constant 11 : i32
      %c0_i32_63 = arith.constant 0 : i32
      %112 = tpu.memref_slice %arg3[%111, %c0_i32_63] : memref<32x400xf32, #tpu.memory_space<any>> -> memref<1x400xf32, #tpu.memory_space<any>>
      %113 = tpu.memref_squeeze %112 : memref<1x400xf32, #tpu.memory_space<any>> -> memref<400xf32, #tpu.memory_space<any>>
      %c0_i32_64 = arith.constant 0 : i32
      %114 = tpu.memref_slice %arg4[%c11_i32_60, %c0_i32_64] : memref<64x400xf32, #tpu.memory_space<vmem>> -> memref<1x400xf32, #tpu.memory_space<vmem>>
      %115 = tpu.memref_squeeze %114 : memref<1x400xf32, #tpu.memory_space<vmem>> -> memref<400xf32, #tpu.memory_space<vmem>>
      %116 = tpu.memref_slice %arg5[%c0_i32_61, %c11_i32_62] : memref<1x16x!tpu.dma_semaphore, #tpu.memory_space<semaphore_mem>> -> memref<1x1x!tpu.dma_semaphore, #tpu.memory_space<semaphore_mem>>
      %117 = tpu.memref_squeeze %116 : memref<1x1x!tpu.dma_semaphore, #tpu.memory_space<semaphore_mem>> -> memref<!tpu.dma_semaphore, #tpu.memory_space<semaphore_mem>>
      tpu.enqueue_dma source(%113 : memref<400xf32, #tpu.memory_space<any>>) target(%115 : memref<400xf32, #tpu.memory_space<vmem>>) target_semaphore(%117 : memref<!tpu.dma_semaphore, #tpu.memory_space<semaphore_mem>>)
      %c12_i32 = arith.constant 12 : i32
      %118 = arith.addi %0, %c12_i32 : i32
      %119 = arith.index_cast %118 : i32 to index
      %120 = memref.load %arg2[%119] : memref<64xi32, #tpu.memory_space<smem>>
      %c12_i32_65 = arith.constant 12 : i32
      %c0_i32_66 = arith.constant 0 : i32
      %c12_i32_67 = arith.constant 12 : i32
      %c0_i32_68 = arith.constant 0 : i32
      %121 = tpu.memref_slice %arg3[%120, %c0_i32_68] : memref<32x400xf32, #tpu.memory_space<any>> -> memref<1x400xf32, #tpu.memory_space<any>>
      %122 = tpu.memref_squeeze %121 : memref<1x400xf32, #tpu.memory_space<any>> -> memref<400xf32, #tpu.memory_space<any>>
      %c0_i32_69 = arith.constant 0 : i32
      %123 = tpu.memref_slice %arg4[%c12_i32_65, %c0_i32_69] : memref<64x400xf32, #tpu.memory_space<vmem>> -> memref<1x400xf32, #tpu.memory_space<vmem>>
      %124 = tpu.memref_squeeze %123 : memref<1x400xf32, #tpu.memory_space<vmem>> -> memref<400xf32, #tpu.memory_space<vmem>>
      %125 = tpu.memref_slice %arg5[%c0_i32_66, %c12_i32_67] : memref<1x16x!tpu.dma_semaphore, #tpu.memory_space<semaphore_mem>> -> memref<1x1x!tpu.dma_semaphore, #tpu.memory_space<semaphore_mem>>
      %126 = tpu.memref_squeeze %125 : memref<1x1x!tpu.dma_semaphore, #tpu.memory_space<semaphore_mem>> -> memref<!tpu.dma_semaphore, #tpu.memory_space<semaphore_mem>>
      tpu.enqueue_dma source(%122 : memref<400xf32, #tpu.memory_space<any>>) target(%124 : memref<400xf32, #tpu.memory_space<vmem>>) target_semaphore(%126 : memref<!tpu.dma_semaphore, #tpu.memory_space<semaphore_mem>>)
      %c13_i32 = arith.constant 13 : i32
      %127 = arith.addi %0, %c13_i32 : i32
      %128 = arith.index_cast %127 : i32 to index
      %129 = memref.load %arg2[%128] : memref<64xi32, #tpu.memory_space<smem>>
      %c13_i32_70 = arith.constant 13 : i32
      %c0_i32_71 = arith.constant 0 : i32
      %c13_i32_72 = arith.constant 13 : i32
      %c0_i32_73 = arith.constant 0 : i32
      %130 = tpu.memref_slice %arg3[%129, %c0_i32_73] : memref<32x400xf32, #tpu.memory_space<any>> -> memref<1x400xf32, #tpu.memory_space<any>>
      %131 = tpu.memref_squeeze %130 : memref<1x400xf32, #tpu.memory_space<any>> -> memref<400xf32, #tpu.memory_space<any>>
      %c0_i32_74 = arith.constant 0 : i32
      %132 = tpu.memref_slice %arg4[%c13_i32_70, %c0_i32_74] : memref<64x400xf32, #tpu.memory_space<vmem>> -> memref<1x400xf32, #tpu.memory_space<vmem>>
      %133 = tpu.memref_squeeze %132 : memref<1x400xf32, #tpu.memory_space<vmem>> -> memref<400xf32, #tpu.memory_space<vmem>>
      %134 = tpu.memref_slice %arg5[%c0_i32_71, %c13_i32_72] : memref<1x16x!tpu.dma_semaphore, #tpu.memory_space<semaphore_mem>> -> memref<1x1x!tpu.dma_semaphore, #tpu.memory_space<semaphore_mem>>
      %135 = tpu.memref_squeeze %134 : memref<1x1x!tpu.dma_semaphore, #tpu.memory_space<semaphore_mem>> -> memref<!tpu.dma_semaphore, #tpu.memory_space<semaphore_mem>>
      tpu.enqueue_dma source(%131 : memref<400xf32, #tpu.memory_space<any>>) target(%133 : memref<400xf32, #tpu.memory_space<vmem>>) target_semaphore(%135 : memref<!tpu.dma_semaphore, #tpu.memory_space<semaphore_mem>>)
      %c14_i32 = arith.constant 14 : i32
      %136 = arith.addi %0, %c14_i32 : i32
      %137 = arith.index_cast %136 : i32 to index
      %138 = memref.load %arg2[%137] : memref<64xi32, #tpu.memory_space<smem>>
      %c14_i32_75 = arith.constant 14 : i32
      %c0_i32_76 = arith.constant 0 : i32
      %c14_i32_77 = arith.constant 14 : i32
      %c0_i32_78 = arith.constant 0 : i32
      %139 = tpu.memref_slice %arg3[%138, %c0_i32_78] : memref<32x400xf32, #tpu.memory_space<any>> -> memref<1x400xf32, #tpu.memory_space<any>>
      %140 = tpu.memref_squeeze %139 : memref<1x400xf32, #tpu.memory_space<any>> -> memref<400xf32, #tpu.memory_space<any>>
      %c0_i32_79 = arith.constant 0 : i32
      %141 = tpu.memref_slice %arg4[%c14_i32_75, %c0_i32_79] : memref<64x400xf32, #tpu.memory_space<vmem>> -> memref<1x400xf32, #tpu.memory_space<vmem>>
      %142 = tpu.memref_squeeze %141 : memref<1x400xf32, #tpu.memory_space<vmem>> -> memref<400xf32, #tpu.memory_space<vmem>>
      %143 = tpu.memref_slice %arg5[%c0_i32_76, %c14_i32_77] : memref<1x16x!tpu.dma_semaphore, #tpu.memory_space<semaphore_mem>> -> memref<1x1x!tpu.dma_semaphore, #tpu.memory_space<semaphore_mem>>
      %144 = tpu.memref_squeeze %143 : memref<1x1x!tpu.dma_semaphore, #tpu.memory_space<semaphore_mem>> -> memref<!tpu.dma_semaphore, #tpu.memory_space<semaphore_mem>>
      tpu.enqueue_dma source(%140 : memref<400xf32, #tpu.memory_space<any>>) target(%142 : memref<400xf32, #tpu.memory_space<vmem>>) target_semaphore(%144 : memref<!tpu.dma_semaphore, #tpu.memory_space<semaphore_mem>>)
      %c15_i32 = arith.constant 15 : i32
      %145 = arith.addi %0, %c15_i32 : i32
      %146 = arith.index_cast %145 : i32 to index
      %147 = memref.load %arg2[%146] : memref<64xi32, #tpu.memory_space<smem>>
      %c15_i32_80 = arith.constant 15 : i32
      %c0_i32_81 = arith.constant 0 : i32
      %c15_i32_82 = arith.constant 15 : i32
      %c0_i32_83 = arith.constant 0 : i32
      %148 = tpu.memref_slice %arg3[%147, %c0_i32_83] : memref<32x400xf32, #tpu.memory_space<any>> -> memref<1x400xf32, #tpu.memory_space<any>>
      %149 = tpu.memref_squeeze %148 : memref<1x400xf32, #tpu.memory_space<any>> -> memref<400xf32, #tpu.memory_space<any>>
      %c0_i32_84 = arith.constant 0 : i32
      %150 = tpu.memref_slice %arg4[%c15_i32_80, %c0_i32_84] : memref<64x400xf32, #tpu.memory_space<vmem>> -> memref<1x400xf32, #tpu.memory_space<vmem>>
      %151 = tpu.memref_squeeze %150 : memref<1x400xf32, #tpu.memory_space<vmem>> -> memref<400xf32, #tpu.memory_space<vmem>>
      %152 = tpu.memref_slice %arg5[%c0_i32_81, %c15_i32_82] : memref<1x16x!tpu.dma_semaphore, #tpu.memory_space<semaphore_mem>> -> memref<1x1x!tpu.dma_semaphore, #tpu.memory_space<semaphore_mem>>
      %153 = tpu.memref_squeeze %152 : memref<1x1x!tpu.dma_semaphore, #tpu.memory_space<semaphore_mem>> -> memref<!tpu.dma_semaphore, #tpu.memory_space<semaphore_mem>>
      tpu.enqueue_dma source(%149 : memref<400xf32, #tpu.memory_space<any>>) target(%151 : memref<400xf32, #tpu.memory_space<vmem>>) target_semaphore(%153 : memref<!tpu.dma_semaphore, #tpu.memory_space<semaphore_mem>>)
      %c16_i32 = arith.constant 16 : i32
      %154 = arith.addi %0, %c16_i32 : i32
      %155 = arith.index_cast %154 : i32 to index
      %156 = memref.load %arg2[%155] : memref<64xi32, #tpu.memory_space<smem>>
      %c0_i32_85 = arith.constant 0 : i32
      %c0_i32_86 = arith.constant 0 : i32
      %c0_i32_87 = arith.constant 0 : i32
      %c0_i32_88 = arith.constant 0 : i32
      %c0_i32_89 = arith.constant 0 : i32
      %157 = tpu.memref_slice %arg3[%c0_i32_85, %c0_i32_89] : memref<32x400xf32, #tpu.memory_space<any>> -> memref<1x400xf32, #tpu.memory_space<any>>
      %158 = tpu.memref_squeeze %157 : memref<1x400xf32, #tpu.memory_space<any>> -> memref<400xf32, #tpu.memory_space<any>>
      %c0_i32_90 = arith.constant 0 : i32
      %159 = tpu.memref_slice %arg4[%c0_i32_86, %c0_i32_90] : memref<64x400xf32, #tpu.memory_space<vmem>> -> memref<1x400xf32, #tpu.memory_space<vmem>>
      %160 = tpu.memref_squeeze %159 : memref<1x400xf32, #tpu.memory_space<vmem>> -> memref<400xf32, #tpu.memory_space<vmem>>
      %161 = tpu.memref_slice %arg5[%c0_i32_87, %c0_i32_88] : memref<1x16x!tpu.dma_semaphore, #tpu.memory_space<semaphore_mem>> -> memref<1x1x!tpu.dma_semaphore, #tpu.memory_space<semaphore_mem>>
      %162 = tpu.memref_squeeze %161 : memref<1x1x!tpu.dma_semaphore, #tpu.memory_space<semaphore_mem>> -> memref<!tpu.dma_semaphore, #tpu.memory_space<semaphore_mem>>
      tpu.wait_dma2 semaphore(%162 : memref<!tpu.dma_semaphore, #tpu.memory_space<semaphore_mem>>) src(%158 : memref<400xf32, #tpu.memory_space<any>>) dst(%160 : memref<400xf32, #tpu.memory_space<vmem>>)
      %c16_i32_91 = arith.constant 16 : i32
      %c0_i32_92 = arith.constant 0 : i32
      %c0_i32_93 = arith.constant 0 : i32
      %c0_i32_94 = arith.constant 0 : i32
      %163 = tpu.memref_slice %arg3[%156, %c0_i32_94] : memref<32x400xf32, #tpu.memory_space<any>> -> memref<1x400xf32, #tpu.memory_space<any>>
      %164 = tpu.memref_squeeze %163 : memref<1x400xf32, #tpu.memory_space<any>> -> memref<400xf32, #tpu.memory_space<any>>
      %c0_i32_95 = arith.constant 0 : i32
      %165 = tpu.memref_slice %arg4[%c16_i32_91, %c0_i32_95] : memref<64x400xf32, #tpu.memory_space<vmem>> -> memref<1x400xf32, #tpu.memory_space<vmem>>
      %166 = tpu.memref_squeeze %165 : memref<1x400xf32, #tpu.memory_space<vmem>> -> memref<400xf32, #tpu.memory_space<vmem>>
      %167 = tpu.memref_slice %arg5[%c0_i32_92, %c0_i32_93] : memref<1x16x!tpu.dma_semaphore, #tpu.memory_space<semaphore_mem>> -> memref<1x1x!tpu.dma_semaphore, #tpu.memory_space<semaphore_mem>>
      %168 = tpu.memref_squeeze %167 : memref<1x1x!tpu.dma_semaphore, #tpu.memory_space<semaphore_mem>> -> memref<!tpu.dma_semaphore, #tpu.memory_space<semaphore_mem>>
      tpu.enqueue_dma source(%164 : memref<400xf32, #tpu.memory_space<any>>) target(%166 : memref<400xf32, #tpu.memory_space<vmem>>) target_semaphore(%168 : memref<!tpu.dma_semaphore, #tpu.memory_space<semaphore_mem>>)
      %c17_i32 = arith.constant 17 : i32
      %169 = arith.addi %0, %c17_i32 : i32
      %170 = arith.index_cast %169 : i32 to index
      %171 = memref.load %arg2[%170] : memref<64xi32, #tpu.memory_space<smem>>
      %c0_i32_96 = arith.constant 0 : i32
      %c0_i32_97 = arith.constant 0 : i32
      %c0_i32_98 = arith.constant 0 : i32
      %c1_i32_99 = arith.constant 1 : i32
      %c0_i32_100 = arith.constant 0 : i32
      %172 = tpu.memref_slice %arg3[%c0_i32_96, %c0_i32_100] : memref<32x400xf32, #tpu.memory_space<any>> -> memref<1x400xf32, #tpu.memory_space<any>>
      %173 = tpu.memref_squeeze %172 : memref<1x400xf32, #tpu.memory_space<any>> -> memref<400xf32, #tpu.memory_space<any>>
      %c0_i32_101 = arith.constant 0 : i32
      %174 = tpu.memref_slice %arg4[%c0_i32_97, %c0_i32_101] : memref<64x400xf32, #tpu.memory_space<vmem>> -> memref<1x400xf32, #tpu.memory_space<vmem>>
      %175 = tpu.memref_squeeze %174 : memref<1x400xf32, #tpu.memory_space<vmem>> -> memref<400xf32, #tpu.memory_space<vmem>>
      %176 = tpu.memref_slice %arg5[%c0_i32_98, %c1_i32_99] : memref<1x16x!tpu.dma_semaphore, #tpu.memory_space<semaphore_mem>> -> memref<1x1x!tpu.dma_semaphore, #tpu.memory_space<semaphore_mem>>
      %177 = tpu.memref_squeeze %176 : memref<1x1x!tpu.dma_semaphore, #tpu.memory_space<semaphore_mem>> -> memref<!tpu.dma_semaphore, #tpu.memory_space<semaphore_mem>>
      tpu.wait_dma2 semaphore(%177 : memref<!tpu.dma_semaphore, #tpu.memory_space<semaphore_mem>>) src(%173 : memref<400xf32, #tpu.memory_space<any>>) dst(%175 : memref<400xf32, #tpu.memory_space<vmem>>)
      %c17_i32_102 = arith.constant 17 : i32
      %c0_i32_103 = arith.constant 0 : i32
      %c1_i32_104 = arith.constant 1 : i32
      %c0_i32_105 = arith.constant 0 : i32
      %178 = tpu.memref_slice %arg3[%171, %c0_i32_105] : memref<32x400xf32, #tpu.memory_space<any>> -> memref<1x400xf32, #tpu.memory_space<any>>
      %179 = tpu.memref_squeeze %178 : memref<1x400xf32, #tpu.memory_space<any>> -> memref<400xf32, #tpu.memory_space<any>>
      %c0_i32_106 = arith.constant 0 : i32
      %180 = tpu.memref_slice %arg4[%c17_i32_102, %c0_i32_106] : memref<64x400xf32, #tpu.memory_space<vmem>> -> memref<1x400xf32, #tpu.memory_space<vmem>>
      %181 = tpu.memref_squeeze %180 : memref<1x400xf32, #tpu.memory_space<vmem>> -> memref<400xf32, #tpu.memory_space<vmem>>
      %182 = tpu.memref_slice %arg5[%c0_i32_103, %c1_i32_104] : memref<1x16x!tpu.dma_semaphore, #tpu.memory_space<semaphore_mem>> -> memref<1x1x!tpu.dma_semaphore, #tpu.memory_space<semaphore_mem>>
      %183 = tpu.memref_squeeze %182 : memref<1x1x!tpu.dma_semaphore, #tpu.memory_space<semaphore_mem>> -> memref<!tpu.dma_semaphore, #tpu.memory_space<semaphore_mem>>
      tpu.enqueue_dma source(%179 : memref<400xf32, #tpu.memory_space<any>>) target(%181 : memref<400xf32, #tpu.memory_space<vmem>>) target_semaphore(%183 : memref<!tpu.dma_semaphore, #tpu.memory_space<semaphore_mem>>)
      %c18_i32 = arith.constant 18 : i32
      %184 = arith.addi %0, %c18_i32 : i32
      %185 = arith.index_cast %184 : i32 to index
      %186 = memref.load %arg2[%185] : memref<64xi32, #tpu.memory_space<smem>>
      %c0_i32_107 = arith.constant 0 : i32
      %c0_i32_108 = arith.constant 0 : i32
      %c0_i32_109 = arith.constant 0 : i32
      %c2_i32_110 = arith.constant 2 : i32
      %c0_i32_111 = arith.constant 0 : i32
      %187 = tpu.memref_slice %arg3[%c0_i32_107, %c0_i32_111] : memref<32x400xf32, #tpu.memory_space<any>> -> memref<1x400xf32, #tpu.memory_space<any>>
      %188 = tpu.memref_squeeze %187 : memref<1x400xf32, #tpu.memory_space<any>> -> memref<400xf32, #tpu.memory_space<any>>
      %c0_i32_112 = arith.constant 0 : i32
      %189 = tpu.memref_slice %arg4[%c0_i32_108, %c0_i32_112] : memref<64x400xf32, #tpu.memory_space<vmem>> -> memref<1x400xf32, #tpu.memory_space<vmem>>
      %190 = tpu.memref_squeeze %189 : memref<1x400xf32, #tpu.memory_space<vmem>> -> memref<400xf32, #tpu.memory_space<vmem>>
      %191 = tpu.memref_slice %arg5[%c0_i32_109, %c2_i32_110] : memref<1x16x!tpu.dma_semaphore, #tpu.memory_space<semaphore_mem>> -> memref<1x1x!tpu.dma_semaphore, #tpu.memory_space<semaphore_mem>>
      %192 = tpu.memref_squeeze %191 : memref<1x1x!tpu.dma_semaphore, #tpu.memory_space<semaphore_mem>> -> memref<!tpu.dma_semaphore, #tpu.memory_space<semaphore_mem>>
      tpu.wait_dma2 semaphore(%192 : memref<!tpu.dma_semaphore, #tpu.memory_space<semaphore_mem>>) src(%188 : memref<400xf32, #tpu.memory_space<any>>) dst(%190 : memref<400xf32, #tpu.memory_space<vmem>>)
      %c18_i32_113 = arith.constant 18 : i32
      %c0_i32_114 = arith.constant 0 : i32
      %c2_i32_115 = arith.constant 2 : i32
      %c0_i32_116 = arith.constant 0 : i32
      %193 = tpu.memref_slice %arg3[%186, %c0_i32_116] : memref<32x400xf32, #tpu.memory_space<any>> -> memref<1x400xf32, #tpu.memory_space<any>>
      %194 = tpu.memref_squeeze %193 : memref<1x400xf32, #tpu.memory_space<any>> -> memref<400xf32, #tpu.memory_space<any>>
      %c0_i32_117 = arith.constant 0 : i32
      %195 = tpu.memref_slice %arg4[%c18_i32_113, %c0_i32_117] : memref<64x400xf32, #tpu.memory_space<vmem>> -> memref<1x400xf32, #tpu.memory_space<vmem>>
      %196 = tpu.memref_squeeze %195 : memref<1x400xf32, #tpu.memory_space<vmem>> -> memref<400xf32, #tpu.memory_space<vmem>>
      %197 = tpu.memref_slice %arg5[%c0_i32_114, %c2_i32_115] : memref<1x16x!tpu.dma_semaphore, #tpu.memory_space<semaphore_mem>> -> memref<1x1x!tpu.dma_semaphore, #tpu.memory_space<semaphore_mem>>
      %198 = tpu.memref_squeeze %197 : memref<1x1x!tpu.dma_semaphore, #tpu.memory_space<semaphore_mem>> -> memref<!tpu.dma_semaphore, #tpu.memory_space<semaphore_mem>>
      tpu.enqueue_dma source(%194 : memref<400xf32, #tpu.memory_space<any>>) target(%196 : memref<400xf32, #tpu.memory_space<vmem>>) target_semaphore(%198 : memref<!tpu.dma_semaphore, #tpu.memory_space<semaphore_mem>>)
      %c19_i32 = arith.constant 19 : i32
      %199 = arith.addi %0, %c19_i32 : i32
      %200 = arith.index_cast %199 : i32 to index
      %201 = memref.load %arg2[%200] : memref<64xi32, #tpu.memory_space<smem>>
      %c0_i32_118 = arith.constant 0 : i32
      %c0_i32_119 = arith.constant 0 : i32
      %c0_i32_120 = arith.constant 0 : i32
      %c3_i32_121 = arith.constant 3 : i32
      %c0_i32_122 = arith.constant 0 : i32
      %202 = tpu.memref_slice %arg3[%c0_i32_118, %c0_i32_122] : memref<32x400xf32, #tpu.memory_space<any>> -> memref<1x400xf32, #tpu.memory_space<any>>
      %203 = tpu.memref_squeeze %202 : memref<1x400xf32, #tpu.memory_space<any>> -> memref<400xf32, #tpu.memory_space<any>>
      %c0_i32_123 = arith.constant 0 : i32
      %204 = tpu.memref_slice %arg4[%c0_i32_119, %c0_i32_123] : memref<64x400xf32, #tpu.memory_space<vmem>> -> memref<1x400xf32, #tpu.memory_space<vmem>>
      %205 = tpu.memref_squeeze %204 : memref<1x400xf32, #tpu.memory_space<vmem>> -> memref<400xf32, #tpu.memory_space<vmem>>
      %206 = tpu.memref_slice %arg5[%c0_i32_120, %c3_i32_121] : memref<1x16x!tpu.dma_semaphore, #tpu.memory_space<semaphore_mem>> -> memref<1x1x!tpu.dma_semaphore, #tpu.memory_space<semaphore_mem>>
      %207 = tpu.memref_squeeze %206 : memref<1x1x!tpu.dma_semaphore, #tpu.memory_space<semaphore_mem>> -> memref<!tpu.dma_semaphore, #tpu.memory_space<semaphore_mem>>
      tpu.wait_dma2 semaphore(%207 : memref<!tpu.dma_semaphore, #tpu.memory_space<semaphore_mem>>) src(%203 : memref<400xf32, #tpu.memory_space<any>>) dst(%205 : memref<400xf32, #tpu.memory_space<vmem>>)
      %c19_i32_124 = arith.constant 19 : i32
      %c0_i32_125 = arith.constant 0 : i32
      %c3_i32_126 = arith.constant 3 : i32
      %c0_i32_127 = arith.constant 0 : i32
      %208 = tpu.memref_slice %arg3[%201, %c0_i32_127] : memref<32x400xf32, #tpu.memory_space<any>> -> memref<1x400xf32, #tpu.memory_space<any>>
      %209 = tpu.memref_squeeze %208 : memref<1x400xf32, #tpu.memory_space<any>> -> memref<400xf32, #tpu.memory_space<any>>
      %c0_i32_128 = arith.constant 0 : i32
      %210 = tpu.memref_slice %arg4[%c19_i32_124, %c0_i32_128] : memref<64x400xf32, #tpu.memory_space<vmem>> -> memref<1x400xf32, #tpu.memory_space<vmem>>
      %211 = tpu.memref_squeeze %210 : memref<1x400xf32, #tpu.memory_space<vmem>> -> memref<400xf32, #tpu.memory_space<vmem>>
      %212 = tpu.memref_slice %arg5[%c0_i32_125, %c3_i32_126] : memref<1x16x!tpu.dma_semaphore, #tpu.memory_space<semaphore_mem>> -> memref<1x1x!tpu.dma_semaphore, #tpu.memory_space<semaphore_mem>>
      %213 = tpu.memref_squeeze %212 : memref<1x1x!tpu.dma_semaphore, #tpu.memory_space<semaphore_mem>> -> memref<!tpu.dma_semaphore, #tpu.memory_space<semaphore_mem>>
      tpu.enqueue_dma source(%209 : memref<400xf32, #tpu.memory_space<any>>) target(%211 : memref<400xf32, #tpu.memory_space<vmem>>) target_semaphore(%213 : memref<!tpu.dma_semaphore, #tpu.memory_space<semaphore_mem>>)
      %c20_i32 = arith.constant 20 : i32
      %214 = arith.addi %0, %c20_i32 : i32
      %215 = arith.index_cast %214 : i32 to index
      %216 = memref.load %arg2[%215] : memref<64xi32, #tpu.memory_space<smem>>
      %c0_i32_129 = arith.constant 0 : i32
      %c0_i32_130 = arith.constant 0 : i32
      %c0_i32_131 = arith.constant 0 : i32
      %c4_i32_132 = arith.constant 4 : i32
      %c0_i32_133 = arith.constant 0 : i32
      %217 = tpu.memref_slice %arg3[%c0_i32_129, %c0_i32_133] : memref<32x400xf32, #tpu.memory_space<any>> -> memref<1x400xf32, #tpu.memory_space<any>>
      %218 = tpu.memref_squeeze %217 : memref<1x400xf32, #tpu.memory_space<any>> -> memref<400xf32, #tpu.memory_space<any>>
      %c0_i32_134 = arith.constant 0 : i32
      %219 = tpu.memref_slice %arg4[%c0_i32_130, %c0_i32_134] : memref<64x400xf32, #tpu.memory_space<vmem>> -> memref<1x400xf32, #tpu.memory_space<vmem>>
      %220 = tpu.memref_squeeze %219 : memref<1x400xf32, #tpu.memory_space<vmem>> -> memref<400xf32, #tpu.memory_space<vmem>>
      %221 = tpu.memref_slice %arg5[%c0_i32_131, %c4_i32_132] : memref<1x16x!tpu.dma_semaphore, #tpu.memory_space<semaphore_mem>> -> memref<1x1x!tpu.dma_semaphore, #tpu.memory_space<semaphore_mem>>
      %222 = tpu.memref_squeeze %221 : memref<1x1x!tpu.dma_semaphore, #tpu.memory_space<semaphore_mem>> -> memref<!tpu.dma_semaphore, #tpu.memory_space<semaphore_mem>>
      tpu.wait_dma2 semaphore(%222 : memref<!tpu.dma_semaphore, #tpu.memory_space<semaphore_mem>>) src(%218 : memref<400xf32, #tpu.memory_space<any>>) dst(%220 : memref<400xf32, #tpu.memory_space<vmem>>)
      %c20_i32_135 = arith.constant 20 : i32
      %c0_i32_136 = arith.constant 0 : i32
      %c4_i32_137 = arith.constant 4 : i32
      %c0_i32_138 = arith.constant 0 : i32
      %223 = tpu.memref_slice %arg3[%216, %c0_i32_138] : memref<32x400xf32, #tpu.memory_space<any>> -> memref<1x400xf32, #tpu.memory_space<any>>
      %224 = tpu.memref_squeeze %223 : memref<1x400xf32, #tpu.memory_space<any>> -> memref<400xf32, #tpu.memory_space<any>>
      %c0_i32_139 = arith.constant 0 : i32
      %225 = tpu.memref_slice %arg4[%c20_i32_135, %c0_i32_139] : memref<64x400xf32, #tpu.memory_space<vmem>> -> memref<1x400xf32, #tpu.memory_space<vmem>>
      %226 = tpu.memref_squeeze %225 : memref<1x400xf32, #tpu.memory_space<vmem>> -> memref<400xf32, #tpu.memory_space<vmem>>
      %227 = tpu.memref_slice %arg5[%c0_i32_136, %c4_i32_137] : memref<1x16x!tpu.dma_semaphore, #tpu.memory_space<semaphore_mem>> -> memref<1x1x!tpu.dma_semaphore, #tpu.memory_space<semaphore_mem>>
      %228 = tpu.memref_squeeze %227 : memref<1x1x!tpu.dma_semaphore, #tpu.memory_space<semaphore_mem>> -> memref<!tpu.dma_semaphore, #tpu.memory_space<semaphore_mem>>
      tpu.enqueue_dma source(%224 : memref<400xf32, #tpu.memory_space<any>>) target(%226 : memref<400xf32, #tpu.memory_space<vmem>>) target_semaphore(%228 : memref<!tpu.dma_semaphore, #tpu.memory_space<semaphore_mem>>)
      %c21_i32 = arith.constant 21 : i32
      %229 = arith.addi %0, %c21_i32 : i32
      %230 = arith.index_cast %229 : i32 to index
      %231 = memref.load %arg2[%230] : memref<64xi32, #tpu.memory_space<smem>>
      %c0_i32_140 = arith.constant 0 : i32
      %c0_i32_141 = arith.constant 0 : i32
      %c0_i32_142 = arith.constant 0 : i32
      %c5_i32_143 = arith.constant 5 : i32
      %c0_i32_144 = arith.constant 0 : i32
      %232 = tpu.memref_slice %arg3[%c0_i32_140, %c0_i32_144] : memref<32x400xf32, #tpu.memory_space<any>> -> memref<1x400xf32, #tpu.memory_space<any>>
      %233 = tpu.memref_squeeze %232 : memref<1x400xf32, #tpu.memory_space<any>> -> memref<400xf32, #tpu.memory_space<any>>
      %c0_i32_145 = arith.constant 0 : i32
      %234 = tpu.memref_slice %arg4[%c0_i32_141, %c0_i32_145] : memref<64x400xf32, #tpu.memory_space<vmem>> -> memref<1x400xf32, #tpu.memory_space<vmem>>
      %235 = tpu.memref_squeeze %234 : memref<1x400xf32, #tpu.memory_space<vmem>> -> memref<400xf32, #tpu.memory_space<vmem>>
      %236 = tpu.memref_slice %arg5[%c0_i32_142, %c5_i32_143] : memref<1x16x!tpu.dma_semaphore, #tpu.memory_space<semaphore_mem>> -> memref<1x1x!tpu.dma_semaphore, #tpu.memory_space<semaphore_mem>>
      %237 = tpu.memref_squeeze %236 : memref<1x1x!tpu.dma_semaphore, #tpu.memory_space<semaphore_mem>> -> memref<!tpu.dma_semaphore, #tpu.memory_space<semaphore_mem>>
      tpu.wait_dma2 semaphore(%237 : memref<!tpu.dma_semaphore, #tpu.memory_space<semaphore_mem>>) src(%233 : memref<400xf32, #tpu.memory_space<any>>) dst(%235 : memref<400xf32, #tpu.memory_space<vmem>>)
      %c21_i32_146 = arith.constant 21 : i32
      %c0_i32_147 = arith.constant 0 : i32
      %c5_i32_148 = arith.constant 5 : i32
      %c0_i32_149 = arith.constant 0 : i32
      %238 = tpu.memref_slice %arg3[%231, %c0_i32_149] : memref<32x400xf32, #tpu.memory_space<any>> -> memref<1x400xf32, #tpu.memory_space<any>>
      %239 = tpu.memref_squeeze %238 : memref<1x400xf32, #tpu.memory_space<any>> -> memref<400xf32, #tpu.memory_space<any>>
      %c0_i32_150 = arith.constant 0 : i32
      %240 = tpu.memref_slice %arg4[%c21_i32_146, %c0_i32_150] : memref<64x400xf32, #tpu.memory_space<vmem>> -> memref<1x400xf32, #tpu.memory_space<vmem>>
      %241 = tpu.memref_squeeze %240 : memref<1x400xf32, #tpu.memory_space<vmem>> -> memref<400xf32, #tpu.memory_space<vmem>>
      %242 = tpu.memref_slice %arg5[%c0_i32_147, %c5_i32_148] : memref<1x16x!tpu.dma_semaphore, #tpu.memory_space<semaphore_mem>> -> memref<1x1x!tpu.dma_semaphore, #tpu.memory_space<semaphore_mem>>
      %243 = tpu.memref_squeeze %242 : memref<1x1x!tpu.dma_semaphore, #tpu.memory_space<semaphore_mem>> -> memref<!tpu.dma_semaphore, #tpu.memory_space<semaphore_mem>>
      tpu.enqueue_dma source(%239 : memref<400xf32, #tpu.memory_space<any>>) target(%241 : memref<400xf32, #tpu.memory_space<vmem>>) target_semaphore(%243 : memref<!tpu.dma_semaphore, #tpu.memory_space<semaphore_mem>>)
      %c22_i32 = arith.constant 22 : i32
      %244 = arith.addi %0, %c22_i32 : i32
      %245 = arith.index_cast %244 : i32 to index
      %246 = memref.load %arg2[%245] : memref<64xi32, #tpu.memory_space<smem>>
      %c0_i32_151 = arith.constant 0 : i32
      %c0_i32_152 = arith.constant 0 : i32
      %c0_i32_153 = arith.constant 0 : i32
      %c6_i32_154 = arith.constant 6 : i32
      %c0_i32_155 = arith.constant 0 : i32
      %247 = tpu.memref_slice %arg3[%c0_i32_151, %c0_i32_155] : memref<32x400xf32, #tpu.memory_space<any>> -> memref<1x400xf32, #tpu.memory_space<any>>
      %248 = tpu.memref_squeeze %247 : memref<1x400xf32, #tpu.memory_space<any>> -> memref<400xf32, #tpu.memory_space<any>>
      %c0_i32_156 = arith.constant 0 : i32
      %249 = tpu.memref_slice %arg4[%c0_i32_152, %c0_i32_156] : memref<64x400xf32, #tpu.memory_space<vmem>> -> memref<1x400xf32, #tpu.memory_space<vmem>>
      %250 = tpu.memref_squeeze %249 : memref<1x400xf32, #tpu.memory_space<vmem>> -> memref<400xf32, #tpu.memory_space<vmem>>
      %251 = tpu.memref_slice %arg5[%c0_i32_153, %c6_i32_154] : memref<1x16x!tpu.dma_semaphore, #tpu.memory_space<semaphore_mem>> -> memref<1x1x!tpu.dma_semaphore, #tpu.memory_space<semaphore_mem>>
      %252 = tpu.memref_squeeze %251 : memref<1x1x!tpu.dma_semaphore, #tpu.memory_space<semaphore_mem>> -> memref<!tpu.dma_semaphore, #tpu.memory_space<semaphore_mem>>
      tpu.wait_dma2 semaphore(%252 : memref<!tpu.dma_semaphore, #tpu.memory_space<semaphore_mem>>) src(%248 : memref<400xf32, #tpu.memory_space<any>>) dst(%250 : memref<400xf32, #tpu.memory_space<vmem>>)
      %c22_i32_157 = arith.constant 22 : i32
      %c0_i32_158 = arith.constant 0 : i32
      %c6_i32_159 = arith.constant 6 : i32
      %c0_i32_160 = arith.constant 0 : i32
      %253 = tpu.memref_slice %arg3[%246, %c0_i32_160] : memref<32x400xf32, #tpu.memory_space<any>> -> memref<1x400xf32, #tpu.memory_space<any>>
      %254 = tpu.memref_squeeze %253 : memref<1x400xf32, #tpu.memory_space<any>> -> memref<400xf32, #tpu.memory_space<any>>
      %c0_i32_161 = arith.constant 0 : i32
      %255 = tpu.memref_slice %arg4[%c22_i32_157, %c0_i32_161] : memref<64x400xf32, #tpu.memory_space<vmem>> -> memref<1x400xf32, #tpu.memory_space<vmem>>
      %256 = tpu.memref_squeeze %255 : memref<1x400xf32, #tpu.memory_space<vmem>> -> memref<400xf32, #tpu.memory_space<vmem>>
      %257 = tpu.memref_slice %arg5[%c0_i32_158, %c6_i32_159] : memref<1x16x!tpu.dma_semaphore, #tpu.memory_space<semaphore_mem>> -> memref<1x1x!tpu.dma_semaphore, #tpu.memory_space<semaphore_mem>>
      %258 = tpu.memref_squeeze %257 : memref<1x1x!tpu.dma_semaphore, #tpu.memory_space<semaphore_mem>> -> memref<!tpu.dma_semaphore, #tpu.memory_space<semaphore_mem>>
      tpu.enqueue_dma source(%254 : memref<400xf32, #tpu.memory_space<any>>) target(%256 : memref<400xf32, #tpu.memory_space<vmem>>) target_semaphore(%258 : memref<!tpu.dma_semaphore, #tpu.memory_space<semaphore_mem>>)
      %c23_i32 = arith.constant 23 : i32
      %259 = arith.addi %0, %c23_i32 : i32
      %260 = arith.index_cast %259 : i32 to index
      %261 = memref.load %arg2[%260] : memref<64xi32, #tpu.memory_space<smem>>
      %c0_i32_162 = arith.constant 0 : i32
      %c0_i32_163 = arith.constant 0 : i32
      %c0_i32_164 = arith.constant 0 : i32
      %c7_i32_165 = arith.constant 7 : i32
      %c0_i32_166 = arith.constant 0 : i32
      %262 = tpu.memref_slice %arg3[%c0_i32_162, %c0_i32_166] : memref<32x400xf32, #tpu.memory_space<any>> -> memref<1x400xf32, #tpu.memory_space<any>>
      %263 = tpu.memref_squeeze %262 : memref<1x400xf32, #tpu.memory_space<any>> -> memref<400xf32, #tpu.memory_space<any>>
      %c0_i32_167 = arith.constant 0 : i32
      %264 = tpu.memref_slice %arg4[%c0_i32_163, %c0_i32_167] : memref<64x400xf32, #tpu.memory_space<vmem>> -> memref<1x400xf32, #tpu.memory_space<vmem>>
      %265 = tpu.memref_squeeze %264 : memref<1x400xf32, #tpu.memory_space<vmem>> -> memref<400xf32, #tpu.memory_space<vmem>>
      %266 = tpu.memref_slice %arg5[%c0_i32_164, %c7_i32_165] : memref<1x16x!tpu.dma_semaphore, #tpu.memory_space<semaphore_mem>> -> memref<1x1x!tpu.dma_semaphore, #tpu.memory_space<semaphore_mem>>
      %267 = tpu.memref_squeeze %266 : memref<1x1x!tpu.dma_semaphore, #tpu.memory_space<semaphore_mem>> -> memref<!tpu.dma_semaphore, #tpu.memory_space<semaphore_mem>>
      tpu.wait_dma2 semaphore(%267 : memref<!tpu.dma_semaphore, #tpu.memory_space<semaphore_mem>>) src(%263 : memref<400xf32, #tpu.memory_space<any>>) dst(%265 : memref<400xf32, #tpu.memory_space<vmem>>)
      %c23_i32_168 = arith.constant 23 : i32
      %c0_i32_169 = arith.constant 0 : i32
      %c7_i32_170 = arith.constant 7 : i32
      %c0_i32_171 = arith.constant 0 : i32
      %268 = tpu.memref_slice %arg3[%261, %c0_i32_171] : memref<32x400xf32, #tpu.memory_space<any>> -> memref<1x400xf32, #tpu.memory_space<any>>
      %269 = tpu.memref_squeeze %268 : memref<1x400xf32, #tpu.memory_space<any>> -> memref<400xf32, #tpu.memory_space<any>>
      %c0_i32_172 = arith.constant 0 : i32
      %270 = tpu.memref_slice %arg4[%c23_i32_168, %c0_i32_172] : memref<64x400xf32, #tpu.memory_space<vmem>> -> memref<1x400xf32, #tpu.memory_space<vmem>>
      %271 = tpu.memref_squeeze %270 : memref<1x400xf32, #tpu.memory_space<vmem>> -> memref<400xf32, #tpu.memory_space<vmem>>
      %272 = tpu.memref_slice %arg5[%c0_i32_169, %c7_i32_170] : memref<1x16x!tpu.dma_semaphore, #tpu.memory_space<semaphore_mem>> -> memref<1x1x!tpu.dma_semaphore, #tpu.memory_space<semaphore_mem>>
      %273 = tpu.memref_squeeze %272 : memref<1x1x!tpu.dma_semaphore, #tpu.memory_space<semaphore_mem>> -> memref<!tpu.dma_semaphore, #tpu.memory_space<semaphore_mem>>
      tpu.enqueue_dma source(%269 : memref<400xf32, #tpu.memory_space<any>>) target(%271 : memref<400xf32, #tpu.memory_space<vmem>>) target_semaphore(%273 : memref<!tpu.dma_semaphore, #tpu.memory_space<semaphore_mem>>)
      %c24_i32 = arith.constant 24 : i32
      %274 = arith.addi %0, %c24_i32 : i32
      %275 = arith.index_cast %274 : i32 to index
      %276 = memref.load %arg2[%275] : memref<64xi32, #tpu.memory_space<smem>>
      %c0_i32_173 = arith.constant 0 : i32
      %c0_i32_174 = arith.constant 0 : i32
      %c0_i32_175 = arith.constant 0 : i32
      %c8_i32_176 = arith.constant 8 : i32
      %c0_i32_177 = arith.constant 0 : i32
      %277 = tpu.memref_slice %arg3[%c0_i32_173, %c0_i32_177] : memref<32x400xf32, #tpu.memory_space<any>> -> memref<1x400xf32, #tpu.memory_space<any>>
      %278 = tpu.memref_squeeze %277 : memref<1x400xf32, #tpu.memory_space<any>> -> memref<400xf32, #tpu.memory_space<any>>
      %c0_i32_178 = arith.constant 0 : i32
      %279 = tpu.memref_slice %arg4[%c0_i32_174, %c0_i32_178] : memref<64x400xf32, #tpu.memory_space<vmem>> -> memref<1x400xf32, #tpu.memory_space<vmem>>
      %280 = tpu.memref_squeeze %279 : memref<1x400xf32, #tpu.memory_space<vmem>> -> memref<400xf32, #tpu.memory_space<vmem>>
      %281 = tpu.memref_slice %arg5[%c0_i32_175, %c8_i32_176] : memref<1x16x!tpu.dma_semaphore, #tpu.memory_space<semaphore_mem>> -> memref<1x1x!tpu.dma_semaphore, #tpu.memory_space<semaphore_mem>>
      %282 = tpu.memref_squeeze %281 : memref<1x1x!tpu.dma_semaphore, #tpu.memory_space<semaphore_mem>> -> memref<!tpu.dma_semaphore, #tpu.memory_space<semaphore_mem>>
      tpu.wait_dma2 semaphore(%282 : memref<!tpu.dma_semaphore, #tpu.memory_space<semaphore_mem>>) src(%278 : memref<400xf32, #tpu.memory_space<any>>) dst(%280 : memref<400xf32, #tpu.memory_space<vmem>>)
      %c24_i32_179 = arith.constant 24 : i32
      %c0_i32_180 = arith.constant 0 : i32
      %c8_i32_181 = arith.constant 8 : i32
      %c0_i32_182 = arith.constant 0 : i32
      %283 = tpu.memref_slice %arg3[%276, %c0_i32_182] : memref<32x400xf32, #tpu.memory_space<any>> -> memref<1x400xf32, #tpu.memory_space<any>>
      %284 = tpu.memref_squeeze %283 : memref<1x400xf32, #tpu.memory_space<any>> -> memref<400xf32, #tpu.memory_space<any>>
      %c0_i32_183 = arith.constant 0 : i32
      %285 = tpu.memref_slice %arg4[%c24_i32_179, %c0_i32_183] : memref<64x400xf32, #tpu.memory_space<vmem>> -> memref<1x400xf32, #tpu.memory_space<vmem>>
      %286 = tpu.memref_squeeze %285 : memref<1x400xf32, #tpu.memory_space<vmem>> -> memref<400xf32, #tpu.memory_space<vmem>>
      %287 = tpu.memref_slice %arg5[%c0_i32_180, %c8_i32_181] : memref<1x16x!tpu.dma_semaphore, #tpu.memory_space<semaphore_mem>> -> memref<1x1x!tpu.dma_semaphore, #tpu.memory_space<semaphore_mem>>
      %288 = tpu.memref_squeeze %287 : memref<1x1x!tpu.dma_semaphore, #tpu.memory_space<semaphore_mem>> -> memref<!tpu.dma_semaphore, #tpu.memory_space<semaphore_mem>>
      tpu.enqueue_dma source(%284 : memref<400xf32, #tpu.memory_space<any>>) target(%286 : memref<400xf32, #tpu.memory_space<vmem>>) target_semaphore(%288 : memref<!tpu.dma_semaphore, #tpu.memory_space<semaphore_mem>>)
      %c25_i32 = arith.constant 25 : i32
      %289 = arith.addi %0, %c25_i32 : i32
      %290 = arith.index_cast %289 : i32 to index
      %291 = memref.load %arg2[%290] : memref<64xi32, #tpu.memory_space<smem>>
      %c0_i32_184 = arith.constant 0 : i32
      %c0_i32_185 = arith.constant 0 : i32
      %c0_i32_186 = arith.constant 0 : i32
      %c9_i32_187 = arith.constant 9 : i32
      %c0_i32_188 = arith.constant 0 : i32
      %292 = tpu.memref_slice %arg3[%c0_i32_184, %c0_i32_188] : memref<32x400xf32, #tpu.memory_space<any>> -> memref<1x400xf32, #tpu.memory_space<any>>
      %293 = tpu.memref_squeeze %292 : memref<1x400xf32, #tpu.memory_space<any>> -> memref<400xf32, #tpu.memory_space<any>>
      %c0_i32_189 = arith.constant 0 : i32
      %294 = tpu.memref_slice %arg4[%c0_i32_185, %c0_i32_189] : memref<64x400xf32, #tpu.memory_space<vmem>> -> memref<1x400xf32, #tpu.memory_space<vmem>>
      %295 = tpu.memref_squeeze %294 : memref<1x400xf32, #tpu.memory_space<vmem>> -> memref<400xf32, #tpu.memory_space<vmem>>
      %296 = tpu.memref_slice %arg5[%c0_i32_186, %c9_i32_187] : memref<1x16x!tpu.dma_semaphore, #tpu.memory_space<semaphore_mem>> -> memref<1x1x!tpu.dma_semaphore, #tpu.memory_space<semaphore_mem>>
      %297 = tpu.memref_squeeze %296 : memref<1x1x!tpu.dma_semaphore, #tpu.memory_space<semaphore_mem>> -> memref<!tpu.dma_semaphore, #tpu.memory_space<semaphore_mem>>
      tpu.wait_dma2 semaphore(%297 : memref<!tpu.dma_semaphore, #tpu.memory_space<semaphore_mem>>) src(%293 : memref<400xf32, #tpu.memory_space<any>>) dst(%295 : memref<400xf32, #tpu.memory_space<vmem>>)
      %c25_i32_190 = arith.constant 25 : i32
      %c0_i32_191 = arith.constant 0 : i32
      %c9_i32_192 = arith.constant 9 : i32
      %c0_i32_193 = arith.constant 0 : i32
      %298 = tpu.memref_slice %arg3[%291, %c0_i32_193] : memref<32x400xf32, #tpu.memory_space<any>> -> memref<1x400xf32, #tpu.memory_space<any>>
      %299 = tpu.memref_squeeze %298 : memref<1x400xf32, #tpu.memory_space<any>> -> memref<400xf32, #tpu.memory_space<any>>
      %c0_i32_194 = arith.constant 0 : i32
      %300 = tpu.memref_slice %arg4[%c25_i32_190, %c0_i32_194] : memref<64x400xf32, #tpu.memory_space<vmem>> -> memref<1x400xf32, #tpu.memory_space<vmem>>
      %301 = tpu.memref_squeeze %300 : memref<1x400xf32, #tpu.memory_space<vmem>> -> memref<400xf32, #tpu.memory_space<vmem>>
      %302 = tpu.memref_slice %arg5[%c0_i32_191, %c9_i32_192] : memref<1x16x!tpu.dma_semaphore, #tpu.memory_space<semaphore_mem>> -> memref<1x1x!tpu.dma_semaphore, #tpu.memory_space<semaphore_mem>>
      %303 = tpu.memref_squeeze %302 : memref<1x1x!tpu.dma_semaphore, #tpu.memory_space<semaphore_mem>> -> memref<!tpu.dma_semaphore, #tpu.memory_space<semaphore_mem>>
      tpu.enqueue_dma source(%299 : memref<400xf32, #tpu.memory_space<any>>) target(%301 : memref<400xf32, #tpu.memory_space<vmem>>) target_semaphore(%303 : memref<!tpu.dma_semaphore, #tpu.memory_space<semaphore_mem>>)
      %c26_i32 = arith.constant 26 : i32
      %304 = arith.addi %0, %c26_i32 : i32
      %305 = arith.index_cast %304 : i32 to index
      %306 = memref.load %arg2[%305] : memref<64xi32, #tpu.memory_space<smem>>
      %c0_i32_195 = arith.constant 0 : i32
      %c0_i32_196 = arith.constant 0 : i32
      %c0_i32_197 = arith.constant 0 : i32
      %c10_i32_198 = arith.constant 10 : i32
      %c0_i32_199 = arith.constant 0 : i32
      %307 = tpu.memref_slice %arg3[%c0_i32_195, %c0_i32_199] : memref<32x400xf32, #tpu.memory_space<any>> -> memref<1x400xf32, #tpu.memory_space<any>>
      %308 = tpu.memref_squeeze %307 : memref<1x400xf32, #tpu.memory_space<any>> -> memref<400xf32, #tpu.memory_space<any>>
      %c0_i32_200 = arith.constant 0 : i32
      %309 = tpu.memref_slice %arg4[%c0_i32_196, %c0_i32_200] : memref<64x400xf32, #tpu.memory_space<vmem>> -> memref<1x400xf32, #tpu.memory_space<vmem>>
      %310 = tpu.memref_squeeze %309 : memref<1x400xf32, #tpu.memory_space<vmem>> -> memref<400xf32, #tpu.memory_space<vmem>>
      %311 = tpu.memref_slice %arg5[%c0_i32_197, %c10_i32_198] : memref<1x16x!tpu.dma_semaphore, #tpu.memory_space<semaphore_mem>> -> memref<1x1x!tpu.dma_semaphore, #tpu.memory_space<semaphore_mem>>
      %312 = tpu.memref_squeeze %311 : memref<1x1x!tpu.dma_semaphore, #tpu.memory_space<semaphore_mem>> -> memref<!tpu.dma_semaphore, #tpu.memory_space<semaphore_mem>>
      tpu.wait_dma2 semaphore(%312 : memref<!tpu.dma_semaphore, #tpu.memory_space<semaphore_mem>>) src(%308 : memref<400xf32, #tpu.memory_space<any>>) dst(%310 : memref<400xf32, #tpu.memory_space<vmem>>)
      %c26_i32_201 = arith.constant 26 : i32
      %c0_i32_202 = arith.constant 0 : i32
      %c10_i32_203 = arith.constant 10 : i32
      %c0_i32_204 = arith.constant 0 : i32
      %313 = tpu.memref_slice %arg3[%306, %c0_i32_204] : memref<32x400xf32, #tpu.memory_space<any>> -> memref<1x400xf32, #tpu.memory_space<any>>
      %314 = tpu.memref_squeeze %313 : memref<1x400xf32, #tpu.memory_space<any>> -> memref<400xf32, #tpu.memory_space<any>>
      %c0_i32_205 = arith.constant 0 : i32
      %315 = tpu.memref_slice %arg4[%c26_i32_201, %c0_i32_205] : memref<64x400xf32, #tpu.memory_space<vmem>> -> memref<1x400xf32, #tpu.memory_space<vmem>>
      %316 = tpu.memref_squeeze %315 : memref<1x400xf32, #tpu.memory_space<vmem>> -> memref<400xf32, #tpu.memory_space<vmem>>
      %317 = tpu.memref_slice %arg5[%c0_i32_202, %c10_i32_203] : memref<1x16x!tpu.dma_semaphore, #tpu.memory_space<semaphore_mem>> -> memref<1x1x!tpu.dma_semaphore, #tpu.memory_space<semaphore_mem>>
      %318 = tpu.memref_squeeze %317 : memref<1x1x!tpu.dma_semaphore, #tpu.memory_space<semaphore_mem>> -> memref<!tpu.dma_semaphore, #tpu.memory_space<semaphore_mem>>
      tpu.enqueue_dma source(%314 : memref<400xf32, #tpu.memory_space<any>>) target(%316 : memref<400xf32, #tpu.memory_space<vmem>>) target_semaphore(%318 : memref<!tpu.dma_semaphore, #tpu.memory_space<semaphore_mem>>)
      %c27_i32 = arith.constant 27 : i32
      %319 = arith.addi %0, %c27_i32 : i32
      %320 = arith.index_cast %319 : i32 to index
      %321 = memref.load %arg2[%320] : memref<64xi32, #tpu.memory_space<smem>>
      %c0_i32_206 = arith.constant 0 : i32
      %c0_i32_207 = arith.constant 0 : i32
      %c0_i32_208 = arith.constant 0 : i32
      %c11_i32_209 = arith.constant 11 : i32
      %c0_i32_210 = arith.constant 0 : i32
      %322 = tpu.memref_slice %arg3[%c0_i32_206, %c0_i32_210] : memref<32x400xf32, #tpu.memory_space<any>> -> memref<1x400xf32, #tpu.memory_space<any>>
      %323 = tpu.memref_squeeze %322 : memref<1x400xf32, #tpu.memory_space<any>> -> memref<400xf32, #tpu.memory_space<any>>
      %c0_i32_211 = arith.constant 0 : i32
      %324 = tpu.memref_slice %arg4[%c0_i32_207, %c0_i32_211] : memref<64x400xf32, #tpu.memory_space<vmem>> -> memref<1x400xf32, #tpu.memory_space<vmem>>
      %325 = tpu.memref_squeeze %324 : memref<1x400xf32, #tpu.memory_space<vmem>> -> memref<400xf32, #tpu.memory_space<vmem>>
      %326 = tpu.memref_slice %arg5[%c0_i32_208, %c11_i32_209] : memref<1x16x!tpu.dma_semaphore, #tpu.memory_space<semaphore_mem>> -> memref<1x1x!tpu.dma_semaphore, #tpu.memory_space<semaphore_mem>>
      %327 = tpu.memref_squeeze %326 : memref<1x1x!tpu.dma_semaphore, #tpu.memory_space<semaphore_mem>> -> memref<!tpu.dma_semaphore, #tpu.memory_space<semaphore_mem>>
      tpu.wait_dma2 semaphore(%327 : memref<!tpu.dma_semaphore, #tpu.memory_space<semaphore_mem>>) src(%323 : memref<400xf32, #tpu.memory_space<any>>) dst(%325 : memref<400xf32, #tpu.memory_space<vmem>>)
      %c27_i32_212 = arith.constant 27 : i32
      %c0_i32_213 = arith.constant 0 : i32
      %c11_i32_214 = arith.constant 11 : i32
      %c0_i32_215 = arith.constant 0 : i32
      %328 = tpu.memref_slice %arg3[%321, %c0_i32_215] : memref<32x400xf32, #tpu.memory_space<any>> -> memref<1x400xf32, #tpu.memory_space<any>>
      %329 = tpu.memref_squeeze %328 : memref<1x400xf32, #tpu.memory_space<any>> -> memref<400xf32, #tpu.memory_space<any>>
      %c0_i32_216 = arith.constant 0 : i32
      %330 = tpu.memref_slice %arg4[%c27_i32_212, %c0_i32_216] : memref<64x400xf32, #tpu.memory_space<vmem>> -> memref<1x400xf32, #tpu.memory_space<vmem>>
      %331 = tpu.memref_squeeze %330 : memref<1x400xf32, #tpu.memory_space<vmem>> -> memref<400xf32, #tpu.memory_space<vmem>>
      %332 = tpu.memref_slice %arg5[%c0_i32_213, %c11_i32_214] : memref<1x16x!tpu.dma_semaphore, #tpu.memory_space<semaphore_mem>> -> memref<1x1x!tpu.dma_semaphore, #tpu.memory_space<semaphore_mem>>
      %333 = tpu.memref_squeeze %332 : memref<1x1x!tpu.dma_semaphore, #tpu.memory_space<semaphore_mem>> -> memref<!tpu.dma_semaphore, #tpu.memory_space<semaphore_mem>>
      tpu.enqueue_dma source(%329 : memref<400xf32, #tpu.memory_space<any>>) target(%331 : memref<400xf32, #tpu.memory_space<vmem>>) target_semaphore(%333 : memref<!tpu.dma_semaphore, #tpu.memory_space<semaphore_mem>>)
      %c28_i32 = arith.constant 28 : i32
      %334 = arith.addi %0, %c28_i32 : i32
      %335 = arith.index_cast %334 : i32 to index
      %336 = memref.load %arg2[%335] : memref<64xi32, #tpu.memory_space<smem>>
      %c0_i32_217 = arith.constant 0 : i32
      %c0_i32_218 = arith.constant 0 : i32
      %c0_i32_219 = arith.constant 0 : i32
      %c12_i32_220 = arith.constant 12 : i32
      %c0_i32_221 = arith.constant 0 : i32
      %337 = tpu.memref_slice %arg3[%c0_i32_217, %c0_i32_221] : memref<32x400xf32, #tpu.memory_space<any>> -> memref<1x400xf32, #tpu.memory_space<any>>
      %338 = tpu.memref_squeeze %337 : memref<1x400xf32, #tpu.memory_space<any>> -> memref<400xf32, #tpu.memory_space<any>>
      %c0_i32_222 = arith.constant 0 : i32
      %339 = tpu.memref_slice %arg4[%c0_i32_218, %c0_i32_222] : memref<64x400xf32, #tpu.memory_space<vmem>> -> memref<1x400xf32, #tpu.memory_space<vmem>>
      %340 = tpu.memref_squeeze %339 : memref<1x400xf32, #tpu.memory_space<vmem>> -> memref<400xf32, #tpu.memory_space<vmem>>
      %341 = tpu.memref_slice %arg5[%c0_i32_219, %c12_i32_220] : memref<1x16x!tpu.dma_semaphore, #tpu.memory_space<semaphore_mem>> -> memref<1x1x!tpu.dma_semaphore, #tpu.memory_space<semaphore_mem>>
      %342 = tpu.memref_squeeze %341 : memref<1x1x!tpu.dma_semaphore, #tpu.memory_space<semaphore_mem>> -> memref<!tpu.dma_semaphore, #tpu.memory_space<semaphore_mem>>
      tpu.wait_dma2 semaphore(%342 : memref<!tpu.dma_semaphore, #tpu.memory_space<semaphore_mem>>) src(%338 : memref<400xf32, #tpu.memory_space<any>>) dst(%340 : memref<400xf32, #tpu.memory_space<vmem>>)
      %c28_i32_223 = arith.constant 28 : i32
      %c0_i32_224 = arith.constant 0 : i32
      %c12_i32_225 = arith.constant 12 : i32
      %c0_i32_226 = arith.constant 0 : i32
      %343 = tpu.memref_slice %arg3[%336, %c0_i32_226] : memref<32x400xf32, #tpu.memory_space<any>> -> memref<1x400xf32, #tpu.memory_space<any>>
      %344 = tpu.memref_squeeze %343 : memref<1x400xf32, #tpu.memory_space<any>> -> memref<400xf32, #tpu.memory_space<any>>
      %c0_i32_227 = arith.constant 0 : i32
      %345 = tpu.memref_slice %arg4[%c28_i32_223, %c0_i32_227] : memref<64x400xf32, #tpu.memory_space<vmem>> -> memref<1x400xf32, #tpu.memory_space<vmem>>
      %346 = tpu.memref_squeeze %345 : memref<1x400xf32, #tpu.memory_space<vmem>> -> memref<400xf32, #tpu.memory_space<vmem>>
      %347 = tpu.memref_slice %arg5[%c0_i32_224, %c12_i32_225] : memref<1x16x!tpu.dma_semaphore, #tpu.memory_space<semaphore_mem>> -> memref<1x1x!tpu.dma_semaphore, #tpu.memory_space<semaphore_mem>>
      %348 = tpu.memref_squeeze %347 : memref<1x1x!tpu.dma_semaphore, #tpu.memory_space<semaphore_mem>> -> memref<!tpu.dma_semaphore, #tpu.memory_space<semaphore_mem>>
      tpu.enqueue_dma source(%344 : memref<400xf32, #tpu.memory_space<any>>) target(%346 : memref<400xf32, #tpu.memory_space<vmem>>) target_semaphore(%348 : memref<!tpu.dma_semaphore, #tpu.memory_space<semaphore_mem>>)
      %c29_i32 = arith.constant 29 : i32
      %349 = arith.addi %0, %c29_i32 : i32
      %350 = arith.index_cast %349 : i32 to index
      %351 = memref.load %arg2[%350] : memref<64xi32, #tpu.memory_space<smem>>
      %c0_i32_228 = arith.constant 0 : i32
      %c0_i32_229 = arith.constant 0 : i32
      %c0_i32_230 = arith.constant 0 : i32
      %c13_i32_231 = arith.constant 13 : i32
      %c0_i32_232 = arith.constant 0 : i32
      %352 = tpu.memref_slice %arg3[%c0_i32_228, %c0_i32_232] : memref<32x400xf32, #tpu.memory_space<any>> -> memref<1x400xf32, #tpu.memory_space<any>>
      %353 = tpu.memref_squeeze %352 : memref<1x400xf32, #tpu.memory_space<any>> -> memref<400xf32, #tpu.memory_space<any>>
      %c0_i32_233 = arith.constant 0 : i32
      %354 = tpu.memref_slice %arg4[%c0_i32_229, %c0_i32_233] : memref<64x400xf32, #tpu.memory_space<vmem>> -> memref<1x400xf32, #tpu.memory_space<vmem>>
      %355 = tpu.memref_squeeze %354 : memref<1x400xf32, #tpu.memory_space<vmem>> -> memref<400xf32, #tpu.memory_space<vmem>>
      %356 = tpu.memref_slice %arg5[%c0_i32_230, %c13_i32_231] : memref<1x16x!tpu.dma_semaphore, #tpu.memory_space<semaphore_mem>> -> memref<1x1x!tpu.dma_semaphore, #tpu.memory_space<semaphore_mem>>
      %357 = tpu.memref_squeeze %356 : memref<1x1x!tpu.dma_semaphore, #tpu.memory_space<semaphore_mem>> -> memref<!tpu.dma_semaphore, #tpu.memory_space<semaphore_mem>>
      tpu.wait_dma2 semaphore(%357 : memref<!tpu.dma_semaphore, #tpu.memory_space<semaphore_mem>>) src(%353 : memref<400xf32, #tpu.memory_space<any>>) dst(%355 : memref<400xf32, #tpu.memory_space<vmem>>)
      %c29_i32_234 = arith.constant 29 : i32
      %c0_i32_235 = arith.constant 0 : i32
      %c13_i32_236 = arith.constant 13 : i32
      %c0_i32_237 = arith.constant 0 : i32
      %358 = tpu.memref_slice %arg3[%351, %c0_i32_237] : memref<32x400xf32, #tpu.memory_space<any>> -> memref<1x400xf32, #tpu.memory_space<any>>
      %359 = tpu.memref_squeeze %358 : memref<1x400xf32, #tpu.memory_space<any>> -> memref<400xf32, #tpu.memory_space<any>>
      %c0_i32_238 = arith.constant 0 : i32
      %360 = tpu.memref_slice %arg4[%c29_i32_234, %c0_i32_238] : memref<64x400xf32, #tpu.memory_space<vmem>> -> memref<1x400xf32, #tpu.memory_space<vmem>>
      %361 = tpu.memref_squeeze %360 : memref<1x400xf32, #tpu.memory_space<vmem>> -> memref<400xf32, #tpu.memory_space<vmem>>
      %362 = tpu.memref_slice %arg5[%c0_i32_235, %c13_i32_236] : memref<1x16x!tpu.dma_semaphore, #tpu.memory_space<semaphore_mem>> -> memref<1x1x!tpu.dma_semaphore, #tpu.memory_space<semaphore_mem>>
      %363 = tpu.memref_squeeze %362 : memref<1x1x!tpu.dma_semaphore, #tpu.memory_space<semaphore_mem>> -> memref<!tpu.dma_semaphore, #tpu.memory_space<semaphore_mem>>
      tpu.enqueue_dma source(%359 : memref<400xf32, #tpu.memory_space<any>>) target(%361 : memref<400xf32, #tpu.memory_space<vmem>>) target_semaphore(%363 : memref<!tpu.dma_semaphore, #tpu.memory_space<semaphore_mem>>)
      %c30_i32 = arith.constant 30 : i32
      %364 = arith.addi %0, %c30_i32 : i32
      %365 = arith.index_cast %364 : i32 to index
      %366 = memref.load %arg2[%365] : memref<64xi32, #tpu.memory_space<smem>>
      %c0_i32_239 = arith.constant 0 : i32
      %c0_i32_240 = arith.constant 0 : i32
      %c0_i32_241 = arith.constant 0 : i32
      %c14_i32_242 = arith.constant 14 : i32
      %c0_i32_243 = arith.constant 0 : i32
      %367 = tpu.memref_slice %arg3[%c0_i32_239, %c0_i32_243] : memref<32x400xf32, #tpu.memory_space<any>> -> memref<1x400xf32, #tpu.memory_space<any>>
      %368 = tpu.memref_squeeze %367 : memref<1x400xf32, #tpu.memory_space<any>> -> memref<400xf32, #tpu.memory_space<any>>
      %c0_i32_244 = arith.constant 0 : i32
      %369 = tpu.memref_slice %arg4[%c0_i32_240, %c0_i32_244] : memref<64x400xf32, #tpu.memory_space<vmem>> -> memref<1x400xf32, #tpu.memory_space<vmem>>
      %370 = tpu.memref_squeeze %369 : memref<1x400xf32, #tpu.memory_space<vmem>> -> memref<400xf32, #tpu.memory_space<vmem>>
      %371 = tpu.memref_slice %arg5[%c0_i32_241, %c14_i32_242] : memref<1x16x!tpu.dma_semaphore, #tpu.memory_space<semaphore_mem>> -> memref<1x1x!tpu.dma_semaphore, #tpu.memory_space<semaphore_mem>>
      %372 = tpu.memref_squeeze %371 : memref<1x1x!tpu.dma_semaphore, #tpu.memory_space<semaphore_mem>> -> memref<!tpu.dma_semaphore, #tpu.memory_space<semaphore_mem>>
      tpu.wait_dma2 semaphore(%372 : memref<!tpu.dma_semaphore, #tpu.memory_space<semaphore_mem>>) src(%368 : memref<400xf32, #tpu.memory_space<any>>) dst(%370 : memref<400xf32, #tpu.memory_space<vmem>>)
      %c30_i32_245 = arith.constant 30 : i32
      %c0_i32_246 = arith.constant 0 : i32
      %c14_i32_247 = arith.constant 14 : i32
      %c0_i32_248 = arith.constant 0 : i32
      %373 = tpu.memref_slice %arg3[%366, %c0_i32_248] : memref<32x400xf32, #tpu.memory_space<any>> -> memref<1x400xf32, #tpu.memory_space<any>>
      %374 = tpu.memref_squeeze %373 : memref<1x400xf32, #tpu.memory_space<any>> -> memref<400xf32, #tpu.memory_space<any>>
      %c0_i32_249 = arith.constant 0 : i32
      %375 = tpu.memref_slice %arg4[%c30_i32_245, %c0_i32_249] : memref<64x400xf32, #tpu.memory_space<vmem>> -> memref<1x400xf32, #tpu.memory_space<vmem>>
      %376 = tpu.memref_squeeze %375 : memref<1x400xf32, #tpu.memory_space<vmem>> -> memref<400xf32, #tpu.memory_space<vmem>>
      %377 = tpu.memref_slice %arg5[%c0_i32_246, %c14_i32_247] : memref<1x16x!tpu.dma_semaphore, #tpu.memory_space<semaphore_mem>> -> memref<1x1x!tpu.dma_semaphore, #tpu.memory_space<semaphore_mem>>
      %378 = tpu.memref_squeeze %377 : memref<1x1x!tpu.dma_semaphore, #tpu.memory_space<semaphore_mem>> -> memref<!tpu.dma_semaphore, #tpu.memory_space<semaphore_mem>>
      tpu.enqueue_dma source(%374 : memref<400xf32, #tpu.memory_space<any>>) target(%376 : memref<400xf32, #tpu.memory_space<vmem>>) target_semaphore(%378 : memref<!tpu.dma_semaphore, #tpu.memory_space<semaphore_mem>>)
      %c31_i32 = arith.constant 31 : i32
      %379 = arith.addi %0, %c31_i32 : i32
      %380 = arith.index_cast %379 : i32 to index
      %381 = memref.load %arg2[%380] : memref<64xi32, #tpu.memory_space<smem>>
      %c0_i32_250 = arith.constant 0 : i32
      %c0_i32_251 = arith.constant 0 : i32
      %c0_i32_252 = arith.constant 0 : i32
      %c15_i32_253 = arith.constant 15 : i32
      %c0_i32_254 = arith.constant 0 : i32
      %382 = tpu.memref_slice %arg3[%c0_i32_250, %c0_i32_254] : memref<32x400xf32, #tpu.memory_space<any>> -> memref<1x400xf32, #tpu.memory_space<any>>
      %383 = tpu.memref_squeeze %382 : memref<1x400xf32, #tpu.memory_space<any>> -> memref<400xf32, #tpu.memory_space<any>>
      %c0_i32_255 = arith.constant 0 : i32
      %384 = tpu.memref_slice %arg4[%c0_i32_251, %c0_i32_255] : memref<64x400xf32, #tpu.memory_space<vmem>> -> memref<1x400xf32, #tpu.memory_space<vmem>>
      %385 = tpu.memref_squeeze %384 : memref<1x400xf32, #tpu.memory_space<vmem>> -> memref<400xf32, #tpu.memory_space<vmem>>
      %386 = tpu.memref_slice %arg5[%c0_i32_252, %c15_i32_253] : memref<1x16x!tpu.dma_semaphore, #tpu.memory_space<semaphore_mem>> -> memref<1x1x!tpu.dma_semaphore, #tpu.memory_space<semaphore_mem>>
      %387 = tpu.memref_squeeze %386 : memref<1x1x!tpu.dma_semaphore, #tpu.memory_space<semaphore_mem>> -> memref<!tpu.dma_semaphore, #tpu.memory_space<semaphore_mem>>
      tpu.wait_dma2 semaphore(%387 : memref<!tpu.dma_semaphore, #tpu.memory_space<semaphore_mem>>) src(%383 : memref<400xf32, #tpu.memory_space<any>>) dst(%385 : memref<400xf32, #tpu.memory_space<vmem>>)
      %c31_i32_256 = arith.constant 31 : i32
      %c0_i32_257 = arith.constant 0 : i32
      %c15_i32_258 = arith.constant 15 : i32
      %c0_i32_259 = arith.constant 0 : i32
      %388 = tpu.memref_slice %arg3[%381, %c0_i32_259] : memref<32x400xf32, #tpu.memory_space<any>> -> memref<1x400xf32, #tpu.memory_space<any>>
      %389 = tpu.memref_squeeze %388 : memref<1x400xf32, #tpu.memory_space<any>> -> memref<400xf32, #tpu.memory_space<any>>
      %c0_i32_260 = arith.constant 0 : i32
      %390 = tpu.memref_slice %arg4[%c31_i32_256, %c0_i32_260] : memref<64x400xf32, #tpu.memory_space<vmem>> -> memref<1x400xf32, #tpu.memory_space<vmem>>
      %391 = tpu.memref_squeeze %390 : memref<1x400xf32, #tpu.memory_space<vmem>> -> memref<400xf32, #tpu.memory_space<vmem>>
      %392 = tpu.memref_slice %arg5[%c0_i32_257, %c15_i32_258] : memref<1x16x!tpu.dma_semaphore, #tpu.memory_space<semaphore_mem>> -> memref<1x1x!tpu.dma_semaphore, #tpu.memory_space<semaphore_mem>>
      %393 = tpu.memref_squeeze %392 : memref<1x1x!tpu.dma_semaphore, #tpu.memory_space<semaphore_mem>> -> memref<!tpu.dma_semaphore, #tpu.memory_space<semaphore_mem>>
      tpu.enqueue_dma source(%389 : memref<400xf32, #tpu.memory_space<any>>) target(%391 : memref<400xf32, #tpu.memory_space<vmem>>) target_semaphore(%393 : memref<!tpu.dma_semaphore, #tpu.memory_space<semaphore_mem>>)
      %c32_i32 = arith.constant 32 : i32
      %394 = arith.addi %0, %c32_i32 : i32
      %395 = arith.index_cast %394 : i32 to index
      %396 = memref.load %arg2[%395] : memref<64xi32, #tpu.memory_space<smem>>
      %c0_i32_261 = arith.constant 0 : i32
      %c0_i32_262 = arith.constant 0 : i32
      %c0_i32_263 = arith.constant 0 : i32
      %c0_i32_264 = arith.constant 0 : i32
      %c0_i32_265 = arith.constant 0 : i32
      %397 = tpu.memref_slice %arg3[%c0_i32_261, %c0_i32_265] : memref<32x400xf32, #tpu.memory_space<any>> -> memref<1x400xf32, #tpu.memory_space<any>>
      %398 = tpu.memref_squeeze %397 : memref<1x400xf32, #tpu.memory_space<any>> -> memref<400xf32, #tpu.memory_space<any>>
      %c0_i32_266 = arith.constant 0 : i32
      %399 = tpu.memref_slice %arg4[%c0_i32_262, %c0_i32_266] : memref<64x400xf32, #tpu.memory_space<vmem>> -> memref<1x400xf32, #tpu.memory_space<vmem>>
      %400 = tpu.memref_squeeze %399 : memref<1x400xf32, #tpu.memory_space<vmem>> -> memref<400xf32, #tpu.memory_space<vmem>>
      %401 = tpu.memref_slice %arg5[%c0_i32_263, %c0_i32_264] : memref<1x16x!tpu.dma_semaphore, #tpu.memory_space<semaphore_mem>> -> memref<1x1x!tpu.dma_semaphore, #tpu.memory_space<semaphore_mem>>
      %402 = tpu.memref_squeeze %401 : memref<1x1x!tpu.dma_semaphore, #tpu.memory_space<semaphore_mem>> -> memref<!tpu.dma_semaphore, #tpu.memory_space<semaphore_mem>>
      tpu.wait_dma2 semaphore(%402 : memref<!tpu.dma_semaphore, #tpu.memory_space<semaphore_mem>>) src(%398 : memref<400xf32, #tpu.memory_space<any>>) dst(%400 : memref<400xf32, #tpu.memory_space<vmem>>)
      %c32_i32_267 = arith.constant 32 : i32
      %c0_i32_268 = arith.constant 0 : i32
      %c0_i32_269 = arith.constant 0 : i32
      %c0_i32_270 = arith.constant 0 : i32
      %403 = tpu.memref_slice %arg3[%396, %c0_i32_270] : memref<32x400xf32, #tpu.memory_space<any>> -> memref<1x400xf32, #tpu.memory_space<any>>
      %404 = tpu.memref_squeeze %403 : memref<1x400xf32, #tpu.memory_space<any>> -> memref<400xf32, #tpu.memory_space<any>>
      %c0_i32_271 = arith.constant 0 : i32
      %405 = tpu.memref_slice %arg4[%c32_i32_267, %c0_i32_271] : memref<64x400xf32, #tpu.memory_space<vmem>> -> memref<1x400xf32, #tpu.memory_space<vmem>>
      %406 = tpu.memref_squeeze %405 : memref<1x400xf32, #tpu.memory_space<vmem>> -> memref<400xf32, #tpu.memory_space<vmem>>
      %407 = tpu.memref_slice %arg5[%c0_i32_268, %c0_i32_269] : memref<1x16x!tpu.dma_semaphore, #tpu.memory_space<semaphore_mem>> -> memref<1x1x!tpu.dma_semaphore, #tpu.memory_space<semaphore_mem>>
      %408 = tpu.memref_squeeze %407 : memref<1x1x!tpu.dma_semaphore, #tpu.memory_space<semaphore_mem>> -> memref<!tpu.dma_semaphore, #tpu.memory_space<semaphore_mem>>
      tpu.enqueue_dma source(%404 : memref<400xf32, #tpu.memory_space<any>>) target(%406 : memref<400xf32, #tpu.memory_space<vmem>>) target_semaphore(%408 : memref<!tpu.dma_semaphore, #tpu.memory_space<semaphore_mem>>)
      %c33_i32 = arith.constant 33 : i32
      %409 = arith.addi %0, %c33_i32 : i32
      %410 = arith.index_cast %409 : i32 to index
      %411 = memref.load %arg2[%410] : memref<64xi32, #tpu.memory_space<smem>>
      %c0_i32_272 = arith.constant 0 : i32
      %c0_i32_273 = arith.constant 0 : i32
      %c0_i32_274 = arith.constant 0 : i32
      %c1_i32_275 = arith.constant 1 : i32
      %c0_i32_276 = arith.constant 0 : i32
      %412 = tpu.memref_slice %arg3[%c0_i32_272, %c0_i32_276] : memref<32x400xf32, #tpu.memory_space<any>> -> memref<1x400xf32, #tpu.memory_space<any>>
      %413 = tpu.memref_squeeze %412 : memref<1x400xf32, #tpu.memory_space<any>> -> memref<400xf32, #tpu.memory_space<any>>
      %c0_i32_277 = arith.constant 0 : i32
      %414 = tpu.memref_slice %arg4[%c0_i32_273, %c0_i32_277] : memref<64x400xf32, #tpu.memory_space<vmem>> -> memref<1x400xf32, #tpu.memory_space<vmem>>
      %415 = tpu.memref_squeeze %414 : memref<1x400xf32, #tpu.memory_space<vmem>> -> memref<400xf32, #tpu.memory_space<vmem>>
      %416 = tpu.memref_slice %arg5[%c0_i32_274, %c1_i32_275] : memref<1x16x!tpu.dma_semaphore, #tpu.memory_space<semaphore_mem>> -> memref<1x1x!tpu.dma_semaphore, #tpu.memory_space<semaphore_mem>>
      %417 = tpu.memref_squeeze %416 : memref<1x1x!tpu.dma_semaphore, #tpu.memory_space<semaphore_mem>> -> memref<!tpu.dma_semaphore, #tpu.memory_space<semaphore_mem>>
      tpu.wait_dma2 semaphore(%417 : memref<!tpu.dma_semaphore, #tpu.memory_space<semaphore_mem>>) src(%413 : memref<400xf32, #tpu.memory_space<any>>) dst(%415 : memref<400xf32, #tpu.memory_space<vmem>>)
      %c33_i32_278 = arith.constant 33 : i32
      %c0_i32_279 = arith.constant 0 : i32
      %c1_i32_280 = arith.constant 1 : i32
      %c0_i32_281 = arith.constant 0 : i32
      %418 = tpu.memref_slice %arg3[%411, %c0_i32_281] : memref<32x400xf32, #tpu.memory_space<any>> -> memref<1x400xf32, #tpu.memory_space<any>>
      %419 = tpu.memref_squeeze %418 : memref<1x400xf32, #tpu.memory_space<any>> -> memref<400xf32, #tpu.memory_space<any>>
      %c0_i32_282 = arith.constant 0 : i32
      %420 = tpu.memref_slice %arg4[%c33_i32_278, %c0_i32_282] : memref<64x400xf32, #tpu.memory_space<vmem>> -> memref<1x400xf32, #tpu.memory_space<vmem>>
      %421 = tpu.memref_squeeze %420 : memref<1x400xf32, #tpu.memory_space<vmem>> -> memref<400xf32, #tpu.memory_space<vmem>>
      %422 = tpu.memref_slice %arg5[%c0_i32_279, %c1_i32_280] : memref<1x16x!tpu.dma_semaphore, #tpu.memory_space<semaphore_mem>> -> memref<1x1x!tpu.dma_semaphore, #tpu.memory_space<semaphore_mem>>
      %423 = tpu.memref_squeeze %422 : memref<1x1x!tpu.dma_semaphore, #tpu.memory_space<semaphore_mem>> -> memref<!tpu.dma_semaphore, #tpu.memory_space<semaphore_mem>>
      tpu.enqueue_dma source(%419 : memref<400xf32, #tpu.memory_space<any>>) target(%421 : memref<400xf32, #tpu.memory_space<vmem>>) target_semaphore(%423 : memref<!tpu.dma_semaphore, #tpu.memory_space<semaphore_mem>>)
      %c34_i32 = arith.constant 34 : i32
      %424 = arith.addi %0, %c34_i32 : i32
      %425 = arith.index_cast %424 : i32 to index
      %426 = memref.load %arg2[%425] : memref<64xi32, #tpu.memory_space<smem>>
      %c0_i32_283 = arith.constant 0 : i32
      %c0_i32_284 = arith.constant 0 : i32
      %c0_i32_285 = arith.constant 0 : i32
      %c2_i32_286 = arith.constant 2 : i32
      %c0_i32_287 = arith.constant 0 : i32
      %427 = tpu.memref_slice %arg3[%c0_i32_283, %c0_i32_287] : memref<32x400xf32, #tpu.memory_space<any>> -> memref<1x400xf32, #tpu.memory_space<any>>
      %428 = tpu.memref_squeeze %427 : memref<1x400xf32, #tpu.memory_space<any>> -> memref<400xf32, #tpu.memory_space<any>>
      %c0_i32_288 = arith.constant 0 : i32
      %429 = tpu.memref_slice %arg4[%c0_i32_284, %c0_i32_288] : memref<64x400xf32, #tpu.memory_space<vmem>> -> memref<1x400xf32, #tpu.memory_space<vmem>>
      %430 = tpu.memref_squeeze %429 : memref<1x400xf32, #tpu.memory_space<vmem>> -> memref<400xf32, #tpu.memory_space<vmem>>
      %431 = tpu.memref_slice %arg5[%c0_i32_285, %c2_i32_286] : memref<1x16x!tpu.dma_semaphore, #tpu.memory_space<semaphore_mem>> -> memref<1x1x!tpu.dma_semaphore, #tpu.memory_space<semaphore_mem>>
      %432 = tpu.memref_squeeze %431 : memref<1x1x!tpu.dma_semaphore, #tpu.memory_space<semaphore_mem>> -> memref<!tpu.dma_semaphore, #tpu.memory_space<semaphore_mem>>
      tpu.wait_dma2 semaphore(%432 : memref<!tpu.dma_semaphore, #tpu.memory_space<semaphore_mem>>) src(%428 : memref<400xf32, #tpu.memory_space<any>>) dst(%430 : memref<400xf32, #tpu.memory_space<vmem>>)
      %c34_i32_289 = arith.constant 34 : i32
      %c0_i32_290 = arith.constant 0 : i32
      %c2_i32_291 = arith.constant 2 : i32
      %c0_i32_292 = arith.constant 0 : i32
      %433 = tpu.memref_slice %arg3[%426, %c0_i32_292] : memref<32x400xf32, #tpu.memory_space<any>> -> memref<1x400xf32, #tpu.memory_space<any>>
      %434 = tpu.memref_squeeze %433 : memref<1x400xf32, #tpu.memory_space<any>> -> memref<400xf32, #tpu.memory_space<any>>
      %c0_i32_293 = arith.constant 0 : i32
      %435 = tpu.memref_slice %arg4[%c34_i32_289, %c0_i32_293] : memref<64x400xf32, #tpu.memory_space<vmem>> -> memref<1x400xf32, #tpu.memory_space<vmem>>
      %436 = tpu.memref_squeeze %435 : memref<1x400xf32, #tpu.memory_space<vmem>> -> memref<400xf32, #tpu.memory_space<vmem>>
      %437 = tpu.memref_slice %arg5[%c0_i32_290, %c2_i32_291] : memref<1x16x!tpu.dma_semaphore, #tpu.memory_space<semaphore_mem>> -> memref<1x1x!tpu.dma_semaphore, #tpu.memory_space<semaphore_mem>>
      %438 = tpu.memref_squeeze %437 : memref<1x1x!tpu.dma_semaphore, #tpu.memory_space<semaphore_mem>> -> memref<!tpu.dma_semaphore, #tpu.memory_space<semaphore_mem>>
      tpu.enqueue_dma source(%434 : memref<400xf32, #tpu.memory_space<any>>) target(%436 : memref<400xf32, #tpu.memory_space<vmem>>) target_semaphore(%438 : memref<!tpu.dma_semaphore, #tpu.memory_space<semaphore_mem>>)
      %c35_i32 = arith.constant 35 : i32
      %439 = arith.addi %0, %c35_i32 : i32
      %440 = arith.index_cast %439 : i32 to index
      %441 = memref.load %arg2[%440] : memref<64xi32, #tpu.memory_space<smem>>
      %c0_i32_294 = arith.constant 0 : i32
      %c0_i32_295 = arith.constant 0 : i32
      %c0_i32_296 = arith.constant 0 : i32
      %c3_i32_297 = arith.constant 3 : i32
      %c0_i32_298 = arith.constant 0 : i32
      %442 = tpu.memref_slice %arg3[%c0_i32_294, %c0_i32_298] : memref<32x400xf32, #tpu.memory_space<any>> -> memref<1x400xf32, #tpu.memory_space<any>>
      %443 = tpu.memref_squeeze %442 : memref<1x400xf32, #tpu.memory_space<any>> -> memref<400xf32, #tpu.memory_space<any>>
      %c0_i32_299 = arith.constant 0 : i32
      %444 = tpu.memref_slice %arg4[%c0_i32_295, %c0_i32_299] : memref<64x400xf32, #tpu.memory_space<vmem>> -> memref<1x400xf32, #tpu.memory_space<vmem>>
      %445 = tpu.memref_squeeze %444 : memref<1x400xf32, #tpu.memory_space<vmem>> -> memref<400xf32, #tpu.memory_space<vmem>>
      %446 = tpu.memref_slice %arg5[%c0_i32_296, %c3_i32_297] : memref<1x16x!tpu.dma_semaphore, #tpu.memory_space<semaphore_mem>> -> memref<1x1x!tpu.dma_semaphore, #tpu.memory_space<semaphore_mem>>
      %447 = tpu.memref_squeeze %446 : memref<1x1x!tpu.dma_semaphore, #tpu.memory_space<semaphore_mem>> -> memref<!tpu.dma_semaphore, #tpu.memory_space<semaphore_mem>>
      tpu.wait_dma2 semaphore(%447 : memref<!tpu.dma_semaphore, #tpu.memory_space<semaphore_mem>>) src(%443 : memref<400xf32, #tpu.memory_space<any>>) dst(%445 : memref<400xf32, #tpu.memory_space<vmem>>)
      %c35_i32_300 = arith.constant 35 : i32
      %c0_i32_301 = arith.constant 0 : i32
      %c3_i32_302 = arith.constant 3 : i32
      %c0_i32_303 = arith.constant 0 : i32
      %448 = tpu.memref_slice %arg3[%441, %c0_i32_303] : memref<32x400xf32, #tpu.memory_space<any>> -> memref<1x400xf32, #tpu.memory_space<any>>
      %449 = tpu.memref_squeeze %448 : memref<1x400xf32, #tpu.memory_space<any>> -> memref<400xf32, #tpu.memory_space<any>>
      %c0_i32_304 = arith.constant 0 : i32
      %450 = tpu.memref_slice %arg4[%c35_i32_300, %c0_i32_304] : memref<64x400xf32, #tpu.memory_space<vmem>> -> memref<1x400xf32, #tpu.memory_space<vmem>>
      %451 = tpu.memref_squeeze %450 : memref<1x400xf32, #tpu.memory_space<vmem>> -> memref<400xf32, #tpu.memory_space<vmem>>
      %452 = tpu.memref_slice %arg5[%c0_i32_301, %c3_i32_302] : memref<1x16x!tpu.dma_semaphore, #tpu.memory_space<semaphore_mem>> -> memref<1x1x!tpu.dma_semaphore, #tpu.memory_space<semaphore_mem>>
      %453 = tpu.memref_squeeze %452 : memref<1x1x!tpu.dma_semaphore, #tpu.memory_space<semaphore_mem>> -> memref<!tpu.dma_semaphore, #tpu.memory_space<semaphore_mem>>
      tpu.enqueue_dma source(%449 : memref<400xf32, #tpu.memory_space<any>>) target(%451 : memref<400xf32, #tpu.memory_space<vmem>>) target_semaphore(%453 : memref<!tpu.dma_semaphore, #tpu.memory_space<semaphore_mem>>)
      %c36_i32 = arith.constant 36 : i32
      %454 = arith.addi %0, %c36_i32 : i32
      %455 = arith.index_cast %454 : i32 to index
      %456 = memref.load %arg2[%455] : memref<64xi32, #tpu.memory_space<smem>>
      %c0_i32_305 = arith.constant 0 : i32
      %c0_i32_306 = arith.constant 0 : i32
      %c0_i32_307 = arith.constant 0 : i32
      %c4_i32_308 = arith.constant 4 : i32
      %c0_i32_309 = arith.constant 0 : i32
      %457 = tpu.memref_slice %arg3[%c0_i32_305, %c0_i32_309] : memref<32x400xf32, #tpu.memory_space<any>> -> memref<1x400xf32, #tpu.memory_space<any>>
      %458 = tpu.memref_squeeze %457 : memref<1x400xf32, #tpu.memory_space<any>> -> memref<400xf32, #tpu.memory_space<any>>
      %c0_i32_310 = arith.constant 0 : i32
      %459 = tpu.memref_slice %arg4[%c0_i32_306, %c0_i32_310] : memref<64x400xf32, #tpu.memory_space<vmem>> -> memref<1x400xf32, #tpu.memory_space<vmem>>
      %460 = tpu.memref_squeeze %459 : memref<1x400xf32, #tpu.memory_space<vmem>> -> memref<400xf32, #tpu.memory_space<vmem>>
      %461 = tpu.memref_slice %arg5[%c0_i32_307, %c4_i32_308] : memref<1x16x!tpu.dma_semaphore, #tpu.memory_space<semaphore_mem>> -> memref<1x1x!tpu.dma_semaphore, #tpu.memory_space<semaphore_mem>>
      %462 = tpu.memref_squeeze %461 : memref<1x1x!tpu.dma_semaphore, #tpu.memory_space<semaphore_mem>> -> memref<!tpu.dma_semaphore, #tpu.memory_space<semaphore_mem>>
      tpu.wait_dma2 semaphore(%462 : memref<!tpu.dma_semaphore, #tpu.memory_space<semaphore_mem>>) src(%458 : memref<400xf32, #tpu.memory_space<any>>) dst(%460 : memref<400xf32, #tpu.memory_space<vmem>>)
      %c36_i32_311 = arith.constant 36 : i32
      %c0_i32_312 = arith.constant 0 : i32
      %c4_i32_313 = arith.constant 4 : i32
      %c0_i32_314 = arith.constant 0 : i32
      %463 = tpu.memref_slice %arg3[%456, %c0_i32_314] : memref<32x400xf32, #tpu.memory_space<any>> -> memref<1x400xf32, #tpu.memory_space<any>>
      %464 = tpu.memref_squeeze %463 : memref<1x400xf32, #tpu.memory_space<any>> -> memref<400xf32, #tpu.memory_space<any>>
      %c0_i32_315 = arith.constant 0 : i32
      %465 = tpu.memref_slice %arg4[%c36_i32_311, %c0_i32_315] : memref<64x400xf32, #tpu.memory_space<vmem>> -> memref<1x400xf32, #tpu.memory_space<vmem>>
      %466 = tpu.memref_squeeze %465 : memref<1x400xf32, #tpu.memory_space<vmem>> -> memref<400xf32, #tpu.memory_space<vmem>>
      %467 = tpu.memref_slice %arg5[%c0_i32_312, %c4_i32_313] : memref<1x16x!tpu.dma_semaphore, #tpu.memory_space<semaphore_mem>> -> memref<1x1x!tpu.dma_semaphore, #tpu.memory_space<semaphore_mem>>
      %468 = tpu.memref_squeeze %467 : memref<1x1x!tpu.dma_semaphore, #tpu.memory_space<semaphore_mem>> -> memref<!tpu.dma_semaphore, #tpu.memory_space<semaphore_mem>>
      tpu.enqueue_dma source(%464 : memref<400xf32, #tpu.memory_space<any>>) target(%466 : memref<400xf32, #tpu.memory_space<vmem>>) target_semaphore(%468 : memref<!tpu.dma_semaphore, #tpu.memory_space<semaphore_mem>>)
      %c37_i32 = arith.constant 37 : i32
      %469 = arith.addi %0, %c37_i32 : i32
      %470 = arith.index_cast %469 : i32 to index
      %471 = memref.load %arg2[%470] : memref<64xi32, #tpu.memory_space<smem>>
      %c0_i32_316 = arith.constant 0 : i32
      %c0_i32_317 = arith.constant 0 : i32
      %c0_i32_318 = arith.constant 0 : i32
      %c5_i32_319 = arith.constant 5 : i32
      %c0_i32_320 = arith.constant 0 : i32
      %472 = tpu.memref_slice %arg3[%c0_i32_316, %c0_i32_320] : memref<32x400xf32, #tpu.memory_space<any>> -> memref<1x400xf32, #tpu.memory_space<any>>
      %473 = tpu.memref_squeeze %472 : memref<1x400xf32, #tpu.memory_space<any>> -> memref<400xf32, #tpu.memory_space<any>>
      %c0_i32_321 = arith.constant 0 : i32
      %474 = tpu.memref_slice %arg4[%c0_i32_317, %c0_i32_321] : memref<64x400xf32, #tpu.memory_space<vmem>> -> memref<1x400xf32, #tpu.memory_space<vmem>>
      %475 = tpu.memref_squeeze %474 : memref<1x400xf32, #tpu.memory_space<vmem>> -> memref<400xf32, #tpu.memory_space<vmem>>
      %476 = tpu.memref_slice %arg5[%c0_i32_318, %c5_i32_319] : memref<1x16x!tpu.dma_semaphore, #tpu.memory_space<semaphore_mem>> -> memref<1x1x!tpu.dma_semaphore, #tpu.memory_space<semaphore_mem>>
      %477 = tpu.memref_squeeze %476 : memref<1x1x!tpu.dma_semaphore, #tpu.memory_space<semaphore_mem>> -> memref<!tpu.dma_semaphore, #tpu.memory_space<semaphore_mem>>
      tpu.wait_dma2 semaphore(%477 : memref<!tpu.dma_semaphore, #tpu.memory_space<semaphore_mem>>) src(%473 : memref<400xf32, #tpu.memory_space<any>>) dst(%475 : memref<400xf32, #tpu.memory_space<vmem>>)
      %c37_i32_322 = arith.constant 37 : i32
      %c0_i32_323 = arith.constant 0 : i32
      %c5_i32_324 = arith.constant 5 : i32
      %c0_i32_325 = arith.constant 0 : i32
      %478 = tpu.memref_slice %arg3[%471, %c0_i32_325] : memref<32x400xf32, #tpu.memory_space<any>> -> memref<1x400xf32, #tpu.memory_space<any>>
      %479 = tpu.memref_squeeze %478 : memref<1x400xf32, #tpu.memory_space<any>> -> memref<400xf32, #tpu.memory_space<any>>
      %c0_i32_326 = arith.constant 0 : i32
      %480 = tpu.memref_slice %arg4[%c37_i32_322, %c0_i32_326] : memref<64x400xf32, #tpu.memory_space<vmem>> -> memref<1x400xf32, #tpu.memory_space<vmem>>
      %481 = tpu.memref_squeeze %480 : memref<1x400xf32, #tpu.memory_space<vmem>> -> memref<400xf32, #tpu.memory_space<vmem>>
      %482 = tpu.memref_slice %arg5[%c0_i32_323, %c5_i32_324] : memref<1x16x!tpu.dma_semaphore, #tpu.memory_space<semaphore_mem>> -> memref<1x1x!tpu.dma_semaphore, #tpu.memory_space<semaphore_mem>>
      %483 = tpu.memref_squeeze %482 : memref<1x1x!tpu.dma_semaphore, #tpu.memory_space<semaphore_mem>> -> memref<!tpu.dma_semaphore, #tpu.memory_space<semaphore_mem>>
      tpu.enqueue_dma source(%479 : memref<400xf32, #tpu.memory_space<any>>) target(%481 : memref<400xf32, #tpu.memory_space<vmem>>) target_semaphore(%483 : memref<!tpu.dma_semaphore, #tpu.memory_space<semaphore_mem>>)
      %c38_i32 = arith.constant 38 : i32
      %484 = arith.addi %0, %c38_i32 : i32
      %485 = arith.index_cast %484 : i32 to index
      %486 = memref.load %arg2[%485] : memref<64xi32, #tpu.memory_space<smem>>
      %c0_i32_327 = arith.constant 0 : i32
      %c0_i32_328 = arith.constant 0 : i32
      %c0_i32_329 = arith.constant 0 : i32
      %c6_i32_330 = arith.constant 6 : i32
      %c0_i32_331 = arith.constant 0 : i32
      %487 = tpu.memref_slice %arg3[%c0_i32_327, %c0_i32_331] : memref<32x400xf32, #tpu.memory_space<any>> -> memref<1x400xf32, #tpu.memory_space<any>>
      %488 = tpu.memref_squeeze %487 : memref<1x400xf32, #tpu.memory_space<any>> -> memref<400xf32, #tpu.memory_space<any>>
      %c0_i32_332 = arith.constant 0 : i32
      %489 = tpu.memref_slice %arg4[%c0_i32_328, %c0_i32_332] : memref<64x400xf32, #tpu.memory_space<vmem>> -> memref<1x400xf32, #tpu.memory_space<vmem>>
      %490 = tpu.memref_squeeze %489 : memref<1x400xf32, #tpu.memory_space<vmem>> -> memref<400xf32, #tpu.memory_space<vmem>>
      %491 = tpu.memref_slice %arg5[%c0_i32_329, %c6_i32_330] : memref<1x16x!tpu.dma_semaphore, #tpu.memory_space<semaphore_mem>> -> memref<1x1x!tpu.dma_semaphore, #tpu.memory_space<semaphore_mem>>
      %492 = tpu.memref_squeeze %491 : memref<1x1x!tpu.dma_semaphore, #tpu.memory_space<semaphore_mem>> -> memref<!tpu.dma_semaphore, #tpu.memory_space<semaphore_mem>>
      tpu.wait_dma2 semaphore(%492 : memref<!tpu.dma_semaphore, #tpu.memory_space<semaphore_mem>>) src(%488 : memref<400xf32, #tpu.memory_space<any>>) dst(%490 : memref<400xf32, #tpu.memory_space<vmem>>)
      %c38_i32_333 = arith.constant 38 : i32
      %c0_i32_334 = arith.constant 0 : i32
      %c6_i32_335 = arith.constant 6 : i32
      %c0_i32_336 = arith.constant 0 : i32
      %493 = tpu.memref_slice %arg3[%486, %c0_i32_336] : memref<32x400xf32, #tpu.memory_space<any>> -> memref<1x400xf32, #tpu.memory_space<any>>
      %494 = tpu.memref_squeeze %493 : memref<1x400xf32, #tpu.memory_space<any>> -> memref<400xf32, #tpu.memory_space<any>>
      %c0_i32_337 = arith.constant 0 : i32
      %495 = tpu.memref_slice %arg4[%c38_i32_333, %c0_i32_337] : memref<64x400xf32, #tpu.memory_space<vmem>> -> memref<1x400xf32, #tpu.memory_space<vmem>>
      %496 = tpu.memref_squeeze %495 : memref<1x400xf32, #tpu.memory_space<vmem>> -> memref<400xf32, #tpu.memory_space<vmem>>
      %497 = tpu.memref_slice %arg5[%c0_i32_334, %c6_i32_335] : memref<1x16x!tpu.dma_semaphore, #tpu.memory_space<semaphore_mem>> -> memref<1x1x!tpu.dma_semaphore, #tpu.memory_space<semaphore_mem>>
      %498 = tpu.memref_squeeze %497 : memref<1x1x!tpu.dma_semaphore, #tpu.memory_space<semaphore_mem>> -> memref<!tpu.dma_semaphore, #tpu.memory_space<semaphore_mem>>
      tpu.enqueue_dma source(%494 : memref<400xf32, #tpu.memory_space<any>>) target(%496 : memref<400xf32, #tpu.memory_space<vmem>>) target_semaphore(%498 : memref<!tpu.dma_semaphore, #tpu.memory_space<semaphore_mem>>)
      %c39_i32 = arith.constant 39 : i32
      %499 = arith.addi %0, %c39_i32 : i32
      %500 = arith.index_cast %499 : i32 to index
      %501 = memref.load %arg2[%500] : memref<64xi32, #tpu.memory_space<smem>>
      %c0_i32_338 = arith.constant 0 : i32
      %c0_i32_339 = arith.constant 0 : i32
      %c0_i32_340 = arith.constant 0 : i32
      %c7_i32_341 = arith.constant 7 : i32
      %c0_i32_342 = arith.constant 0 : i32
      %502 = tpu.memref_slice %arg3[%c0_i32_338, %c0_i32_342] : memref<32x400xf32, #tpu.memory_space<any>> -> memref<1x400xf32, #tpu.memory_space<any>>
      %503 = tpu.memref_squeeze %502 : memref<1x400xf32, #tpu.memory_space<any>> -> memref<400xf32, #tpu.memory_space<any>>
      %c0_i32_343 = arith.constant 0 : i32
      %504 = tpu.memref_slice %arg4[%c0_i32_339, %c0_i32_343] : memref<64x400xf32, #tpu.memory_space<vmem>> -> memref<1x400xf32, #tpu.memory_space<vmem>>
      %505 = tpu.memref_squeeze %504 : memref<1x400xf32, #tpu.memory_space<vmem>> -> memref<400xf32, #tpu.memory_space<vmem>>
      %506 = tpu.memref_slice %arg5[%c0_i32_340, %c7_i32_341] : memref<1x16x!tpu.dma_semaphore, #tpu.memory_space<semaphore_mem>> -> memref<1x1x!tpu.dma_semaphore, #tpu.memory_space<semaphore_mem>>
      %507 = tpu.memref_squeeze %506 : memref<1x1x!tpu.dma_semaphore, #tpu.memory_space<semaphore_mem>> -> memref<!tpu.dma_semaphore, #tpu.memory_space<semaphore_mem>>
      tpu.wait_dma2 semaphore(%507 : memref<!tpu.dma_semaphore, #tpu.memory_space<semaphore_mem>>) src(%503 : memref<400xf32, #tpu.memory_space<any>>) dst(%505 : memref<400xf32, #tpu.memory_space<vmem>>)
      %c39_i32_344 = arith.constant 39 : i32
      %c0_i32_345 = arith.constant 0 : i32
      %c7_i32_346 = arith.constant 7 : i32
      %c0_i32_347 = arith.constant 0 : i32
      %508 = tpu.memref_slice %arg3[%501, %c0_i32_347] : memref<32x400xf32, #tpu.memory_space<any>> -> memref<1x400xf32, #tpu.memory_space<any>>
      %509 = tpu.memref_squeeze %508 : memref<1x400xf32, #tpu.memory_space<any>> -> memref<400xf32, #tpu.memory_space<any>>
      %c0_i32_348 = arith.constant 0 : i32
      %510 = tpu.memref_slice %arg4[%c39_i32_344, %c0_i32_348] : memref<64x400xf32, #tpu.memory_space<vmem>> -> memref<1x400xf32, #tpu.memory_space<vmem>>
      %511 = tpu.memref_squeeze %510 : memref<1x400xf32, #tpu.memory_space<vmem>> -> memref<400xf32, #tpu.memory_space<vmem>>
      %512 = tpu.memref_slice %arg5[%c0_i32_345, %c7_i32_346] : memref<1x16x!tpu.dma_semaphore, #tpu.memory_space<semaphore_mem>> -> memref<1x1x!tpu.dma_semaphore, #tpu.memory_space<semaphore_mem>>
      %513 = tpu.memref_squeeze %512 : memref<1x1x!tpu.dma_semaphore, #tpu.memory_space<semaphore_mem>> -> memref<!tpu.dma_semaphore, #tpu.memory_space<semaphore_mem>>
      tpu.enqueue_dma source(%509 : memref<400xf32, #tpu.memory_space<any>>) target(%511 : memref<400xf32, #tpu.memory_space<vmem>>) target_semaphore(%513 : memref<!tpu.dma_semaphore, #tpu.memory_space<semaphore_mem>>)
      %c40_i32 = arith.constant 40 : i32
      %514 = arith.addi %0, %c40_i32 : i32
      %515 = arith.index_cast %514 : i32 to index
      %516 = memref.load %arg2[%515] : memref<64xi32, #tpu.memory_space<smem>>
      %c0_i32_349 = arith.constant 0 : i32
      %c0_i32_350 = arith.constant 0 : i32
      %c0_i32_351 = arith.constant 0 : i32
      %c8_i32_352 = arith.constant 8 : i32
      %c0_i32_353 = arith.constant 0 : i32
      %517 = tpu.memref_slice %arg3[%c0_i32_349, %c0_i32_353] : memref<32x400xf32, #tpu.memory_space<any>> -> memref<1x400xf32, #tpu.memory_space<any>>
      %518 = tpu.memref_squeeze %517 : memref<1x400xf32, #tpu.memory_space<any>> -> memref<400xf32, #tpu.memory_space<any>>
      %c0_i32_354 = arith.constant 0 : i32
      %519 = tpu.memref_slice %arg4[%c0_i32_350, %c0_i32_354] : memref<64x400xf32, #tpu.memory_space<vmem>> -> memref<1x400xf32, #tpu.memory_space<vmem>>
      %520 = tpu.memref_squeeze %519 : memref<1x400xf32, #tpu.memory_space<vmem>> -> memref<400xf32, #tpu.memory_space<vmem>>
      %521 = tpu.memref_slice %arg5[%c0_i32_351, %c8_i32_352] : memref<1x16x!tpu.dma_semaphore, #tpu.memory_space<semaphore_mem>> -> memref<1x1x!tpu.dma_semaphore, #tpu.memory_space<semaphore_mem>>
      %522 = tpu.memref_squeeze %521 : memref<1x1x!tpu.dma_semaphore, #tpu.memory_space<semaphore_mem>> -> memref<!tpu.dma_semaphore, #tpu.memory_space<semaphore_mem>>
      tpu.wait_dma2 semaphore(%522 : memref<!tpu.dma_semaphore, #tpu.memory_space<semaphore_mem>>) src(%518 : memref<400xf32, #tpu.memory_space<any>>) dst(%520 : memref<400xf32, #tpu.memory_space<vmem>>)
      %c40_i32_355 = arith.constant 40 : i32
      %c0_i32_356 = arith.constant 0 : i32
      %c8_i32_357 = arith.constant 8 : i32
      %c0_i32_358 = arith.constant 0 : i32
      %523 = tpu.memref_slice %arg3[%516, %c0_i32_358] : memref<32x400xf32, #tpu.memory_space<any>> -> memref<1x400xf32, #tpu.memory_space<any>>
      %524 = tpu.memref_squeeze %523 : memref<1x400xf32, #tpu.memory_space<any>> -> memref<400xf32, #tpu.memory_space<any>>
      %c0_i32_359 = arith.constant 0 : i32
      %525 = tpu.memref_slice %arg4[%c40_i32_355, %c0_i32_359] : memref<64x400xf32, #tpu.memory_space<vmem>> -> memref<1x400xf32, #tpu.memory_space<vmem>>
      %526 = tpu.memref_squeeze %525 : memref<1x400xf32, #tpu.memory_space<vmem>> -> memref<400xf32, #tpu.memory_space<vmem>>
      %527 = tpu.memref_slice %arg5[%c0_i32_356, %c8_i32_357] : memref<1x16x!tpu.dma_semaphore, #tpu.memory_space<semaphore_mem>> -> memref<1x1x!tpu.dma_semaphore, #tpu.memory_space<semaphore_mem>>
      %528 = tpu.memref_squeeze %527 : memref<1x1x!tpu.dma_semaphore, #tpu.memory_space<semaphore_mem>> -> memref<!tpu.dma_semaphore, #tpu.memory_space<semaphore_mem>>
      tpu.enqueue_dma source(%524 : memref<400xf32, #tpu.memory_space<any>>) target(%526 : memref<400xf32, #tpu.memory_space<vmem>>) target_semaphore(%528 : memref<!tpu.dma_semaphore, #tpu.memory_space<semaphore_mem>>)
      %c41_i32 = arith.constant 41 : i32
      %529 = arith.addi %0, %c41_i32 : i32
      %530 = arith.index_cast %529 : i32 to index
      %531 = memref.load %arg2[%530] : memref<64xi32, #tpu.memory_space<smem>>
      %c0_i32_360 = arith.constant 0 : i32
      %c0_i32_361 = arith.constant 0 : i32
      %c0_i32_362 = arith.constant 0 : i32
      %c9_i32_363 = arith.constant 9 : i32
      %c0_i32_364 = arith.constant 0 : i32
      %532 = tpu.memref_slice %arg3[%c0_i32_360, %c0_i32_364] : memref<32x400xf32, #tpu.memory_space<any>> -> memref<1x400xf32, #tpu.memory_space<any>>
      %533 = tpu.memref_squeeze %532 : memref<1x400xf32, #tpu.memory_space<any>> -> memref<400xf32, #tpu.memory_space<any>>
      %c0_i32_365 = arith.constant 0 : i32
      %534 = tpu.memref_slice %arg4[%c0_i32_361, %c0_i32_365] : memref<64x400xf32, #tpu.memory_space<vmem>> -> memref<1x400xf32, #tpu.memory_space<vmem>>
      %535 = tpu.memref_squeeze %534 : memref<1x400xf32, #tpu.memory_space<vmem>> -> memref<400xf32, #tpu.memory_space<vmem>>
      %536 = tpu.memref_slice %arg5[%c0_i32_362, %c9_i32_363] : memref<1x16x!tpu.dma_semaphore, #tpu.memory_space<semaphore_mem>> -> memref<1x1x!tpu.dma_semaphore, #tpu.memory_space<semaphore_mem>>
      %537 = tpu.memref_squeeze %536 : memref<1x1x!tpu.dma_semaphore, #tpu.memory_space<semaphore_mem>> -> memref<!tpu.dma_semaphore, #tpu.memory_space<semaphore_mem>>
      tpu.wait_dma2 semaphore(%537 : memref<!tpu.dma_semaphore, #tpu.memory_space<semaphore_mem>>) src(%533 : memref<400xf32, #tpu.memory_space<any>>) dst(%535 : memref<400xf32, #tpu.memory_space<vmem>>)
      %c41_i32_366 = arith.constant 41 : i32
      %c0_i32_367 = arith.constant 0 : i32
      %c9_i32_368 = arith.constant 9 : i32
      %c0_i32_369 = arith.constant 0 : i32
      %538 = tpu.memref_slice %arg3[%531, %c0_i32_369] : memref<32x400xf32, #tpu.memory_space<any>> -> memref<1x400xf32, #tpu.memory_space<any>>
      %539 = tpu.memref_squeeze %538 : memref<1x400xf32, #tpu.memory_space<any>> -> memref<400xf32, #tpu.memory_space<any>>
      %c0_i32_370 = arith.constant 0 : i32
      %540 = tpu.memref_slice %arg4[%c41_i32_366, %c0_i32_370] : memref<64x400xf32, #tpu.memory_space<vmem>> -> memref<1x400xf32, #tpu.memory_space<vmem>>
      %541 = tpu.memref_squeeze %540 : memref<1x400xf32, #tpu.memory_space<vmem>> -> memref<400xf32, #tpu.memory_space<vmem>>
      %542 = tpu.memref_slice %arg5[%c0_i32_367, %c9_i32_368] : memref<1x16x!tpu.dma_semaphore, #tpu.memory_space<semaphore_mem>> -> memref<1x1x!tpu.dma_semaphore, #tpu.memory_space<semaphore_mem>>
      %543 = tpu.memref_squeeze %542 : memref<1x1x!tpu.dma_semaphore, #tpu.memory_space<semaphore_mem>> -> memref<!tpu.dma_semaphore, #tpu.memory_space<semaphore_mem>>
      tpu.enqueue_dma source(%539 : memref<400xf32, #tpu.memory_space<any>>) target(%541 : memref<400xf32, #tpu.memory_space<vmem>>) target_semaphore(%543 : memref<!tpu.dma_semaphore, #tpu.memory_space<semaphore_mem>>)
      %c42_i32 = arith.constant 42 : i32
      %544 = arith.addi %0, %c42_i32 : i32
      %545 = arith.index_cast %544 : i32 to index
      %546 = memref.load %arg2[%545] : memref<64xi32, #tpu.memory_space<smem>>
      %c0_i32_371 = arith.constant 0 : i32
      %c0_i32_372 = arith.constant 0 : i32
      %c0_i32_373 = arith.constant 0 : i32
      %c10_i32_374 = arith.constant 10 : i32
      %c0_i32_375 = arith.constant 0 : i32
      %547 = tpu.memref_slice %arg3[%c0_i32_371, %c0_i32_375] : memref<32x400xf32, #tpu.memory_space<any>> -> memref<1x400xf32, #tpu.memory_space<any>>
      %548 = tpu.memref_squeeze %547 : memref<1x400xf32, #tpu.memory_space<any>> -> memref<400xf32, #tpu.memory_space<any>>
      %c0_i32_376 = arith.constant 0 : i32
      %549 = tpu.memref_slice %arg4[%c0_i32_372, %c0_i32_376] : memref<64x400xf32, #tpu.memory_space<vmem>> -> memref<1x400xf32, #tpu.memory_space<vmem>>
      %550 = tpu.memref_squeeze %549 : memref<1x400xf32, #tpu.memory_space<vmem>> -> memref<400xf32, #tpu.memory_space<vmem>>
      %551 = tpu.memref_slice %arg5[%c0_i32_373, %c10_i32_374] : memref<1x16x!tpu.dma_semaphore, #tpu.memory_space<semaphore_mem>> -> memref<1x1x!tpu.dma_semaphore, #tpu.memory_space<semaphore_mem>>
      %552 = tpu.memref_squeeze %551 : memref<1x1x!tpu.dma_semaphore, #tpu.memory_space<semaphore_mem>> -> memref<!tpu.dma_semaphore, #tpu.memory_space<semaphore_mem>>
      tpu.wait_dma2 semaphore(%552 : memref<!tpu.dma_semaphore, #tpu.memory_space<semaphore_mem>>) src(%548 : memref<400xf32, #tpu.memory_space<any>>) dst(%550 : memref<400xf32, #tpu.memory_space<vmem>>)
      %c42_i32_377 = arith.constant 42 : i32
      %c0_i32_378 = arith.constant 0 : i32
      %c10_i32_379 = arith.constant 10 : i32
      %c0_i32_380 = arith.constant 0 : i32
      %553 = tpu.memref_slice %arg3[%546, %c0_i32_380] : memref<32x400xf32, #tpu.memory_space<any>> -> memref<1x400xf32, #tpu.memory_space<any>>
      %554 = tpu.memref_squeeze %553 : memref<1x400xf32, #tpu.memory_space<any>> -> memref<400xf32, #tpu.memory_space<any>>
      %c0_i32_381 = arith.constant 0 : i32
      %555 = tpu.memref_slice %arg4[%c42_i32_377, %c0_i32_381] : memref<64x400xf32, #tpu.memory_space<vmem>> -> memref<1x400xf32, #tpu.memory_space<vmem>>
      %556 = tpu.memref_squeeze %555 : memref<1x400xf32, #tpu.memory_space<vmem>> -> memref<400xf32, #tpu.memory_space<vmem>>
      %557 = tpu.memref_slice %arg5[%c0_i32_378, %c10_i32_379] : memref<1x16x!tpu.dma_semaphore, #tpu.memory_space<semaphore_mem>> -> memref<1x1x!tpu.dma_semaphore, #tpu.memory_space<semaphore_mem>>
      %558 = tpu.memref_squeeze %557 : memref<1x1x!tpu.dma_semaphore, #tpu.memory_space<semaphore_mem>> -> memref<!tpu.dma_semaphore, #tpu.memory_space<semaphore_mem>>
      tpu.enqueue_dma source(%554 : memref<400xf32, #tpu.memory_space<any>>) target(%556 : memref<400xf32, #tpu.memory_space<vmem>>) target_semaphore(%558 : memref<!tpu.dma_semaphore, #tpu.memory_space<semaphore_mem>>)
      %c43_i32 = arith.constant 43 : i32
      %559 = arith.addi %0, %c43_i32 : i32
      %560 = arith.index_cast %559 : i32 to index
      %561 = memref.load %arg2[%560] : memref<64xi32, #tpu.memory_space<smem>>
      %c0_i32_382 = arith.constant 0 : i32
      %c0_i32_383 = arith.constant 0 : i32
      %c0_i32_384 = arith.constant 0 : i32
      %c11_i32_385 = arith.constant 11 : i32
      %c0_i32_386 = arith.constant 0 : i32
      %562 = tpu.memref_slice %arg3[%c0_i32_382, %c0_i32_386] : memref<32x400xf32, #tpu.memory_space<any>> -> memref<1x400xf32, #tpu.memory_space<any>>
      %563 = tpu.memref_squeeze %562 : memref<1x400xf32, #tpu.memory_space<any>> -> memref<400xf32, #tpu.memory_space<any>>
      %c0_i32_387 = arith.constant 0 : i32
      %564 = tpu.memref_slice %arg4[%c0_i32_383, %c0_i32_387] : memref<64x400xf32, #tpu.memory_space<vmem>> -> memref<1x400xf32, #tpu.memory_space<vmem>>
      %565 = tpu.memref_squeeze %564 : memref<1x400xf32, #tpu.memory_space<vmem>> -> memref<400xf32, #tpu.memory_space<vmem>>
      %566 = tpu.memref_slice %arg5[%c0_i32_384, %c11_i32_385] : memref<1x16x!tpu.dma_semaphore, #tpu.memory_space<semaphore_mem>> -> memref<1x1x!tpu.dma_semaphore, #tpu.memory_space<semaphore_mem>>
      %567 = tpu.memref_squeeze %566 : memref<1x1x!tpu.dma_semaphore, #tpu.memory_space<semaphore_mem>> -> memref<!tpu.dma_semaphore, #tpu.memory_space<semaphore_mem>>
      tpu.wait_dma2 semaphore(%567 : memref<!tpu.dma_semaphore, #tpu.memory_space<semaphore_mem>>) src(%563 : memref<400xf32, #tpu.memory_space<any>>) dst(%565 : memref<400xf32, #tpu.memory_space<vmem>>)
      %c43_i32_388 = arith.constant 43 : i32
      %c0_i32_389 = arith.constant 0 : i32
      %c11_i32_390 = arith.constant 11 : i32
      %c0_i32_391 = arith.constant 0 : i32
      %568 = tpu.memref_slice %arg3[%561, %c0_i32_391] : memref<32x400xf32, #tpu.memory_space<any>> -> memref<1x400xf32, #tpu.memory_space<any>>
      %569 = tpu.memref_squeeze %568 : memref<1x400xf32, #tpu.memory_space<any>> -> memref<400xf32, #tpu.memory_space<any>>
      %c0_i32_392 = arith.constant 0 : i32
      %570 = tpu.memref_slice %arg4[%c43_i32_388, %c0_i32_392] : memref<64x400xf32, #tpu.memory_space<vmem>> -> memref<1x400xf32, #tpu.memory_space<vmem>>
      %571 = tpu.memref_squeeze %570 : memref<1x400xf32, #tpu.memory_space<vmem>> -> memref<400xf32, #tpu.memory_space<vmem>>
      %572 = tpu.memref_slice %arg5[%c0_i32_389, %c11_i32_390] : memref<1x16x!tpu.dma_semaphore, #tpu.memory_space<semaphore_mem>> -> memref<1x1x!tpu.dma_semaphore, #tpu.memory_space<semaphore_mem>>
      %573 = tpu.memref_squeeze %572 : memref<1x1x!tpu.dma_semaphore, #tpu.memory_space<semaphore_mem>> -> memref<!tpu.dma_semaphore, #tpu.memory_space<semaphore_mem>>
      tpu.enqueue_dma source(%569 : memref<400xf32, #tpu.memory_space<any>>) target(%571 : memref<400xf32, #tpu.memory_space<vmem>>) target_semaphore(%573 : memref<!tpu.dma_semaphore, #tpu.memory_space<semaphore_mem>>)
      %c44_i32 = arith.constant 44 : i32
      %574 = arith.addi %0, %c44_i32 : i32
      %575 = arith.index_cast %574 : i32 to index
      %576 = memref.load %arg2[%575] : memref<64xi32, #tpu.memory_space<smem>>
      %c0_i32_393 = arith.constant 0 : i32
      %c0_i32_394 = arith.constant 0 : i32
      %c0_i32_395 = arith.constant 0 : i32
      %c12_i32_396 = arith.constant 12 : i32
      %c0_i32_397 = arith.constant 0 : i32
      %577 = tpu.memref_slice %arg3[%c0_i32_393, %c0_i32_397] : memref<32x400xf32, #tpu.memory_space<any>> -> memref<1x400xf32, #tpu.memory_space<any>>
      %578 = tpu.memref_squeeze %577 : memref<1x400xf32, #tpu.memory_space<any>> -> memref<400xf32, #tpu.memory_space<any>>
      %c0_i32_398 = arith.constant 0 : i32
      %579 = tpu.memref_slice %arg4[%c0_i32_394, %c0_i32_398] : memref<64x400xf32, #tpu.memory_space<vmem>> -> memref<1x400xf32, #tpu.memory_space<vmem>>
      %580 = tpu.memref_squeeze %579 : memref<1x400xf32, #tpu.memory_space<vmem>> -> memref<400xf32, #tpu.memory_space<vmem>>
      %581 = tpu.memref_slice %arg5[%c0_i32_395, %c12_i32_396] : memref<1x16x!tpu.dma_semaphore, #tpu.memory_space<semaphore_mem>> -> memref<1x1x!tpu.dma_semaphore, #tpu.memory_space<semaphore_mem>>
      %582 = tpu.memref_squeeze %581 : memref<1x1x!tpu.dma_semaphore, #tpu.memory_space<semaphore_mem>> -> memref<!tpu.dma_semaphore, #tpu.memory_space<semaphore_mem>>
      tpu.wait_dma2 semaphore(%582 : memref<!tpu.dma_semaphore, #tpu.memory_space<semaphore_mem>>) src(%578 : memref<400xf32, #tpu.memory_space<any>>) dst(%580 : memref<400xf32, #tpu.memory_space<vmem>>)
      %c44_i32_399 = arith.constant 44 : i32
      %c0_i32_400 = arith.constant 0 : i32
      %c12_i32_401 = arith.constant 12 : i32
      %c0_i32_402 = arith.constant 0 : i32
      %583 = tpu.memref_slice %arg3[%576, %c0_i32_402] : memref<32x400xf32, #tpu.memory_space<any>> -> memref<1x400xf32, #tpu.memory_space<any>>
      %584 = tpu.memref_squeeze %583 : memref<1x400xf32, #tpu.memory_space<any>> -> memref<400xf32, #tpu.memory_space<any>>
      %c0_i32_403 = arith.constant 0 : i32
      %585 = tpu.memref_slice %arg4[%c44_i32_399, %c0_i32_403] : memref<64x400xf32, #tpu.memory_space<vmem>> -> memref<1x400xf32, #tpu.memory_space<vmem>>
      %586 = tpu.memref_squeeze %585 : memref<1x400xf32, #tpu.memory_space<vmem>> -> memref<400xf32, #tpu.memory_space<vmem>>
      %587 = tpu.memref_slice %arg5[%c0_i32_400, %c12_i32_401] : memref<1x16x!tpu.dma_semaphore, #tpu.memory_space<semaphore_mem>> -> memref<1x1x!tpu.dma_semaphore, #tpu.memory_space<semaphore_mem>>
      %588 = tpu.memref_squeeze %587 : memref<1x1x!tpu.dma_semaphore, #tpu.memory_space<semaphore_mem>> -> memref<!tpu.dma_semaphore, #tpu.memory_space<semaphore_mem>>
      tpu.enqueue_dma source(%584 : memref<400xf32, #tpu.memory_space<any>>) target(%586 : memref<400xf32, #tpu.memory_space<vmem>>) target_semaphore(%588 : memref<!tpu.dma_semaphore, #tpu.memory_space<semaphore_mem>>)
      %c45_i32 = arith.constant 45 : i32
      %589 = arith.addi %0, %c45_i32 : i32
      %590 = arith.index_cast %589 : i32 to index
      %591 = memref.load %arg2[%590] : memref<64xi32, #tpu.memory_space<smem>>
      %c0_i32_404 = arith.constant 0 : i32
      %c0_i32_405 = arith.constant 0 : i32
      %c0_i32_406 = arith.constant 0 : i32
      %c13_i32_407 = arith.constant 13 : i32
      %c0_i32_408 = arith.constant 0 : i32
      %592 = tpu.memref_slice %arg3[%c0_i32_404, %c0_i32_408] : memref<32x400xf32, #tpu.memory_space<any>> -> memref<1x400xf32, #tpu.memory_space<any>>
      %593 = tpu.memref_squeeze %592 : memref<1x400xf32, #tpu.memory_space<any>> -> memref<400xf32, #tpu.memory_space<any>>
      %c0_i32_409 = arith.constant 0 : i32
      %594 = tpu.memref_slice %arg4[%c0_i32_405, %c0_i32_409] : memref<64x400xf32, #tpu.memory_space<vmem>> -> memref<1x400xf32, #tpu.memory_space<vmem>>
      %595 = tpu.memref_squeeze %594 : memref<1x400xf32, #tpu.memory_space<vmem>> -> memref<400xf32, #tpu.memory_space<vmem>>
      %596 = tpu.memref_slice %arg5[%c0_i32_406, %c13_i32_407] : memref<1x16x!tpu.dma_semaphore, #tpu.memory_space<semaphore_mem>> -> memref<1x1x!tpu.dma_semaphore, #tpu.memory_space<semaphore_mem>>
      %597 = tpu.memref_squeeze %596 : memref<1x1x!tpu.dma_semaphore, #tpu.memory_space<semaphore_mem>> -> memref<!tpu.dma_semaphore, #tpu.memory_space<semaphore_mem>>
      tpu.wait_dma2 semaphore(%597 : memref<!tpu.dma_semaphore, #tpu.memory_space<semaphore_mem>>) src(%593 : memref<400xf32, #tpu.memory_space<any>>) dst(%595 : memref<400xf32, #tpu.memory_space<vmem>>)
      %c45_i32_410 = arith.constant 45 : i32
      %c0_i32_411 = arith.constant 0 : i32
      %c13_i32_412 = arith.constant 13 : i32
      %c0_i32_413 = arith.constant 0 : i32
      %598 = tpu.memref_slice %arg3[%591, %c0_i32_413] : memref<32x400xf32, #tpu.memory_space<any>> -> memref<1x400xf32, #tpu.memory_space<any>>
      %599 = tpu.memref_squeeze %598 : memref<1x400xf32, #tpu.memory_space<any>> -> memref<400xf32, #tpu.memory_space<any>>
      %c0_i32_414 = arith.constant 0 : i32
      %600 = tpu.memref_slice %arg4[%c45_i32_410, %c0_i32_414] : memref<64x400xf32, #tpu.memory_space<vmem>> -> memref<1x400xf32, #tpu.memory_space<vmem>>
      %601 = tpu.memref_squeeze %600 : memref<1x400xf32, #tpu.memory_space<vmem>> -> memref<400xf32, #tpu.memory_space<vmem>>
      %602 = tpu.memref_slice %arg5[%c0_i32_411, %c13_i32_412] : memref<1x16x!tpu.dma_semaphore, #tpu.memory_space<semaphore_mem>> -> memref<1x1x!tpu.dma_semaphore, #tpu.memory_space<semaphore_mem>>
      %603 = tpu.memref_squeeze %602 : memref<1x1x!tpu.dma_semaphore, #tpu.memory_space<semaphore_mem>> -> memref<!tpu.dma_semaphore, #tpu.memory_space<semaphore_mem>>
      tpu.enqueue_dma source(%599 : memref<400xf32, #tpu.memory_space<any>>) target(%601 : memref<400xf32, #tpu.memory_space<vmem>>) target_semaphore(%603 : memref<!tpu.dma_semaphore, #tpu.memory_space<semaphore_mem>>)
      %c46_i32 = arith.constant 46 : i32
      %604 = arith.addi %0, %c46_i32 : i32
      %605 = arith.index_cast %604 : i32 to index
      %606 = memref.load %arg2[%605] : memref<64xi32, #tpu.memory_space<smem>>
      %c0_i32_415 = arith.constant 0 : i32
      %c0_i32_416 = arith.constant 0 : i32
      %c0_i32_417 = arith.constant 0 : i32
      %c14_i32_418 = arith.constant 14 : i32
      %c0_i32_419 = arith.constant 0 : i32
      %607 = tpu.memref_slice %arg3[%c0_i32_415, %c0_i32_419] : memref<32x400xf32, #tpu.memory_space<any>> -> memref<1x400xf32, #tpu.memory_space<any>>
      %608 = tpu.memref_squeeze %607 : memref<1x400xf32, #tpu.memory_space<any>> -> memref<400xf32, #tpu.memory_space<any>>
      %c0_i32_420 = arith.constant 0 : i32
      %609 = tpu.memref_slice %arg4[%c0_i32_416, %c0_i32_420] : memref<64x400xf32, #tpu.memory_space<vmem>> -> memref<1x400xf32, #tpu.memory_space<vmem>>
      %610 = tpu.memref_squeeze %609 : memref<1x400xf32, #tpu.memory_space<vmem>> -> memref<400xf32, #tpu.memory_space<vmem>>
      %611 = tpu.memref_slice %arg5[%c0_i32_417, %c14_i32_418] : memref<1x16x!tpu.dma_semaphore, #tpu.memory_space<semaphore_mem>> -> memref<1x1x!tpu.dma_semaphore, #tpu.memory_space<semaphore_mem>>
      %612 = tpu.memref_squeeze %611 : memref<1x1x!tpu.dma_semaphore, #tpu.memory_space<semaphore_mem>> -> memref<!tpu.dma_semaphore, #tpu.memory_space<semaphore_mem>>
      tpu.wait_dma2 semaphore(%612 : memref<!tpu.dma_semaphore, #tpu.memory_space<semaphore_mem>>) src(%608 : memref<400xf32, #tpu.memory_space<any>>) dst(%610 : memref<400xf32, #tpu.memory_space<vmem>>)
      %c46_i32_421 = arith.constant 46 : i32
      %c0_i32_422 = arith.constant 0 : i32
      %c14_i32_423 = arith.constant 14 : i32
      %c0_i32_424 = arith.constant 0 : i32
      %613 = tpu.memref_slice %arg3[%606, %c0_i32_424] : memref<32x400xf32, #tpu.memory_space<any>> -> memref<1x400xf32, #tpu.memory_space<any>>
      %614 = tpu.memref_squeeze %613 : memref<1x400xf32, #tpu.memory_space<any>> -> memref<400xf32, #tpu.memory_space<any>>
      %c0_i32_425 = arith.constant 0 : i32
      %615 = tpu.memref_slice %arg4[%c46_i32_421, %c0_i32_425] : memref<64x400xf32, #tpu.memory_space<vmem>> -> memref<1x400xf32, #tpu.memory_space<vmem>>
      %616 = tpu.memref_squeeze %615 : memref<1x400xf32, #tpu.memory_space<vmem>> -> memref<400xf32, #tpu.memory_space<vmem>>
      %617 = tpu.memref_slice %arg5[%c0_i32_422, %c14_i32_423] : memref<1x16x!tpu.dma_semaphore, #tpu.memory_space<semaphore_mem>> -> memref<1x1x!tpu.dma_semaphore, #tpu.memory_space<semaphore_mem>>
      %618 = tpu.memref_squeeze %617 : memref<1x1x!tpu.dma_semaphore, #tpu.memory_space<semaphore_mem>> -> memref<!tpu.dma_semaphore, #tpu.memory_space<semaphore_mem>>
      tpu.enqueue_dma source(%614 : memref<400xf32, #tpu.memory_space<any>>) target(%616 : memref<400xf32, #tpu.memory_space<vmem>>) target_semaphore(%618 : memref<!tpu.dma_semaphore, #tpu.memory_space<semaphore_mem>>)
      %c47_i32 = arith.constant 47 : i32
      %619 = arith.addi %0, %c47_i32 : i32
      %620 = arith.index_cast %619 : i32 to index
      %621 = memref.load %arg2[%620] : memref<64xi32, #tpu.memory_space<smem>>
      %c0_i32_426 = arith.constant 0 : i32
      %c0_i32_427 = arith.constant 0 : i32
      %c0_i32_428 = arith.constant 0 : i32
      %c15_i32_429 = arith.constant 15 : i32
      %c0_i32_430 = arith.constant 0 : i32
      %622 = tpu.memref_slice %arg3[%c0_i32_426, %c0_i32_430] : memref<32x400xf32, #tpu.memory_space<any>> -> memref<1x400xf32, #tpu.memory_space<any>>
      %623 = tpu.memref_squeeze %622 : memref<1x400xf32, #tpu.memory_space<any>> -> memref<400xf32, #tpu.memory_space<any>>
      %c0_i32_431 = arith.constant 0 : i32
      %624 = tpu.memref_slice %arg4[%c0_i32_427, %c0_i32_431] : memref<64x400xf32, #tpu.memory_space<vmem>> -> memref<1x400xf32, #tpu.memory_space<vmem>>
      %625 = tpu.memref_squeeze %624 : memref<1x400xf32, #tpu.memory_space<vmem>> -> memref<400xf32, #tpu.memory_space<vmem>>
      %626 = tpu.memref_slice %arg5[%c0_i32_428, %c15_i32_429] : memref<1x16x!tpu.dma_semaphore, #tpu.memory_space<semaphore_mem>> -> memref<1x1x!tpu.dma_semaphore, #tpu.memory_space<semaphore_mem>>
      %627 = tpu.memref_squeeze %626 : memref<1x1x!tpu.dma_semaphore, #tpu.memory_space<semaphore_mem>> -> memref<!tpu.dma_semaphore, #tpu.memory_space<semaphore_mem>>
      tpu.wait_dma2 semaphore(%627 : memref<!tpu.dma_semaphore, #tpu.memory_space<semaphore_mem>>) src(%623 : memref<400xf32, #tpu.memory_space<any>>) dst(%625 : memref<400xf32, #tpu.memory_space<vmem>>)
      %c47_i32_432 = arith.constant 47 : i32
      %c0_i32_433 = arith.constant 0 : i32
      %c15_i32_434 = arith.constant 15 : i32
      %c0_i32_435 = arith.constant 0 : i32
      %628 = tpu.memref_slice %arg3[%621, %c0_i32_435] : memref<32x400xf32, #tpu.memory_space<any>> -> memref<1x400xf32, #tpu.memory_space<any>>
      %629 = tpu.memref_squeeze %628 : memref<1x400xf32, #tpu.memory_space<any>> -> memref<400xf32, #tpu.memory_space<any>>
      %c0_i32_436 = arith.constant 0 : i32
      %630 = tpu.memref_slice %arg4[%c47_i32_432, %c0_i32_436] : memref<64x400xf32, #tpu.memory_space<vmem>> -> memref<1x400xf32, #tpu.memory_space<vmem>>
      %631 = tpu.memref_squeeze %630 : memref<1x400xf32, #tpu.memory_space<vmem>> -> memref<400xf32, #tpu.memory_space<vmem>>
      %632 = tpu.memref_slice %arg5[%c0_i32_433, %c15_i32_434] : memref<1x16x!tpu.dma_semaphore, #tpu.memory_space<semaphore_mem>> -> memref<1x1x!tpu.dma_semaphore, #tpu.memory_space<semaphore_mem>>
      %633 = tpu.memref_squeeze %632 : memref<1x1x!tpu.dma_semaphore, #tpu.memory_space<semaphore_mem>> -> memref<!tpu.dma_semaphore, #tpu.memory_space<semaphore_mem>>
      tpu.enqueue_dma source(%629 : memref<400xf32, #tpu.memory_space<any>>) target(%631 : memref<400xf32, #tpu.memory_space<vmem>>) target_semaphore(%633 : memref<!tpu.dma_semaphore, #tpu.memory_space<semaphore_mem>>)
      %c48_i32 = arith.constant 48 : i32
      %634 = arith.addi %0, %c48_i32 : i32
      %635 = arith.index_cast %634 : i32 to index
      %636 = memref.load %arg2[%635] : memref<64xi32, #tpu.memory_space<smem>>
      %c0_i32_437 = arith.constant 0 : i32
      %c0_i32_438 = arith.constant 0 : i32
      %c0_i32_439 = arith.constant 0 : i32
      %c0_i32_440 = arith.constant 0 : i32
      %c0_i32_441 = arith.constant 0 : i32
      %637 = tpu.memref_slice %arg3[%c0_i32_437, %c0_i32_441] : memref<32x400xf32, #tpu.memory_space<any>> -> memref<1x400xf32, #tpu.memory_space<any>>
      %638 = tpu.memref_squeeze %637 : memref<1x400xf32, #tpu.memory_space<any>> -> memref<400xf32, #tpu.memory_space<any>>
      %c0_i32_442 = arith.constant 0 : i32
      %639 = tpu.memref_slice %arg4[%c0_i32_438, %c0_i32_442] : memref<64x400xf32, #tpu.memory_space<vmem>> -> memref<1x400xf32, #tpu.memory_space<vmem>>
      %640 = tpu.memref_squeeze %639 : memref<1x400xf32, #tpu.memory_space<vmem>> -> memref<400xf32, #tpu.memory_space<vmem>>
      %641 = tpu.memref_slice %arg5[%c0_i32_439, %c0_i32_440] : memref<1x16x!tpu.dma_semaphore, #tpu.memory_space<semaphore_mem>> -> memref<1x1x!tpu.dma_semaphore, #tpu.memory_space<semaphore_mem>>
      %642 = tpu.memref_squeeze %641 : memref<1x1x!tpu.dma_semaphore, #tpu.memory_space<semaphore_mem>> -> memref<!tpu.dma_semaphore, #tpu.memory_space<semaphore_mem>>
      tpu.wait_dma2 semaphore(%642 : memref<!tpu.dma_semaphore, #tpu.memory_space<semaphore_mem>>) src(%638 : memref<400xf32, #tpu.memory_space<any>>) dst(%640 : memref<400xf32, #tpu.memory_space<vmem>>)
      %c48_i32_443 = arith.constant 48 : i32
      %c0_i32_444 = arith.constant 0 : i32
      %c0_i32_445 = arith.constant 0 : i32
      %c0_i32_446 = arith.constant 0 : i32
      %643 = tpu.memref_slice %arg3[%636, %c0_i32_446] : memref<32x400xf32, #tpu.memory_space<any>> -> memref<1x400xf32, #tpu.memory_space<any>>
      %644 = tpu.memref_squeeze %643 : memref<1x400xf32, #tpu.memory_space<any>> -> memref<400xf32, #tpu.memory_space<any>>
      %c0_i32_447 = arith.constant 0 : i32
      %645 = tpu.memref_slice %arg4[%c48_i32_443, %c0_i32_447] : memref<64x400xf32, #tpu.memory_space<vmem>> -> memref<1x400xf32, #tpu.memory_space<vmem>>
      %646 = tpu.memref_squeeze %645 : memref<1x400xf32, #tpu.memory_space<vmem>> -> memref<400xf32, #tpu.memory_space<vmem>>
      %647 = tpu.memref_slice %arg5[%c0_i32_444, %c0_i32_445] : memref<1x16x!tpu.dma_semaphore, #tpu.memory_space<semaphore_mem>> -> memref<1x1x!tpu.dma_semaphore, #tpu.memory_space<semaphore_mem>>
      %648 = tpu.memref_squeeze %647 : memref<1x1x!tpu.dma_semaphore, #tpu.memory_space<semaphore_mem>> -> memref<!tpu.dma_semaphore, #tpu.memory_space<semaphore_mem>>
      tpu.enqueue_dma source(%644 : memref<400xf32, #tpu.memory_space<any>>) target(%646 : memref<400xf32, #tpu.memory_space<vmem>>) target_semaphore(%648 : memref<!tpu.dma_semaphore, #tpu.memory_space<semaphore_mem>>)
      %c49_i32 = arith.constant 49 : i32
      %649 = arith.addi %0, %c49_i32 : i32
      %650 = arith.index_cast %649 : i32 to index
      %651 = memref.load %arg2[%650] : memref<64xi32, #tpu.memory_space<smem>>
      %c0_i32_448 = arith.constant 0 : i32
      %c0_i32_449 = arith.constant 0 : i32
      %c0_i32_450 = arith.constant 0 : i32
      %c1_i32_451 = arith.constant 1 : i32
      %c0_i32_452 = arith.constant 0 : i32
      %652 = tpu.memref_slice %arg3[%c0_i32_448, %c0_i32_452] : memref<32x400xf32, #tpu.memory_space<any>> -> memref<1x400xf32, #tpu.memory_space<any>>
      %653 = tpu.memref_squeeze %652 : memref<1x400xf32, #tpu.memory_space<any>> -> memref<400xf32, #tpu.memory_space<any>>
      %c0_i32_453 = arith.constant 0 : i32
      %654 = tpu.memref_slice %arg4[%c0_i32_449, %c0_i32_453] : memref<64x400xf32, #tpu.memory_space<vmem>> -> memref<1x400xf32, #tpu.memory_space<vmem>>
      %655 = tpu.memref_squeeze %654 : memref<1x400xf32, #tpu.memory_space<vmem>> -> memref<400xf32, #tpu.memory_space<vmem>>
      %656 = tpu.memref_slice %arg5[%c0_i32_450, %c1_i32_451] : memref<1x16x!tpu.dma_semaphore, #tpu.memory_space<semaphore_mem>> -> memref<1x1x!tpu.dma_semaphore, #tpu.memory_space<semaphore_mem>>
      %657 = tpu.memref_squeeze %656 : memref<1x1x!tpu.dma_semaphore, #tpu.memory_space<semaphore_mem>> -> memref<!tpu.dma_semaphore, #tpu.memory_space<semaphore_mem>>
      tpu.wait_dma2 semaphore(%657 : memref<!tpu.dma_semaphore, #tpu.memory_space<semaphore_mem>>) src(%653 : memref<400xf32, #tpu.memory_space<any>>) dst(%655 : memref<400xf32, #tpu.memory_space<vmem>>)
      %c49_i32_454 = arith.constant 49 : i32
      %c0_i32_455 = arith.constant 0 : i32
      %c1_i32_456 = arith.constant 1 : i32
      %c0_i32_457 = arith.constant 0 : i32
      %658 = tpu.memref_slice %arg3[%651, %c0_i32_457] : memref<32x400xf32, #tpu.memory_space<any>> -> memref<1x400xf32, #tpu.memory_space<any>>
      %659 = tpu.memref_squeeze %658 : memref<1x400xf32, #tpu.memory_space<any>> -> memref<400xf32, #tpu.memory_space<any>>
      %c0_i32_458 = arith.constant 0 : i32
      %660 = tpu.memref_slice %arg4[%c49_i32_454, %c0_i32_458] : memref<64x400xf32, #tpu.memory_space<vmem>> -> memref<1x400xf32, #tpu.memory_space<vmem>>
      %661 = tpu.memref_squeeze %660 : memref<1x400xf32, #tpu.memory_space<vmem>> -> memref<400xf32, #tpu.memory_space<vmem>>
      %662 = tpu.memref_slice %arg5[%c0_i32_455, %c1_i32_456] : memref<1x16x!tpu.dma_semaphore, #tpu.memory_space<semaphore_mem>> -> memref<1x1x!tpu.dma_semaphore, #tpu.memory_space<semaphore_mem>>
      %663 = tpu.memref_squeeze %662 : memref<1x1x!tpu.dma_semaphore, #tpu.memory_space<semaphore_mem>> -> memref<!tpu.dma_semaphore, #tpu.memory_space<semaphore_mem>>
      tpu.enqueue_dma source(%659 : memref<400xf32, #tpu.memory_space<any>>) target(%661 : memref<400xf32, #tpu.memory_space<vmem>>) target_semaphore(%663 : memref<!tpu.dma_semaphore, #tpu.memory_space<semaphore_mem>>)
      %c50_i32 = arith.constant 50 : i32
      %664 = arith.addi %0, %c50_i32 : i32
      %665 = arith.index_cast %664 : i32 to index
      %666 = memref.load %arg2[%665] : memref<64xi32, #tpu.memory_space<smem>>
      %c0_i32_459 = arith.constant 0 : i32
      %c0_i32_460 = arith.constant 0 : i32
      %c0_i32_461 = arith.constant 0 : i32
      %c2_i32_462 = arith.constant 2 : i32
      %c0_i32_463 = arith.constant 0 : i32
      %667 = tpu.memref_slice %arg3[%c0_i32_459, %c0_i32_463] : memref<32x400xf32, #tpu.memory_space<any>> -> memref<1x400xf32, #tpu.memory_space<any>>
      %668 = tpu.memref_squeeze %667 : memref<1x400xf32, #tpu.memory_space<any>> -> memref<400xf32, #tpu.memory_space<any>>
      %c0_i32_464 = arith.constant 0 : i32
      %669 = tpu.memref_slice %arg4[%c0_i32_460, %c0_i32_464] : memref<64x400xf32, #tpu.memory_space<vmem>> -> memref<1x400xf32, #tpu.memory_space<vmem>>
      %670 = tpu.memref_squeeze %669 : memref<1x400xf32, #tpu.memory_space<vmem>> -> memref<400xf32, #tpu.memory_space<vmem>>
      %671 = tpu.memref_slice %arg5[%c0_i32_461, %c2_i32_462] : memref<1x16x!tpu.dma_semaphore, #tpu.memory_space<semaphore_mem>> -> memref<1x1x!tpu.dma_semaphore, #tpu.memory_space<semaphore_mem>>
      %672 = tpu.memref_squeeze %671 : memref<1x1x!tpu.dma_semaphore, #tpu.memory_space<semaphore_mem>> -> memref<!tpu.dma_semaphore, #tpu.memory_space<semaphore_mem>>
      tpu.wait_dma2 semaphore(%672 : memref<!tpu.dma_semaphore, #tpu.memory_space<semaphore_mem>>) src(%668 : memref<400xf32, #tpu.memory_space<any>>) dst(%670 : memref<400xf32, #tpu.memory_space<vmem>>)
      %c50_i32_465 = arith.constant 50 : i32
      %c0_i32_466 = arith.constant 0 : i32
      %c2_i32_467 = arith.constant 2 : i32
      %c0_i32_468 = arith.constant 0 : i32
      %673 = tpu.memref_slice %arg3[%666, %c0_i32_468] : memref<32x400xf32, #tpu.memory_space<any>> -> memref<1x400xf32, #tpu.memory_space<any>>
      %674 = tpu.memref_squeeze %673 : memref<1x400xf32, #tpu.memory_space<any>> -> memref<400xf32, #tpu.memory_space<any>>
      %c0_i32_469 = arith.constant 0 : i32
      %675 = tpu.memref_slice %arg4[%c50_i32_465, %c0_i32_469] : memref<64x400xf32, #tpu.memory_space<vmem>> -> memref<1x400xf32, #tpu.memory_space<vmem>>
      %676 = tpu.memref_squeeze %675 : memref<1x400xf32, #tpu.memory_space<vmem>> -> memref<400xf32, #tpu.memory_space<vmem>>
      %677 = tpu.memref_slice %arg5[%c0_i32_466, %c2_i32_467] : memref<1x16x!tpu.dma_semaphore, #tpu.memory_space<semaphore_mem>> -> memref<1x1x!tpu.dma_semaphore, #tpu.memory_space<semaphore_mem>>
      %678 = tpu.memref_squeeze %677 : memref<1x1x!tpu.dma_semaphore, #tpu.memory_space<semaphore_mem>> -> memref<!tpu.dma_semaphore, #tpu.memory_space<semaphore_mem>>
      tpu.enqueue_dma source(%674 : memref<400xf32, #tpu.memory_space<any>>) target(%676 : memref<400xf32, #tpu.memory_space<vmem>>) target_semaphore(%678 : memref<!tpu.dma_semaphore, #tpu.memory_space<semaphore_mem>>)
      %c51_i32 = arith.constant 51 : i32
      %679 = arith.addi %0, %c51_i32 : i32
      %680 = arith.index_cast %679 : i32 to index
      %681 = memref.load %arg2[%680] : memref<64xi32, #tpu.memory_space<smem>>
      %c0_i32_470 = arith.constant 0 : i32
      %c0_i32_471 = arith.constant 0 : i32
      %c0_i32_472 = arith.constant 0 : i32
      %c3_i32_473 = arith.constant 3 : i32
      %c0_i32_474 = arith.constant 0 : i32
      %682 = tpu.memref_slice %arg3[%c0_i32_470, %c0_i32_474] : memref<32x400xf32, #tpu.memory_space<any>> -> memref<1x400xf32, #tpu.memory_space<any>>
      %683 = tpu.memref_squeeze %682 : memref<1x400xf32, #tpu.memory_space<any>> -> memref<400xf32, #tpu.memory_space<any>>
      %c0_i32_475 = arith.constant 0 : i32
      %684 = tpu.memref_slice %arg4[%c0_i32_471, %c0_i32_475] : memref<64x400xf32, #tpu.memory_space<vmem>> -> memref<1x400xf32, #tpu.memory_space<vmem>>
      %685 = tpu.memref_squeeze %684 : memref<1x400xf32, #tpu.memory_space<vmem>> -> memref<400xf32, #tpu.memory_space<vmem>>
      %686 = tpu.memref_slice %arg5[%c0_i32_472, %c3_i32_473] : memref<1x16x!tpu.dma_semaphore, #tpu.memory_space<semaphore_mem>> -> memref<1x1x!tpu.dma_semaphore, #tpu.memory_space<semaphore_mem>>
      %687 = tpu.memref_squeeze %686 : memref<1x1x!tpu.dma_semaphore, #tpu.memory_space<semaphore_mem>> -> memref<!tpu.dma_semaphore, #tpu.memory_space<semaphore_mem>>
      tpu.wait_dma2 semaphore(%687 : memref<!tpu.dma_semaphore, #tpu.memory_space<semaphore_mem>>) src(%683 : memref<400xf32, #tpu.memory_space<any>>) dst(%685 : memref<400xf32, #tpu.memory_space<vmem>>)
      %c51_i32_476 = arith.constant 51 : i32
      %c0_i32_477 = arith.constant 0 : i32
      %c3_i32_478 = arith.constant 3 : i32
      %c0_i32_479 = arith.constant 0 : i32
      %688 = tpu.memref_slice %arg3[%681, %c0_i32_479] : memref<32x400xf32, #tpu.memory_space<any>> -> memref<1x400xf32, #tpu.memory_space<any>>
      %689 = tpu.memref_squeeze %688 : memref<1x400xf32, #tpu.memory_space<any>> -> memref<400xf32, #tpu.memory_space<any>>
      %c0_i32_480 = arith.constant 0 : i32
      %690 = tpu.memref_slice %arg4[%c51_i32_476, %c0_i32_480] : memref<64x400xf32, #tpu.memory_space<vmem>> -> memref<1x400xf32, #tpu.memory_space<vmem>>
      %691 = tpu.memref_squeeze %690 : memref<1x400xf32, #tpu.memory_space<vmem>> -> memref<400xf32, #tpu.memory_space<vmem>>
      %692 = tpu.memref_slice %arg5[%c0_i32_477, %c3_i32_478] : memref<1x16x!tpu.dma_semaphore, #tpu.memory_space<semaphore_mem>> -> memref<1x1x!tpu.dma_semaphore, #tpu.memory_space<semaphore_mem>>
      %693 = tpu.memref_squeeze %692 : memref<1x1x!tpu.dma_semaphore, #tpu.memory_space<semaphore_mem>> -> memref<!tpu.dma_semaphore, #tpu.memory_space<semaphore_mem>>
      tpu.enqueue_dma source(%689 : memref<400xf32, #tpu.memory_space<any>>) target(%691 : memref<400xf32, #tpu.memory_space<vmem>>) target_semaphore(%693 : memref<!tpu.dma_semaphore, #tpu.memory_space<semaphore_mem>>)
      %c52_i32 = arith.constant 52 : i32
      %694 = arith.addi %0, %c52_i32 : i32
      %695 = arith.index_cast %694 : i32 to index
      %696 = memref.load %arg2[%695] : memref<64xi32, #tpu.memory_space<smem>>
      %c0_i32_481 = arith.constant 0 : i32
      %c0_i32_482 = arith.constant 0 : i32
      %c0_i32_483 = arith.constant 0 : i32
      %c4_i32_484 = arith.constant 4 : i32
      %c0_i32_485 = arith.constant 0 : i32
      %697 = tpu.memref_slice %arg3[%c0_i32_481, %c0_i32_485] : memref<32x400xf32, #tpu.memory_space<any>> -> memref<1x400xf32, #tpu.memory_space<any>>
      %698 = tpu.memref_squeeze %697 : memref<1x400xf32, #tpu.memory_space<any>> -> memref<400xf32, #tpu.memory_space<any>>
      %c0_i32_486 = arith.constant 0 : i32
      %699 = tpu.memref_slice %arg4[%c0_i32_482, %c0_i32_486] : memref<64x400xf32, #tpu.memory_space<vmem>> -> memref<1x400xf32, #tpu.memory_space<vmem>>
      %700 = tpu.memref_squeeze %699 : memref<1x400xf32, #tpu.memory_space<vmem>> -> memref<400xf32, #tpu.memory_space<vmem>>
      %701 = tpu.memref_slice %arg5[%c0_i32_483, %c4_i32_484] : memref<1x16x!tpu.dma_semaphore, #tpu.memory_space<semaphore_mem>> -> memref<1x1x!tpu.dma_semaphore, #tpu.memory_space<semaphore_mem>>
      %702 = tpu.memref_squeeze %701 : memref<1x1x!tpu.dma_semaphore, #tpu.memory_space<semaphore_mem>> -> memref<!tpu.dma_semaphore, #tpu.memory_space<semaphore_mem>>
      tpu.wait_dma2 semaphore(%702 : memref<!tpu.dma_semaphore, #tpu.memory_space<semaphore_mem>>) src(%698 : memref<400xf32, #tpu.memory_space<any>>) dst(%700 : memref<400xf32, #tpu.memory_space<vmem>>)
      %c52_i32_487 = arith.constant 52 : i32
      %c0_i32_488 = arith.constant 0 : i32
      %c4_i32_489 = arith.constant 4 : i32
      %c0_i32_490 = arith.constant 0 : i32
      %703 = tpu.memref_slice %arg3[%696, %c0_i32_490] : memref<32x400xf32, #tpu.memory_space<any>> -> memref<1x400xf32, #tpu.memory_space<any>>
      %704 = tpu.memref_squeeze %703 : memref<1x400xf32, #tpu.memory_space<any>> -> memref<400xf32, #tpu.memory_space<any>>
      %c0_i32_491 = arith.constant 0 : i32
      %705 = tpu.memref_slice %arg4[%c52_i32_487, %c0_i32_491] : memref<64x400xf32, #tpu.memory_space<vmem>> -> memref<1x400xf32, #tpu.memory_space<vmem>>
      %706 = tpu.memref_squeeze %705 : memref<1x400xf32, #tpu.memory_space<vmem>> -> memref<400xf32, #tpu.memory_space<vmem>>
      %707 = tpu.memref_slice %arg5[%c0_i32_488, %c4_i32_489] : memref<1x16x!tpu.dma_semaphore, #tpu.memory_space<semaphore_mem>> -> memref<1x1x!tpu.dma_semaphore, #tpu.memory_space<semaphore_mem>>
      %708 = tpu.memref_squeeze %707 : memref<1x1x!tpu.dma_semaphore, #tpu.memory_space<semaphore_mem>> -> memref<!tpu.dma_semaphore, #tpu.memory_space<semaphore_mem>>
      tpu.enqueue_dma source(%704 : memref<400xf32, #tpu.memory_space<any>>) target(%706 : memref<400xf32, #tpu.memory_space<vmem>>) target_semaphore(%708 : memref<!tpu.dma_semaphore, #tpu.memory_space<semaphore_mem>>)
      %c53_i32 = arith.constant 53 : i32
      %709 = arith.addi %0, %c53_i32 : i32
      %710 = arith.index_cast %709 : i32 to index
      %711 = memref.load %arg2[%710] : memref<64xi32, #tpu.memory_space<smem>>
      %c0_i32_492 = arith.constant 0 : i32
      %c0_i32_493 = arith.constant 0 : i32
      %c0_i32_494 = arith.constant 0 : i32
      %c5_i32_495 = arith.constant 5 : i32
      %c0_i32_496 = arith.constant 0 : i32
      %712 = tpu.memref_slice %arg3[%c0_i32_492, %c0_i32_496] : memref<32x400xf32, #tpu.memory_space<any>> -> memref<1x400xf32, #tpu.memory_space<any>>
      %713 = tpu.memref_squeeze %712 : memref<1x400xf32, #tpu.memory_space<any>> -> memref<400xf32, #tpu.memory_space<any>>
      %c0_i32_497 = arith.constant 0 : i32
      %714 = tpu.memref_slice %arg4[%c0_i32_493, %c0_i32_497] : memref<64x400xf32, #tpu.memory_space<vmem>> -> memref<1x400xf32, #tpu.memory_space<vmem>>
      %715 = tpu.memref_squeeze %714 : memref<1x400xf32, #tpu.memory_space<vmem>> -> memref<400xf32, #tpu.memory_space<vmem>>
      %716 = tpu.memref_slice %arg5[%c0_i32_494, %c5_i32_495] : memref<1x16x!tpu.dma_semaphore, #tpu.memory_space<semaphore_mem>> -> memref<1x1x!tpu.dma_semaphore, #tpu.memory_space<semaphore_mem>>
      %717 = tpu.memref_squeeze %716 : memref<1x1x!tpu.dma_semaphore, #tpu.memory_space<semaphore_mem>> -> memref<!tpu.dma_semaphore, #tpu.memory_space<semaphore_mem>>
      tpu.wait_dma2 semaphore(%717 : memref<!tpu.dma_semaphore, #tpu.memory_space<semaphore_mem>>) src(%713 : memref<400xf32, #tpu.memory_space<any>>) dst(%715 : memref<400xf32, #tpu.memory_space<vmem>>)
      %c53_i32_498 = arith.constant 53 : i32
      %c0_i32_499 = arith.constant 0 : i32
      %c5_i32_500 = arith.constant 5 : i32
      %c0_i32_501 = arith.constant 0 : i32
      %718 = tpu.memref_slice %arg3[%711, %c0_i32_501] : memref<32x400xf32, #tpu.memory_space<any>> -> memref<1x400xf32, #tpu.memory_space<any>>
      %719 = tpu.memref_squeeze %718 : memref<1x400xf32, #tpu.memory_space<any>> -> memref<400xf32, #tpu.memory_space<any>>
      %c0_i32_502 = arith.constant 0 : i32
      %720 = tpu.memref_slice %arg4[%c53_i32_498, %c0_i32_502] : memref<64x400xf32, #tpu.memory_space<vmem>> -> memref<1x400xf32, #tpu.memory_space<vmem>>
      %721 = tpu.memref_squeeze %720 : memref<1x400xf32, #tpu.memory_space<vmem>> -> memref<400xf32, #tpu.memory_space<vmem>>
      %722 = tpu.memref_slice %arg5[%c0_i32_499, %c5_i32_500] : memref<1x16x!tpu.dma_semaphore, #tpu.memory_space<semaphore_mem>> -> memref<1x1x!tpu.dma_semaphore, #tpu.memory_space<semaphore_mem>>
      %723 = tpu.memref_squeeze %722 : memref<1x1x!tpu.dma_semaphore, #tpu.memory_space<semaphore_mem>> -> memref<!tpu.dma_semaphore, #tpu.memory_space<semaphore_mem>>
      tpu.enqueue_dma source(%719 : memref<400xf32, #tpu.memory_space<any>>) target(%721 : memref<400xf32, #tpu.memory_space<vmem>>) target_semaphore(%723 : memref<!tpu.dma_semaphore, #tpu.memory_space<semaphore_mem>>)
      %c54_i32 = arith.constant 54 : i32
      %724 = arith.addi %0, %c54_i32 : i32
      %725 = arith.index_cast %724 : i32 to index
      %726 = memref.load %arg2[%725] : memref<64xi32, #tpu.memory_space<smem>>
      %c0_i32_503 = arith.constant 0 : i32
      %c0_i32_504 = arith.constant 0 : i32
      %c0_i32_505 = arith.constant 0 : i32
      %c6_i32_506 = arith.constant 6 : i32
      %c0_i32_507 = arith.constant 0 : i32
      %727 = tpu.memref_slice %arg3[%c0_i32_503, %c0_i32_507] : memref<32x400xf32, #tpu.memory_space<any>> -> memref<1x400xf32, #tpu.memory_space<any>>
      %728 = tpu.memref_squeeze %727 : memref<1x400xf32, #tpu.memory_space<any>> -> memref<400xf32, #tpu.memory_space<any>>
      %c0_i32_508 = arith.constant 0 : i32
      %729 = tpu.memref_slice %arg4[%c0_i32_504, %c0_i32_508] : memref<64x400xf32, #tpu.memory_space<vmem>> -> memref<1x400xf32, #tpu.memory_space<vmem>>
      %730 = tpu.memref_squeeze %729 : memref<1x400xf32, #tpu.memory_space<vmem>> -> memref<400xf32, #tpu.memory_space<vmem>>
      %731 = tpu.memref_slice %arg5[%c0_i32_505, %c6_i32_506] : memref<1x16x!tpu.dma_semaphore, #tpu.memory_space<semaphore_mem>> -> memref<1x1x!tpu.dma_semaphore, #tpu.memory_space<semaphore_mem>>
      %732 = tpu.memref_squeeze %731 : memref<1x1x!tpu.dma_semaphore, #tpu.memory_space<semaphore_mem>> -> memref<!tpu.dma_semaphore, #tpu.memory_space<semaphore_mem>>
      tpu.wait_dma2 semaphore(%732 : memref<!tpu.dma_semaphore, #tpu.memory_space<semaphore_mem>>) src(%728 : memref<400xf32, #tpu.memory_space<any>>) dst(%730 : memref<400xf32, #tpu.memory_space<vmem>>)
      %c54_i32_509 = arith.constant 54 : i32
      %c0_i32_510 = arith.constant 0 : i32
      %c6_i32_511 = arith.constant 6 : i32
      %c0_i32_512 = arith.constant 0 : i32
      %733 = tpu.memref_slice %arg3[%726, %c0_i32_512] : memref<32x400xf32, #tpu.memory_space<any>> -> memref<1x400xf32, #tpu.memory_space<any>>
      %734 = tpu.memref_squeeze %733 : memref<1x400xf32, #tpu.memory_space<any>> -> memref<400xf32, #tpu.memory_space<any>>
      %c0_i32_513 = arith.constant 0 : i32
      %735 = tpu.memref_slice %arg4[%c54_i32_509, %c0_i32_513] : memref<64x400xf32, #tpu.memory_space<vmem>> -> memref<1x400xf32, #tpu.memory_space<vmem>>
      %736 = tpu.memref_squeeze %735 : memref<1x400xf32, #tpu.memory_space<vmem>> -> memref<400xf32, #tpu.memory_space<vmem>>
      %737 = tpu.memref_slice %arg5[%c0_i32_510, %c6_i32_511] : memref<1x16x!tpu.dma_semaphore, #tpu.memory_space<semaphore_mem>> -> memref<1x1x!tpu.dma_semaphore, #tpu.memory_space<semaphore_mem>>
      %738 = tpu.memref_squeeze %737 : memref<1x1x!tpu.dma_semaphore, #tpu.memory_space<semaphore_mem>> -> memref<!tpu.dma_semaphore, #tpu.memory_space<semaphore_mem>>
      tpu.enqueue_dma source(%734 : memref<400xf32, #tpu.memory_space<any>>) target(%736 : memref<400xf32, #tpu.memory_space<vmem>>) target_semaphore(%738 : memref<!tpu.dma_semaphore, #tpu.memory_space<semaphore_mem>>)
      %c55_i32 = arith.constant 55 : i32
      %739 = arith.addi %0, %c55_i32 : i32
      %740 = arith.index_cast %739 : i32 to index
      %741 = memref.load %arg2[%740] : memref<64xi32, #tpu.memory_space<smem>>
      %c0_i32_514 = arith.constant 0 : i32
      %c0_i32_515 = arith.constant 0 : i32
      %c0_i32_516 = arith.constant 0 : i32
      %c7_i32_517 = arith.constant 7 : i32
      %c0_i32_518 = arith.constant 0 : i32
      %742 = tpu.memref_slice %arg3[%c0_i32_514, %c0_i32_518] : memref<32x400xf32, #tpu.memory_space<any>> -> memref<1x400xf32, #tpu.memory_space<any>>
      %743 = tpu.memref_squeeze %742 : memref<1x400xf32, #tpu.memory_space<any>> -> memref<400xf32, #tpu.memory_space<any>>
      %c0_i32_519 = arith.constant 0 : i32
      %744 = tpu.memref_slice %arg4[%c0_i32_515, %c0_i32_519] : memref<64x400xf32, #tpu.memory_space<vmem>> -> memref<1x400xf32, #tpu.memory_space<vmem>>
      %745 = tpu.memref_squeeze %744 : memref<1x400xf32, #tpu.memory_space<vmem>> -> memref<400xf32, #tpu.memory_space<vmem>>
      %746 = tpu.memref_slice %arg5[%c0_i32_516, %c7_i32_517] : memref<1x16x!tpu.dma_semaphore, #tpu.memory_space<semaphore_mem>> -> memref<1x1x!tpu.dma_semaphore, #tpu.memory_space<semaphore_mem>>
      %747 = tpu.memref_squeeze %746 : memref<1x1x!tpu.dma_semaphore, #tpu.memory_space<semaphore_mem>> -> memref<!tpu.dma_semaphore, #tpu.memory_space<semaphore_mem>>
      tpu.wait_dma2 semaphore(%747 : memref<!tpu.dma_semaphore, #tpu.memory_space<semaphore_mem>>) src(%743 : memref<400xf32, #tpu.memory_space<any>>) dst(%745 : memref<400xf32, #tpu.memory_space<vmem>>)
      %c55_i32_520 = arith.constant 55 : i32
      %c0_i32_521 = arith.constant 0 : i32
      %c7_i32_522 = arith.constant 7 : i32
      %c0_i32_523 = arith.constant 0 : i32
      %748 = tpu.memref_slice %arg3[%741, %c0_i32_523] : memref<32x400xf32, #tpu.memory_space<any>> -> memref<1x400xf32, #tpu.memory_space<any>>
      %749 = tpu.memref_squeeze %748 : memref<1x400xf32, #tpu.memory_space<any>> -> memref<400xf32, #tpu.memory_space<any>>
      %c0_i32_524 = arith.constant 0 : i32
      %750 = tpu.memref_slice %arg4[%c55_i32_520, %c0_i32_524] : memref<64x400xf32, #tpu.memory_space<vmem>> -> memref<1x400xf32, #tpu.memory_space<vmem>>
      %751 = tpu.memref_squeeze %750 : memref<1x400xf32, #tpu.memory_space<vmem>> -> memref<400xf32, #tpu.memory_space<vmem>>
      %752 = tpu.memref_slice %arg5[%c0_i32_521, %c7_i32_522] : memref<1x16x!tpu.dma_semaphore, #tpu.memory_space<semaphore_mem>> -> memref<1x1x!tpu.dma_semaphore, #tpu.memory_space<semaphore_mem>>
      %753 = tpu.memref_squeeze %752 : memref<1x1x!tpu.dma_semaphore, #tpu.memory_space<semaphore_mem>> -> memref<!tpu.dma_semaphore, #tpu.memory_space<semaphore_mem>>
      tpu.enqueue_dma source(%749 : memref<400xf32, #tpu.memory_space<any>>) target(%751 : memref<400xf32, #tpu.memory_space<vmem>>) target_semaphore(%753 : memref<!tpu.dma_semaphore, #tpu.memory_space<semaphore_mem>>)
      %c56_i32 = arith.constant 56 : i32
      %754 = arith.addi %0, %c56_i32 : i32
      %755 = arith.index_cast %754 : i32 to index
      %756 = memref.load %arg2[%755] : memref<64xi32, #tpu.memory_space<smem>>
      %c0_i32_525 = arith.constant 0 : i32
      %c0_i32_526 = arith.constant 0 : i32
      %c0_i32_527 = arith.constant 0 : i32
      %c8_i32_528 = arith.constant 8 : i32
      %c0_i32_529 = arith.constant 0 : i32
      %757 = tpu.memref_slice %arg3[%c0_i32_525, %c0_i32_529] : memref<32x400xf32, #tpu.memory_space<any>> -> memref<1x400xf32, #tpu.memory_space<any>>
      %758 = tpu.memref_squeeze %757 : memref<1x400xf32, #tpu.memory_space<any>> -> memref<400xf32, #tpu.memory_space<any>>
      %c0_i32_530 = arith.constant 0 : i32
      %759 = tpu.memref_slice %arg4[%c0_i32_526, %c0_i32_530] : memref<64x400xf32, #tpu.memory_space<vmem>> -> memref<1x400xf32, #tpu.memory_space<vmem>>
      %760 = tpu.memref_squeeze %759 : memref<1x400xf32, #tpu.memory_space<vmem>> -> memref<400xf32, #tpu.memory_space<vmem>>
      %761 = tpu.memref_slice %arg5[%c0_i32_527, %c8_i32_528] : memref<1x16x!tpu.dma_semaphore, #tpu.memory_space<semaphore_mem>> -> memref<1x1x!tpu.dma_semaphore, #tpu.memory_space<semaphore_mem>>
      %762 = tpu.memref_squeeze %761 : memref<1x1x!tpu.dma_semaphore, #tpu.memory_space<semaphore_mem>> -> memref<!tpu.dma_semaphore, #tpu.memory_space<semaphore_mem>>
      tpu.wait_dma2 semaphore(%762 : memref<!tpu.dma_semaphore, #tpu.memory_space<semaphore_mem>>) src(%758 : memref<400xf32, #tpu.memory_space<any>>) dst(%760 : memref<400xf32, #tpu.memory_space<vmem>>)
      %c56_i32_531 = arith.constant 56 : i32
      %c0_i32_532 = arith.constant 0 : i32
      %c8_i32_533 = arith.constant 8 : i32
      %c0_i32_534 = arith.constant 0 : i32
      %763 = tpu.memref_slice %arg3[%756, %c0_i32_534] : memref<32x400xf32, #tpu.memory_space<any>> -> memref<1x400xf32, #tpu.memory_space<any>>
      %764 = tpu.memref_squeeze %763 : memref<1x400xf32, #tpu.memory_space<any>> -> memref<400xf32, #tpu.memory_space<any>>
      %c0_i32_535 = arith.constant 0 : i32
      %765 = tpu.memref_slice %arg4[%c56_i32_531, %c0_i32_535] : memref<64x400xf32, #tpu.memory_space<vmem>> -> memref<1x400xf32, #tpu.memory_space<vmem>>
      %766 = tpu.memref_squeeze %765 : memref<1x400xf32, #tpu.memory_space<vmem>> -> memref<400xf32, #tpu.memory_space<vmem>>
      %767 = tpu.memref_slice %arg5[%c0_i32_532, %c8_i32_533] : memref<1x16x!tpu.dma_semaphore, #tpu.memory_space<semaphore_mem>> -> memref<1x1x!tpu.dma_semaphore, #tpu.memory_space<semaphore_mem>>
      %768 = tpu.memref_squeeze %767 : memref<1x1x!tpu.dma_semaphore, #tpu.memory_space<semaphore_mem>> -> memref<!tpu.dma_semaphore, #tpu.memory_space<semaphore_mem>>
      tpu.enqueue_dma source(%764 : memref<400xf32, #tpu.memory_space<any>>) target(%766 : memref<400xf32, #tpu.memory_space<vmem>>) target_semaphore(%768 : memref<!tpu.dma_semaphore, #tpu.memory_space<semaphore_mem>>)
      %c57_i32 = arith.constant 57 : i32
      %769 = arith.addi %0, %c57_i32 : i32
      %770 = arith.index_cast %769 : i32 to index
      %771 = memref.load %arg2[%770] : memref<64xi32, #tpu.memory_space<smem>>
      %c0_i32_536 = arith.constant 0 : i32
      %c0_i32_537 = arith.constant 0 : i32
      %c0_i32_538 = arith.constant 0 : i32
      %c9_i32_539 = arith.constant 9 : i32
      %c0_i32_540 = arith.constant 0 : i32
      %772 = tpu.memref_slice %arg3[%c0_i32_536, %c0_i32_540] : memref<32x400xf32, #tpu.memory_space<any>> -> memref<1x400xf32, #tpu.memory_space<any>>
      %773 = tpu.memref_squeeze %772 : memref<1x400xf32, #tpu.memory_space<any>> -> memref<400xf32, #tpu.memory_space<any>>
      %c0_i32_541 = arith.constant 0 : i32
      %774 = tpu.memref_slice %arg4[%c0_i32_537, %c0_i32_541] : memref<64x400xf32, #tpu.memory_space<vmem>> -> memref<1x400xf32, #tpu.memory_space<vmem>>
      %775 = tpu.memref_squeeze %774 : memref<1x400xf32, #tpu.memory_space<vmem>> -> memref<400xf32, #tpu.memory_space<vmem>>
      %776 = tpu.memref_slice %arg5[%c0_i32_538, %c9_i32_539] : memref<1x16x!tpu.dma_semaphore, #tpu.memory_space<semaphore_mem>> -> memref<1x1x!tpu.dma_semaphore, #tpu.memory_space<semaphore_mem>>
      %777 = tpu.memref_squeeze %776 : memref<1x1x!tpu.dma_semaphore, #tpu.memory_space<semaphore_mem>> -> memref<!tpu.dma_semaphore, #tpu.memory_space<semaphore_mem>>
      tpu.wait_dma2 semaphore(%777 : memref<!tpu.dma_semaphore, #tpu.memory_space<semaphore_mem>>) src(%773 : memref<400xf32, #tpu.memory_space<any>>) dst(%775 : memref<400xf32, #tpu.memory_space<vmem>>)
      %c57_i32_542 = arith.constant 57 : i32
      %c0_i32_543 = arith.constant 0 : i32
      %c9_i32_544 = arith.constant 9 : i32
      %c0_i32_545 = arith.constant 0 : i32
      %778 = tpu.memref_slice %arg3[%771, %c0_i32_545] : memref<32x400xf32, #tpu.memory_space<any>> -> memref<1x400xf32, #tpu.memory_space<any>>
      %779 = tpu.memref_squeeze %778 : memref<1x400xf32, #tpu.memory_space<any>> -> memref<400xf32, #tpu.memory_space<any>>
      %c0_i32_546 = arith.constant 0 : i32
      %780 = tpu.memref_slice %arg4[%c57_i32_542, %c0_i32_546] : memref<64x400xf32, #tpu.memory_space<vmem>> -> memref<1x400xf32, #tpu.memory_space<vmem>>
      %781 = tpu.memref_squeeze %780 : memref<1x400xf32, #tpu.memory_space<vmem>> -> memref<400xf32, #tpu.memory_space<vmem>>
      %782 = tpu.memref_slice %arg5[%c0_i32_543, %c9_i32_544] : memref<1x16x!tpu.dma_semaphore, #tpu.memory_space<semaphore_mem>> -> memref<1x1x!tpu.dma_semaphore, #tpu.memory_space<semaphore_mem>>
      %783 = tpu.memref_squeeze %782 : memref<1x1x!tpu.dma_semaphore, #tpu.memory_space<semaphore_mem>> -> memref<!tpu.dma_semaphore, #tpu.memory_space<semaphore_mem>>
      tpu.enqueue_dma source(%779 : memref<400xf32, #tpu.memory_space<any>>) target(%781 : memref<400xf32, #tpu.memory_space<vmem>>) target_semaphore(%783 : memref<!tpu.dma_semaphore, #tpu.memory_space<semaphore_mem>>)
      %c58_i32 = arith.constant 58 : i32
      %784 = arith.addi %0, %c58_i32 : i32
      %785 = arith.index_cast %784 : i32 to index
      %786 = memref.load %arg2[%785] : memref<64xi32, #tpu.memory_space<smem>>
      %c0_i32_547 = arith.constant 0 : i32
      %c0_i32_548 = arith.constant 0 : i32
      %c0_i32_549 = arith.constant 0 : i32
      %c10_i32_550 = arith.constant 10 : i32
      %c0_i32_551 = arith.constant 0 : i32
      %787 = tpu.memref_slice %arg3[%c0_i32_547, %c0_i32_551] : memref<32x400xf32, #tpu.memory_space<any>> -> memref<1x400xf32, #tpu.memory_space<any>>
      %788 = tpu.memref_squeeze %787 : memref<1x400xf32, #tpu.memory_space<any>> -> memref<400xf32, #tpu.memory_space<any>>
      %c0_i32_552 = arith.constant 0 : i32
      %789 = tpu.memref_slice %arg4[%c0_i32_548, %c0_i32_552] : memref<64x400xf32, #tpu.memory_space<vmem>> -> memref<1x400xf32, #tpu.memory_space<vmem>>
      %790 = tpu.memref_squeeze %789 : memref<1x400xf32, #tpu.memory_space<vmem>> -> memref<400xf32, #tpu.memory_space<vmem>>
      %791 = tpu.memref_slice %arg5[%c0_i32_549, %c10_i32_550] : memref<1x16x!tpu.dma_semaphore, #tpu.memory_space<semaphore_mem>> -> memref<1x1x!tpu.dma_semaphore, #tpu.memory_space<semaphore_mem>>
      %792 = tpu.memref_squeeze %791 : memref<1x1x!tpu.dma_semaphore, #tpu.memory_space<semaphore_mem>> -> memref<!tpu.dma_semaphore, #tpu.memory_space<semaphore_mem>>
      tpu.wait_dma2 semaphore(%792 : memref<!tpu.dma_semaphore, #tpu.memory_space<semaphore_mem>>) src(%788 : memref<400xf32, #tpu.memory_space<any>>) dst(%790 : memref<400xf32, #tpu.memory_space<vmem>>)
      %c58_i32_553 = arith.constant 58 : i32
      %c0_i32_554 = arith.constant 0 : i32
      %c10_i32_555 = arith.constant 10 : i32
      %c0_i32_556 = arith.constant 0 : i32
      %793 = tpu.memref_slice %arg3[%786, %c0_i32_556] : memref<32x400xf32, #tpu.memory_space<any>> -> memref<1x400xf32, #tpu.memory_space<any>>
      %794 = tpu.memref_squeeze %793 : memref<1x400xf32, #tpu.memory_space<any>> -> memref<400xf32, #tpu.memory_space<any>>
      %c0_i32_557 = arith.constant 0 : i32
      %795 = tpu.memref_slice %arg4[%c58_i32_553, %c0_i32_557] : memref<64x400xf32, #tpu.memory_space<vmem>> -> memref<1x400xf32, #tpu.memory_space<vmem>>
      %796 = tpu.memref_squeeze %795 : memref<1x400xf32, #tpu.memory_space<vmem>> -> memref<400xf32, #tpu.memory_space<vmem>>
      %797 = tpu.memref_slice %arg5[%c0_i32_554, %c10_i32_555] : memref<1x16x!tpu.dma_semaphore, #tpu.memory_space<semaphore_mem>> -> memref<1x1x!tpu.dma_semaphore, #tpu.memory_space<semaphore_mem>>
      %798 = tpu.memref_squeeze %797 : memref<1x1x!tpu.dma_semaphore, #tpu.memory_space<semaphore_mem>> -> memref<!tpu.dma_semaphore, #tpu.memory_space<semaphore_mem>>
      tpu.enqueue_dma source(%794 : memref<400xf32, #tpu.memory_space<any>>) target(%796 : memref<400xf32, #tpu.memory_space<vmem>>) target_semaphore(%798 : memref<!tpu.dma_semaphore, #tpu.memory_space<semaphore_mem>>)
      %c59_i32 = arith.constant 59 : i32
      %799 = arith.addi %0, %c59_i32 : i32
      %800 = arith.index_cast %799 : i32 to index
      %801 = memref.load %arg2[%800] : memref<64xi32, #tpu.memory_space<smem>>
      %c0_i32_558 = arith.constant 0 : i32
      %c0_i32_559 = arith.constant 0 : i32
      %c0_i32_560 = arith.constant 0 : i32
      %c11_i32_561 = arith.constant 11 : i32
      %c0_i32_562 = arith.constant 0 : i32
      %802 = tpu.memref_slice %arg3[%c0_i32_558, %c0_i32_562] : memref<32x400xf32, #tpu.memory_space<any>> -> memref<1x400xf32, #tpu.memory_space<any>>
      %803 = tpu.memref_squeeze %802 : memref<1x400xf32, #tpu.memory_space<any>> -> memref<400xf32, #tpu.memory_space<any>>
      %c0_i32_563 = arith.constant 0 : i32
      %804 = tpu.memref_slice %arg4[%c0_i32_559, %c0_i32_563] : memref<64x400xf32, #tpu.memory_space<vmem>> -> memref<1x400xf32, #tpu.memory_space<vmem>>
      %805 = tpu.memref_squeeze %804 : memref<1x400xf32, #tpu.memory_space<vmem>> -> memref<400xf32, #tpu.memory_space<vmem>>
      %806 = tpu.memref_slice %arg5[%c0_i32_560, %c11_i32_561] : memref<1x16x!tpu.dma_semaphore, #tpu.memory_space<semaphore_mem>> -> memref<1x1x!tpu.dma_semaphore, #tpu.memory_space<semaphore_mem>>
      %807 = tpu.memref_squeeze %806 : memref<1x1x!tpu.dma_semaphore, #tpu.memory_space<semaphore_mem>> -> memref<!tpu.dma_semaphore, #tpu.memory_space<semaphore_mem>>
      tpu.wait_dma2 semaphore(%807 : memref<!tpu.dma_semaphore, #tpu.memory_space<semaphore_mem>>) src(%803 : memref<400xf32, #tpu.memory_space<any>>) dst(%805 : memref<400xf32, #tpu.memory_space<vmem>>)
      %c59_i32_564 = arith.constant 59 : i32
      %c0_i32_565 = arith.constant 0 : i32
      %c11_i32_566 = arith.constant 11 : i32
      %c0_i32_567 = arith.constant 0 : i32
      %808 = tpu.memref_slice %arg3[%801, %c0_i32_567] : memref<32x400xf32, #tpu.memory_space<any>> -> memref<1x400xf32, #tpu.memory_space<any>>
      %809 = tpu.memref_squeeze %808 : memref<1x400xf32, #tpu.memory_space<any>> -> memref<400xf32, #tpu.memory_space<any>>
      %c0_i32_568 = arith.constant 0 : i32
      %810 = tpu.memref_slice %arg4[%c59_i32_564, %c0_i32_568] : memref<64x400xf32, #tpu.memory_space<vmem>> -> memref<1x400xf32, #tpu.memory_space<vmem>>
      %811 = tpu.memref_squeeze %810 : memref<1x400xf32, #tpu.memory_space<vmem>> -> memref<400xf32, #tpu.memory_space<vmem>>
      %812 = tpu.memref_slice %arg5[%c0_i32_565, %c11_i32_566] : memref<1x16x!tpu.dma_semaphore, #tpu.memory_space<semaphore_mem>> -> memref<1x1x!tpu.dma_semaphore, #tpu.memory_space<semaphore_mem>>
      %813 = tpu.memref_squeeze %812 : memref<1x1x!tpu.dma_semaphore, #tpu.memory_space<semaphore_mem>> -> memref<!tpu.dma_semaphore, #tpu.memory_space<semaphore_mem>>
      tpu.enqueue_dma source(%809 : memref<400xf32, #tpu.memory_space<any>>) target(%811 : memref<400xf32, #tpu.memory_space<vmem>>) target_semaphore(%813 : memref<!tpu.dma_semaphore, #tpu.memory_space<semaphore_mem>>)
      %c60_i32 = arith.constant 60 : i32
      %814 = arith.addi %0, %c60_i32 : i32
      %815 = arith.index_cast %814 : i32 to index
      %816 = memref.load %arg2[%815] : memref<64xi32, #tpu.memory_space<smem>>
      %c0_i32_569 = arith.constant 0 : i32
      %c0_i32_570 = arith.constant 0 : i32
      %c0_i32_571 = arith.constant 0 : i32
      %c12_i32_572 = arith.constant 12 : i32
      %c0_i32_573 = arith.constant 0 : i32
      %817 = tpu.memref_slice %arg3[%c0_i32_569, %c0_i32_573] : memref<32x400xf32, #tpu.memory_space<any>> -> memref<1x400xf32, #tpu.memory_space<any>>
      %818 = tpu.memref_squeeze %817 : memref<1x400xf32, #tpu.memory_space<any>> -> memref<400xf32, #tpu.memory_space<any>>
      %c0_i32_574 = arith.constant 0 : i32
      %819 = tpu.memref_slice %arg4[%c0_i32_570, %c0_i32_574] : memref<64x400xf32, #tpu.memory_space<vmem>> -> memref<1x400xf32, #tpu.memory_space<vmem>>
      %820 = tpu.memref_squeeze %819 : memref<1x400xf32, #tpu.memory_space<vmem>> -> memref<400xf32, #tpu.memory_space<vmem>>
      %821 = tpu.memref_slice %arg5[%c0_i32_571, %c12_i32_572] : memref<1x16x!tpu.dma_semaphore, #tpu.memory_space<semaphore_mem>> -> memref<1x1x!tpu.dma_semaphore, #tpu.memory_space<semaphore_mem>>
      %822 = tpu.memref_squeeze %821 : memref<1x1x!tpu.dma_semaphore, #tpu.memory_space<semaphore_mem>> -> memref<!tpu.dma_semaphore, #tpu.memory_space<semaphore_mem>>
      tpu.wait_dma2 semaphore(%822 : memref<!tpu.dma_semaphore, #tpu.memory_space<semaphore_mem>>) src(%818 : memref<400xf32, #tpu.memory_space<any>>) dst(%820 : memref<400xf32, #tpu.memory_space<vmem>>)
      %c60_i32_575 = arith.constant 60 : i32
      %c0_i32_576 = arith.constant 0 : i32
      %c12_i32_577 = arith.constant 12 : i32
      %c0_i32_578 = arith.constant 0 : i32
      %823 = tpu.memref_slice %arg3[%816, %c0_i32_578] : memref<32x400xf32, #tpu.memory_space<any>> -> memref<1x400xf32, #tpu.memory_space<any>>
      %824 = tpu.memref_squeeze %823 : memref<1x400xf32, #tpu.memory_space<any>> -> memref<400xf32, #tpu.memory_space<any>>
      %c0_i32_579 = arith.constant 0 : i32
      %825 = tpu.memref_slice %arg4[%c60_i32_575, %c0_i32_579] : memref<64x400xf32, #tpu.memory_space<vmem>> -> memref<1x400xf32, #tpu.memory_space<vmem>>
      %826 = tpu.memref_squeeze %825 : memref<1x400xf32, #tpu.memory_space<vmem>> -> memref<400xf32, #tpu.memory_space<vmem>>
      %827 = tpu.memref_slice %arg5[%c0_i32_576, %c12_i32_577] : memref<1x16x!tpu.dma_semaphore, #tpu.memory_space<semaphore_mem>> -> memref<1x1x!tpu.dma_semaphore, #tpu.memory_space<semaphore_mem>>
      %828 = tpu.memref_squeeze %827 : memref<1x1x!tpu.dma_semaphore, #tpu.memory_space<semaphore_mem>> -> memref<!tpu.dma_semaphore, #tpu.memory_space<semaphore_mem>>
      tpu.enqueue_dma source(%824 : memref<400xf32, #tpu.memory_space<any>>) target(%826 : memref<400xf32, #tpu.memory_space<vmem>>) target_semaphore(%828 : memref<!tpu.dma_semaphore, #tpu.memory_space<semaphore_mem>>)
      %c61_i32 = arith.constant 61 : i32
      %829 = arith.addi %0, %c61_i32 : i32
      %830 = arith.index_cast %829 : i32 to index
      %831 = memref.load %arg2[%830] : memref<64xi32, #tpu.memory_space<smem>>
      %c0_i32_580 = arith.constant 0 : i32
      %c0_i32_581 = arith.constant 0 : i32
      %c0_i32_582 = arith.constant 0 : i32
      %c13_i32_583 = arith.constant 13 : i32
      %c0_i32_584 = arith.constant 0 : i32
      %832 = tpu.memref_slice %arg3[%c0_i32_580, %c0_i32_584] : memref<32x400xf32, #tpu.memory_space<any>> -> memref<1x400xf32, #tpu.memory_space<any>>
      %833 = tpu.memref_squeeze %832 : memref<1x400xf32, #tpu.memory_space<any>> -> memref<400xf32, #tpu.memory_space<any>>
      %c0_i32_585 = arith.constant 0 : i32
      %834 = tpu.memref_slice %arg4[%c0_i32_581, %c0_i32_585] : memref<64x400xf32, #tpu.memory_space<vmem>> -> memref<1x400xf32, #tpu.memory_space<vmem>>
      %835 = tpu.memref_squeeze %834 : memref<1x400xf32, #tpu.memory_space<vmem>> -> memref<400xf32, #tpu.memory_space<vmem>>
      %836 = tpu.memref_slice %arg5[%c0_i32_582, %c13_i32_583] : memref<1x16x!tpu.dma_semaphore, #tpu.memory_space<semaphore_mem>> -> memref<1x1x!tpu.dma_semaphore, #tpu.memory_space<semaphore_mem>>
      %837 = tpu.memref_squeeze %836 : memref<1x1x!tpu.dma_semaphore, #tpu.memory_space<semaphore_mem>> -> memref<!tpu.dma_semaphore, #tpu.memory_space<semaphore_mem>>
      tpu.wait_dma2 semaphore(%837 : memref<!tpu.dma_semaphore, #tpu.memory_space<semaphore_mem>>) src(%833 : memref<400xf32, #tpu.memory_space<any>>) dst(%835 : memref<400xf32, #tpu.memory_space<vmem>>)
      %c61_i32_586 = arith.constant 61 : i32
      %c0_i32_587 = arith.constant 0 : i32
      %c13_i32_588 = arith.constant 13 : i32
      %c0_i32_589 = arith.constant 0 : i32
      %838 = tpu.memref_slice %arg3[%831, %c0_i32_589] : memref<32x400xf32, #tpu.memory_space<any>> -> memref<1x400xf32, #tpu.memory_space<any>>
      %839 = tpu.memref_squeeze %838 : memref<1x400xf32, #tpu.memory_space<any>> -> memref<400xf32, #tpu.memory_space<any>>
      %c0_i32_590 = arith.constant 0 : i32
      %840 = tpu.memref_slice %arg4[%c61_i32_586, %c0_i32_590] : memref<64x400xf32, #tpu.memory_space<vmem>> -> memref<1x400xf32, #tpu.memory_space<vmem>>
      %841 = tpu.memref_squeeze %840 : memref<1x400xf32, #tpu.memory_space<vmem>> -> memref<400xf32, #tpu.memory_space<vmem>>
      %842 = tpu.memref_slice %arg5[%c0_i32_587, %c13_i32_588] : memref<1x16x!tpu.dma_semaphore, #tpu.memory_space<semaphore_mem>> -> memref<1x1x!tpu.dma_semaphore, #tpu.memory_space<semaphore_mem>>
      %843 = tpu.memref_squeeze %842 : memref<1x1x!tpu.dma_semaphore, #tpu.memory_space<semaphore_mem>> -> memref<!tpu.dma_semaphore, #tpu.memory_space<semaphore_mem>>
      tpu.enqueue_dma source(%839 : memref<400xf32, #tpu.memory_space<any>>) target(%841 : memref<400xf32, #tpu.memory_space<vmem>>) target_semaphore(%843 : memref<!tpu.dma_semaphore, #tpu.memory_space<semaphore_mem>>)
      %c62_i32 = arith.constant 62 : i32
      %844 = arith.addi %0, %c62_i32 : i32
      %845 = arith.index_cast %844 : i32 to index
      %846 = memref.load %arg2[%845] : memref<64xi32, #tpu.memory_space<smem>>
      %c0_i32_591 = arith.constant 0 : i32
      %c0_i32_592 = arith.constant 0 : i32
      %c0_i32_593 = arith.constant 0 : i32
      %c14_i32_594 = arith.constant 14 : i32
      %c0_i32_595 = arith.constant 0 : i32
      %847 = tpu.memref_slice %arg3[%c0_i32_591, %c0_i32_595] : memref<32x400xf32, #tpu.memory_space<any>> -> memref<1x400xf32, #tpu.memory_space<any>>
      %848 = tpu.memref_squeeze %847 : memref<1x400xf32, #tpu.memory_space<any>> -> memref<400xf32, #tpu.memory_space<any>>
      %c0_i32_596 = arith.constant 0 : i32
      %849 = tpu.memref_slice %arg4[%c0_i32_592, %c0_i32_596] : memref<64x400xf32, #tpu.memory_space<vmem>> -> memref<1x400xf32, #tpu.memory_space<vmem>>
      %850 = tpu.memref_squeeze %849 : memref<1x400xf32, #tpu.memory_space<vmem>> -> memref<400xf32, #tpu.memory_space<vmem>>
      %851 = tpu.memref_slice %arg5[%c0_i32_593, %c14_i32_594] : memref<1x16x!tpu.dma_semaphore, #tpu.memory_space<semaphore_mem>> -> memref<1x1x!tpu.dma_semaphore, #tpu.memory_space<semaphore_mem>>
      %852 = tpu.memref_squeeze %851 : memref<1x1x!tpu.dma_semaphore, #tpu.memory_space<semaphore_mem>> -> memref<!tpu.dma_semaphore, #tpu.memory_space<semaphore_mem>>
      tpu.wait_dma2 semaphore(%852 : memref<!tpu.dma_semaphore, #tpu.memory_space<semaphore_mem>>) src(%848 : memref<400xf32, #tpu.memory_space<any>>) dst(%850 : memref<400xf32, #tpu.memory_space<vmem>>)
      %c62_i32_597 = arith.constant 62 : i32
      %c0_i32_598 = arith.constant 0 : i32
      %c14_i32_599 = arith.constant 14 : i32
      %c0_i32_600 = arith.constant 0 : i32
      %853 = tpu.memref_slice %arg3[%846, %c0_i32_600] : memref<32x400xf32, #tpu.memory_space<any>> -> memref<1x400xf32, #tpu.memory_space<any>>
      %854 = tpu.memref_squeeze %853 : memref<1x400xf32, #tpu.memory_space<any>> -> memref<400xf32, #tpu.memory_space<any>>
      %c0_i32_601 = arith.constant 0 : i32
      %855 = tpu.memref_slice %arg4[%c62_i32_597, %c0_i32_601] : memref<64x400xf32, #tpu.memory_space<vmem>> -> memref<1x400xf32, #tpu.memory_space<vmem>>
      %856 = tpu.memref_squeeze %855 : memref<1x400xf32, #tpu.memory_space<vmem>> -> memref<400xf32, #tpu.memory_space<vmem>>
      %857 = tpu.memref_slice %arg5[%c0_i32_598, %c14_i32_599] : memref<1x16x!tpu.dma_semaphore, #tpu.memory_space<semaphore_mem>> -> memref<1x1x!tpu.dma_semaphore, #tpu.memory_space<semaphore_mem>>
      %858 = tpu.memref_squeeze %857 : memref<1x1x!tpu.dma_semaphore, #tpu.memory_space<semaphore_mem>> -> memref<!tpu.dma_semaphore, #tpu.memory_space<semaphore_mem>>
      tpu.enqueue_dma source(%854 : memref<400xf32, #tpu.memory_space<any>>) target(%856 : memref<400xf32, #tpu.memory_space<vmem>>) target_semaphore(%858 : memref<!tpu.dma_semaphore, #tpu.memory_space<semaphore_mem>>)
      %c63_i32 = arith.constant 63 : i32
      %859 = arith.addi %0, %c63_i32 : i32
      %860 = arith.index_cast %859 : i32 to index
      %861 = memref.load %arg2[%860] : memref<64xi32, #tpu.memory_space<smem>>
      %c0_i32_602 = arith.constant 0 : i32
      %c0_i32_603 = arith.constant 0 : i32
      %c0_i32_604 = arith.constant 0 : i32
      %c15_i32_605 = arith.constant 15 : i32
      %c0_i32_606 = arith.constant 0 : i32
      %862 = tpu.memref_slice %arg3[%c0_i32_602, %c0_i32_606] : memref<32x400xf32, #tpu.memory_space<any>> -> memref<1x400xf32, #tpu.memory_space<any>>
      %863 = tpu.memref_squeeze %862 : memref<1x400xf32, #tpu.memory_space<any>> -> memref<400xf32, #tpu.memory_space<any>>
      %c0_i32_607 = arith.constant 0 : i32
      %864 = tpu.memref_slice %arg4[%c0_i32_603, %c0_i32_607] : memref<64x400xf32, #tpu.memory_space<vmem>> -> memref<1x400xf32, #tpu.memory_space<vmem>>
      %865 = tpu.memref_squeeze %864 : memref<1x400xf32, #tpu.memory_space<vmem>> -> memref<400xf32, #tpu.memory_space<vmem>>
      %866 = tpu.memref_slice %arg5[%c0_i32_604, %c15_i32_605] : memref<1x16x!tpu.dma_semaphore, #tpu.memory_space<semaphore_mem>> -> memref<1x1x!tpu.dma_semaphore, #tpu.memory_space<semaphore_mem>>
      %867 = tpu.memref_squeeze %866 : memref<1x1x!tpu.dma_semaphore, #tpu.memory_space<semaphore_mem>> -> memref<!tpu.dma_semaphore, #tpu.memory_space<semaphore_mem>>
      tpu.wait_dma2 semaphore(%867 : memref<!tpu.dma_semaphore, #tpu.memory_space<semaphore_mem>>) src(%863 : memref<400xf32, #tpu.memory_space<any>>) dst(%865 : memref<400xf32, #tpu.memory_space<vmem>>)
      %c63_i32_608 = arith.constant 63 : i32
      %c0_i32_609 = arith.constant 0 : i32
      %c15_i32_610 = arith.constant 15 : i32
      %c0_i32_611 = arith.constant 0 : i32
      %868 = tpu.memref_slice %arg3[%861, %c0_i32_611] : memref<32x400xf32, #tpu.memory_space<any>> -> memref<1x400xf32, #tpu.memory_space<any>>
      %869 = tpu.memref_squeeze %868 : memref<1x400xf32, #tpu.memory_space<any>> -> memref<400xf32, #tpu.memory_space<any>>
      %c0_i32_612 = arith.constant 0 : i32
      %870 = tpu.memref_slice %arg4[%c63_i32_608, %c0_i32_612] : memref<64x400xf32, #tpu.memory_space<vmem>> -> memref<1x400xf32, #tpu.memory_space<vmem>>
      %871 = tpu.memref_squeeze %870 : memref<1x400xf32, #tpu.memory_space<vmem>> -> memref<400xf32, #tpu.memory_space<vmem>>
      %872 = tpu.memref_slice %arg5[%c0_i32_609, %c15_i32_610] : memref<1x16x!tpu.dma_semaphore, #tpu.memory_space<semaphore_mem>> -> memref<1x1x!tpu.dma_semaphore, #tpu.memory_space<semaphore_mem>>
      %873 = tpu.memref_squeeze %872 : memref<1x1x!tpu.dma_semaphore, #tpu.memory_space<semaphore_mem>> -> memref<!tpu.dma_semaphore, #tpu.memory_space<semaphore_mem>>
      tpu.enqueue_dma source(%869 : memref<400xf32, #tpu.memory_space<any>>) target(%871 : memref<400xf32, #tpu.memory_space<vmem>>) target_semaphore(%873 : memref<!tpu.dma_semaphore, #tpu.memory_space<semaphore_mem>>)
      %c0_i32_613 = arith.constant 0 : i32
      %c0_i32_614 = arith.constant 0 : i32
      %c0_i32_615 = arith.constant 0 : i32
      %c0_i32_616 = arith.constant 0 : i32
      %c0_i32_617 = arith.constant 0 : i32
      %874 = tpu.memref_slice %arg3[%c0_i32_613, %c0_i32_617] : memref<32x400xf32, #tpu.memory_space<any>> -> memref<1x400xf32, #tpu.memory_space<any>>
      %875 = tpu.memref_squeeze %874 : memref<1x400xf32, #tpu.memory_space<any>> -> memref<400xf32, #tpu.memory_space<any>>
      %c0_i32_618 = arith.constant 0 : i32
      %876 = tpu.memref_slice %arg4[%c0_i32_614, %c0_i32_618] : memref<64x400xf32, #tpu.memory_space<vmem>> -> memref<1x400xf32, #tpu.memory_space<vmem>>
      %877 = tpu.memref_squeeze %876 : memref<1x400xf32, #tpu.memory_space<vmem>> -> memref<400xf32, #tpu.memory_space<vmem>>
      %878 = tpu.memref_slice %arg5[%c0_i32_615, %c0_i32_616] : memref<1x16x!tpu.dma_semaphore, #tpu.memory_space<semaphore_mem>> -> memref<1x1x!tpu.dma_semaphore, #tpu.memory_space<semaphore_mem>>
      %879 = tpu.memref_squeeze %878 : memref<1x1x!tpu.dma_semaphore, #tpu.memory_space<semaphore_mem>> -> memref<!tpu.dma_semaphore, #tpu.memory_space<semaphore_mem>>
      tpu.wait_dma2 semaphore(%879 : memref<!tpu.dma_semaphore, #tpu.memory_space<semaphore_mem>>) src(%875 : memref<400xf32, #tpu.memory_space<any>>) dst(%877 : memref<400xf32, #tpu.memory_space<vmem>>)
      %c0_i32_619 = arith.constant 0 : i32
      %c0_i32_620 = arith.constant 0 : i32
      %c0_i32_621 = arith.constant 0 : i32
      %c1_i32_622 = arith.constant 1 : i32
      %c0_i32_623 = arith.constant 0 : i32
      %880 = tpu.memref_slice %arg3[%c0_i32_619, %c0_i32_623] : memref<32x400xf32, #tpu.memory_space<any>> -> memref<1x400xf32, #tpu.memory_space<any>>
      %881 = tpu.memref_squeeze %880 : memref<1x400xf32, #tpu.memory_space<any>> -> memref<400xf32, #tpu.memory_space<any>>
      %c0_i32_624 = arith.constant 0 : i32
      %882 = tpu.memref_slice %arg4[%c0_i32_620, %c0_i32_624] : memref<64x400xf32, #tpu.memory_space<vmem>> -> memref<1x400xf32, #tpu.memory_space<vmem>>
      %883 = tpu.memref_squeeze %882 : memref<1x400xf32, #tpu.memory_space<vmem>> -> memref<400xf32, #tpu.memory_space<vmem>>
      %884 = tpu.memref_slice %arg5[%c0_i32_621, %c1_i32_622] : memref<1x16x!tpu.dma_semaphore, #tpu.memory_space<semaphore_mem>> -> memref<1x1x!tpu.dma_semaphore, #tpu.memory_space<semaphore_mem>>
      %885 = tpu.memref_squeeze %884 : memref<1x1x!tpu.dma_semaphore, #tpu.memory_space<semaphore_mem>> -> memref<!tpu.dma_semaphore, #tpu.memory_space<semaphore_mem>>
      tpu.wait_dma2 semaphore(%885 : memref<!tpu.dma_semaphore, #tpu.memory_space<semaphore_mem>>) src(%881 : memref<400xf32, #tpu.memory_space<any>>) dst(%883 : memref<400xf32, #tpu.memory_space<vmem>>)
      %c0_i32_625 = arith.constant 0 : i32
      %c0_i32_626 = arith.constant 0 : i32
      %c0_i32_627 = arith.constant 0 : i32
      %c2_i32_628 = arith.constant 2 : i32
      %c0_i32_629 = arith.constant 0 : i32
      %886 = tpu.memref_slice %arg3[%c0_i32_625, %c0_i32_629] : memref<32x400xf32, #tpu.memory_space<any>> -> memref<1x400xf32, #tpu.memory_space<any>>
      %887 = tpu.memref_squeeze %886 : memref<1x400xf32, #tpu.memory_space<any>> -> memref<400xf32, #tpu.memory_space<any>>
      %c0_i32_630 = arith.constant 0 : i32
      %888 = tpu.memref_slice %arg4[%c0_i32_626, %c0_i32_630] : memref<64x400xf32, #tpu.memory_space<vmem>> -> memref<1x400xf32, #tpu.memory_space<vmem>>
      %889 = tpu.memref_squeeze %888 : memref<1x400xf32, #tpu.memory_space<vmem>> -> memref<400xf32, #tpu.memory_space<vmem>>
      %890 = tpu.memref_slice %arg5[%c0_i32_627, %c2_i32_628] : memref<1x16x!tpu.dma_semaphore, #tpu.memory_space<semaphore_mem>> -> memref<1x1x!tpu.dma_semaphore, #tpu.memory_space<semaphore_mem>>
      %891 = tpu.memref_squeeze %890 : memref<1x1x!tpu.dma_semaphore, #tpu.memory_space<semaphore_mem>> -> memref<!tpu.dma_semaphore, #tpu.memory_space<semaphore_mem>>
      tpu.wait_dma2 semaphore(%891 : memref<!tpu.dma_semaphore, #tpu.memory_space<semaphore_mem>>) src(%887 : memref<400xf32, #tpu.memory_space<any>>) dst(%889 : memref<400xf32, #tpu.memory_space<vmem>>)
      %c0_i32_631 = arith.constant 0 : i32
      %c0_i32_632 = arith.constant 0 : i32
      %c0_i32_633 = arith.constant 0 : i32
      %c3_i32_634 = arith.constant 3 : i32
      %c0_i32_635 = arith.constant 0 : i32
      %892 = tpu.memref_slice %arg3[%c0_i32_631, %c0_i32_635] : memref<32x400xf32, #tpu.memory_space<any>> -> memref<1x400xf32, #tpu.memory_space<any>>
      %893 = tpu.memref_squeeze %892 : memref<1x400xf32, #tpu.memory_space<any>> -> memref<400xf32, #tpu.memory_space<any>>
      %c0_i32_636 = arith.constant 0 : i32
      %894 = tpu.memref_slice %arg4[%c0_i32_632, %c0_i32_636] : memref<64x400xf32, #tpu.memory_space<vmem>> -> memref<1x400xf32, #tpu.memory_space<vmem>>
      %895 = tpu.memref_squeeze %894 : memref<1x400xf32, #tpu.memory_space<vmem>> -> memref<400xf32, #tpu.memory_space<vmem>>
      %896 = tpu.memref_slice %arg5[%c0_i32_633, %c3_i32_634] : memref<1x16x!tpu.dma_semaphore, #tpu.memory_space<semaphore_mem>> -> memref<1x1x!tpu.dma_semaphore, #tpu.memory_space<semaphore_mem>>
      %897 = tpu.memref_squeeze %896 : memref<1x1x!tpu.dma_semaphore, #tpu.memory_space<semaphore_mem>> -> memref<!tpu.dma_semaphore, #tpu.memory_space<semaphore_mem>>
      tpu.wait_dma2 semaphore(%897 : memref<!tpu.dma_semaphore, #tpu.memory_space<semaphore_mem>>) src(%893 : memref<400xf32, #tpu.memory_space<any>>) dst(%895 : memref<400xf32, #tpu.memory_space<vmem>>)
      %c0_i32_637 = arith.constant 0 : i32
      %c0_i32_638 = arith.constant 0 : i32
      %c0_i32_639 = arith.constant 0 : i32
      %c4_i32_640 = arith.constant 4 : i32
      %c0_i32_641 = arith.constant 0 : i32
      %898 = tpu.memref_slice %arg3[%c0_i32_637, %c0_i32_641] : memref<32x400xf32, #tpu.memory_space<any>> -> memref<1x400xf32, #tpu.memory_space<any>>
      %899 = tpu.memref_squeeze %898 : memref<1x400xf32, #tpu.memory_space<any>> -> memref<400xf32, #tpu.memory_space<any>>
      %c0_i32_642 = arith.constant 0 : i32
      %900 = tpu.memref_slice %arg4[%c0_i32_638, %c0_i32_642] : memref<64x400xf32, #tpu.memory_space<vmem>> -> memref<1x400xf32, #tpu.memory_space<vmem>>
      %901 = tpu.memref_squeeze %900 : memref<1x400xf32, #tpu.memory_space<vmem>> -> memref<400xf32, #tpu.memory_space<vmem>>
      %902 = tpu.memref_slice %arg5[%c0_i32_639, %c4_i32_640] : memref<1x16x!tpu.dma_semaphore, #tpu.memory_space<semaphore_mem>> -> memref<1x1x!tpu.dma_semaphore, #tpu.memory_space<semaphore_mem>>
      %903 = tpu.memref_squeeze %902 : memref<1x1x!tpu.dma_semaphore, #tpu.memory_space<semaphore_mem>> -> memref<!tpu.dma_semaphore, #tpu.memory_space<semaphore_mem>>
      tpu.wait_dma2 semaphore(%903 : memref<!tpu.dma_semaphore, #tpu.memory_space<semaphore_mem>>) src(%899 : memref<400xf32, #tpu.memory_space<any>>) dst(%901 : memref<400xf32, #tpu.memory_space<vmem>>)
      %c0_i32_643 = arith.constant 0 : i32
      %c0_i32_644 = arith.constant 0 : i32
      %c0_i32_645 = arith.constant 0 : i32
      %c5_i32_646 = arith.constant 5 : i32
      %c0_i32_647 = arith.constant 0 : i32
      %904 = tpu.memref_slice %arg3[%c0_i32_643, %c0_i32_647] : memref<32x400xf32, #tpu.memory_space<any>> -> memref<1x400xf32, #tpu.memory_space<any>>
      %905 = tpu.memref_squeeze %904 : memref<1x400xf32, #tpu.memory_space<any>> -> memref<400xf32, #tpu.memory_space<any>>
      %c0_i32_648 = arith.constant 0 : i32
      %906 = tpu.memref_slice %arg4[%c0_i32_644, %c0_i32_648] : memref<64x400xf32, #tpu.memory_space<vmem>> -> memref<1x400xf32, #tpu.memory_space<vmem>>
      %907 = tpu.memref_squeeze %906 : memref<1x400xf32, #tpu.memory_space<vmem>> -> memref<400xf32, #tpu.memory_space<vmem>>
      %908 = tpu.memref_slice %arg5[%c0_i32_645, %c5_i32_646] : memref<1x16x!tpu.dma_semaphore, #tpu.memory_space<semaphore_mem>> -> memref<1x1x!tpu.dma_semaphore, #tpu.memory_space<semaphore_mem>>
      %909 = tpu.memref_squeeze %908 : memref<1x1x!tpu.dma_semaphore, #tpu.memory_space<semaphore_mem>> -> memref<!tpu.dma_semaphore, #tpu.memory_space<semaphore_mem>>
      tpu.wait_dma2 semaphore(%909 : memref<!tpu.dma_semaphore, #tpu.memory_space<semaphore_mem>>) src(%905 : memref<400xf32, #tpu.memory_space<any>>) dst(%907 : memref<400xf32, #tpu.memory_space<vmem>>)
      %c0_i32_649 = arith.constant 0 : i32
      %c0_i32_650 = arith.constant 0 : i32
      %c0_i32_651 = arith.constant 0 : i32
      %c6_i32_652 = arith.constant 6 : i32
      %c0_i32_653 = arith.constant 0 : i32
      %910 = tpu.memref_slice %arg3[%c0_i32_649, %c0_i32_653] : memref<32x400xf32, #tpu.memory_space<any>> -> memref<1x400xf32, #tpu.memory_space<any>>
      %911 = tpu.memref_squeeze %910 : memref<1x400xf32, #tpu.memory_space<any>> -> memref<400xf32, #tpu.memory_space<any>>
      %c0_i32_654 = arith.constant 0 : i32
      %912 = tpu.memref_slice %arg4[%c0_i32_650, %c0_i32_654] : memref<64x400xf32, #tpu.memory_space<vmem>> -> memref<1x400xf32, #tpu.memory_space<vmem>>
      %913 = tpu.memref_squeeze %912 : memref<1x400xf32, #tpu.memory_space<vmem>> -> memref<400xf32, #tpu.memory_space<vmem>>
      %914 = tpu.memref_slice %arg5[%c0_i32_651, %c6_i32_652] : memref<1x16x!tpu.dma_semaphore, #tpu.memory_space<semaphore_mem>> -> memref<1x1x!tpu.dma_semaphore, #tpu.memory_space<semaphore_mem>>
      %915 = tpu.memref_squeeze %914 : memref<1x1x!tpu.dma_semaphore, #tpu.memory_space<semaphore_mem>> -> memref<!tpu.dma_semaphore, #tpu.memory_space<semaphore_mem>>
      tpu.wait_dma2 semaphore(%915 : memref<!tpu.dma_semaphore, #tpu.memory_space<semaphore_mem>>) src(%911 : memref<400xf32, #tpu.memory_space<any>>) dst(%913 : memref<400xf32, #tpu.memory_space<vmem>>)
      %c0_i32_655 = arith.constant 0 : i32
      %c0_i32_656 = arith.constant 0 : i32
      %c0_i32_657 = arith.constant 0 : i32
      %c7_i32_658 = arith.constant 7 : i32
      %c0_i32_659 = arith.constant 0 : i32
      %916 = tpu.memref_slice %arg3[%c0_i32_655, %c0_i32_659] : memref<32x400xf32, #tpu.memory_space<any>> -> memref<1x400xf32, #tpu.memory_space<any>>
      %917 = tpu.memref_squeeze %916 : memref<1x400xf32, #tpu.memory_space<any>> -> memref<400xf32, #tpu.memory_space<any>>
      %c0_i32_660 = arith.constant 0 : i32
      %918 = tpu.memref_slice %arg4[%c0_i32_656, %c0_i32_660] : memref<64x400xf32, #tpu.memory_space<vmem>> -> memref<1x400xf32, #tpu.memory_space<vmem>>
      %919 = tpu.memref_squeeze %918 : memref<1x400xf32, #tpu.memory_space<vmem>> -> memref<400xf32, #tpu.memory_space<vmem>>
      %920 = tpu.memref_slice %arg5[%c0_i32_657, %c7_i32_658] : memref<1x16x!tpu.dma_semaphore, #tpu.memory_space<semaphore_mem>> -> memref<1x1x!tpu.dma_semaphore, #tpu.memory_space<semaphore_mem>>
      %921 = tpu.memref_squeeze %920 : memref<1x1x!tpu.dma_semaphore, #tpu.memory_space<semaphore_mem>> -> memref<!tpu.dma_semaphore, #tpu.memory_space<semaphore_mem>>
      tpu.wait_dma2 semaphore(%921 : memref<!tpu.dma_semaphore, #tpu.memory_space<semaphore_mem>>) src(%917 : memref<400xf32, #tpu.memory_space<any>>) dst(%919 : memref<400xf32, #tpu.memory_space<vmem>>)
      %c0_i32_661 = arith.constant 0 : i32
      %c0_i32_662 = arith.constant 0 : i32
      %c0_i32_663 = arith.constant 0 : i32
      %c8_i32_664 = arith.constant 8 : i32
      %c0_i32_665 = arith.constant 0 : i32
      %922 = tpu.memref_slice %arg3[%c0_i32_661, %c0_i32_665] : memref<32x400xf32, #tpu.memory_space<any>> -> memref<1x400xf32, #tpu.memory_space<any>>
      %923 = tpu.memref_squeeze %922 : memref<1x400xf32, #tpu.memory_space<any>> -> memref<400xf32, #tpu.memory_space<any>>
      %c0_i32_666 = arith.constant 0 : i32
      %924 = tpu.memref_slice %arg4[%c0_i32_662, %c0_i32_666] : memref<64x400xf32, #tpu.memory_space<vmem>> -> memref<1x400xf32, #tpu.memory_space<vmem>>
      %925 = tpu.memref_squeeze %924 : memref<1x400xf32, #tpu.memory_space<vmem>> -> memref<400xf32, #tpu.memory_space<vmem>>
      %926 = tpu.memref_slice %arg5[%c0_i32_663, %c8_i32_664] : memref<1x16x!tpu.dma_semaphore, #tpu.memory_space<semaphore_mem>> -> memref<1x1x!tpu.dma_semaphore, #tpu.memory_space<semaphore_mem>>
      %927 = tpu.memref_squeeze %926 : memref<1x1x!tpu.dma_semaphore, #tpu.memory_space<semaphore_mem>> -> memref<!tpu.dma_semaphore, #tpu.memory_space<semaphore_mem>>
      tpu.wait_dma2 semaphore(%927 : memref<!tpu.dma_semaphore, #tpu.memory_space<semaphore_mem>>) src(%923 : memref<400xf32, #tpu.memory_space<any>>) dst(%925 : memref<400xf32, #tpu.memory_space<vmem>>)
      %c0_i32_667 = arith.constant 0 : i32
      %c0_i32_668 = arith.constant 0 : i32
      %c0_i32_669 = arith.constant 0 : i32
      %c9_i32_670 = arith.constant 9 : i32
      %c0_i32_671 = arith.constant 0 : i32
      %928 = tpu.memref_slice %arg3[%c0_i32_667, %c0_i32_671] : memref<32x400xf32, #tpu.memory_space<any>> -> memref<1x400xf32, #tpu.memory_space<any>>
      %929 = tpu.memref_squeeze %928 : memref<1x400xf32, #tpu.memory_space<any>> -> memref<400xf32, #tpu.memory_space<any>>
      %c0_i32_672 = arith.constant 0 : i32
      %930 = tpu.memref_slice %arg4[%c0_i32_668, %c0_i32_672] : memref<64x400xf32, #tpu.memory_space<vmem>> -> memref<1x400xf32, #tpu.memory_space<vmem>>
      %931 = tpu.memref_squeeze %930 : memref<1x400xf32, #tpu.memory_space<vmem>> -> memref<400xf32, #tpu.memory_space<vmem>>
      %932 = tpu.memref_slice %arg5[%c0_i32_669, %c9_i32_670] : memref<1x16x!tpu.dma_semaphore, #tpu.memory_space<semaphore_mem>> -> memref<1x1x!tpu.dma_semaphore, #tpu.memory_space<semaphore_mem>>
      %933 = tpu.memref_squeeze %932 : memref<1x1x!tpu.dma_semaphore, #tpu.memory_space<semaphore_mem>> -> memref<!tpu.dma_semaphore, #tpu.memory_space<semaphore_mem>>
      tpu.wait_dma2 semaphore(%933 : memref<!tpu.dma_semaphore, #tpu.memory_space<semaphore_mem>>) src(%929 : memref<400xf32, #tpu.memory_space<any>>) dst(%931 : memref<400xf32, #tpu.memory_space<vmem>>)
      %c0_i32_673 = arith.constant 0 : i32
      %c0_i32_674 = arith.constant 0 : i32
      %c0_i32_675 = arith.constant 0 : i32
      %c10_i32_676 = arith.constant 10 : i32
      %c0_i32_677 = arith.constant 0 : i32
      %934 = tpu.memref_slice %arg3[%c0_i32_673, %c0_i32_677] : memref<32x400xf32, #tpu.memory_space<any>> -> memref<1x400xf32, #tpu.memory_space<any>>
      %935 = tpu.memref_squeeze %934 : memref<1x400xf32, #tpu.memory_space<any>> -> memref<400xf32, #tpu.memory_space<any>>
      %c0_i32_678 = arith.constant 0 : i32
      %936 = tpu.memref_slice %arg4[%c0_i32_674, %c0_i32_678] : memref<64x400xf32, #tpu.memory_space<vmem>> -> memref<1x400xf32, #tpu.memory_space<vmem>>
      %937 = tpu.memref_squeeze %936 : memref<1x400xf32, #tpu.memory_space<vmem>> -> memref<400xf32, #tpu.memory_space<vmem>>
      %938 = tpu.memref_slice %arg5[%c0_i32_675, %c10_i32_676] : memref<1x16x!tpu.dma_semaphore, #tpu.memory_space<semaphore_mem>> -> memref<1x1x!tpu.dma_semaphore, #tpu.memory_space<semaphore_mem>>
      %939 = tpu.memref_squeeze %938 : memref<1x1x!tpu.dma_semaphore, #tpu.memory_space<semaphore_mem>> -> memref<!tpu.dma_semaphore, #tpu.memory_space<semaphore_mem>>
      tpu.wait_dma2 semaphore(%939 : memref<!tpu.dma_semaphore, #tpu.memory_space<semaphore_mem>>) src(%935 : memref<400xf32, #tpu.memory_space<any>>) dst(%937 : memref<400xf32, #tpu.memory_space<vmem>>)
      %c0_i32_679 = arith.constant 0 : i32
      %c0_i32_680 = arith.constant 0 : i32
      %c0_i32_681 = arith.constant 0 : i32
      %c11_i32_682 = arith.constant 11 : i32
      %c0_i32_683 = arith.constant 0 : i32
      %940 = tpu.memref_slice %arg3[%c0_i32_679, %c0_i32_683] : memref<32x400xf32, #tpu.memory_space<any>> -> memref<1x400xf32, #tpu.memory_space<any>>
      %941 = tpu.memref_squeeze %940 : memref<1x400xf32, #tpu.memory_space<any>> -> memref<400xf32, #tpu.memory_space<any>>
      %c0_i32_684 = arith.constant 0 : i32
      %942 = tpu.memref_slice %arg4[%c0_i32_680, %c0_i32_684] : memref<64x400xf32, #tpu.memory_space<vmem>> -> memref<1x400xf32, #tpu.memory_space<vmem>>
      %943 = tpu.memref_squeeze %942 : memref<1x400xf32, #tpu.memory_space<vmem>> -> memref<400xf32, #tpu.memory_space<vmem>>
      %944 = tpu.memref_slice %arg5[%c0_i32_681, %c11_i32_682] : memref<1x16x!tpu.dma_semaphore, #tpu.memory_space<semaphore_mem>> -> memref<1x1x!tpu.dma_semaphore, #tpu.memory_space<semaphore_mem>>
      %945 = tpu.memref_squeeze %944 : memref<1x1x!tpu.dma_semaphore, #tpu.memory_space<semaphore_mem>> -> memref<!tpu.dma_semaphore, #tpu.memory_space<semaphore_mem>>
      tpu.wait_dma2 semaphore(%945 : memref<!tpu.dma_semaphore, #tpu.memory_space<semaphore_mem>>) src(%941 : memref<400xf32, #tpu.memory_space<any>>) dst(%943 : memref<400xf32, #tpu.memory_space<vmem>>)
      %c0_i32_685 = arith.constant 0 : i32
      %c0_i32_686 = arith.constant 0 : i32
      %c0_i32_687 = arith.constant 0 : i32
      %c12_i32_688 = arith.constant 12 : i32
      %c0_i32_689 = arith.constant 0 : i32
      %946 = tpu.memref_slice %arg3[%c0_i32_685, %c0_i32_689] : memref<32x400xf32, #tpu.memory_space<any>> -> memref<1x400xf32, #tpu.memory_space<any>>
      %947 = tpu.memref_squeeze %946 : memref<1x400xf32, #tpu.memory_space<any>> -> memref<400xf32, #tpu.memory_space<any>>
      %c0_i32_690 = arith.constant 0 : i32
      %948 = tpu.memref_slice %arg4[%c0_i32_686, %c0_i32_690] : memref<64x400xf32, #tpu.memory_space<vmem>> -> memref<1x400xf32, #tpu.memory_space<vmem>>
      %949 = tpu.memref_squeeze %948 : memref<1x400xf32, #tpu.memory_space<vmem>> -> memref<400xf32, #tpu.memory_space<vmem>>
      %950 = tpu.memref_slice %arg5[%c0_i32_687, %c12_i32_688] : memref<1x16x!tpu.dma_semaphore, #tpu.memory_space<semaphore_mem>> -> memref<1x1x!tpu.dma_semaphore, #tpu.memory_space<semaphore_mem>>
      %951 = tpu.memref_squeeze %950 : memref<1x1x!tpu.dma_semaphore, #tpu.memory_space<semaphore_mem>> -> memref<!tpu.dma_semaphore, #tpu.memory_space<semaphore_mem>>
      tpu.wait_dma2 semaphore(%951 : memref<!tpu.dma_semaphore, #tpu.memory_space<semaphore_mem>>) src(%947 : memref<400xf32, #tpu.memory_space<any>>) dst(%949 : memref<400xf32, #tpu.memory_space<vmem>>)
      %c0_i32_691 = arith.constant 0 : i32
      %c0_i32_692 = arith.constant 0 : i32
      %c0_i32_693 = arith.constant 0 : i32
      %c13_i32_694 = arith.constant 13 : i32
      %c0_i32_695 = arith.constant 0 : i32
      %952 = tpu.memref_slice %arg3[%c0_i32_691, %c0_i32_695] : memref<32x400xf32, #tpu.memory_space<any>> -> memref<1x400xf32, #tpu.memory_space<any>>
      %953 = tpu.memref_squeeze %952 : memref<1x400xf32, #tpu.memory_space<any>> -> memref<400xf32, #tpu.memory_space<any>>
      %c0_i32_696 = arith.constant 0 : i32
      %954 = tpu.memref_slice %arg4[%c0_i32_692, %c0_i32_696] : memref<64x400xf32, #tpu.memory_space<vmem>> -> memref<1x400xf32, #tpu.memory_space<vmem>>
      %955 = tpu.memref_squeeze %954 : memref<1x400xf32, #tpu.memory_space<vmem>> -> memref<400xf32, #tpu.memory_space<vmem>>
      %956 = tpu.memref_slice %arg5[%c0_i32_693, %c13_i32_694] : memref<1x16x!tpu.dma_semaphore, #tpu.memory_space<semaphore_mem>> -> memref<1x1x!tpu.dma_semaphore, #tpu.memory_space<semaphore_mem>>
      %957 = tpu.memref_squeeze %956 : memref<1x1x!tpu.dma_semaphore, #tpu.memory_space<semaphore_mem>> -> memref<!tpu.dma_semaphore, #tpu.memory_space<semaphore_mem>>
      tpu.wait_dma2 semaphore(%957 : memref<!tpu.dma_semaphore, #tpu.memory_space<semaphore_mem>>) src(%953 : memref<400xf32, #tpu.memory_space<any>>) dst(%955 : memref<400xf32, #tpu.memory_space<vmem>>)
      %c0_i32_697 = arith.constant 0 : i32
      %c0_i32_698 = arith.constant 0 : i32
      %c0_i32_699 = arith.constant 0 : i32
      %c14_i32_700 = arith.constant 14 : i32
      %c0_i32_701 = arith.constant 0 : i32
      %958 = tpu.memref_slice %arg3[%c0_i32_697, %c0_i32_701] : memref<32x400xf32, #tpu.memory_space<any>> -> memref<1x400xf32, #tpu.memory_space<any>>
      %959 = tpu.memref_squeeze %958 : memref<1x400xf32, #tpu.memory_space<any>> -> memref<400xf32, #tpu.memory_space<any>>
      %c0_i32_702 = arith.constant 0 : i32
      %960 = tpu.memref_slice %arg4[%c0_i32_698, %c0_i32_702] : memref<64x400xf32, #tpu.memory_space<vmem>> -> memref<1x400xf32, #tpu.memory_space<vmem>>
      %961 = tpu.memref_squeeze %960 : memref<1x400xf32, #tpu.memory_space<vmem>> -> memref<400xf32, #tpu.memory_space<vmem>>
      %962 = tpu.memref_slice %arg5[%c0_i32_699, %c14_i32_700] : memref<1x16x!tpu.dma_semaphore, #tpu.memory_space<semaphore_mem>> -> memref<1x1x!tpu.dma_semaphore, #tpu.memory_space<semaphore_mem>>
      %963 = tpu.memref_squeeze %962 : memref<1x1x!tpu.dma_semaphore, #tpu.memory_space<semaphore_mem>> -> memref<!tpu.dma_semaphore, #tpu.memory_space<semaphore_mem>>
      tpu.wait_dma2 semaphore(%963 : memref<!tpu.dma_semaphore, #tpu.memory_space<semaphore_mem>>) src(%959 : memref<400xf32, #tpu.memory_space<any>>) dst(%961 : memref<400xf32, #tpu.memory_space<vmem>>)
      %c0_i32_703 = arith.constant 0 : i32
      %c0_i32_704 = arith.constant 0 : i32
      %c0_i32_705 = arith.constant 0 : i32
      %c15_i32_706 = arith.constant 15 : i32
      %c0_i32_707 = arith.constant 0 : i32
      %964 = tpu.memref_slice %arg3[%c0_i32_703, %c0_i32_707] : memref<32x400xf32, #tpu.memory_space<any>> -> memref<1x400xf32, #tpu.memory_space<any>>
      %965 = tpu.memref_squeeze %964 : memref<1x400xf32, #tpu.memory_space<any>> -> memref<400xf32, #tpu.memory_space<any>>
      %c0_i32_708 = arith.constant 0 : i32
      %966 = tpu.memref_slice %arg4[%c0_i32_704, %c0_i32_708] : memref<64x400xf32, #tpu.memory_space<vmem>> -> memref<1x400xf32, #tpu.memory_space<vmem>>
      %967 = tpu.memref_squeeze %966 : memref<1x400xf32, #tpu.memory_space<vmem>> -> memref<400xf32, #tpu.memory_space<vmem>>
      %968 = tpu.memref_slice %arg5[%c0_i32_705, %c15_i32_706] : memref<1x16x!tpu.dma_semaphore, #tpu.memory_space<semaphore_mem>> -> memref<1x1x!tpu.dma_semaphore, #tpu.memory_space<semaphore_mem>>
      %969 = tpu.memref_squeeze %968 : memref<1x1x!tpu.dma_semaphore, #tpu.memory_space<semaphore_mem>> -> memref<!tpu.dma_semaphore, #tpu.memory_space<semaphore_mem>>
      tpu.wait_dma2 semaphore(%969 : memref<!tpu.dma_semaphore, #tpu.memory_space<semaphore_mem>>) src(%965 : memref<400xf32, #tpu.memory_space<any>>) dst(%967 : memref<400xf32, #tpu.memory_space<vmem>>)
    } else {
    }
    %c64_i32_2 = arith.constant 64 : i32
    %7 = arith.cmpi slt, %3, %c64_i32_2 : i32
    %8 = arith.extui %7 : i1 to i32
    %c0_i32_3 = arith.constant 0 : i32
    %9 = arith.cmpi ne, %8, %c0_i32_3 : i32
    scf.if %9 {
      %c16_i32 = arith.constant 16 : i32
      %10 = arith.minsi %3, %c16_i32 : i32
      %c0_i32_4 = arith.constant 0 : i32
      %c0_i32_5 = arith.constant 0 : i32
      %11 = arith.subi %10, %c0_i32_5 : i32
      %12 = arith.addi %c0_i32_5, %11 : i32
      %c1_i32 = arith.constant 1 : i32
      scf.for %arg6 = %c0_i32_5 to %12 step %c1_i32  : i32 {
        %c16_i32_12 = arith.constant 16 : i32
        %c0_i32_13 = arith.constant 0 : i32
        %17 = arith.cmpi eq, %c16_i32_12, %c0_i32_13 : i32
        %c1_i32_14 = arith.constant 1 : i32
        %18 = arith.select %17, %c1_i32_14, %c16_i32_12 : i32
        %19 = arith.remsi %arg6, %18 : i32
        %c0_i32_15 = arith.constant 0 : i32
        %20 = arith.cmpi ne, %19, %c0_i32_15 : i32
        %c0_i32_16 = arith.constant 0 : i32
        %21 = arith.cmpi slt, %19, %c0_i32_16 : i32
        %c0_i32_17 = arith.constant 0 : i32
        %22 = arith.cmpi slt, %18, %c0_i32_17 : i32
        %23 = arith.xori %21, %22 : i1
        %24 = arith.andi %23, %20 : i1
        %25 = arith.addi %19, %18 : i32
        %26 = arith.select %24, %25, %19 : i32
        %27 = arith.addi %0, %arg6 : i32
        %28 = arith.index_cast %27 : i32 to index
        %29 = memref.load %arg2[%28] : memref<64xi32, #tpu.memory_space<smem>>
        %c0_i32_18 = arith.constant 0 : i32
        %c0_i32_19 = arith.constant 0 : i32
        %30 = tpu.memref_slice %arg3[%29, %c0_i32_19] : memref<32x400xf32, #tpu.memory_space<any>> -> memref<1x400xf32, #tpu.memory_space<any>>
        %31 = tpu.memref_squeeze %30 : memref<1x400xf32, #tpu.memory_space<any>> -> memref<400xf32, #tpu.memory_space<any>>
        %c0_i32_20 = arith.constant 0 : i32
        %32 = tpu.memref_slice %arg4[%arg6, %c0_i32_20] : memref<64x400xf32, #tpu.memory_space<vmem>> -> memref<1x400xf32, #tpu.memory_space<vmem>>
        %33 = tpu.memref_squeeze %32 : memref<1x400xf32, #tpu.memory_space<vmem>> -> memref<400xf32, #tpu.memory_space<vmem>>
        %34 = tpu.memref_slice %arg5[%c0_i32_18, %26] : memref<1x16x!tpu.dma_semaphore, #tpu.memory_space<semaphore_mem>> -> memref<1x1x!tpu.dma_semaphore, #tpu.memory_space<semaphore_mem>>
        %35 = tpu.memref_squeeze %34 : memref<1x1x!tpu.dma_semaphore, #tpu.memory_space<semaphore_mem>> -> memref<!tpu.dma_semaphore, #tpu.memory_space<semaphore_mem>>
        tpu.enqueue_dma source(%31 : memref<400xf32, #tpu.memory_space<any>>) target(%33 : memref<400xf32, #tpu.memory_space<vmem>>) target_semaphore(%35 : memref<!tpu.dma_semaphore, #tpu.memory_space<semaphore_mem>>)
      }
      %c0_i32_6 = arith.constant 0 : i32
      %c16_i32_7 = arith.constant 16 : i32
      %13 = arith.subi %3, %c16_i32_7 : i32
      %14 = arith.addi %c16_i32_7, %13 : i32
      %c1_i32_8 = arith.constant 1 : i32
      scf.for %arg6 = %c16_i32_7 to %14 step %c1_i32_8  : i32 {
        %17 = arith.addi %0, %arg6 : i32
        %18 = arith.index_cast %17 : i32 to index
        %19 = memref.load %arg2[%18] : memref<64xi32, #tpu.memory_space<smem>>
        %c16_i32_12 = arith.constant 16 : i32
        %c0_i32_13 = arith.constant 0 : i32
        %20 = arith.cmpi eq, %c16_i32_12, %c0_i32_13 : i32
        %c1_i32_14 = arith.constant 1 : i32
        %21 = arith.select %20, %c1_i32_14, %c16_i32_12 : i32
        %22 = arith.remsi %arg6, %21 : i32
        %c0_i32_15 = arith.constant 0 : i32
        %23 = arith.cmpi ne, %22, %c0_i32_15 : i32
        %c0_i32_16 = arith.constant 0 : i32
        %24 = arith.cmpi slt, %22, %c0_i32_16 : i32
        %c0_i32_17 = arith.constant 0 : i32
        %25 = arith.cmpi slt, %21, %c0_i32_17 : i32
        %26 = arith.xori %24, %25 : i1
        %27 = arith.andi %26, %23 : i1
        %28 = arith.addi %22, %21 : i32
        %29 = arith.select %27, %28, %22 : i32
        %c0_i32_18 = arith.constant 0 : i32
        %c0_i32_19 = arith.constant 0 : i32
        %c0_i32_20 = arith.constant 0 : i32
        %c0_i32_21 = arith.constant 0 : i32
        %30 = tpu.memref_slice %arg3[%c0_i32_18, %c0_i32_21] : memref<32x400xf32, #tpu.memory_space<any>> -> memref<1x400xf32, #tpu.memory_space<any>>
        %31 = tpu.memref_squeeze %30 : memref<1x400xf32, #tpu.memory_space<any>> -> memref<400xf32, #tpu.memory_space<any>>
        %c0_i32_22 = arith.constant 0 : i32
        %32 = tpu.memref_slice %arg4[%c0_i32_19, %c0_i32_22] : memref<64x400xf32, #tpu.memory_space<vmem>> -> memref<1x400xf32, #tpu.memory_space<vmem>>
        %33 = tpu.memref_squeeze %32 : memref<1x400xf32, #tpu.memory_space<vmem>> -> memref<400xf32, #tpu.memory_space<vmem>>
        %34 = tpu.memref_slice %arg5[%c0_i32_20, %29] : memref<1x16x!tpu.dma_semaphore, #tpu.memory_space<semaphore_mem>> -> memref<1x1x!tpu.dma_semaphore, #tpu.memory_space<semaphore_mem>>
        %35 = tpu.memref_squeeze %34 : memref<1x1x!tpu.dma_semaphore, #tpu.memory_space<semaphore_mem>> -> memref<!tpu.dma_semaphore, #tpu.memory_space<semaphore_mem>>
        tpu.wait_dma2 semaphore(%35 : memref<!tpu.dma_semaphore, #tpu.memory_space<semaphore_mem>>) src(%31 : memref<400xf32, #tpu.memory_space<any>>) dst(%33 : memref<400xf32, #tpu.memory_space<vmem>>)
        %c0_i32_23 = arith.constant 0 : i32
        %c0_i32_24 = arith.constant 0 : i32
        %36 = tpu.memref_slice %arg3[%19, %c0_i32_24] : memref<32x400xf32, #tpu.memory_space<any>> -> memref<1x400xf32, #tpu.memory_space<any>>
        %37 = tpu.memref_squeeze %36 : memref<1x400xf32, #tpu.memory_space<any>> -> memref<400xf32, #tpu.memory_space<any>>
        %c0_i32_25 = arith.constant 0 : i32
        %38 = tpu.memref_slice %arg4[%arg6, %c0_i32_25] : memref<64x400xf32, #tpu.memory_space<vmem>> -> memref<1x400xf32, #tpu.memory_space<vmem>>
        %39 = tpu.memref_squeeze %38 : memref<1x400xf32, #tpu.memory_space<vmem>> -> memref<400xf32, #tpu.memory_space<vmem>>
        %40 = tpu.memref_slice %arg5[%c0_i32_23, %29] : memref<1x16x!tpu.dma_semaphore, #tpu.memory_space<semaphore_mem>> -> memref<1x1x!tpu.dma_semaphore, #tpu.memory_space<semaphore_mem>>
        %41 = tpu.memref_squeeze %40 : memref<1x1x!tpu.dma_semaphore, #tpu.memory_space<semaphore_mem>> -> memref<!tpu.dma_semaphore, #tpu.memory_space<semaphore_mem>>
        tpu.enqueue_dma source(%37 : memref<400xf32, #tpu.memory_space<any>>) target(%39 : memref<400xf32, #tpu.memory_space<vmem>>) target_semaphore(%41 : memref<!tpu.dma_semaphore, #tpu.memory_space<semaphore_mem>>)
      }
      %c0_i32_9 = arith.constant 0 : i32
      %c0_i32_10 = arith.constant 0 : i32
      %15 = arith.subi %10, %c0_i32_10 : i32
      %16 = arith.addi %c0_i32_10, %15 : i32
      %c1_i32_11 = arith.constant 1 : i32
      scf.for %arg6 = %c0_i32_10 to %16 step %c1_i32_11  : i32 {
        %17 = arith.subi %3, %10 : i32
        %18 = arith.addi %17, %arg6 : i32
        %c16_i32_12 = arith.constant 16 : i32
        %c0_i32_13 = arith.constant 0 : i32
        %19 = arith.cmpi eq, %c16_i32_12, %c0_i32_13 : i32
        %c1_i32_14 = arith.constant 1 : i32
        %20 = arith.select %19, %c1_i32_14, %c16_i32_12 : i32
        %21 = arith.remsi %18, %20 : i32
        %c0_i32_15 = arith.constant 0 : i32
        %22 = arith.cmpi ne, %21, %c0_i32_15 : i32
        %c0_i32_16 = arith.constant 0 : i32
        %23 = arith.cmpi slt, %21, %c0_i32_16 : i32
        %c0_i32_17 = arith.constant 0 : i32
        %24 = arith.cmpi slt, %20, %c0_i32_17 : i32
        %25 = arith.xori %23, %24 : i1
        %26 = arith.andi %25, %22 : i1
        %27 = arith.addi %21, %20 : i32
        %28 = arith.select %26, %27, %21 : i32
        %c0_i32_18 = arith.constant 0 : i32
        %c0_i32_19 = arith.constant 0 : i32
        %c0_i32_20 = arith.constant 0 : i32
        %c0_i32_21 = arith.constant 0 : i32
        %29 = tpu.memref_slice %arg3[%c0_i32_18, %c0_i32_21] : memref<32x400xf32, #tpu.memory_space<any>> -> memref<1x400xf32, #tpu.memory_space<any>>
        %30 = tpu.memref_squeeze %29 : memref<1x400xf32, #tpu.memory_space<any>> -> memref<400xf32, #tpu.memory_space<any>>
        %c0_i32_22 = arith.constant 0 : i32
        %31 = tpu.memref_slice %arg4[%c0_i32_19, %c0_i32_22] : memref<64x400xf32, #tpu.memory_space<vmem>> -> memref<1x400xf32, #tpu.memory_space<vmem>>
        %32 = tpu.memref_squeeze %31 : memref<1x400xf32, #tpu.memory_space<vmem>> -> memref<400xf32, #tpu.memory_space<vmem>>
        %33 = tpu.memref_slice %arg5[%c0_i32_20, %28] : memref<1x16x!tpu.dma_semaphore, #tpu.memory_space<semaphore_mem>> -> memref<1x1x!tpu.dma_semaphore, #tpu.memory_space<semaphore_mem>>
        %34 = tpu.memref_squeeze %33 : memref<1x1x!tpu.dma_semaphore, #tpu.memory_space<semaphore_mem>> -> memref<!tpu.dma_semaphore, #tpu.memory_space<semaphore_mem>>
        tpu.wait_dma2 semaphore(%34 : memref<!tpu.dma_semaphore, #tpu.memory_space<semaphore_mem>>) src(%30 : memref<400xf32, #tpu.memory_space<any>>) dst(%32 : memref<400xf32, #tpu.memory_space<vmem>>)
      }
    } else {
    }
    return
  }
  func.func @transform_1(%arg0: i32, %arg1: memref<1xi32, #tpu.memory_space<smem>>, %arg2: memref<64xi32, #tpu.memory_space<smem>>) -> (i32, i32) {
    %c0_i32 = arith.constant 0 : i32
    %c0_i32_0 = arith.constant 0 : i32
    return %arg0, %c0_i32 : i32, i32
  }
}

</mosaic_0001>

<bundles_post_ra>
// kernel: _encode_single_padded.1
= control target key start
LH: loop header
LB: loop body
LE: loop exit
PB: predicated region body
PF: predicated region fallthrough
CT: control target
= control target key end

     0   :  { %s4991_s0 = inlined_call_operand.<no memory space> [shape: s32[1], index: 0, kind: input, shape index: {}]   ;;  %s4992_s1 = inlined_call_operand.vmem [shape: s32[64], index: 1, kind: input, shape index: {}]   ;;  %s4993_s2 = inlined_call_operand.hbm [shape: f32[32,400], index: 2, kind: input, shape index: {}]   ;;  %s4994_s3 = inlined_call_operand.hbm [shape: f32[64,400], index: 3, kind: output, shape index: {}]  }
   0x1   :  { %s9_s14 = sshll.u32 %s4992_s1, 4  ;;  %s10_s14 = int_to_ptr.vmem [resolvable:$true] %s9_s14 }
   0x2   :  { %s1916_s15 = scalar_lea.vmem %s10_s14, 16  ;;  %p1921_p1 = scmp.lt.s32.totalorder %s10_s14, %s10_s14 }
   0x3   :  { %p1917_p0 = scmp.ne.s32.totalorder %s10_s14, %s1916_s15  ;;  %p1922_p2 = scmp.lt.s32.totalorder %s1916_s15, %s1916_s15 }
   0x5   :  { %p1923_p3 = por %p1922_p2, %p1921_p1 }
   0x7   :  { %p1924_p4 = pnand %p1923_p3, %p1917_p0 }
   0x9   :  { %1927 = shalt.err (!%p1924_p4)  }
   0xa   :  { %s3694_s16 = smov [#allocation5]  }
   0xb   :  { %12 = dma.vmem_to_smem %s10_s14, 16, %s3694_s16, [#allocation3] }
   0xc   :  { %3546 = dma.done.wait [#allocation3], 16 }
   0xd   :  { %3547 = vsyncadd [#allocation3], 4294967280 }
   0xe   :  { %14 = sfence }
   0xf   :  { %15 = vsyncpa [#allocation7], 0  ;;  %p19_p5 = scmp.lt.s32.totalorder %s4991_s0, 64 }
  0x11   :  { %s3803_s22 = scalar_select %p19_p5, %s4991_s0, 64 }
  0x13   :  { %p1582_p6 = scmp.ne.s32.totalorder %s3803_s22, 64 }
  0x14   :  { %s25_s23 = sld [smem:[#allocation5]] (!%p1582_p6)  ;;  %s3695_s24 = smov (!%p1582_p6), [#allocation6]  }
  0x15   :  { %24 = sbr.rel (%p1582_p6) target bundleno = 1642 (0x66a), region = 5  ;;  %s33_s25 = sshll.u32 (!%p1582_p6), %s3695_s24, 4  ;;  %s3806_s25 = int_to_ptr.vmem [resolvable:$true] %s33_s25 }
  0x16   :  { %s3808_s26 = sld [smem:[#allocation5 + $0x1]] (!%p1582_p6)  ;;  %s3696_s27 = smov (!%p1582_p6), [#allocation6 + $0x1]  }
  0x17   :  { %s48_s28 = sshll.u32 (!%p1582_p6), %s3696_s27, 4  ;;  %s3810_s29 = sld [smem:[#allocation5 + $0x2]] (!%p1582_p6)  ;;  %s3812_s28 = int_to_ptr.vmem [resolvable:$true] %s48_s28 }
  0x18   :  { %s3697_s6 = smov (!%p1582_p6), [#allocation6 + $0x2]   ;;  %s3824_s18 = scalar_lea.hbm (!%p1582_p6), %s4993_s2, 2048 }
  0x19   :  { %s63_s7 = sshll.u32 (!%p1582_p6), %s3697_s6, 4  ;;  %s3814_s7 = int_to_ptr.vmem [resolvable:$true] %s63_s7 }
  0x1a   :  { %s26_s30 = sshrl.u32 (!%p1582_p6), %s25_s23, 3  ;;  %s27_s4 = sand.u32 (!%p1582_p6), 7, %s25_s23  }
  0x1b   :  { %s1583_s5 = sshll.u32 (!%p1582_p6), %s26_s30, 5 }
  0x1c   :  { %s29_s8 = sadd.s32 %s1583_s5, %s27_s4  ;;  %s39_s10 = sshrl.u32 %s3808_s26, 3 }
  0x1d   :  { %s1584_s9 = sshll.u32 %s29_s8, 4  ;;  %s40_s14 = sand.u32 7, %s3808_s26  }
  0x1e   :  { %s31_s13 = scalar_lea.hbm %s4993_s2, %s1584_s9 }
  0x1f   :  { %s1928_s15 = scalar_lea.hbm %s31_s13, 64  ;;  %p1931_p8 = scmp.lt.u32.totalorder %s31_s13, %s4993_s2 }
  0x20   :  { %p1929_p7 = scmp.ne.s32.totalorder %s31_s13, %s1928_s15  ;;  %p1932_p9 = scmp.lt.u32.totalorder %s3824_s18, %s1928_s15 }
  0x21   :  { %p1934_p11 = scmp.lt.u32.totalorder %s1928_s15, %s31_s13 }
  0x22   :  { %p1933_p10 = por %p1932_p9, %p1931_p8 }
  0x24   :  { %p1935_p12 = por %p1934_p11, %p1933_p10 }
  0x26   :  { %p1936_p13 = pnand %p1935_p12, %p1929_p7 }
  0x28   :  { %1939 = shalt.err (!%p1936_p13)  }
  0x29   :  { %s1940_s20 = scalar_lea.vmem %s3806_s25, 64  ;;  %s3833_s21 = scalar_lea.vmem %s3806_s25, 4096 }
  0x2a   :  { %p1941_p0 = scmp.ne.s32.totalorder %s3806_s25, %s1940_s20  ;;  %p1945_p1 = scmp.lt.s32.totalorder %s3806_s25, %s3806_s25 }
  0x2b   :  { %p1946_p2 = scmp.lt.s32.totalorder %s3833_s21, %s1940_s20 }
  0x2d   :  { %p1947_p3 = por %p1946_p2, %p1945_p1 }
  0x2f   :  { %p1948_p4 = pnand %p1947_p3, %p1941_p0 }
  0x31   :  { %1951 = shalt.err (!%p1948_p4)  }
  0x32   :  { %s3698_s23 = smov 128   ;;  %s3699_s24 = smov 1  }
  0x33   :  { %36 = dma.hbm_to_vmem [thread:$0]  %s31_s13, 64, %s3806_s25, [#allocation2], %s3698_s23, %s3698_s23, %s3699_s24 }
  0x34   :  { %s1586_s26 = sshll.u32 %s39_s10, 5  ;;  %s54_s27 = sshrl.u32 %s3810_s29, 3 }
  0x35   :  { %s42_s30 = sadd.s32 %s1586_s26, %s40_s14  ;;  %s55_s4 = sand.u32 7, %s3810_s29  }
  0x36   :  { %s1587_s5 = sshll.u32 %s42_s30, 4  ;;  %s1589_s6 = sshll.u32 %s54_s27, 5 }
  0x37   :  { %s44_s11 = scalar_lea.hbm %s4993_s2, %s1587_s5  ;;  %s57_s12 = sadd.s32 %s1589_s6, %s55_s4 }
  0x38   :  { %s1952_s15 = scalar_lea.hbm %s44_s11, 64  ;;  %p1955_p7 = scmp.lt.u32.totalorder %s44_s11, %s4993_s2 }
  0x39   :  { %p1953_p6 = scmp.ne.s32.totalorder %s44_s11, %s1952_s15  ;;  %p1956_p8 = scmp.lt.u32.totalorder %s3824_s18, %s1952_s15 }
  0x3a   :  { %p1958_p10 = scmp.lt.u32.totalorder %s1952_s15, %s44_s11 }
  0x3b   :  { %p1957_p9 = por %p1956_p8, %p1955_p7 }
  0x3d   :  { %p1959_p11 = por %p1958_p10, %p1957_p9 }
  0x3f   :  { %p1960_p12 = pnand %p1959_p11, %p1953_p6 }
  0x41   :  { %1963 = shalt.err (!%p1960_p12)  }
  0x42   :  { %s1964_s29 = scalar_lea.vmem %s3812_s28, 64  ;;  %p1969_p0 = scmp.lt.s32.totalorder %s3812_s28, %s3806_s25 }
  0x43   :  { %p1965_p13 = scmp.ne.s32.totalorder %s3812_s28, %s1964_s29  ;;  %p1970_p1 = scmp.lt.s32.totalorder %s3833_s21, %s1964_s29 }
  0x45   :  { %p1971_p2 = por %p1970_p1, %p1969_p0 }
  0x47   :  { %p1972_p3 = pnand %p1971_p2, %p1965_p13 }
  0x49   :  { %1975 = shalt.err (!%p1972_p3)  }
  0x4a   :  { %51 = dma.hbm_to_vmem [thread:$0]  %s44_s11, 64, %s3812_s28, [#allocation2 + $0x1], %s3698_s23, %s3698_s23, %s3699_s24 }
  0x4b   :  { %s1590_s10 = sshll.u32 %s57_s12, 4  ;;  %s3860_s13 = sld [smem:[#allocation5 + $0x3]] }
  0x4c   :  { %s59_s1 = scalar_lea.hbm %s4993_s2, %s1590_s10 }
  0x4d   :  { %s1976_s20 = scalar_lea.hbm %s59_s1, 64  ;;  %p1979_p6 = scmp.lt.u32.totalorder %s59_s1, %s4993_s2 }
  0x4e   :  { %p1977_p4 = scmp.ne.s32.totalorder %s59_s1, %s1976_s20  ;;  %p1980_p7 = scmp.lt.u32.totalorder %s3824_s18, %s1976_s20 }
  0x4f   :  { %p1982_p9 = scmp.lt.u32.totalorder %s1976_s20, %s59_s1 }
  0x50   :  { %p1981_p8 = por %p1980_p7, %p1979_p6 }
  0x52   :  { %p1983_p10 = por %p1982_p9, %p1981_p8 }
  0x54   :  { %p1984_p11 = pnand %p1983_p10, %p1977_p4 }
  0x56   :  { %1987 = shalt.err (!%p1984_p11)  }
  0x57   :  { %s1988_s28 = scalar_lea.vmem %s3814_s7, 64  ;;  %p1993_p13 = scmp.lt.s32.totalorder %s3814_s7, %s3806_s25 }
  0x58   :  { %p1989_p12 = scmp.ne.s32.totalorder %s3814_s7, %s1988_s28  ;;  %p1994_p0 = scmp.lt.s32.totalorder %s3833_s21, %s1988_s28 }
  0x5a   :  { %p1995_p1 = por %p1994_p0, %p1993_p13 }
  0x5c   :  { %p1996_p2 = pnand %p1995_p1, %p1989_p12 }
  0x5e   :  { %1999 = shalt.err (!%p1996_p2)  }
  0x5f   :  { %66 = dma.hbm_to_vmem [thread:$0]  %s59_s1, 64, %s3814_s7, [#allocation2 + $0x2], %s3698_s23, %s3698_s23, %s3699_s24 }
  0x60   :  { %s3700_s30 = smov [#allocation6 + $0x3]   ;;  %s3878_s5 = sld [smem:[#allocation5 + $0x4]] }
  0x61   :  { %s78_s4 = sshll.u32 %s3700_s30, 4  ;;  %s3701_s6 = smov [#allocation6 + $0x4]   ;;  %s3880_s4 = int_to_ptr.vmem [resolvable:$true] %s78_s4 }
  0x62   :  { %s93_s8 = sshll.u32 %s3701_s6, 4  ;;  %s3882_s9 = sld [smem:[#allocation5 + $0x5]]  ;;  %s3886_s8 = int_to_ptr.vmem [resolvable:$true] %s93_s8 }
  0x63   :  { %s69_s11 = sshrl.u32 %s3860_s13, 3  ;;  %s70_s12 = sand.u32 7, %s3860_s13  }
  0x64   :  { %s1592_s15 = sshll.u32 %s69_s11, 5 }
  0x65   :  { %s72_s16 = sadd.s32 %s1592_s15, %s70_s12 }
  0x66   :  { %s1593_s7 = sshll.u32 %s72_s16, 4  ;;  %s84_s17 = sshrl.u32 %s3878_s5, 3 }
  0x67   :  { %s74_s14 = scalar_lea.hbm %s4993_s2, %s1593_s7  ;;  %s85_s19 = sand.u32 7, %s3878_s5  }
  0x68   :  { %s2000_s1 = scalar_lea.hbm %s74_s14, 64  ;;  %p2003_p4 = scmp.lt.u32.totalorder %s74_s14, %s4993_s2 }
  0x69   :  { %p2001_p3 = scmp.ne.s32.totalorder %s74_s14, %s2000_s1  ;;  %p2004_p6 = scmp.lt.u32.totalorder %s3824_s18, %s2000_s1 }
  0x6a   :  { %p2006_p8 = scmp.lt.u32.totalorder %s2000_s1, %s74_s14 }
  0x6b   :  { %p2005_p7 = por %p2004_p6, %p2003_p4 }
  0x6d   :  { %p2007_p9 = por %p2006_p8, %p2005_p7 }
  0x6f   :  { %p2008_p10 = pnand %p2007_p9, %p2001_p3 }
  0x71   :  { %2011 = shalt.err (!%p2008_p10)  }
  0x72   :  { %s2012_s13 = scalar_lea.vmem %s3880_s4, 64  ;;  %p2017_p12 = scmp.lt.s32.totalorder %s3880_s4, %s3806_s25 }
  0x73   :  { %p2013_p11 = scmp.ne.s32.totalorder %s3880_s4, %s2012_s13  ;;  %p2018_p13 = scmp.lt.s32.totalorder %s3833_s21, %s2012_s13 }
  0x75   :  { %p2019_p0 = por %p2018_p13, %p2017_p12 }
  0x77   :  { %p2020_p1 = pnand %p2019_p0, %p2013_p11 }
  0x79   :  { %2023 = shalt.err (!%p2020_p1)  }
  0x7a   :  { %81 = dma.hbm_to_vmem [thread:$0]  %s74_s14, 64, %s3880_s4, [#allocation2 + $0x3], %s3698_s23, %s3698_s23, %s3699_s24 }
  0x7b   :  { %s1595_s27 = sshll.u32 %s84_s17, 5  ;;  %s99_s28 = sshrl.u32 %s3882_s9, 3 }
  0x7c   :  { %s87_s30 = sadd.s32 %s1595_s27, %s85_s19  ;;  %s100_s5 = sand.u32 7, %s3882_s9  }
  0x7d   :  { %s1596_s6 = sshll.u32 %s87_s30, 4  ;;  %s1598_s11 = sshll.u32 %s99_s28, 5 }
  0x7e   :  { %s89_s16 = scalar_lea.hbm %s4993_s2, %s1596_s6  ;;  %s102_s7 = sadd.s32 %s1598_s11, %s100_s5 }
  0x7f   :  { %s2024_s29 = scalar_lea.hbm %s89_s16, 64  ;;  %p2027_p3 = scmp.lt.u32.totalorder %s89_s16, %s4993_s2 }
  0x80   :  { %p2025_p2 = scmp.ne.s32.totalorder %s89_s16, %s2024_s29  ;;  %p2028_p4 = scmp.lt.u32.totalorder %s3824_s18, %s2024_s29 }
  0x81   :  { %p2030_p7 = scmp.lt.u32.totalorder %s2024_s29, %s89_s16 }
  0x82   :  { %p2029_p6 = por %p2028_p4, %p2027_p3 }
  0x84   :  { %p2031_p8 = por %p2030_p7, %p2029_p6 }
  0x86   :  { %p2032_p9 = pnand %p2031_p8, %p2025_p2 }
  0x88   :  { %2035 = shalt.err (!%p2032_p9)  }
  0x89   :  { %s2036_s4 = scalar_lea.vmem %s3886_s8, 64  ;;  %p2041_p11 = scmp.lt.s32.totalorder %s3886_s8, %s3806_s25 }
  0x8a   :  { %p2037_p10 = scmp.ne.s32.totalorder %s3886_s8, %s2036_s4  ;;  %p2042_p12 = scmp.lt.s32.totalorder %s3833_s21, %s2036_s4 }
  0x8c   :  { %p2043_p13 = por %p2042_p12, %p2041_p11 }
  0x8e   :  { %p2044_p0 = pnand %p2043_p13, %p2037_p10 }
  0x90   :  { %2047 = shalt.err (!%p2044_p0)  }
  0x91   :  { %96 = dma.hbm_to_vmem [thread:$0]  %s89_s16, 64, %s3886_s8, [#allocation2 + $0x4], %s3698_s23, %s3698_s23, %s3699_s24 }
  0x92   :  { %s1599_s9 = sshll.u32 %s102_s7, 4  ;;  %s3702_s17 = smov [#allocation6 + $0x5]  }
  0x93   :  { %s108_s14 = sshll.u32 %s3702_s17, 4  ;;  %s104_s26 = scalar_lea.hbm %s4993_s2, %s1599_s9  ;;  %s109_s14 = int_to_ptr.vmem [resolvable:$true] %s108_s14 }
  0x94   :  { %s2048_s13 = scalar_lea.hbm %s104_s26, 64  ;;  %p2051_p2 = scmp.lt.u32.totalorder %s104_s26, %s4993_s2 }
  0x95   :  { %p2049_p1 = scmp.ne.s32.totalorder %s104_s26, %s2048_s13  ;;  %p2052_p3 = scmp.lt.u32.totalorder %s3824_s18, %s2048_s13 }
  0x96   :  { %p2054_p6 = scmp.lt.u32.totalorder %s2048_s13, %s104_s26 }
  0x97   :  { %p2053_p4 = por %p2052_p3, %p2051_p2 }
  0x99   :  { %p2055_p7 = por %p2054_p6, %p2053_p4 }
  0x9b   :  { %p2056_p8 = pnand %p2055_p7, %p2049_p1 }
  0x9d   :  { %2059 = shalt.err (!%p2056_p8)  }
  0x9e   :  { %s2060_s8 = scalar_lea.vmem %s109_s14, 64  ;;  %p2065_p10 = scmp.lt.s32.totalorder %s109_s14, %s3806_s25 }
  0x9f   :  { %p2061_p9 = scmp.ne.s32.totalorder %s109_s14, %s2060_s8  ;;  %p2066_p11 = scmp.lt.s32.totalorder %s3833_s21, %s2060_s8 }
  0xa1   :  { %p2067_p12 = por %p2066_p11, %p2065_p10 }
  0xa3   :  { %p2068_p13 = pnand %p2067_p12, %p2061_p9 }
  0xa5   :  { %2071 = shalt.err (!%p2068_p13)  }
  0xa6   :  { %111 = dma.hbm_to_vmem [thread:$0]  %s104_s26, 64, %s109_s14, [#allocation2 + $0x5], %s3698_s23, %s3698_s23, %s3699_s24 }
  0xa7   :  { %s1600_s30 = sld [smem:[#allocation5 + $0x6]]  ;;  %s3703_s5 = smov [#allocation6 + $0x6]  }
  0xa8   :  { %s123_s6 = sshll.u32 %s3703_s5, 4  ;;  %s1603_s11 = sld [smem:[#allocation5 + $0x7]]  ;;  %s3936_s6 = int_to_ptr.vmem [resolvable:$true] %s123_s6 }
  0xa9   :  { %s3704_s12 = smov [#allocation6 + $0x7]   ;;  %s3938_s16 = sld [smem:[#allocation5 + $0x8]] }
  0xaa   :  { %s138_s15 = sshll.u32 %s3704_s12, 4  ;;  %s3705_s7 = smov [#allocation6 + $0x20]   ;;  %s3940_s15 = int_to_ptr.vmem [resolvable:$true] %s138_s15 }
  0xab   :  { %s3942_s29 = sshll.u32 %s3705_s7, 4  ;;  %s3944_s10 = sld [smem:[#allocation5 + $0x9]]  ;;  %s154_s29 = int_to_ptr.vmem [resolvable:$true] %s3942_s29 }
  0xad   :  { %s114_s1 = sshrl.u32 %s1600_s30, 3  ;;  %s115_s4 = sand.u32 7, %s1600_s30  }
  0xae   :  { %s1601_s9 = sshll.u32 %s114_s1, 5  ;;  %s129_s17 = sshrl.u32 %s1603_s11, 3 }
  0xaf   :  { %s117_s14 = sadd.s32 %s1601_s9, %s115_s4  ;;  %s130_s19 = sand.u32 7, %s1603_s11  }
  0xb0   :  { %s1602_s20 = sshll.u32 %s117_s14, 4  ;;  %s1604_s26 = sshll.u32 %s129_s17, 5 }
  0xb1   :  { %s119_s28 = scalar_lea.hbm %s4993_s2, %s1602_s20  ;;  %s132_s8 = sadd.s32 %s1604_s26, %s130_s19 }
  0xb2   :  { %s2072_s5 = scalar_lea.hbm %s119_s28, 64  ;;  %p2075_p1 = scmp.lt.u32.totalorder %s119_s28, %s4993_s2 }
  0xb3   :  { %p2073_p0 = scmp.ne.s32.totalorder %s119_s28, %s2072_s5  ;;  %p2076_p2 = scmp.lt.u32.totalorder %s3824_s18, %s2072_s5 }
  0xb4   :  { %p2078_p4 = scmp.lt.u32.totalorder %s2072_s5, %s119_s28 }
  0xb5   :  { %p2077_p3 = por %p2076_p2, %p2075_p1 }
  0xb7   :  { %p2079_p6 = por %p2078_p4, %p2077_p3 }
  0xb9   :  { %p2080_p7 = pnand %p2079_p6, %p2073_p0 }
  0xbb   :  { %2083 = shalt.err (!%p2080_p7)  }
  0xbc   :  { %s2084_s30 = scalar_lea.vmem %s3936_s6, 64  ;;  %p2089_p9 = scmp.lt.s32.totalorder %s3936_s6, %s3806_s25 }
  0xbd   :  { %p2085_p8 = scmp.ne.s32.totalorder %s3936_s6, %s2084_s30  ;;  %p2090_p10 = scmp.lt.s32.totalorder %s3833_s21, %s2084_s30 }
  0xbf   :  { %p2091_p11 = por %p2090_p10, %p2089_p9 }
  0xc1   :  { %p2092_p12 = pnand %p2091_p11, %p2085_p8 }
  0xc3   :  { %2095 = shalt.err (!%p2092_p12)  }
  0xc4   :  { %126 = dma.hbm_to_vmem [thread:$0]  %s119_s28, 64, %s3936_s6, [#allocation2 + $0x6], %s3698_s23, %s3698_s23, %s3699_s24 }
  0xc5   :  { %s1605_s11 = sshll.u32 %s132_s8, 4  ;;  %s144_s1 = sshrl.u32 %s3938_s16, 3 }
  0xc6   :  { %s134_s17 = scalar_lea.hbm %s4993_s2, %s1605_s11  ;;  %s145_s14 = sand.u32 7, %s3938_s16  }
  0xc7   :  { %s2096_s19 = scalar_lea.hbm %s134_s17, 64  ;;  %p2099_p0 = scmp.lt.u32.totalorder %s134_s17, %s4993_s2 }
  0xc8   :  { %p2097_p13 = scmp.ne.s32.totalorder %s134_s17, %s2096_s19  ;;  %p2100_p1 = scmp.lt.u32.totalorder %s3824_s18, %s2096_s19 }
  0xc9   :  { %p2102_p3 = scmp.lt.u32.totalorder %s2096_s19, %s134_s17 }
  0xca   :  { %p2101_p2 = por %p2100_p1, %p2099_p0 }
  0xcc   :  { %p2103_p4 = por %p2102_p3, %p2101_p2 }
  0xce   :  { %p2104_p6 = pnand %p2103_p4, %p2097_p13 }
  0xd0   :  { %2107 = shalt.err (!%p2104_p6)  }
  0xd1   :  { %s2108_s6 = scalar_lea.vmem %s3940_s15, 64  ;;  %p2113_p8 = scmp.lt.s32.totalorder %s3940_s15, %s3806_s25 }
  0xd2   :  { %p2109_p7 = scmp.ne.s32.totalorder %s3940_s15, %s2108_s6  ;;  %p2114_p9 = scmp.lt.s32.totalorder %s3833_s21, %s2108_s6 }
  0xd4   :  { %p2115_p10 = por %p2114_p9, %p2113_p8 }
  0xd6   :  { %p2116_p11 = pnand %p2115_p10, %p2109_p7 }
  0xd8   :  { %2119 = shalt.err (!%p2116_p11)  }
  0xd9   :  { %141 = dma.hbm_to_vmem [thread:$0]  %s134_s17, 64, %s3940_s15, [#allocation2 + $0x7], %s3698_s23, %s3698_s23, %s3699_s24 }
  0xda   :  { %s1607_s16 = sshll.u32 %s144_s1, 5  ;;  %s159_s27 = sshrl.u32 %s3944_s10, 3 }
  0xdb   :  { %s147_s13 = sadd.s32 %s1607_s16, %s145_s14  ;;  %s160_s8 = sand.u32 7, %s3944_s10  }
  0xdc   :  { %s1608_s28 = sshll.u32 %s147_s13, 4  ;;  %s1610_s30 = sshll.u32 %s159_s27, 5 }
  0xdd   :  { %s149_s7 = scalar_lea.hbm %s4993_s2, %s1608_s28 }
  0xde   :  { %s2120_s11 = scalar_lea.hbm %s149_s7, 64  ;;  %p2123_p13 = scmp.lt.u32.totalorder %s149_s7, %s4993_s2 }
  0xdf   :  { %p2121_p12 = scmp.ne.s32.totalorder %s149_s7, %s2120_s11  ;;  %p2124_p0 = scmp.lt.u32.totalorder %s3824_s18, %s2120_s11 }
  0xe0   :  { %p2126_p2 = scmp.lt.u32.totalorder %s2120_s11, %s149_s7 }
  0xe1   :  { %p2125_p1 = por %p2124_p0, %p2123_p13 }
  0xe3   :  { %p2127_p3 = por %p2126_p2, %p2125_p1 }
  0xe5   :  { %p2128_p4 = pnand %p2127_p3, %p2121_p12 }
  0xe7   :  { %2131 = shalt.err (!%p2128_p4)  }
  0xe8   :  { %s2132_s15 = scalar_lea.vmem %s154_s29, 64  ;;  %p2137_p7 = scmp.lt.s32.totalorder %s154_s29, %s3806_s25 }
  0xe9   :  { %p2133_p6 = scmp.ne.s32.totalorder %s154_s29, %s2132_s15  ;;  %p2138_p8 = scmp.lt.s32.totalorder %s3833_s21, %s2132_s15 }
  0xeb   :  { %p2139_p9 = por %p2138_p8, %p2137_p7 }
  0xed   :  { %p2140_p10 = pnand %p2139_p9, %p2133_p6 }
  0xef   :  { %2143 = shalt.err (!%p2140_p10)  }
  0xf0   :  { %156 = dma.hbm_to_vmem [thread:$0]  %s149_s7, 64, %s154_s29, [#allocation2 + $0x8], %s3698_s23, %s3698_s23, %s3699_s24 }
  0xf1   :  { %s162_s10 = sadd.s32 %s1610_s30, %s160_s8  ;;  %s3706_s17 = smov [#allocation6 + $0x21]  }
  0xf2   :  { %s1611_s1 = sshll.u32 %s162_s10, 4  ;;  %s168_s14 = sshll.u32 %s3706_s17, 4  ;;  %s169_s14 = int_to_ptr.vmem [resolvable:$true] %s168_s14 }
  0xf3   :  { %s164_s26 = scalar_lea.hbm %s4993_s2, %s1611_s1 }
  0xf4   :  { %s2144_s6 = scalar_lea.hbm %s164_s26, 64  ;;  %p2147_p12 = scmp.lt.u32.totalorder %s164_s26, %s4993_s2 }
  0xf5   :  { %p2145_p11 = scmp.ne.s32.totalorder %s164_s26, %s2144_s6  ;;  %p2148_p13 = scmp.lt.u32.totalorder %s3824_s18, %s2144_s6 }
  0xf6   :  { %p2150_p1 = scmp.lt.u32.totalorder %s2144_s6, %s164_s26 }
  0xf7   :  { %p2149_p0 = por %p2148_p13, %p2147_p12 }
  0xf9   :  { %p2151_p2 = por %p2150_p1, %p2149_p0 }
  0xfb   :  { %p2152_p3 = pnand %p2151_p2, %p2145_p11 }
  0xfd   :  { %2155 = shalt.err (!%p2152_p3)  }
  0xfe   :  { %s2156_s29 = scalar_lea.vmem %s169_s14, 64  ;;  %p2161_p6 = scmp.lt.s32.totalorder %s169_s14, %s3806_s25 }
  0xff   :  { %p2157_p4 = scmp.ne.s32.totalorder %s169_s14, %s2156_s29  ;;  %p2162_p7 = scmp.lt.s32.totalorder %s3833_s21, %s2156_s29 }
 0x101   :  { %p2163_p8 = por %p2162_p7, %p2161_p6 }
 0x103   :  { %p2164_p9 = pnand %p2163_p8, %p2157_p4 }
 0x105   :  { %2167 = shalt.err (!%p2164_p9)  }
 0x106   :  { %171 = dma.hbm_to_vmem [thread:$0]  %s164_s26, 64, %s169_s14, [#allocation2 + $0x9], %s3698_s23, %s3698_s23, %s3699_s24 }
 0x107   :  { %s1612_s27 = sld [smem:[#allocation5 + $0xa]]  ;;  %s3707_s28 = smov [#allocation6 + $0x22]  }
 0x108   :  { %s183_s8 = sshll.u32 %s3707_s28, 4  ;;  %s1615_s5 = sld [smem:[#allocation5 + $0xb]]  ;;  %s4007_s8 = int_to_ptr.vmem [resolvable:$true] %s183_s8 }
 0x109   :  { %s3708_s12 = smov [#allocation6 + $0x23]   ;;  %s4009_s30 = sld [smem:[#allocation5 + $0xc]] }
 0x10a   :  { %s198_s7 = sshll.u32 %s3708_s12, 4  ;;  %s3709_s11 = smov [#allocation6 + $0x24]   ;;  %s4011_s7 = int_to_ptr.vmem [resolvable:$true] %s198_s7 }
 0x10b   :  { %s4013_s4 = sshll.u32 %s3709_s11, 4  ;;  %s4015_s9 = sld [smem:[#allocation5 + $0xd]]  ;;  %s214_s4 = int_to_ptr.vmem [resolvable:$true] %s4013_s4 }
 0x10d   :  { %s174_s15 = sshrl.u32 %s1612_s27, 3  ;;  %s175_s10 = sand.u32 7, %s1612_s27  }
 0x10e   :  { %s1613_s1 = sshll.u32 %s174_s15, 5  ;;  %s189_s17 = sshrl.u32 %s1615_s5, 3 }
 0x10f   :  { %s177_s14 = sadd.s32 %s1613_s1, %s175_s10  ;;  %s190_s19 = sand.u32 7, %s1615_s5  }
 0x110   :  { %s1614_s20 = sshll.u32 %s177_s14, 4  ;;  %s1616_s26 = sshll.u32 %s189_s17, 5 }
 0x111   :  { %s179_s13 = scalar_lea.hbm %s4993_s2, %s1614_s20  ;;  %s192_s29 = sadd.s32 %s1616_s26, %s190_s19 }
 0x112   :  { %s2168_s28 = scalar_lea.hbm %s179_s13, 64  ;;  %p2171_p11 = scmp.lt.u32.totalorder %s179_s13, %s4993_s2 }
 0x113   :  { %p2169_p10 = scmp.ne.s32.totalorder %s179_s13, %s2168_s28  ;;  %p2172_p12 = scmp.lt.u32.totalorder %s3824_s18, %s2168_s28 }
 0x114   :  { %p2174_p0 = scmp.lt.u32.totalorder %s2168_s28, %s179_s13 }
 0x115   :  { %p2173_p13 = por %p2172_p12, %p2171_p11 }
 0x117   :  { %p2175_p1 = por %p2174_p0, %p2173_p13 }
 0x119   :  { %p2176_p2 = pnand %p2175_p1, %p2169_p10 }
 0x11b   :  { %2179 = shalt.err (!%p2176_p2)  }
 0x11c   :  { %s2180_s27 = scalar_lea.vmem %s4007_s8, 64  ;;  %p2185_p4 = scmp.lt.s32.totalorder %s4007_s8, %s3806_s25 }
 0x11d   :  { %p2181_p3 = scmp.ne.s32.totalorder %s4007_s8, %s2180_s27  ;;  %p2186_p6 = scmp.lt.s32.totalorder %s3833_s21, %s2180_s27 }
 0x11f   :  { %p2187_p7 = por %p2186_p6, %p2185_p4 }
 0x121   :  { %p2188_p8 = pnand %p2187_p7, %p2181_p3 }
 0x123   :  { %2191 = shalt.err (!%p2188_p8)  }
 0x124   :  { %186 = dma.hbm_to_vmem [thread:$0]  %s179_s13, 64, %s4007_s8, [#allocation2 + $0xa], %s3698_s23, %s3698_s23, %s3699_s24 }
 0x125   :  { %s1617_s5 = sshll.u32 %s192_s29, 4  ;;  %s204_s15 = sshrl.u32 %s4009_s30, 3 }
 0x126   :  { %s194_s17 = scalar_lea.hbm %s4993_s2, %s1617_s5  ;;  %s205_s14 = sand.u32 7, %s4009_s30  }
 0x127   :  { %s2192_s19 = scalar_lea.hbm %s194_s17, 64  ;;  %p2195_p10 = scmp.lt.u32.totalorder %s194_s17, %s4993_s2 }
 0x128   :  { %p2193_p9 = scmp.ne.s32.totalorder %s194_s17, %s2192_s19  ;;  %p2196_p11 = scmp.lt.u32.totalorder %s3824_s18, %s2192_s19 }
 0x129   :  { %p2198_p13 = scmp.lt.u32.totalorder %s2192_s19, %s194_s17 }
 0x12a   :  { %p2197_p12 = por %p2196_p11, %p2195_p10 }
 0x12c   :  { %p2199_p0 = por %p2198_p13, %p2197_p12 }
 0x12e   :  { %p2200_p1 = pnand %p2199_p0, %p2193_p9 }
 0x130   :  { %2203 = shalt.err (!%p2200_p1)  }
 0x131   :  { %s2204_s8 = scalar_lea.vmem %s4011_s7, 64  ;;  %p2209_p3 = scmp.lt.s32.totalorder %s4011_s7, %s3806_s25 }
 0x132   :  { %p2205_p2 = scmp.ne.s32.totalorder %s4011_s7, %s2204_s8  ;;  %p2210_p4 = scmp.lt.s32.totalorder %s3833_s21, %s2204_s8 }
 0x134   :  { %p2211_p6 = por %p2210_p4, %p2209_p3 }
 0x136   :  { %p2212_p7 = pnand %p2211_p6, %p2205_p2 }
 0x138   :  { %2215 = shalt.err (!%p2212_p7)  }
 0x139   :  { %201 = dma.hbm_to_vmem [thread:$0]  %s194_s17, 64, %s4011_s7, [#allocation2 + $0xb], %s3698_s23, %s3698_s23, %s3699_s24 }
 0x13a   :  { %s1619_s30 = sshll.u32 %s204_s15, 5  ;;  %s219_s16 = sshrl.u32 %s4015_s9, 3 }
 0x13b   :  { %s207_s6 = sadd.s32 %s1619_s30, %s205_s14  ;;  %s220_s29 = sand.u32 7, %s4015_s9  }
 0x13c   :  { %s1620_s13 = sshll.u32 %s207_s6, 4  ;;  %s1622_s27 = sshll.u32 %s219_s16, 5 }
 0x13d   :  { %s209_s11 = scalar_lea.hbm %s4993_s2, %s1620_s13 }
 0x13e   :  { %s2216_s5 = scalar_lea.hbm %s209_s11, 64  ;;  %p2219_p9 = scmp.lt.u32.totalorder %s209_s11, %s4993_s2 }
 0x13f   :  { %p2217_p8 = scmp.ne.s32.totalorder %s209_s11, %s2216_s5  ;;  %p2220_p10 = scmp.lt.u32.totalorder %s3824_s18, %s2216_s5 }
 0x140   :  { %p2222_p12 = scmp.lt.u32.totalorder %s2216_s5, %s209_s11 }
 0x141   :  { %p2221_p11 = por %p2220_p10, %p2219_p9 }
 0x143   :  { %p2223_p13 = por %p2222_p12, %p2221_p11 }
 0x145   :  { %p2224_p0 = pnand %p2223_p13, %p2217_p8 }
 0x147   :  { %2227 = shalt.err (!%p2224_p0)  }
 0x148   :  { %s2228_s7 = scalar_lea.vmem %s214_s4, 64  ;;  %p2233_p2 = scmp.lt.s32.totalorder %s214_s4, %s3806_s25 }
 0x149   :  { %p2229_p1 = scmp.ne.s32.totalorder %s214_s4, %s2228_s7  ;;  %p2234_p3 = scmp.lt.s32.totalorder %s3833_s21, %s2228_s7 }
 0x14b   :  { %p2235_p4 = por %p2234_p3, %p2233_p2 }
 0x14d   :  { %p2236_p6 = pnand %p2235_p4, %p2229_p1 }
 0x14f   :  { %2239 = shalt.err (!%p2236_p6)  }
 0x150   :  { %216 = dma.hbm_to_vmem [thread:$0]  %s209_s11, 64, %s214_s4, [#allocation2 + $0xc], %s3698_s23, %s3698_s23, %s3699_s24 }
 0x151   :  { %s222_s9 = sadd.s32 %s1622_s27, %s220_s29  ;;  %s3710_s17 = smov [#allocation6 + $0x25]  }
 0x152   :  { %s1623_s15 = sshll.u32 %s222_s9, 4  ;;  %s228_s14 = sshll.u32 %s3710_s17, 4  ;;  %s229_s14 = int_to_ptr.vmem [resolvable:$true] %s228_s14 }
 0x153   :  { %s224_s26 = scalar_lea.hbm %s4993_s2, %s1623_s15 }
 0x154   :  { %s2240_s8 = scalar_lea.hbm %s224_s26, 64  ;;  %p2243_p8 = scmp.lt.u32.totalorder %s224_s26, %s4993_s2 }
 0x155   :  { %p2241_p7 = scmp.ne.s32.totalorder %s224_s26, %s2240_s8  ;;  %p2244_p9 = scmp.lt.u32.totalorder %s3824_s18, %s2240_s8 }
 0x156   :  { %p2246_p11 = scmp.lt.u32.totalorder %s2240_s8, %s224_s26 }
 0x157   :  { %p2245_p10 = por %p2244_p9, %p2243_p8 }
 0x159   :  { %p2247_p12 = por %p2246_p11, %p2245_p10 }
 0x15b   :  { %p2248_p13 = pnand %p2247_p12, %p2241_p7 }
 0x15d   :  { %2251 = shalt.err (!%p2248_p13)  }
 0x15e   :  { %s2252_s4 = scalar_lea.vmem %s229_s14, 64  ;;  %p2257_p1 = scmp.lt.s32.totalorder %s229_s14, %s3806_s25 }
 0x15f   :  { %p2253_p0 = scmp.ne.s32.totalorder %s229_s14, %s2252_s4  ;;  %p2258_p2 = scmp.lt.s32.totalorder %s3833_s21, %s2252_s4 }
 0x161   :  { %p2259_p3 = por %p2258_p2, %p2257_p1 }
 0x163   :  { %p2260_p4 = pnand %p2259_p3, %p2253_p0 }
 0x165   :  { %2263 = shalt.err (!%p2260_p4)  }
 0x166   :  { %231 = dma.hbm_to_vmem [thread:$0]  %s224_s26, 64, %s229_s14, [#allocation2 + $0xd], %s3698_s23, %s3698_s23, %s3699_s24 }
 0x167   :  { %s1624_s16 = sld [smem:[#allocation5 + $0xe]]  ;;  %s1627_s13 = sld [smem:[#allocation5 + $0xf]] }
 0x168   :  { %s3711_s29 = smov [#allocation6 + $0x26]   ;;  %s3712_s12 = smov [#allocation6 + $0x27]  }
 0x169   :  { %s243_s28 = sshll.u32 %s3711_s29, 4  ;;  %s258_s11 = sshll.u32 %s3712_s12, 4  ;;  %s4080_s28 = int_to_ptr.vmem [resolvable:$true] %s243_s28  ;;  %s4082_s11 = int_to_ptr.vmem [resolvable:$true] %s258_s11 }
 0x16a   :  { %s4078_s27 = sld [smem:[#allocation5 + $0x10]] }
 0x16d   :  { %s234_s5 = sshrl.u32 %s1624_s16, 3  ;;  %s235_s10 = sand.u32 7, %s1624_s16  }
 0x16e   :  { %s1625_s1 = sshll.u32 %s234_s5, 5  ;;  %s249_s7 = sshrl.u32 %s1627_s13, 3 }
 0x16f   :  { %s237_s9 = sadd.s32 %s1625_s1, %s235_s10  ;;  %s250_s15 = sand.u32 7, %s1627_s13  }
 0x170   :  { %s1626_s17 = sshll.u32 %s237_s9, 4  ;;  %s1628_s14 = sshll.u32 %s249_s7, 5 }
 0x171   :  { %s239_s26 = scalar_lea.hbm %s4993_s2, %s1626_s17  ;;  %s252_s8 = sadd.s32 %s1628_s14, %s250_s15 }
 0x172   :  { %s2264_s30 = scalar_lea.hbm %s239_s26, 64  ;;  %p2267_p7 = scmp.lt.u32.totalorder %s239_s26, %s4993_s2 }
 0x173   :  { %p2265_p6 = scmp.ne.s32.totalorder %s239_s26, %s2264_s30  ;;  %p2268_p8 = scmp.lt.u32.totalorder %s3824_s18, %s2264_s30 }
 0x174   :  { %p2270_p10 = scmp.lt.u32.totalorder %s2264_s30, %s239_s26 }
 0x175   :  { %p2269_p9 = por %p2268_p8, %p2267_p7 }
 0x177   :  { %p2271_p11 = por %p2270_p10, %p2269_p9 }
 0x179   :  { %p2272_p12 = pnand %p2271_p11, %p2265_p6 }
 0x17b   :  { %2275 = shalt.err (!%p2272_p12)  }
 0x17c   :  { %s2276_s16 = scalar_lea.vmem %s4080_s28, 64  ;;  %p2281_p0 = scmp.lt.s32.totalorder %s4080_s28, %s3806_s25 }
 0x17d   :  { %p2277_p13 = scmp.ne.s32.totalorder %s4080_s28, %s2276_s16  ;;  %p2282_p1 = scmp.lt.s32.totalorder %s3833_s21, %s2276_s16 }
 0x17f   :  { %p2283_p2 = por %p2282_p1, %p2281_p0 }
 0x181   :  { %p2284_p3 = pnand %p2283_p2, %p2277_p13 }
 0x183   :  { %2287 = shalt.err (!%p2284_p3)  }
 0x184   :  { %246 = dma.hbm_to_vmem [thread:$0]  %s239_s26, 64, %s4080_s28, [#allocation2 + $0xe], %s3698_s23, %s3698_s23, %s3699_s24 }
 0x185   :  { %s1629_s13 = sshll.u32 %s252_s8, 4 }
 0x186   :  { %s254_s5 = scalar_lea.hbm %s4993_s2, %s1629_s13 }
 0x187   :  { %s2288_s10 = scalar_lea.hbm %s254_s5, 64  ;;  %p2291_p6 = scmp.lt.u32.totalorder %s254_s5, %s4993_s2 }
 0x188   :  { %p2289_p4 = scmp.ne.s32.totalorder %s254_s5, %s2288_s10  ;;  %p2292_p7 = scmp.lt.u32.totalorder %s3824_s18, %s2288_s10 }
 0x189   :  { %p2294_p9 = scmp.lt.u32.totalorder %s2288_s10, %s254_s5 }
 0x18a   :  { %p2293_p8 = por %p2292_p7, %p2291_p6 }
 0x18c   :  { %p2295_p10 = por %p2294_p9, %p2293_p8 }
 0x18e   :  { %p2296_p11 = pnand %p2295_p10, %p2289_p4 }
 0x190   :  { %2299 = shalt.err (!%p2296_p11)  }
 0x191   :  { %s2300_s28 = scalar_lea.vmem %s4082_s11, 64  ;;  %p2305_p13 = scmp.lt.s32.totalorder %s4082_s11, %s3806_s25 }
 0x192   :  { %p2301_p12 = scmp.ne.s32.totalorder %s4082_s11, %s2300_s28  ;;  %p2306_p0 = scmp.lt.s32.totalorder %s3833_s21, %s2300_s28 }
 0x194   :  { %p2307_p1 = por %p2306_p0, %p2305_p13 }
 0x196   :  { %p2308_p2 = pnand %p2307_p1, %p2301_p12 }
 0x198   :  { %2311 = shalt.err (!%p2308_p2)  }
 0x199   :  { %261 = dma.hbm_to_vmem [thread:$0]  %s254_s5, 64, %s4082_s11, [#allocation2 + $0xf], %s3698_s23, %s3698_s23, %s3699_s24 }
 0x19a   :  { %3548 = dma.done.wait [#allocation2], 64 }
 0x19b   :  { %3549 = vsyncadd [#allocation2], 4294967232  ;;  %s266_s9 = sshrl.u32 %s4078_s27, 3  ;;  %s267_s15 = sand.u32 7, %s4078_s27  }
 0x19c   :  { %s4118_s17 = sld [smem:[#allocation5 + $0x11]]  ;;  %s1631_s14 = sshll.u32 %s266_s9, 5 }
 0x19d   :  { %s269_s19 = sadd.s32 %s1631_s14, %s267_s15  ;;  %s3713_s26 = smov [#allocation6 + $0x40]  }
 0x19e   :  { %s1632_s20 = sshll.u32 %s269_s19, 4  ;;  %s274_s8 = sshll.u32 %s3713_s26, 4  ;;  %s275_s8 = int_to_ptr.vmem [resolvable:$true] %s274_s8 }
 0x19f   :  { %s271_s4 = scalar_lea.hbm %s4993_s2, %s1632_s20 }
 0x1a0   :  { %s2312_s11 = scalar_lea.hbm %s271_s4, 64  ;;  %p2315_p4 = scmp.lt.u32.totalorder %s271_s4, %s4993_s2 }
 0x1a1   :  { %p2313_p3 = scmp.ne.s32.totalorder %s271_s4, %s2312_s11  ;;  %p2316_p6 = scmp.lt.u32.totalorder %s3824_s18, %s2312_s11 }
 0x1a2   :  { %p2318_p8 = scmp.lt.u32.totalorder %s2312_s11, %s271_s4 }
 0x1a3   :  { %p2317_p7 = por %p2316_p6, %p2315_p4 }
 0x1a5   :  { %p2319_p9 = por %p2318_p8, %p2317_p7 }
 0x1a7   :  { %p2320_p10 = pnand %p2319_p9, %p2313_p3 }
 0x1a9   :  { %2323 = shalt.err (!%p2320_p10)  }
 0x1aa   :  { %s2324_s27 = scalar_lea.vmem %s275_s8, 64  ;;  %p2329_p12 = scmp.lt.s32.totalorder %s275_s8, %s3806_s25 }
 0x1ab   :  { %p2325_p11 = scmp.ne.s32.totalorder %s275_s8, %s2324_s27  ;;  %p2330_p13 = scmp.lt.s32.totalorder %s3833_s21, %s2324_s27 }
 0x1ad   :  { %p2331_p0 = por %p2330_p13, %p2329_p12 }
 0x1af   :  { %p2332_p1 = pnand %p2331_p0, %p2325_p11 }
 0x1b1   :  { %2335 = shalt.err (!%p2332_p1)  }
 0x1b2   :  { %277 = dma.hbm_to_vmem [thread:$0]  %s271_s4, 64, %s275_s8, [#allocation2], %s3698_s23, %s3698_s23, %s3699_s24 }
 0x1b3   :  { %3550 = dma.done.wait [#allocation2 + $0x1], 64 }
 0x1b4   :  { %3551 = vsyncadd [#allocation2 + $0x1], 4294967232  ;;  %s282_s29 = sshrl.u32 %s4118_s17, 3  ;;  %s283_s12 = sand.u32 7, %s4118_s17  }
 0x1b5   :  { %s4134_s5 = sld [smem:[#allocation5 + $0x12]]  ;;  %s1634_s10 = sshll.u32 %s282_s29, 5 }
 0x1b6   :  { %s285_s1 = sadd.s32 %s1634_s10, %s283_s12  ;;  %s3714_s28 = smov [#allocation6 + $0x41]  }
 0x1b7   :  { %s1635_s7 = sshll.u32 %s285_s1, 4  ;;  %s290_s9 = sshll.u32 %s3714_s28, 4  ;;  %s291_s9 = int_to_ptr.vmem [resolvable:$true] %s290_s9 }
 0x1b8   :  { %s287_s19 = scalar_lea.hbm %s4993_s2, %s1635_s7 }
 0x1b9   :  { %s2336_s20 = scalar_lea.hbm %s287_s19, 64  ;;  %p2339_p3 = scmp.lt.u32.totalorder %s287_s19, %s4993_s2 }
 0x1ba   :  { %p2337_p2 = scmp.ne.s32.totalorder %s287_s19, %s2336_s20  ;;  %p2340_p4 = scmp.lt.u32.totalorder %s3824_s18, %s2336_s20 }
 0x1bb   :  { %p2342_p7 = scmp.lt.u32.totalorder %s2336_s20, %s287_s19 }
 0x1bc   :  { %p2341_p6 = por %p2340_p4, %p2339_p3 }
 0x1be   :  { %p2343_p8 = por %p2342_p7, %p2341_p6 }
 0x1c0   :  { %p2344_p9 = pnand %p2343_p8, %p2337_p2 }
 0x1c2   :  { %2347 = shalt.err (!%p2344_p9)  }
 0x1c3   :  { %s2348_s17 = scalar_lea.vmem %s291_s9, 64  ;;  %p2353_p11 = scmp.lt.s32.totalorder %s291_s9, %s3806_s25 }
 0x1c4   :  { %p2349_p10 = scmp.ne.s32.totalorder %s291_s9, %s2348_s17  ;;  %p2354_p12 = scmp.lt.s32.totalorder %s3833_s21, %s2348_s17 }
 0x1c6   :  { %p2355_p13 = por %p2354_p12, %p2353_p11 }
 0x1c8   :  { %p2356_p0 = pnand %p2355_p13, %p2349_p10 }
 0x1ca   :  { %2359 = shalt.err (!%p2356_p0)  }
 0x1cb   :  { %293 = dma.hbm_to_vmem [thread:$0]  %s287_s19, 64, %s291_s9, [#allocation2 + $0x1], %s3698_s23, %s3698_s23, %s3699_s24 }
 0x1cc   :  { %3552 = dma.done.wait [#allocation2 + $0x2], 64 }
 0x1cd   :  { %3553 = vsyncadd [#allocation2 + $0x2], 4294967232  ;;  %s298_s30 = sshrl.u32 %s4134_s5, 3  ;;  %s299_s6 = sand.u32 7, %s4134_s5  }
 0x1ce   :  { %s4150_s4 = sld [smem:[#allocation5 + $0x13]]  ;;  %s1637_s11 = sshll.u32 %s298_s30, 5 }
 0x1cf   :  { %s301_s16 = sadd.s32 %s1637_s11, %s299_s6  ;;  %s3715_s27 = smov [#allocation6 + $0x42]  }
 0x1d0   :  { %s1638_s13 = sshll.u32 %s301_s16, 4  ;;  %s306_s29 = sshll.u32 %s3715_s27, 4  ;;  %s307_s29 = int_to_ptr.vmem [resolvable:$true] %s306_s29 }
 0x1d1   :  { %s303_s1 = scalar_lea.hbm %s4993_s2, %s1638_s13 }
 0x1d2   :  { %s2360_s7 = scalar_lea.hbm %s303_s1, 64  ;;  %p2363_p2 = scmp.lt.u32.totalorder %s303_s1, %s4993_s2 }
 0x1d3   :  { %p2361_p1 = scmp.ne.s32.totalorder %s303_s1, %s2360_s7  ;;  %p2364_p3 = scmp.lt.u32.totalorder %s3824_s18, %s2360_s7 }
 0x1d4   :  { %p2366_p6 = scmp.lt.u32.totalorder %s2360_s7, %s303_s1 }
 0x1d5   :  { %p2365_p4 = por %p2364_p3, %p2363_p2 }
 0x1d7   :  { %p2367_p7 = por %p2366_p6, %p2365_p4 }
 0x1d9   :  { %p2368_p8 = pnand %p2367_p7, %p2361_p1 }
 0x1db   :  { %2371 = shalt.err (!%p2368_p8)  }
 0x1dc   :  { %s2372_s5 = scalar_lea.vmem %s307_s29, 64  ;;  %p2377_p10 = scmp.lt.s32.totalorder %s307_s29, %s3806_s25 }
 0x1dd   :  { %p2373_p9 = scmp.ne.s32.totalorder %s307_s29, %s2372_s5  ;;  %p2378_p11 = scmp.lt.s32.totalorder %s3833_s21, %s2372_s5 }
 0x1df   :  { %p2379_p12 = por %p2378_p11, %p2377_p10 }
 0x1e1   :  { %p2380_p13 = pnand %p2379_p12, %p2373_p9 }
 0x1e3   :  { %2383 = shalt.err (!%p2380_p13)  }
 0x1e4   :  { %309 = dma.hbm_to_vmem [thread:$0]  %s303_s1, 64, %s307_s29, [#allocation2 + $0x2], %s3698_s23, %s3698_s23, %s3699_s24 }
 0x1e5   :  { %3554 = dma.done.wait [#allocation2 + $0x3], 64 }
 0x1e6   :  { %3555 = vsyncadd [#allocation2 + $0x3], 4294967232  ;;  %s314_s15 = sshrl.u32 %s4150_s4, 3  ;;  %s315_s14 = sand.u32 7, %s4150_s4  }
 0x1e7   :  { %s4166_s19 = sld [smem:[#allocation5 + $0x14]]  ;;  %s1640_s20 = sshll.u32 %s314_s15, 5 }
 0x1e8   :  { %s317_s26 = sadd.s32 %s1640_s20, %s315_s14  ;;  %s3716_s17 = smov [#allocation6 + $0x43]  }
 0x1e9   :  { %s1641_s8 = sshll.u32 %s317_s26, 4  ;;  %s322_s30 = sshll.u32 %s3716_s17, 4  ;;  %s323_s30 = int_to_ptr.vmem [resolvable:$true] %s322_s30 }
 0x1ea   :  { %s319_s16 = scalar_lea.hbm %s4993_s2, %s1641_s8 }
 0x1eb   :  { %s2384_s13 = scalar_lea.hbm %s319_s16, 64  ;;  %p2387_p1 = scmp.lt.u32.totalorder %s319_s16, %s4993_s2 }
 0x1ec   :  { %p2385_p0 = scmp.ne.s32.totalorder %s319_s16, %s2384_s13  ;;  %p2388_p2 = scmp.lt.u32.totalorder %s3824_s18, %s2384_s13 }
 0x1ed   :  { %p2390_p4 = scmp.lt.u32.totalorder %s2384_s13, %s319_s16 }
 0x1ee   :  { %p2389_p3 = por %p2388_p2, %p2387_p1 }
 0x1f0   :  { %p2391_p6 = por %p2390_p4, %p2389_p3 }
 0x1f2   :  { %p2392_p7 = pnand %p2391_p6, %p2385_p0 }
 0x1f4   :  { %2395 = shalt.err (!%p2392_p7)  }
 0x1f5   :  { %s2396_s4 = scalar_lea.vmem %s323_s30, 64  ;;  %p2401_p9 = scmp.lt.s32.totalorder %s323_s30, %s3806_s25 }
 0x1f6   :  { %p2397_p8 = scmp.ne.s32.totalorder %s323_s30, %s2396_s4  ;;  %p2402_p10 = scmp.lt.s32.totalorder %s3833_s21, %s2396_s4 }
 0x1f8   :  { %p2403_p11 = por %p2402_p10, %p2401_p9 }
 0x1fa   :  { %p2404_p12 = pnand %p2403_p11, %p2397_p8 }
 0x1fc   :  { %2407 = shalt.err (!%p2404_p12)  }
 0x1fd   :  { %325 = dma.hbm_to_vmem [thread:$0]  %s319_s16, 64, %s323_s30, [#allocation2 + $0x3], %s3698_s23, %s3698_s23, %s3699_s24 }
 0x1fe   :  { %3556 = dma.done.wait [#allocation2 + $0x4], 64 }
 0x1ff   :  { %3557 = vsyncadd [#allocation2 + $0x4], 4294967232  ;;  %s330_s12 = sshrl.u32 %s4166_s19, 3  ;;  %s331_s10 = sand.u32 7, %s4166_s19  }
 0x200   :  { %s4182_s1 = sld [smem:[#allocation5 + $0x15]]  ;;  %s1643_s7 = sshll.u32 %s330_s12, 5 }
 0x201   :  { %s333_s28 = sadd.s32 %s1643_s7, %s331_s10  ;;  %s3717_s5 = smov [#allocation6 + $0x44]  }
 0x202   :  { %s1644_s9 = sshll.u32 %s333_s28, 4  ;;  %s338_s15 = sshll.u32 %s3717_s5, 4  ;;  %s339_s15 = int_to_ptr.vmem [resolvable:$true] %s338_s15 }
 0x203   :  { %s335_s26 = scalar_lea.hbm %s4993_s2, %s1644_s9 }
 0x204   :  { %s2408_s8 = scalar_lea.hbm %s335_s26, 64  ;;  %p2411_p0 = scmp.lt.u32.totalorder %s335_s26, %s4993_s2 }
 0x205   :  { %p2409_p13 = scmp.ne.s32.totalorder %s335_s26, %s2408_s8  ;;  %p2412_p1 = scmp.lt.u32.totalorder %s3824_s18, %s2408_s8 }
 0x206   :  { %p2414_p3 = scmp.lt.u32.totalorder %s2408_s8, %s335_s26 }
 0x207   :  { %p2413_p2 = por %p2412_p1, %p2411_p0 }
 0x209   :  { %p2415_p4 = por %p2414_p3, %p2413_p2 }
 0x20b   :  { %p2416_p6 = pnand %p2415_p4, %p2409_p13 }
 0x20d   :  { %2419 = shalt.err (!%p2416_p6)  }
 0x20e   :  { %s2420_s19 = scalar_lea.vmem %s339_s15, 64  ;;  %p2425_p8 = scmp.lt.s32.totalorder %s339_s15, %s3806_s25 }
 0x20f   :  { %p2421_p7 = scmp.ne.s32.totalorder %s339_s15, %s2420_s19  ;;  %p2426_p9 = scmp.lt.s32.totalorder %s3833_s21, %s2420_s19 }
 0x211   :  { %p2427_p10 = por %p2426_p9, %p2425_p8 }
 0x213   :  { %p2428_p11 = pnand %p2427_p10, %p2421_p7 }
 0x215   :  { %2431 = shalt.err (!%p2428_p11)  }
 0x216   :  { %341 = dma.hbm_to_vmem [thread:$0]  %s335_s26, 64, %s339_s15, [#allocation2 + $0x4], %s3698_s23, %s3698_s23, %s3699_s24 }
 0x217   :  { %3558 = dma.done.wait [#allocation2 + $0x5], 64 }
 0x218   :  { %3559 = vsyncadd [#allocation2 + $0x5], 4294967232  ;;  %s346_s6 = sshrl.u32 %s4182_s1, 3  ;;  %s347_s11 = sand.u32 7, %s4182_s1  }
 0x219   :  { %s4198_s16 = sld [smem:[#allocation5 + $0x16]]  ;;  %s1646_s13 = sshll.u32 %s346_s6, 5 }
 0x21a   :  { %s349_s27 = sadd.s32 %s1646_s13, %s347_s11  ;;  %s3718_s4 = smov [#allocation6 + $0x45]  }
 0x21b   :  { %s1647_s29 = sshll.u32 %s349_s27, 4  ;;  %s354_s12 = sshll.u32 %s3718_s4, 4  ;;  %s355_s12 = int_to_ptr.vmem [resolvable:$true] %s354_s12 }
 0x21c   :  { %s351_s28 = scalar_lea.hbm %s4993_s2, %s1647_s29 }
 0x21d   :  { %s2432_s9 = scalar_lea.hbm %s351_s28, 64  ;;  %p2435_p13 = scmp.lt.u32.totalorder %s351_s28, %s4993_s2 }
 0x21e   :  { %p2433_p12 = scmp.ne.s32.totalorder %s351_s28, %s2432_s9  ;;  %p2436_p0 = scmp.lt.u32.totalorder %s3824_s18, %s2432_s9 }
 0x21f   :  { %p2438_p2 = scmp.lt.u32.totalorder %s2432_s9, %s351_s28 }
 0x220   :  { %p2437_p1 = por %p2436_p0, %p2435_p13 }
 0x222   :  { %p2439_p3 = por %p2438_p2, %p2437_p1 }
 0x224   :  { %p2440_p4 = pnand %p2439_p3, %p2433_p12 }
 0x226   :  { %2443 = shalt.err (!%p2440_p4)  }
 0x227   :  { %s2444_s1 = scalar_lea.vmem %s355_s12, 64  ;;  %p2449_p7 = scmp.lt.s32.totalorder %s355_s12, %s3806_s25 }
 0x228   :  { %p2445_p6 = scmp.ne.s32.totalorder %s355_s12, %s2444_s1  ;;  %p2450_p8 = scmp.lt.s32.totalorder %s3833_s21, %s2444_s1 }
 0x22a   :  { %p2451_p9 = por %p2450_p8, %p2449_p7 }
 0x22c   :  { %p2452_p10 = pnand %p2451_p9, %p2445_p6 }
 0x22e   :  { %2455 = shalt.err (!%p2452_p10)  }
 0x22f   :  { %357 = dma.hbm_to_vmem [thread:$0]  %s351_s28, 64, %s355_s12, [#allocation2 + $0x5], %s3698_s23, %s3698_s23, %s3699_s24 }
 0x230   :  { %3560 = dma.done.wait [#allocation2 + $0x6], 64 }
 0x231   :  { %3561 = vsyncadd [#allocation2 + $0x6], 4294967232  ;;  %s362_s14 = sshrl.u32 %s4198_s16, 3  ;;  %s363_s20 = sand.u32 7, %s4198_s16  }
 0x232   :  { %s4214_s26 = sld [smem:[#allocation5 + $0x17]]  ;;  %s1649_s8 = sshll.u32 %s362_s14, 5 }
 0x233   :  { %s365_s17 = sadd.s32 %s1649_s8, %s363_s20  ;;  %s3719_s19 = smov [#allocation6 + $0x46]  }
 0x234   :  { %s1650_s30 = sshll.u32 %s365_s17, 4  ;;  %s370_s6 = sshll.u32 %s3719_s19, 4  ;;  %s371_s6 = int_to_ptr.vmem [resolvable:$true] %s370_s6 }
 0x235   :  { %s367_s27 = scalar_lea.hbm %s4993_s2, %s1650_s30 }
 0x236   :  { %s2456_s29 = scalar_lea.hbm %s367_s27, 64  ;;  %p2459_p12 = scmp.lt.u32.totalorder %s367_s27, %s4993_s2 }
 0x237   :  { %p2457_p11 = scmp.ne.s32.totalorder %s367_s27, %s2456_s29  ;;  %p2460_p13 = scmp.lt.u32.totalorder %s3824_s18, %s2456_s29 }
 0x238   :  { %p2462_p1 = scmp.lt.u32.totalorder %s2456_s29, %s367_s27 }
 0x239   :  { %p2461_p0 = por %p2460_p13, %p2459_p12 }
 0x23b   :  { %p2463_p2 = por %p2462_p1, %p2461_p0 }
 0x23d   :  { %p2464_p3 = pnand %p2463_p2, %p2457_p11 }
 0x23f   :  { %2467 = shalt.err (!%p2464_p3)  }
 0x240   :  { %s2468_s16 = scalar_lea.vmem %s371_s6, 64  ;;  %p2473_p6 = scmp.lt.s32.totalorder %s371_s6, %s3806_s25 }
 0x241   :  { %p2469_p4 = scmp.ne.s32.totalorder %s371_s6, %s2468_s16  ;;  %p2474_p7 = scmp.lt.s32.totalorder %s3833_s21, %s2468_s16 }
 0x243   :  { %p2475_p8 = por %p2474_p7, %p2473_p6 }
 0x245   :  { %p2476_p9 = pnand %p2475_p8, %p2469_p4 }
 0x247   :  { %2479 = shalt.err (!%p2476_p9)  }
 0x248   :  { %373 = dma.hbm_to_vmem [thread:$0]  %s367_s27, 64, %s371_s6, [#allocation2 + $0x6], %s3698_s23, %s3698_s23, %s3699_s24 }
 0x249   :  { %3562 = dma.done.wait [#allocation2 + $0x7], 64 }
 0x24a   :  { %3563 = vsyncadd [#allocation2 + $0x7], 4294967232  ;;  %s378_s10 = sshrl.u32 %s4214_s26, 3  ;;  %s379_s7 = sand.u32 7, %s4214_s26  }
 0x24b   :  { %s4230_s28 = sld [smem:[#allocation5 + $0x18]]  ;;  %s1652_s9 = sshll.u32 %s378_s10, 5 }
 0x24c   :  { %s381_s5 = sadd.s32 %s1652_s9, %s379_s7  ;;  %s3720_s1 = smov [#allocation6 + $0x47]  }
 0x24d   :  { %s1653_s15 = sshll.u32 %s381_s5, 4  ;;  %s386_s14 = sshll.u32 %s3720_s1, 4  ;;  %s387_s14 = int_to_ptr.vmem [resolvable:$true] %s386_s14 }
 0x24e   :  { %s383_s17 = scalar_lea.hbm %s4993_s2, %s1653_s15 }
 0x24f   :  { %s2480_s30 = scalar_lea.hbm %s383_s17, 64  ;;  %p2483_p11 = scmp.lt.u32.totalorder %s383_s17, %s4993_s2 }
 0x250   :  { %p2481_p10 = scmp.ne.s32.totalorder %s383_s17, %s2480_s30  ;;  %p2484_p12 = scmp.lt.u32.totalorder %s3824_s18, %s2480_s30 }
 0x251   :  { %p2486_p0 = scmp.lt.u32.totalorder %s2480_s30, %s383_s17 }
 0x252   :  { %p2485_p13 = por %p2484_p12, %p2483_p11 }
 0x254   :  { %p2487_p1 = por %p2486_p0, %p2485_p13 }
 0x256   :  { %p2488_p2 = pnand %p2487_p1, %p2481_p10 }
 0x258   :  { %2491 = shalt.err (!%p2488_p2)  }
 0x259   :  { %s2492_s26 = scalar_lea.vmem %s387_s14, 64  ;;  %p2497_p4 = scmp.lt.s32.totalorder %s387_s14, %s3806_s25 }
 0x25a   :  { %p2493_p3 = scmp.ne.s32.totalorder %s387_s14, %s2492_s26  ;;  %p2498_p6 = scmp.lt.s32.totalorder %s3833_s21, %s2492_s26 }
 0x25c   :  { %p2499_p7 = por %p2498_p6, %p2497_p4 }
 0x25e   :  { %p2500_p8 = pnand %p2499_p7, %p2493_p3 }
 0x260   :  { %2503 = shalt.err (!%p2500_p8)  }
 0x261   :  { %389 = dma.hbm_to_vmem [thread:$0]  %s383_s17, 64, %s387_s14, [#allocation2 + $0x7], %s3698_s23, %s3698_s23, %s3699_s24 }
 0x262   :  { %3564 = dma.done.wait [#allocation2 + $0x8], 64 }
 0x263   :  { %3565 = vsyncadd [#allocation2 + $0x8], 4294967232  ;;  %s394_s11 = sshrl.u32 %s4230_s28, 3  ;;  %s395_s13 = sand.u32 7, %s4230_s28  }
 0x264   :  { %s4246_s27 = sld [smem:[#allocation5 + $0x19]]  ;;  %s1655_s29 = sshll.u32 %s394_s11, 5 }
 0x265   :  { %s397_s4 = sadd.s32 %s1655_s29, %s395_s13  ;;  %s3721_s16 = smov [#allocation6 + $0x60]  }
 0x266   :  { %s1656_s12 = sshll.u32 %s397_s4, 4  ;;  %s402_s10 = sshll.u32 %s3721_s16, 4  ;;  %s403_s10 = int_to_ptr.vmem [resolvable:$true] %s402_s10 }
 0x267   :  { %s399_s5 = scalar_lea.hbm %s4993_s2, %s1656_s12 }
 0x268   :  { %s2504_s15 = scalar_lea.hbm %s399_s5, 64  ;;  %p2507_p10 = scmp.lt.u32.totalorder %s399_s5, %s4993_s2 }
 0x269   :  { %p2505_p9 = scmp.ne.s32.totalorder %s399_s5, %s2504_s15  ;;  %p2508_p11 = scmp.lt.u32.totalorder %s3824_s18, %s2504_s15 }
 0x26a   :  { %p2510_p13 = scmp.lt.u32.totalorder %s2504_s15, %s399_s5 }
 0x26b   :  { %p2509_p12 = por %p2508_p11, %p2507_p10 }
 0x26d   :  { %p2511_p0 = por %p2510_p13, %p2509_p12 }
 0x26f   :  { %p2512_p1 = pnand %p2511_p0, %p2505_p9 }
 0x271   :  { %2515 = shalt.err (!%p2512_p1)  }
 0x272   :  { %s2516_s28 = scalar_lea.vmem %s403_s10, 64  ;;  %p2521_p3 = scmp.lt.s32.totalorder %s403_s10, %s3806_s25 }
 0x273   :  { %p2517_p2 = scmp.ne.s32.totalorder %s403_s10, %s2516_s28  ;;  %p2522_p4 = scmp.lt.s32.totalorder %s3833_s21, %s2516_s28 }
 0x275   :  { %p2523_p6 = por %p2522_p4, %p2521_p3 }
 0x277   :  { %p2524_p7 = pnand %p2523_p6, %p2517_p2 }
 0x279   :  { %2527 = shalt.err (!%p2524_p7)  }
 0x27a   :  { %405 = dma.hbm_to_vmem [thread:$0]  %s399_s5, 64, %s403_s10, [#allocation2 + $0x8], %s3698_s23, %s3698_s23, %s3699_s24 }
 0x27b   :  { %3566 = dma.done.wait [#allocation2 + $0x9], 64 }
 0x27c   :  { %3567 = vsyncadd [#allocation2 + $0x9], 4294967232  ;;  %s410_s20 = sshrl.u32 %s4246_s27, 3  ;;  %s411_s8 = sand.u32 7, %s4246_s27  }
 0x27d   :  { %s4262_s17 = sld [smem:[#allocation5 + $0x1a]]  ;;  %s1658_s30 = sshll.u32 %s410_s20, 5 }
 0x27e   :  { %s413_s19 = sadd.s32 %s1658_s30, %s411_s8  ;;  %s3722_s26 = smov [#allocation6 + $0x61]  }
 0x27f   :  { %s1659_s6 = sshll.u32 %s413_s19, 4  ;;  %s418_s11 = sshll.u32 %s3722_s26, 4  ;;  %s419_s11 = int_to_ptr.vmem [resolvable:$true] %s418_s11 }
 0x280   :  { %s415_s4 = scalar_lea.hbm %s4993_s2, %s1659_s6 }
 0x281   :  { %s2528_s12 = scalar_lea.hbm %s415_s4, 64  ;;  %p2531_p9 = scmp.lt.u32.totalorder %s415_s4, %s4993_s2 }
 0x282   :  { %p2529_p8 = scmp.ne.s32.totalorder %s415_s4, %s2528_s12  ;;  %p2532_p10 = scmp.lt.u32.totalorder %s3824_s18, %s2528_s12 }
 0x283   :  { %p2534_p12 = scmp.lt.u32.totalorder %s2528_s12, %s415_s4 }
 0x284   :  { %p2533_p11 = por %p2532_p10, %p2531_p9 }
 0x286   :  { %p2535_p13 = por %p2534_p12, %p2533_p11 }
 0x288   :  { %p2536_p0 = pnand %p2535_p13, %p2529_p8 }
 0x28a   :  { %2539 = shalt.err (!%p2536_p0)  }
 0x28b   :  { %s2540_s27 = scalar_lea.vmem %s419_s11, 64  ;;  %p2545_p2 = scmp.lt.s32.totalorder %s419_s11, %s3806_s25 }
 0x28c   :  { %p2541_p1 = scmp.ne.s32.totalorder %s419_s11, %s2540_s27  ;;  %p2546_p3 = scmp.lt.s32.totalorder %s3833_s21, %s2540_s27 }
 0x28e   :  { %p2547_p4 = por %p2546_p3, %p2545_p2 }
 0x290   :  { %p2548_p6 = pnand %p2547_p4, %p2541_p1 }
 0x292   :  { %2551 = shalt.err (!%p2548_p6)  }
 0x293   :  { %421 = dma.hbm_to_vmem [thread:$0]  %s415_s4, 64, %s419_s11, [#allocation2 + $0x9], %s3698_s23, %s3698_s23, %s3699_s24 }
 0x294   :  { %3568 = dma.done.wait [#allocation2 + $0xa], 64 }
 0x295   :  { %3569 = vsyncadd [#allocation2 + $0xa], 4294967232  ;;  %s426_s7 = sshrl.u32 %s4262_s17, 3  ;;  %s427_s9 = sand.u32 7, %s4262_s17  }
 0x296   :  { %s4278_s5 = sld [smem:[#allocation5 + $0x1b]]  ;;  %s1661_s15 = sshll.u32 %s426_s7, 5 }
 0x297   :  { %s429_s1 = sadd.s32 %s1661_s15, %s427_s9  ;;  %s3723_s28 = smov [#allocation6 + $0x62]  }
 0x298   :  { %s1662_s14 = sshll.u32 %s429_s1, 4  ;;  %s434_s20 = sshll.u32 %s3723_s28, 4  ;;  %s435_s20 = int_to_ptr.vmem [resolvable:$true] %s434_s20 }
 0x299   :  { %s431_s19 = scalar_lea.hbm %s4993_s2, %s1662_s14 }
 0x29a   :  { %s2552_s6 = scalar_lea.hbm %s431_s19, 64  ;;  %p2555_p8 = scmp.lt.u32.totalorder %s431_s19, %s4993_s2 }
 0x29b   :  { %p2553_p7 = scmp.ne.s32.totalorder %s431_s19, %s2552_s6  ;;  %p2556_p9 = scmp.lt.u32.totalorder %s3824_s18, %s2552_s6 }
 0x29c   :  { %p2558_p11 = scmp.lt.u32.totalorder %s2552_s6, %s431_s19 }
 0x29d   :  { %p2557_p10 = por %p2556_p9, %p2555_p8 }
 0x29f   :  { %p2559_p12 = por %p2558_p11, %p2557_p10 }
 0x2a1   :  { %p2560_p13 = pnand %p2559_p12, %p2553_p7 }
 0x2a3   :  { %2563 = shalt.err (!%p2560_p13)  }
 0x2a4   :  { %s2564_s17 = scalar_lea.vmem %s435_s20, 64  ;;  %p2569_p1 = scmp.lt.s32.totalorder %s435_s20, %s3806_s25 }
 0x2a5   :  { %p2565_p0 = scmp.ne.s32.totalorder %s435_s20, %s2564_s17  ;;  %p2570_p2 = scmp.lt.s32.totalorder %s3833_s21, %s2564_s17 }
 0x2a7   :  { %p2571_p3 = por %p2570_p2, %p2569_p1 }
 0x2a9   :  { %p2572_p4 = pnand %p2571_p3, %p2565_p0 }
 0x2ab   :  { %2575 = shalt.err (!%p2572_p4)  }
 0x2ac   :  { %437 = dma.hbm_to_vmem [thread:$0]  %s431_s19, 64, %s435_s20, [#allocation2 + $0xa], %s3698_s23, %s3698_s23, %s3699_s24 }
 0x2ad   :  { %3570 = dma.done.wait [#allocation2 + $0xb], 64 }
 0x2ae   :  { %3571 = vsyncadd [#allocation2 + $0xb], 4294967232  ;;  %s442_s13 = sshrl.u32 %s4278_s5, 3  ;;  %s443_s29 = sand.u32 7, %s4278_s5  }
 0x2af   :  { %s4294_s4 = sld [smem:[#allocation5 + $0x1c]]  ;;  %s1664_s12 = sshll.u32 %s442_s13, 5 }
 0x2b0   :  { %s445_s16 = sadd.s32 %s1664_s12, %s443_s29  ;;  %s3724_s27 = smov [#allocation6 + $0x63]  }
 0x2b1   :  { %s1665_s10 = sshll.u32 %s445_s16, 4  ;;  %s450_s7 = sshll.u32 %s3724_s27, 4  ;;  %s451_s7 = int_to_ptr.vmem [resolvable:$true] %s450_s7 }
 0x2b2   :  { %s447_s1 = scalar_lea.hbm %s4993_s2, %s1665_s10 }
 0x2b3   :  { %s2576_s14 = scalar_lea.hbm %s447_s1, 64  ;;  %p2579_p7 = scmp.lt.u32.totalorder %s447_s1, %s4993_s2 }
 0x2b4   :  { %p2577_p6 = scmp.ne.s32.totalorder %s447_s1, %s2576_s14  ;;  %p2580_p8 = scmp.lt.u32.totalorder %s3824_s18, %s2576_s14 }
 0x2b5   :  { %p2582_p10 = scmp.lt.u32.totalorder %s2576_s14, %s447_s1 }
 0x2b6   :  { %p2581_p9 = por %p2580_p8, %p2579_p7 }
 0x2b8   :  { %p2583_p11 = por %p2582_p10, %p2581_p9 }
 0x2ba   :  { %p2584_p12 = pnand %p2583_p11, %p2577_p6 }
 0x2bc   :  { %2587 = shalt.err (!%p2584_p12)  }
 0x2bd   :  { %s2588_s5 = scalar_lea.vmem %s451_s7, 64  ;;  %p2593_p0 = scmp.lt.s32.totalorder %s451_s7, %s3806_s25 }
 0x2be   :  { %p2589_p13 = scmp.ne.s32.totalorder %s451_s7, %s2588_s5  ;;  %p2594_p1 = scmp.lt.s32.totalorder %s3833_s21, %s2588_s5 }
 0x2c0   :  { %p2595_p2 = por %p2594_p1, %p2593_p0 }
 0x2c2   :  { %p2596_p3 = pnand %p2595_p2, %p2589_p13 }
 0x2c4   :  { %2599 = shalt.err (!%p2596_p3)  }
 0x2c5   :  { %453 = dma.hbm_to_vmem [thread:$0]  %s447_s1, 64, %s451_s7, [#allocation2 + $0xb], %s3698_s23, %s3698_s23, %s3699_s24 }
 0x2c6   :  { %3572 = dma.done.wait [#allocation2 + $0xc], 64 }
 0x2c7   :  { %3573 = vsyncadd [#allocation2 + $0xc], 4294967232  ;;  %s458_s8 = sshrl.u32 %s4294_s4, 3  ;;  %s459_s30 = sand.u32 7, %s4294_s4  }
 0x2c8   :  { %s4310_s19 = sld [smem:[#allocation5 + $0x1d]]  ;;  %s1667_s6 = sshll.u32 %s458_s8, 5 }
 0x2c9   :  { %s461_s26 = sadd.s32 %s1667_s6, %s459_s30  ;;  %s3725_s17 = smov [#allocation6 + $0x64]  }
 0x2ca   :  { %s1668_s11 = sshll.u32 %s461_s26, 4  ;;  %s466_s13 = sshll.u32 %s3725_s17, 4  ;;  %s467_s13 = int_to_ptr.vmem [resolvable:$true] %s466_s13 }
 0x2cb   :  { %s463_s16 = scalar_lea.hbm %s4993_s2, %s1668_s11 }
 0x2cc   :  { %s2600_s10 = scalar_lea.hbm %s463_s16, 64  ;;  %p2603_p6 = scmp.lt.u32.totalorder %s463_s16, %s4993_s2 }
 0x2cd   :  { %p2601_p4 = scmp.ne.s32.totalorder %s463_s16, %s2600_s10  ;;  %p2604_p7 = scmp.lt.u32.totalorder %s3824_s18, %s2600_s10 }
 0x2ce   :  { %p2606_p9 = scmp.lt.u32.totalorder %s2600_s10, %s463_s16 }
 0x2cf   :  { %p2605_p8 = por %p2604_p7, %p2603_p6 }
 0x2d1   :  { %p2607_p10 = por %p2606_p9, %p2605_p8 }
 0x2d3   :  { %p2608_p11 = pnand %p2607_p10, %p2601_p4 }
 0x2d5   :  { %2611 = shalt.err (!%p2608_p11)  }
 0x2d6   :  { %s2612_s4 = scalar_lea.vmem %s467_s13, 64  ;;  %p2617_p13 = scmp.lt.s32.totalorder %s467_s13, %s3806_s25 }
 0x2d7   :  { %p2613_p12 = scmp.ne.s32.totalorder %s467_s13, %s2612_s4  ;;  %p2618_p0 = scmp.lt.s32.totalorder %s3833_s21, %s2612_s4 }
 0x2d9   :  { %p2619_p1 = por %p2618_p0, %p2617_p13 }
 0x2db   :  { %p2620_p2 = pnand %p2619_p1, %p2613_p12 }
 0x2dd   :  { %2623 = shalt.err (!%p2620_p2)  }
 0x2de   :  { %469 = dma.hbm_to_vmem [thread:$0]  %s463_s16, 64, %s467_s13, [#allocation2 + $0xc], %s3698_s23, %s3698_s23, %s3699_s24 }
 0x2df   :  { %3574 = dma.done.wait [#allocation2 + $0xd], 64 }
 0x2e0   :  { %3575 = vsyncadd [#allocation2 + $0xd], 4294967232  ;;  %s474_s9 = sshrl.u32 %s4310_s19, 3  ;;  %s475_s15 = sand.u32 7, %s4310_s19  }
 0x2e1   :  { %s4326_s1 = sld [smem:[#allocation5 + $0x1e]]  ;;  %s1670_s14 = sshll.u32 %s474_s9, 5 }
 0x2e2   :  { %s477_s28 = sadd.s32 %s1670_s14, %s475_s15  ;;  %s3726_s5 = smov [#allocation6 + $0x65]  }
 0x2e3   :  { %s1671_s20 = sshll.u32 %s477_s28, 4  ;;  %s482_s8 = sshll.u32 %s3726_s5, 4  ;;  %s483_s8 = int_to_ptr.vmem [resolvable:$true] %s482_s8 }
 0x2e4   :  { %s479_s26 = scalar_lea.hbm %s4993_s2, %s1671_s20 }
 0x2e5   :  { %s2624_s11 = scalar_lea.hbm %s479_s26, 64  ;;  %p2627_p4 = scmp.lt.u32.totalorder %s479_s26, %s4993_s2 }
 0x2e6   :  { %p2625_p3 = scmp.ne.s32.totalorder %s479_s26, %s2624_s11  ;;  %p2628_p6 = scmp.lt.u32.totalorder %s3824_s18, %s2624_s11 }
 0x2e7   :  { %p2630_p8 = scmp.lt.u32.totalorder %s2624_s11, %s479_s26 }
 0x2e8   :  { %p2629_p7 = por %p2628_p6, %p2627_p4 }
 0x2ea   :  { %p2631_p9 = por %p2630_p8, %p2629_p7 }
 0x2ec   :  { %p2632_p10 = pnand %p2631_p9, %p2625_p3 }
 0x2ee   :  { %2635 = shalt.err (!%p2632_p10)  }
 0x2ef   :  { %s2636_s19 = scalar_lea.vmem %s483_s8, 64  ;;  %p2641_p12 = scmp.lt.s32.totalorder %s483_s8, %s3806_s25 }
 0x2f0   :  { %p2637_p11 = scmp.ne.s32.totalorder %s483_s8, %s2636_s19  ;;  %p2642_p13 = scmp.lt.s32.totalorder %s3833_s21, %s2636_s19 }
 0x2f2   :  { %p2643_p0 = por %p2642_p13, %p2641_p12 }
 0x2f4   :  { %p2644_p1 = pnand %p2643_p0, %p2637_p11 }
 0x2f6   :  { %2647 = shalt.err (!%p2644_p1)  }
 0x2f7   :  { %485 = dma.hbm_to_vmem [thread:$0]  %s479_s26, 64, %s483_s8, [#allocation2 + $0xd], %s3698_s23, %s3698_s23, %s3699_s24 }
 0x2f8   :  { %3576 = dma.done.wait [#allocation2 + $0xe], 64 }
 0x2f9   :  { %3577 = vsyncadd [#allocation2 + $0xe], 4294967232  ;;  %s490_s29 = sshrl.u32 %s4326_s1, 3  ;;  %s491_s12 = sand.u32 7, %s4326_s1  }
 0x2fa   :  { %s4342_s16 = sld [smem:[#allocation5 + $0x1f]]  ;;  %s1673_s10 = sshll.u32 %s490_s29, 5 }
 0x2fb   :  { %s493_s27 = sadd.s32 %s1673_s10, %s491_s12  ;;  %s3727_s4 = smov [#allocation6 + $0x66]  }
 0x2fc   :  { %s1674_s7 = sshll.u32 %s493_s27, 4  ;;  %s498_s9 = sshll.u32 %s3727_s4, 4  ;;  %s499_s9 = int_to_ptr.vmem [resolvable:$true] %s498_s9 }
 0x2fd   :  { %s495_s28 = scalar_lea.hbm %s4993_s2, %s1674_s7 }
 0x2fe   :  { %s2648_s20 = scalar_lea.hbm %s495_s28, 64  ;;  %p2651_p3 = scmp.lt.u32.totalorder %s495_s28, %s4993_s2 }
 0x2ff   :  { %p2649_p2 = scmp.ne.s32.totalorder %s495_s28, %s2648_s20  ;;  %p2652_p4 = scmp.lt.u32.totalorder %s3824_s18, %s2648_s20 }
 0x300   :  { %p2654_p7 = scmp.lt.u32.totalorder %s2648_s20, %s495_s28 }
 0x301   :  { %p2653_p6 = por %p2652_p4, %p2651_p3 }
 0x303   :  { %p2655_p8 = por %p2654_p7, %p2653_p6 }
 0x305   :  { %p2656_p9 = pnand %p2655_p8, %p2649_p2 }
 0x307   :  { %2659 = shalt.err (!%p2656_p9)  }
 0x308   :  { %s2660_s1 = scalar_lea.vmem %s499_s9, 64  ;;  %p2665_p11 = scmp.lt.s32.totalorder %s499_s9, %s3806_s25 }
 0x309   :  { %p2661_p10 = scmp.ne.s32.totalorder %s499_s9, %s2660_s1  ;;  %p2666_p12 = scmp.lt.s32.totalorder %s3833_s21, %s2660_s1 }
 0x30b   :  { %p2667_p13 = por %p2666_p12, %p2665_p11 }
 0x30d   :  { %p2668_p0 = pnand %p2667_p13, %p2661_p10 }
 0x30f   :  { %2671 = shalt.err (!%p2668_p0)  }
 0x310   :  { %501 = dma.hbm_to_vmem [thread:$0]  %s495_s28, 64, %s499_s9, [#allocation2 + $0xe], %s3698_s23, %s3698_s23, %s3699_s24 }
 0x311   :  { %3578 = dma.done.wait [#allocation2 + $0xf], 64 }
 0x312   :  { %3579 = vsyncadd [#allocation2 + $0xf], 4294967232  ;;  %s506_s30 = sshrl.u32 %s4342_s16, 3  ;;  %s507_s6 = sand.u32 7, %s4342_s16  }
 0x313   :  { %s4358_s26 = sld [smem:[#allocation5 + $0x20]]  ;;  %s1676_s11 = sshll.u32 %s506_s30, 5 }
 0x314   :  { %s509_s17 = sadd.s32 %s1676_s11, %s507_s6  ;;  %s3728_s19 = smov [#allocation6 + $0x67]  }
 0x315   :  { %s1677_s13 = sshll.u32 %s509_s17, 4  ;;  %s514_s29 = sshll.u32 %s3728_s19, 4  ;;  %s515_s29 = int_to_ptr.vmem [resolvable:$true] %s514_s29 }
 0x316   :  { %s511_s27 = scalar_lea.hbm %s4993_s2, %s1677_s13 }
 0x317   :  { %s2672_s7 = scalar_lea.hbm %s511_s27, 64  ;;  %p2675_p2 = scmp.lt.u32.totalorder %s511_s27, %s4993_s2 }
 0x318   :  { %p2673_p1 = scmp.ne.s32.totalorder %s511_s27, %s2672_s7  ;;  %p2676_p3 = scmp.lt.u32.totalorder %s3824_s18, %s2672_s7 }
 0x319   :  { %p2678_p6 = scmp.lt.u32.totalorder %s2672_s7, %s511_s27 }
 0x31a   :  { %p2677_p4 = por %p2676_p3, %p2675_p2 }
 0x31c   :  { %p2679_p7 = por %p2678_p6, %p2677_p4 }
 0x31e   :  { %p2680_p8 = pnand %p2679_p7, %p2673_p1 }
 0x320   :  { %2683 = shalt.err (!%p2680_p8)  }
 0x321   :  { %s2684_s16 = scalar_lea.vmem %s515_s29, 64  ;;  %p2689_p10 = scmp.lt.s32.totalorder %s515_s29, %s3806_s25 }
 0x322   :  { %p2685_p9 = scmp.ne.s32.totalorder %s515_s29, %s2684_s16  ;;  %p2690_p11 = scmp.lt.s32.totalorder %s3833_s21, %s2684_s16 }
 0x324   :  { %p2691_p12 = por %p2690_p11, %p2689_p10 }
 0x326   :  { %p2692_p13 = pnand %p2691_p12, %p2685_p9 }
 0x328   :  { %2695 = shalt.err (!%p2692_p13)  }
 0x329   :  { %517 = dma.hbm_to_vmem [thread:$0]  %s511_s27, 64, %s515_s29, [#allocation2 + $0xf], %s3698_s23, %s3698_s23, %s3699_s24 }
 0x32a   :  { %3580 = dma.done.wait [#allocation2], 64 }
 0x32b   :  { %3581 = vsyncadd [#allocation2], 4294967232  ;;  %s522_s15 = sshrl.u32 %s4358_s26, 3  ;;  %s523_s14 = sand.u32 7, %s4358_s26  }
 0x32c   :  { %s4374_s28 = sld [smem:[#allocation5 + $0x21]]  ;;  %s1679_s20 = sshll.u32 %s522_s15, 5 }
 0x32d   :  { %s525_s5 = sadd.s32 %s1679_s20, %s523_s14  ;;  %s3729_s1 = smov [#allocation6 + $0x80]  }
 0x32e   :  { %s1680_s8 = sshll.u32 %s525_s5, 4  ;;  %s530_s30 = sshll.u32 %s3729_s1, 4  ;;  %s531_s30 = int_to_ptr.vmem [resolvable:$true] %s530_s30 }
 0x32f   :  { %s527_s17 = scalar_lea.hbm %s4993_s2, %s1680_s8 }
 0x330   :  { %s2696_s13 = scalar_lea.hbm %s527_s17, 64  ;;  %p2699_p1 = scmp.lt.u32.totalorder %s527_s17, %s4993_s2 }
 0x331   :  { %p2697_p0 = scmp.ne.s32.totalorder %s527_s17, %s2696_s13  ;;  %p2700_p2 = scmp.lt.u32.totalorder %s3824_s18, %s2696_s13 }
 0x332   :  { %p2702_p4 = scmp.lt.u32.totalorder %s2696_s13, %s527_s17 }
 0x333   :  { %p2701_p3 = por %p2700_p2, %p2699_p1 }
 0x335   :  { %p2703_p6 = por %p2702_p4, %p2701_p3 }
 0x337   :  { %p2704_p7 = pnand %p2703_p6, %p2697_p0 }
 0x339   :  { %2707 = shalt.err (!%p2704_p7)  }
 0x33a   :  { %s2708_s26 = scalar_lea.vmem %s531_s30, 64  ;;  %p2713_p9 = scmp.lt.s32.totalorder %s531_s30, %s3806_s25 }
 0x33b   :  { %p2709_p8 = scmp.ne.s32.totalorder %s531_s30, %s2708_s26  ;;  %p2714_p10 = scmp.lt.s32.totalorder %s3833_s21, %s2708_s26 }
 0x33d   :  { %p2715_p11 = por %p2714_p10, %p2713_p9 }
 0x33f   :  { %p2716_p12 = pnand %p2715_p11, %p2709_p8 }
 0x341   :  { %2719 = shalt.err (!%p2716_p12)  }
 0x342   :  { %533 = dma.hbm_to_vmem [thread:$0]  %s527_s17, 64, %s531_s30, [#allocation2], %s3698_s23, %s3698_s23, %s3699_s24 }
 0x343   :  { %3582 = dma.done.wait [#allocation2 + $0x1], 64 }
 0x344   :  { %3583 = vsyncadd [#allocation2 + $0x1], 4294967232  ;;  %s538_s12 = sshrl.u32 %s4374_s28, 3  ;;  %s539_s10 = sand.u32 7, %s4374_s28  }
 0x345   :  { %s4390_s27 = sld [smem:[#allocation5 + $0x22]]  ;;  %s1682_s7 = sshll.u32 %s538_s12, 5 }
 0x346   :  { %s541_s4 = sadd.s32 %s1682_s7, %s539_s10  ;;  %s3730_s16 = smov [#allocation6 + $0x81]  }
 0x347   :  { %s1683_s9 = sshll.u32 %s541_s4, 4  ;;  %s546_s15 = sshll.u32 %s3730_s16, 4  ;;  %s547_s15 = int_to_ptr.vmem [resolvable:$true] %s546_s15 }
 0x348   :  { %s543_s5 = scalar_lea.hbm %s4993_s2, %s1683_s9 }
 0x349   :  { %s2720_s8 = scalar_lea.hbm %s543_s5, 64  ;;  %p2723_p0 = scmp.lt.u32.totalorder %s543_s5, %s4993_s2 }
 0x34a   :  { %p2721_p13 = scmp.ne.s32.totalorder %s543_s5, %s2720_s8  ;;  %p2724_p1 = scmp.lt.u32.totalorder %s3824_s18, %s2720_s8 }
 0x34b   :  { %p2726_p3 = scmp.lt.u32.totalorder %s2720_s8, %s543_s5 }
 0x34c   :  { %p2725_p2 = por %p2724_p1, %p2723_p0 }
 0x34e   :  { %p2727_p4 = por %p2726_p3, %p2725_p2 }
 0x350   :  { %p2728_p6 = pnand %p2727_p4, %p2721_p13 }
 0x352   :  { %2731 = shalt.err (!%p2728_p6)  }
 0x353   :  { %s2732_s28 = scalar_lea.vmem %s547_s15, 64  ;;  %p2737_p8 = scmp.lt.s32.totalorder %s547_s15, %s3806_s25 }
 0x354   :  { %p2733_p7 = scmp.ne.s32.totalorder %s547_s15, %s2732_s28  ;;  %p2738_p9 = scmp.lt.s32.totalorder %s3833_s21, %s2732_s28 }
 0x356   :  { %p2739_p10 = por %p2738_p9, %p2737_p8 }
 0x358   :  { %p2740_p11 = pnand %p2739_p10, %p2733_p7 }
 0x35a   :  { %2743 = shalt.err (!%p2740_p11)  }
 0x35b   :  { %549 = dma.hbm_to_vmem [thread:$0]  %s543_s5, 64, %s547_s15, [#allocation2 + $0x1], %s3698_s23, %s3698_s23, %s3699_s24 }
 0x35c   :  { %3584 = dma.done.wait [#allocation2 + $0x2], 64 }
 0x35d   :  { %3585 = vsyncadd [#allocation2 + $0x2], 4294967232  ;;  %s554_s6 = sshrl.u32 %s4390_s27, 3  ;;  %s555_s11 = sand.u32 7, %s4390_s27  }
 0x35e   :  { %s4406_s17 = sld [smem:[#allocation5 + $0x23]]  ;;  %s1685_s13 = sshll.u32 %s554_s6, 5 }
 0x35f   :  { %s557_s19 = sadd.s32 %s1685_s13, %s555_s11  ;;  %s3731_s26 = smov [#allocation6 + $0x82]  }
 0x360   :  { %s1686_s29 = sshll.u32 %s557_s19, 4  ;;  %s562_s12 = sshll.u32 %s3731_s26, 4  ;;  %s563_s12 = int_to_ptr.vmem [resolvable:$true] %s562_s12 }
 0x361   :  { %s559_s4 = scalar_lea.hbm %s4993_s2, %s1686_s29 }
 0x362   :  { %s2744_s9 = scalar_lea.hbm %s559_s4, 64  ;;  %p2747_p13 = scmp.lt.u32.totalorder %s559_s4, %s4993_s2 }
 0x363   :  { %p2745_p12 = scmp.ne.s32.totalorder %s559_s4, %s2744_s9  ;;  %p2748_p0 = scmp.lt.u32.totalorder %s3824_s18, %s2744_s9 }
 0x364   :  { %p2750_p2 = scmp.lt.u32.totalorder %s2744_s9, %s559_s4 }
 0x365   :  { %p2749_p1 = por %p2748_p0, %p2747_p13 }
 0x367   :  { %p2751_p3 = por %p2750_p2, %p2749_p1 }
 0x369   :  { %p2752_p4 = pnand %p2751_p3, %p2745_p12 }
 0x36b   :  { %2755 = shalt.err (!%p2752_p4)  }
 0x36c   :  { %s2756_s27 = scalar_lea.vmem %s563_s12, 64  ;;  %p2761_p7 = scmp.lt.s32.totalorder %s563_s12, %s3806_s25 }
 0x36d   :  { %p2757_p6 = scmp.ne.s32.totalorder %s563_s12, %s2756_s27  ;;  %p2762_p8 = scmp.lt.s32.totalorder %s3833_s21, %s2756_s27 }
 0x36f   :  { %p2763_p9 = por %p2762_p8, %p2761_p7 }
 0x371   :  { %p2764_p10 = pnand %p2763_p9, %p2757_p6 }
 0x373   :  { %2767 = shalt.err (!%p2764_p10)  }
 0x374   :  { %565 = dma.hbm_to_vmem [thread:$0]  %s559_s4, 64, %s563_s12, [#allocation2 + $0x2], %s3698_s23, %s3698_s23, %s3699_s24 }
 0x375   :  { %3586 = dma.done.wait [#allocation2 + $0x3], 64 }
 0x376   :  { %3587 = vsyncadd [#allocation2 + $0x3], 4294967232  ;;  %s570_s14 = sshrl.u32 %s4406_s17, 3  ;;  %s571_s20 = sand.u32 7, %s4406_s17  }
 0x377   :  { %s4422_s5 = sld [smem:[#allocation5 + $0x24]]  ;;  %s1688_s8 = sshll.u32 %s570_s14, 5 }
 0x378   :  { %s573_s1 = sadd.s32 %s1688_s8, %s571_s20  ;;  %s3732_s28 = smov [#allocation6 + $0x83]  }
 0x379   :  { %s1689_s30 = sshll.u32 %s573_s1, 4  ;;  %s578_s6 = sshll.u32 %s3732_s28, 4  ;;  %s579_s6 = int_to_ptr.vmem [resolvable:$true] %s578_s6 }
 0x37a   :  { %s575_s19 = scalar_lea.hbm %s4993_s2, %s1689_s30 }
 0x37b   :  { %s2768_s29 = scalar_lea.hbm %s575_s19, 64  ;;  %p2771_p12 = scmp.lt.u32.totalorder %s575_s19, %s4993_s2 }
 0x37c   :  { %p2769_p11 = scmp.ne.s32.totalorder %s575_s19, %s2768_s29  ;;  %p2772_p13 = scmp.lt.u32.totalorder %s3824_s18, %s2768_s29 }
 0x37d   :  { %p2774_p1 = scmp.lt.u32.totalorder %s2768_s29, %s575_s19 }
 0x37e   :  { %p2773_p0 = por %p2772_p13, %p2771_p12 }
 0x380   :  { %p2775_p2 = por %p2774_p1, %p2773_p0 }
 0x382   :  { %p2776_p3 = pnand %p2775_p2, %p2769_p11 }
 0x384   :  { %2779 = shalt.err (!%p2776_p3)  }
 0x385   :  { %s2780_s17 = scalar_lea.vmem %s579_s6, 64  ;;  %p2785_p6 = scmp.lt.s32.totalorder %s579_s6, %s3806_s25 }
 0x386   :  { %p2781_p4 = scmp.ne.s32.totalorder %s579_s6, %s2780_s17  ;;  %p2786_p7 = scmp.lt.s32.totalorder %s3833_s21, %s2780_s17 }
 0x388   :  { %p2787_p8 = por %p2786_p7, %p2785_p6 }
 0x38a   :  { %p2788_p9 = pnand %p2787_p8, %p2781_p4 }
 0x38c   :  { %2791 = shalt.err (!%p2788_p9)  }
 0x38d   :  { %581 = dma.hbm_to_vmem [thread:$0]  %s575_s19, 64, %s579_s6, [#allocation2 + $0x3], %s3698_s23, %s3698_s23, %s3699_s24 }
 0x38e   :  { %3588 = dma.done.wait [#allocation2 + $0x4], 64 }
 0x38f   :  { %3589 = vsyncadd [#allocation2 + $0x4], 4294967232  ;;  %s586_s10 = sshrl.u32 %s4422_s5, 3  ;;  %s587_s7 = sand.u32 7, %s4422_s5  }
 0x390   :  { %s4438_s4 = sld [smem:[#allocation5 + $0x25]]  ;;  %s1691_s9 = sshll.u32 %s586_s10, 5 }
 0x391   :  { %s589_s16 = sadd.s32 %s1691_s9, %s587_s7  ;;  %s3733_s27 = smov [#allocation6 + $0x84]  }
 0x392   :  { %s1692_s15 = sshll.u32 %s589_s16, 4  ;;  %s594_s14 = sshll.u32 %s3733_s27, 4  ;;  %s595_s14 = int_to_ptr.vmem [resolvable:$true] %s594_s14 }
 0x393   :  { %s591_s1 = scalar_lea.hbm %s4993_s2, %s1692_s15 }
 0x394   :  { %s2792_s30 = scalar_lea.hbm %s591_s1, 64  ;;  %p2795_p11 = scmp.lt.u32.totalorder %s591_s1, %s4993_s2 }
 0x395   :  { %p2793_p10 = scmp.ne.s32.totalorder %s591_s1, %s2792_s30  ;;  %p2796_p12 = scmp.lt.u32.totalorder %s3824_s18, %s2792_s30 }
 0x396   :  { %p2798_p0 = scmp.lt.u32.totalorder %s2792_s30, %s591_s1 }
 0x397   :  { %p2797_p13 = por %p2796_p12, %p2795_p11 }
 0x399   :  { %p2799_p1 = por %p2798_p0, %p2797_p13 }
 0x39b   :  { %p2800_p2 = pnand %p2799_p1, %p2793_p10 }
 0x39d   :  { %2803 = shalt.err (!%p2800_p2)  }
 0x39e   :  { %s2804_s5 = scalar_lea.vmem %s595_s14, 64  ;;  %p2809_p4 = scmp.lt.s32.totalorder %s595_s14, %s3806_s25 }
 0x39f   :  { %p2805_p3 = scmp.ne.s32.totalorder %s595_s14, %s2804_s5  ;;  %p2810_p6 = scmp.lt.s32.totalorder %s3833_s21, %s2804_s5 }
 0x3a1   :  { %p2811_p7 = por %p2810_p6, %p2809_p4 }
 0x3a3   :  { %p2812_p8 = pnand %p2811_p7, %p2805_p3 }
 0x3a5   :  { %2815 = shalt.err (!%p2812_p8)  }
 0x3a6   :  { %597 = dma.hbm_to_vmem [thread:$0]  %s591_s1, 64, %s595_s14, [#allocation2 + $0x4], %s3698_s23, %s3698_s23, %s3699_s24 }
 0x3a7   :  { %3590 = dma.done.wait [#allocation2 + $0x5], 64 }
 0x3a8   :  { %3591 = vsyncadd [#allocation2 + $0x5], 4294967232  ;;  %s602_s11 = sshrl.u32 %s4438_s4, 3  ;;  %s603_s13 = sand.u32 7, %s4438_s4  }
 0x3a9   :  { %s4454_s19 = sld [smem:[#allocation5 + $0x26]]  ;;  %s1694_s29 = sshll.u32 %s602_s11, 5 }
 0x3aa   :  { %s605_s26 = sadd.s32 %s1694_s29, %s603_s13  ;;  %s3734_s17 = smov [#allocation6 + $0x85]  }
 0x3ab   :  { %s1695_s12 = sshll.u32 %s605_s26, 4  ;;  %s610_s10 = sshll.u32 %s3734_s17, 4  ;;  %s611_s10 = int_to_ptr.vmem [resolvable:$true] %s610_s10 }
 0x3ac   :  { %s607_s16 = scalar_lea.hbm %s4993_s2, %s1695_s12 }
 0x3ad   :  { %s2816_s15 = scalar_lea.hbm %s607_s16, 64  ;;  %p2819_p10 = scmp.lt.u32.totalorder %s607_s16, %s4993_s2 }
 0x3ae   :  { %p2817_p9 = scmp.ne.s32.totalorder %s607_s16, %s2816_s15  ;;  %p2820_p11 = scmp.lt.u32.totalorder %s3824_s18, %s2816_s15 }
 0x3af   :  { %p2822_p13 = scmp.lt.u32.totalorder %s2816_s15, %s607_s16 }
 0x3b0   :  { %p2821_p12 = por %p2820_p11, %p2819_p10 }
 0x3b2   :  { %p2823_p0 = por %p2822_p13, %p2821_p12 }
 0x3b4   :  { %p2824_p1 = pnand %p2823_p0, %p2817_p9 }
 0x3b6   :  { %2827 = shalt.err (!%p2824_p1)  }
 0x3b7   :  { %s2828_s4 = scalar_lea.vmem %s611_s10, 64  ;;  %p2833_p3 = scmp.lt.s32.totalorder %s611_s10, %s3806_s25 }
 0x3b8   :  { %p2829_p2 = scmp.ne.s32.totalorder %s611_s10, %s2828_s4  ;;  %p2834_p4 = scmp.lt.s32.totalorder %s3833_s21, %s2828_s4 }
 0x3ba   :  { %p2835_p6 = por %p2834_p4, %p2833_p3 }
 0x3bc   :  { %p2836_p7 = pnand %p2835_p6, %p2829_p2 }
 0x3be   :  { %2839 = shalt.err (!%p2836_p7)  }
 0x3bf   :  { %613 = dma.hbm_to_vmem [thread:$0]  %s607_s16, 64, %s611_s10, [#allocation2 + $0x5], %s3698_s23, %s3698_s23, %s3699_s24 }
 0x3c0   :  { %3592 = dma.done.wait [#allocation2 + $0x6], 64 }
 0x3c1   :  { %3593 = vsyncadd [#allocation2 + $0x6], 4294967232  ;;  %s618_s20 = sshrl.u32 %s4454_s19, 3  ;;  %s619_s8 = sand.u32 7, %s4454_s19  }
 0x3c2   :  { %s4470_s1 = sld [smem:[#allocation5 + $0x27]]  ;;  %s1697_s30 = sshll.u32 %s618_s20, 5 }
 0x3c3   :  { %s621_s28 = sadd.s32 %s1697_s30, %s619_s8  ;;  %s3735_s5 = smov [#allocation6 + $0x86]  }
 0x3c4   :  { %s1698_s6 = sshll.u32 %s621_s28, 4  ;;  %s626_s11 = sshll.u32 %s3735_s5, 4  ;;  %s627_s11 = int_to_ptr.vmem [resolvable:$true] %s626_s11 }
 0x3c5   :  { %s623_s26 = scalar_lea.hbm %s4993_s2, %s1698_s6 }
 0x3c6   :  { %s2840_s12 = scalar_lea.hbm %s623_s26, 64  ;;  %p2843_p9 = scmp.lt.u32.totalorder %s623_s26, %s4993_s2 }
 0x3c7   :  { %p2841_p8 = scmp.ne.s32.totalorder %s623_s26, %s2840_s12  ;;  %p2844_p10 = scmp.lt.u32.totalorder %s3824_s18, %s2840_s12 }
 0x3c8   :  { %p2846_p12 = scmp.lt.u32.totalorder %s2840_s12, %s623_s26 }
 0x3c9   :  { %p2845_p11 = por %p2844_p10, %p2843_p9 }
 0x3cb   :  { %p2847_p13 = por %p2846_p12, %p2845_p11 }
 0x3cd   :  { %p2848_p0 = pnand %p2847_p13, %p2841_p8 }
 0x3cf   :  { %2851 = shalt.err (!%p2848_p0)  }
 0x3d0   :  { %s2852_s19 = scalar_lea.vmem %s627_s11, 64  ;;  %p2857_p2 = scmp.lt.s32.totalorder %s627_s11, %s3806_s25 }
 0x3d1   :  { %p2853_p1 = scmp.ne.s32.totalorder %s627_s11, %s2852_s19  ;;  %p2858_p3 = scmp.lt.s32.totalorder %s3833_s21, %s2852_s19 }
 0x3d3   :  { %p2859_p4 = por %p2858_p3, %p2857_p2 }
 0x3d5   :  { %p2860_p6 = pnand %p2859_p4, %p2853_p1 }
 0x3d7   :  { %2863 = shalt.err (!%p2860_p6)  }
 0x3d8   :  { %629 = dma.hbm_to_vmem [thread:$0]  %s623_s26, 64, %s627_s11, [#allocation2 + $0x6], %s3698_s23, %s3698_s23, %s3699_s24 }
 0x3d9   :  { %3594 = dma.done.wait [#allocation2 + $0x7], 64 }
 0x3da   :  { %3595 = vsyncadd [#allocation2 + $0x7], 4294967232  ;;  %s634_s7 = sshrl.u32 %s4470_s1, 3  ;;  %s635_s9 = sand.u32 7, %s4470_s1  }
 0x3db   :  { %s4486_s16 = sld [smem:[#allocation5 + $0x28]]  ;;  %s1700_s15 = sshll.u32 %s634_s7, 5 }
 0x3dc   :  { %s637_s27 = sadd.s32 %s1700_s15, %s635_s9  ;;  %s3736_s4 = smov [#allocation6 + $0x87]  }
 0x3dd   :  { %s1701_s14 = sshll.u32 %s637_s27, 4  ;;  %s642_s20 = sshll.u32 %s3736_s4, 4  ;;  %s643_s20 = int_to_ptr.vmem [resolvable:$true] %s642_s20 }
 0x3de   :  { %s639_s28 = scalar_lea.hbm %s4993_s2, %s1701_s14 }
 0x3df   :  { %s2864_s6 = scalar_lea.hbm %s639_s28, 64  ;;  %p2867_p8 = scmp.lt.u32.totalorder %s639_s28, %s4993_s2 }
 0x3e0   :  { %p2865_p7 = scmp.ne.s32.totalorder %s639_s28, %s2864_s6  ;;  %p2868_p9 = scmp.lt.u32.totalorder %s3824_s18, %s2864_s6 }
 0x3e1   :  { %p2870_p11 = scmp.lt.u32.totalorder %s2864_s6, %s639_s28 }
 0x3e2   :  { %p2869_p10 = por %p2868_p9, %p2867_p8 }
 0x3e4   :  { %p2871_p12 = por %p2870_p11, %p2869_p10 }
 0x3e6   :  { %p2872_p13 = pnand %p2871_p12, %p2865_p7 }
 0x3e8   :  { %2875 = shalt.err (!%p2872_p13)  }
 0x3e9   :  { %s2876_s1 = scalar_lea.vmem %s643_s20, 64  ;;  %p2881_p1 = scmp.lt.s32.totalorder %s643_s20, %s3806_s25 }
 0x3ea   :  { %p2877_p0 = scmp.ne.s32.totalorder %s643_s20, %s2876_s1  ;;  %p2882_p2 = scmp.lt.s32.totalorder %s3833_s21, %s2876_s1 }
 0x3ec   :  { %p2883_p3 = por %p2882_p2, %p2881_p1 }
 0x3ee   :  { %p2884_p4 = pnand %p2883_p3, %p2877_p0 }
 0x3f0   :  { %2887 = shalt.err (!%p2884_p4)  }
 0x3f1   :  { %645 = dma.hbm_to_vmem [thread:$0]  %s639_s28, 64, %s643_s20, [#allocation2 + $0x7], %s3698_s23, %s3698_s23, %s3699_s24 }
 0x3f2   :  { %3596 = dma.done.wait [#allocation2 + $0x8], 64 }
 0x3f3   :  { %3597 = vsyncadd [#allocation2 + $0x8], 4294967232  ;;  %s650_s13 = sshrl.u32 %s4486_s16, 3  ;;  %s651_s29 = sand.u32 7, %s4486_s16  }
 0x3f4   :  { %s4502_s26 = sld [smem:[#allocation5 + $0x29]]  ;;  %s1703_s12 = sshll.u32 %s650_s13, 5 }
 0x3f5   :  { %s653_s17 = sadd.s32 %s1703_s12, %s651_s29  ;;  %s3737_s19 = smov [#allocation6 + $0xa0]  }
 0x3f6   :  { %s1704_s10 = sshll.u32 %s653_s17, 4  ;;  %s658_s7 = sshll.u32 %s3737_s19, 4  ;;  %s659_s7 = int_to_ptr.vmem [resolvable:$true] %s658_s7 }
 0x3f7   :  { %s655_s27 = scalar_lea.hbm %s4993_s2, %s1704_s10 }
 0x3f8   :  { %s2888_s14 = scalar_lea.hbm %s655_s27, 64  ;;  %p2891_p7 = scmp.lt.u32.totalorder %s655_s27, %s4993_s2 }
 0x3f9   :  { %p2889_p6 = scmp.ne.s32.totalorder %s655_s27, %s2888_s14  ;;  %p2892_p8 = scmp.lt.u32.totalorder %s3824_s18, %s2888_s14 }
 0x3fa   :  { %p2894_p10 = scmp.lt.u32.totalorder %s2888_s14, %s655_s27 }
 0x3fb   :  { %p2893_p9 = por %p2892_p8, %p2891_p7 }
 0x3fd   :  { %p2895_p11 = por %p2894_p10, %p2893_p9 }
 0x3ff   :  { %p2896_p12 = pnand %p2895_p11, %p2889_p6 }
 0x401   :  { %2899 = shalt.err (!%p2896_p12)  }
 0x402   :  { %s2900_s16 = scalar_lea.vmem %s659_s7, 64  ;;  %p2905_p0 = scmp.lt.s32.totalorder %s659_s7, %s3806_s25 }
 0x403   :  { %p2901_p13 = scmp.ne.s32.totalorder %s659_s7, %s2900_s16  ;;  %p2906_p1 = scmp.lt.s32.totalorder %s3833_s21, %s2900_s16 }
 0x405   :  { %p2907_p2 = por %p2906_p1, %p2905_p0 }
 0x407   :  { %p2908_p3 = pnand %p2907_p2, %p2901_p13 }
 0x409   :  { %2911 = shalt.err (!%p2908_p3)  }
 0x40a   :  { %661 = dma.hbm_to_vmem [thread:$0]  %s655_s27, 64, %s659_s7, [#allocation2 + $0x8], %s3698_s23, %s3698_s23, %s3699_s24 }
 0x40b   :  { %3598 = dma.done.wait [#allocation2 + $0x9], 64 }
 0x40c   :  { %3599 = vsyncadd [#allocation2 + $0x9], 4294967232  ;;  %s666_s8 = sshrl.u32 %s4502_s26, 3  ;;  %s667_s30 = sand.u32 7, %s4502_s26  }
 0x40d   :  { %s4518_s28 = sld [smem:[#allocation5 + $0x2a]]  ;;  %s1706_s6 = sshll.u32 %s666_s8, 5 }
 0x40e   :  { %s669_s5 = sadd.s32 %s1706_s6, %s667_s30  ;;  %s3738_s1 = smov [#allocation6 + $0xa1]  }
 0x40f   :  { %s1707_s11 = sshll.u32 %s669_s5, 4  ;;  %s674_s13 = sshll.u32 %s3738_s1, 4  ;;  %s675_s13 = int_to_ptr.vmem [resolvable:$true] %s674_s13 }
 0x410   :  { %s671_s17 = scalar_lea.hbm %s4993_s2, %s1707_s11 }
 0x411   :  { %s2912_s10 = scalar_lea.hbm %s671_s17, 64  ;;  %p2915_p6 = scmp.lt.u32.totalorder %s671_s17, %s4993_s2 }
 0x412   :  { %p2913_p4 = scmp.ne.s32.totalorder %s671_s17, %s2912_s10  ;;  %p2916_p7 = scmp.lt.u32.totalorder %s3824_s18, %s2912_s10 }
 0x413   :  { %p2918_p9 = scmp.lt.u32.totalorder %s2912_s10, %s671_s17 }
 0x414   :  { %p2917_p8 = por %p2916_p7, %p2915_p6 }
 0x416   :  { %p2919_p10 = por %p2918_p9, %p2917_p8 }
 0x418   :  { %p2920_p11 = pnand %p2919_p10, %p2913_p4 }
 0x41a   :  { %2923 = shalt.err (!%p2920_p11)  }
 0x41b   :  { %s2924_s26 = scalar_lea.vmem %s675_s13, 64  ;;  %p2929_p13 = scmp.lt.s32.totalorder %s675_s13, %s3806_s25 }
 0x41c   :  { %p2925_p12 = scmp.ne.s32.totalorder %s675_s13, %s2924_s26  ;;  %p2930_p0 = scmp.lt.s32.totalorder %s3833_s21, %s2924_s26 }
 0x41e   :  { %p2931_p1 = por %p2930_p0, %p2929_p13 }
 0x420   :  { %p2932_p2 = pnand %p2931_p1, %p2925_p12 }
 0x422   :  { %2935 = shalt.err (!%p2932_p2)  }
 0x423   :  { %677 = dma.hbm_to_vmem [thread:$0]  %s671_s17, 64, %s675_s13, [#allocation2 + $0x9], %s3698_s23, %s3698_s23, %s3699_s24 }
 0x424   :  { %3600 = dma.done.wait [#allocation2 + $0xa], 64 }
 0x425   :  { %3601 = vsyncadd [#allocation2 + $0xa], 4294967232  ;;  %s682_s9 = sshrl.u32 %s4518_s28, 3  ;;  %s683_s15 = sand.u32 7, %s4518_s28  }
 0x426   :  { %s4534_s27 = sld [smem:[#allocation5 + $0x2b]]  ;;  %s1709_s14 = sshll.u32 %s682_s9, 5 }
 0x427   :  { %s685_s4 = sadd.s32 %s1709_s14, %s683_s15  ;;  %s3739_s16 = smov [#allocation6 + $0xa2]  }
 0x428   :  { %s1710_s20 = sshll.u32 %s685_s4, 4  ;;  %s690_s8 = sshll.u32 %s3739_s16, 4  ;;  %s691_s8 = int_to_ptr.vmem [resolvable:$true] %s690_s8 }
 0x429   :  { %s687_s5 = scalar_lea.hbm %s4993_s2, %s1710_s20 }
 0x42a   :  { %s2936_s11 = scalar_lea.hbm %s687_s5, 64  ;;  %p2939_p4 = scmp.lt.u32.totalorder %s687_s5, %s4993_s2 }
 0x42b   :  { %p2937_p3 = scmp.ne.s32.totalorder %s687_s5, %s2936_s11  ;;  %p2940_p6 = scmp.lt.u32.totalorder %s3824_s18, %s2936_s11 }
 0x42c   :  { %p2942_p8 = scmp.lt.u32.totalorder %s2936_s11, %s687_s5 }
 0x42d   :  { %p2941_p7 = por %p2940_p6, %p2939_p4 }
 0x42f   :  { %p2943_p9 = por %p2942_p8, %p2941_p7 }
 0x431   :  { %p2944_p10 = pnand %p2943_p9, %p2937_p3 }
 0x433   :  { %2947 = shalt.err (!%p2944_p10)  }
 0x434   :  { %s2948_s28 = scalar_lea.vmem %s691_s8, 64  ;;  %p2953_p12 = scmp.lt.s32.totalorder %s691_s8, %s3806_s25 }
 0x435   :  { %p2949_p11 = scmp.ne.s32.totalorder %s691_s8, %s2948_s28  ;;  %p2954_p13 = scmp.lt.s32.totalorder %s3833_s21, %s2948_s28 }
 0x437   :  { %p2955_p0 = por %p2954_p13, %p2953_p12 }
 0x439   :  { %p2956_p1 = pnand %p2955_p0, %p2949_p11 }
 0x43b   :  { %2959 = shalt.err (!%p2956_p1)  }
 0x43c   :  { %693 = dma.hbm_to_vmem [thread:$0]  %s687_s5, 64, %s691_s8, [#allocation2 + $0xa], %s3698_s23, %s3698_s23, %s3699_s24 }
 0x43d   :  { %3602 = dma.done.wait [#allocation2 + $0xb], 64 }
 0x43e   :  { %3603 = vsyncadd [#allocation2 + $0xb], 4294967232  ;;  %s698_s29 = sshrl.u32 %s4534_s27, 3  ;;  %s699_s12 = sand.u32 7, %s4534_s27  }
 0x43f   :  { %s4550_s17 = sld [smem:[#allocation5 + $0x2c]]  ;;  %s1712_s10 = sshll.u32 %s698_s29, 5 }
 0x440   :  { %s701_s19 = sadd.s32 %s1712_s10, %s699_s12  ;;  %s3740_s26 = smov [#allocation6 + $0xa3]  }
 0x441   :  { %s1713_s7 = sshll.u32 %s701_s19, 4  ;;  %s706_s9 = sshll.u32 %s3740_s26, 4  ;;  %s707_s9 = int_to_ptr.vmem [resolvable:$true] %s706_s9 }
 0x442   :  { %s703_s4 = scalar_lea.hbm %s4993_s2, %s1713_s7 }
 0x443   :  { %s2960_s20 = scalar_lea.hbm %s703_s4, 64  ;;  %p2963_p3 = scmp.lt.u32.totalorder %s703_s4, %s4993_s2 }
 0x444   :  { %p2961_p2 = scmp.ne.s32.totalorder %s703_s4, %s2960_s20  ;;  %p2964_p4 = scmp.lt.u32.totalorder %s3824_s18, %s2960_s20 }
 0x445   :  { %p2966_p7 = scmp.lt.u32.totalorder %s2960_s20, %s703_s4 }
 0x446   :  { %p2965_p6 = por %p2964_p4, %p2963_p3 }
 0x448   :  { %p2967_p8 = por %p2966_p7, %p2965_p6 }
 0x44a   :  { %p2968_p9 = pnand %p2967_p8, %p2961_p2 }
 0x44c   :  { %2971 = shalt.err (!%p2968_p9)  }
 0x44d   :  { %s2972_s27 = scalar_lea.vmem %s707_s9, 64  ;;  %p2977_p11 = scmp.lt.s32.totalorder %s707_s9, %s3806_s25 }
 0x44e   :  { %p2973_p10 = scmp.ne.s32.totalorder %s707_s9, %s2972_s27  ;;  %p2978_p12 = scmp.lt.s32.totalorder %s3833_s21, %s2972_s27 }
 0x450   :  { %p2979_p13 = por %p2978_p12, %p2977_p11 }
 0x452   :  { %p2980_p0 = pnand %p2979_p13, %p2973_p10 }
 0x454   :  { %2983 = shalt.err (!%p2980_p0)  }
 0x455   :  { %709 = dma.hbm_to_vmem [thread:$0]  %s703_s4, 64, %s707_s9, [#allocation2 + $0xb], %s3698_s23, %s3698_s23, %s3699_s24 }
 0x456   :  { %3604 = dma.done.wait [#allocation2 + $0xc], 64 }
 0x457   :  { %3605 = vsyncadd [#allocation2 + $0xc], 4294967232  ;;  %s714_s30 = sshrl.u32 %s4550_s17, 3  ;;  %s715_s6 = sand.u32 7, %s4550_s17  }
 0x458   :  { %s4566_s5 = sld [smem:[#allocation5 + $0x2d]]  ;;  %s1715_s11 = sshll.u32 %s714_s30, 5 }
 0x459   :  { %s717_s1 = sadd.s32 %s1715_s11, %s715_s6  ;;  %s3741_s28 = smov [#allocation6 + $0xa4]  }
 0x45a   :  { %s1716_s13 = sshll.u32 %s717_s1, 4  ;;  %s722_s29 = sshll.u32 %s3741_s28, 4  ;;  %s723_s29 = int_to_ptr.vmem [resolvable:$true] %s722_s29 }
 0x45b   :  { %s719_s19 = scalar_lea.hbm %s4993_s2, %s1716_s13 }
 0x45c   :  { %s2984_s7 = scalar_lea.hbm %s719_s19, 64  ;;  %p2987_p2 = scmp.lt.u32.totalorder %s719_s19, %s4993_s2 }
 0x45d   :  { %p2985_p1 = scmp.ne.s32.totalorder %s719_s19, %s2984_s7  ;;  %p2988_p3 = scmp.lt.u32.totalorder %s3824_s18, %s2984_s7 }
 0x45e   :  { %p2990_p6 = scmp.lt.u32.totalorder %s2984_s7, %s719_s19 }
 0x45f   :  { %p2989_p4 = por %p2988_p3, %p2987_p2 }
 0x461   :  { %p2991_p7 = por %p2990_p6, %p2989_p4 }
 0x463   :  { %p2992_p8 = pnand %p2991_p7, %p2985_p1 }
 0x465   :  { %2995 = shalt.err (!%p2992_p8)  }
 0x466   :  { %s2996_s17 = scalar_lea.vmem %s723_s29, 64  ;;  %p3001_p10 = scmp.lt.s32.totalorder %s723_s29, %s3806_s25 }
 0x467   :  { %p2997_p9 = scmp.ne.s32.totalorder %s723_s29, %s2996_s17  ;;  %p3002_p11 = scmp.lt.s32.totalorder %s3833_s21, %s2996_s17 }
 0x469   :  { %p3003_p12 = por %p3002_p11, %p3001_p10 }
 0x46b   :  { %p3004_p13 = pnand %p3003_p12, %p2997_p9 }
 0x46d   :  { %3007 = shalt.err (!%p3004_p13)  }
 0x46e   :  { %725 = dma.hbm_to_vmem [thread:$0]  %s719_s19, 64, %s723_s29, [#allocation2 + $0xc], %s3698_s23, %s3698_s23, %s3699_s24 }
 0x46f   :  { %3606 = dma.done.wait [#allocation2 + $0xd], 64 }
 0x470   :  { %3607 = vsyncadd [#allocation2 + $0xd], 4294967232  ;;  %s730_s15 = sshrl.u32 %s4566_s5, 3  ;;  %s731_s14 = sand.u32 7, %s4566_s5  }
 0x471   :  { %s4582_s4 = sld [smem:[#allocation5 + $0x2e]]  ;;  %s1718_s20 = sshll.u32 %s730_s15, 5 }
 0x472   :  { %s733_s16 = sadd.s32 %s1718_s20, %s731_s14  ;;  %s3742_s27 = smov [#allocation6 + $0xa5]  }
 0x473   :  { %s1719_s8 = sshll.u32 %s733_s16, 4  ;;  %s738_s30 = sshll.u32 %s3742_s27, 4  ;;  %s739_s30 = int_to_ptr.vmem [resolvable:$true] %s738_s30 }
 0x474   :  { %s735_s1 = scalar_lea.hbm %s4993_s2, %s1719_s8 }
 0x475   :  { %s3008_s13 = scalar_lea.hbm %s735_s1, 64  ;;  %p3011_p1 = scmp.lt.u32.totalorder %s735_s1, %s4993_s2 }
 0x476   :  { %p3009_p0 = scmp.ne.s32.totalorder %s735_s1, %s3008_s13  ;;  %p3012_p2 = scmp.lt.u32.totalorder %s3824_s18, %s3008_s13 }
 0x477   :  { %p3014_p4 = scmp.lt.u32.totalorder %s3008_s13, %s735_s1 }
 0x478   :  { %p3013_p3 = por %p3012_p2, %p3011_p1 }
 0x47a   :  { %p3015_p6 = por %p3014_p4, %p3013_p3 }
 0x47c   :  { %p3016_p7 = pnand %p3015_p6, %p3009_p0 }
 0x47e   :  { %3019 = shalt.err (!%p3016_p7)  }
 0x47f   :  { %s3020_s5 = scalar_lea.vmem %s739_s30, 64  ;;  %p3025_p9 = scmp.lt.s32.totalorder %s739_s30, %s3806_s25 }
 0x480   :  { %p3021_p8 = scmp.ne.s32.totalorder %s739_s30, %s3020_s5  ;;  %p3026_p10 = scmp.lt.s32.totalorder %s3833_s21, %s3020_s5 }
 0x482   :  { %p3027_p11 = por %p3026_p10, %p3025_p9 }
 0x484   :  { %p3028_p12 = pnand %p3027_p11, %p3021_p8 }
 0x486   :  { %3031 = shalt.err (!%p3028_p12)  }
 0x487   :  { %741 = dma.hbm_to_vmem [thread:$0]  %s735_s1, 64, %s739_s30, [#allocation2 + $0xd], %s3698_s23, %s3698_s23, %s3699_s24 }
 0x488   :  { %3608 = dma.done.wait [#allocation2 + $0xe], 64 }
 0x489   :  { %3609 = vsyncadd [#allocation2 + $0xe], 4294967232  ;;  %s746_s12 = sshrl.u32 %s4582_s4, 3  ;;  %s747_s10 = sand.u32 7, %s4582_s4  }
 0x48a   :  { %s4598_s19 = sld [smem:[#allocation5 + $0x2f]]  ;;  %s1721_s7 = sshll.u32 %s746_s12, 5 }
 0x48b   :  { %s749_s26 = sadd.s32 %s1721_s7, %s747_s10  ;;  %s3743_s17 = smov [#allocation6 + $0xa6]  }
 0x48c   :  { %s1722_s9 = sshll.u32 %s749_s26, 4  ;;  %s754_s15 = sshll.u32 %s3743_s17, 4  ;;  %s755_s15 = int_to_ptr.vmem [resolvable:$true] %s754_s15 }
 0x48d   :  { %s751_s16 = scalar_lea.hbm %s4993_s2, %s1722_s9 }
 0x48e   :  { %s3032_s8 = scalar_lea.hbm %s751_s16, 64  ;;  %p3035_p0 = scmp.lt.u32.totalorder %s751_s16, %s4993_s2 }
 0x48f   :  { %p3033_p13 = scmp.ne.s32.totalorder %s751_s16, %s3032_s8  ;;  %p3036_p1 = scmp.lt.u32.totalorder %s3824_s18, %s3032_s8 }
 0x490   :  { %p3038_p3 = scmp.lt.u32.totalorder %s3032_s8, %s751_s16 }
 0x491   :  { %p3037_p2 = por %p3036_p1, %p3035_p0 }
 0x493   :  { %p3039_p4 = por %p3038_p3, %p3037_p2 }
 0x495   :  { %p3040_p6 = pnand %p3039_p4, %p3033_p13 }
 0x497   :  { %3043 = shalt.err (!%p3040_p6)  }
 0x498   :  { %s3044_s4 = scalar_lea.vmem %s755_s15, 64  ;;  %p3049_p8 = scmp.lt.s32.totalorder %s755_s15, %s3806_s25 }
 0x499   :  { %p3045_p7 = scmp.ne.s32.totalorder %s755_s15, %s3044_s4  ;;  %p3050_p9 = scmp.lt.s32.totalorder %s3833_s21, %s3044_s4 }
 0x49b   :  { %p3051_p10 = por %p3050_p9, %p3049_p8 }
 0x49d   :  { %p3052_p11 = pnand %p3051_p10, %p3045_p7 }
 0x49f   :  { %3055 = shalt.err (!%p3052_p11)  }
 0x4a0   :  { %757 = dma.hbm_to_vmem [thread:$0]  %s751_s16, 64, %s755_s15, [#allocation2 + $0xe], %s3698_s23, %s3698_s23, %s3699_s24 }
 0x4a1   :  { %3610 = dma.done.wait [#allocation2 + $0xf], 64 }
 0x4a2   :  { %3611 = vsyncadd [#allocation2 + $0xf], 4294967232  ;;  %s762_s6 = sshrl.u32 %s4598_s19, 3  ;;  %s763_s11 = sand.u32 7, %s4598_s19  }
 0x4a3   :  { %s4614_s1 = sld [smem:[#allocation5 + $0x30]]  ;;  %s1724_s13 = sshll.u32 %s762_s6, 5 }
 0x4a4   :  { %s765_s28 = sadd.s32 %s1724_s13, %s763_s11  ;;  %s3744_s5 = smov [#allocation6 + $0xa7]  }
 0x4a5   :  { %s1725_s29 = sshll.u32 %s765_s28, 4  ;;  %s770_s12 = sshll.u32 %s3744_s5, 4  ;;  %s771_s12 = int_to_ptr.vmem [resolvable:$true] %s770_s12 }
 0x4a6   :  { %s767_s26 = scalar_lea.hbm %s4993_s2, %s1725_s29 }
 0x4a7   :  { %s3056_s9 = scalar_lea.hbm %s767_s26, 64  ;;  %p3059_p13 = scmp.lt.u32.totalorder %s767_s26, %s4993_s2 }
 0x4a8   :  { %p3057_p12 = scmp.ne.s32.totalorder %s767_s26, %s3056_s9  ;;  %p3060_p0 = scmp.lt.u32.totalorder %s3824_s18, %s3056_s9 }
 0x4a9   :  { %p3062_p2 = scmp.lt.u32.totalorder %s3056_s9, %s767_s26 }
 0x4aa   :  { %p3061_p1 = por %p3060_p0, %p3059_p13 }
 0x4ac   :  { %p3063_p3 = por %p3062_p2, %p3061_p1 }
 0x4ae   :  { %p3064_p4 = pnand %p3063_p3, %p3057_p12 }
 0x4b0   :  { %3067 = shalt.err (!%p3064_p4)  }
 0x4b1   :  { %s3068_s19 = scalar_lea.vmem %s771_s12, 64  ;;  %p3073_p7 = scmp.lt.s32.totalorder %s771_s12, %s3806_s25 }
 0x4b2   :  { %p3069_p6 = scmp.ne.s32.totalorder %s771_s12, %s3068_s19  ;;  %p3074_p8 = scmp.lt.s32.totalorder %s3833_s21, %s3068_s19 }
 0x4b4   :  { %p3075_p9 = por %p3074_p8, %p3073_p7 }
 0x4b6   :  { %p3076_p10 = pnand %p3075_p9, %p3069_p6 }
 0x4b8   :  { %3079 = shalt.err (!%p3076_p10)  }
 0x4b9   :  { %773 = dma.hbm_to_vmem [thread:$0]  %s767_s26, 64, %s771_s12, [#allocation2 + $0xf], %s3698_s23, %s3698_s23, %s3699_s24 }
 0x4ba   :  { %3612 = dma.done.wait [#allocation2], 64 }
 0x4bb   :  { %3613 = vsyncadd [#allocation2], 4294967232  ;;  %s778_s14 = sshrl.u32 %s4614_s1, 3  ;;  %s779_s20 = sand.u32 7, %s4614_s1  }
 0x4bc   :  { %s4630_s16 = sld [smem:[#allocation5 + $0x31]]  ;;  %s1727_s8 = sshll.u32 %s778_s14, 5 }
 0x4bd   :  { %s781_s27 = sadd.s32 %s1727_s8, %s779_s20  ;;  %s3745_s4 = smov [#allocation6 + $0xc0]  }
 0x4be   :  { %s1728_s30 = sshll.u32 %s781_s27, 4  ;;  %s786_s6 = sshll.u32 %s3745_s4, 4  ;;  %s787_s6 = int_to_ptr.vmem [resolvable:$true] %s786_s6 }
 0x4bf   :  { %s783_s28 = scalar_lea.hbm %s4993_s2, %s1728_s30 }
 0x4c0   :  { %s3080_s29 = scalar_lea.hbm %s783_s28, 64  ;;  %p3083_p12 = scmp.lt.u32.totalorder %s783_s28, %s4993_s2 }
 0x4c1   :  { %p3081_p11 = scmp.ne.s32.totalorder %s783_s28, %s3080_s29  ;;  %p3084_p13 = scmp.lt.u32.totalorder %s3824_s18, %s3080_s29 }
 0x4c2   :  { %p3086_p1 = scmp.lt.u32.totalorder %s3080_s29, %s783_s28 }
 0x4c3   :  { %p3085_p0 = por %p3084_p13, %p3083_p12 }
 0x4c5   :  { %p3087_p2 = por %p3086_p1, %p3085_p0 }
 0x4c7   :  { %p3088_p3 = pnand %p3087_p2, %p3081_p11 }
 0x4c9   :  { %3091 = shalt.err (!%p3088_p3)  }
 0x4ca   :  { %s3092_s1 = scalar_lea.vmem %s787_s6, 64  ;;  %p3097_p6 = scmp.lt.s32.totalorder %s787_s6, %s3806_s25 }
 0x4cb   :  { %p3093_p4 = scmp.ne.s32.totalorder %s787_s6, %s3092_s1  ;;  %p3098_p7 = scmp.lt.s32.totalorder %s3833_s21, %s3092_s1 }
 0x4cd   :  { %p3099_p8 = por %p3098_p7, %p3097_p6 }
 0x4cf   :  { %p3100_p9 = pnand %p3099_p8, %p3093_p4 }
 0x4d1   :  { %3103 = shalt.err (!%p3100_p9)  }
 0x4d2   :  { %789 = dma.hbm_to_vmem [thread:$0]  %s783_s28, 64, %s787_s6, [#allocation2], %s3698_s23, %s3698_s23, %s3699_s24 }
 0x4d3   :  { %3614 = dma.done.wait [#allocation2 + $0x1], 64 }
 0x4d4   :  { %3615 = vsyncadd [#allocation2 + $0x1], 4294967232  ;;  %s794_s10 = sshrl.u32 %s4630_s16, 3  ;;  %s795_s7 = sand.u32 7, %s4630_s16  }
 0x4d5   :  { %s4646_s26 = sld [smem:[#allocation5 + $0x32]]  ;;  %s1730_s9 = sshll.u32 %s794_s10, 5 }
 0x4d6   :  { %s797_s17 = sadd.s32 %s1730_s9, %s795_s7  ;;  %s3746_s19 = smov [#allocation6 + $0xc1]  }
 0x4d7   :  { %s1731_s15 = sshll.u32 %s797_s17, 4  ;;  %s802_s14 = sshll.u32 %s3746_s19, 4  ;;  %s803_s14 = int_to_ptr.vmem [resolvable:$true] %s802_s14 }
 0x4d8   :  { %s799_s27 = scalar_lea.hbm %s4993_s2, %s1731_s15 }
 0x4d9   :  { %s3104_s30 = scalar_lea.hbm %s799_s27, 64  ;;  %p3107_p11 = scmp.lt.u32.totalorder %s799_s27, %s4993_s2 }
 0x4da   :  { %p3105_p10 = scmp.ne.s32.totalorder %s799_s27, %s3104_s30  ;;  %p3108_p12 = scmp.lt.u32.totalorder %s3824_s18, %s3104_s30 }
 0x4db   :  { %p3110_p0 = scmp.lt.u32.totalorder %s3104_s30, %s799_s27 }
 0x4dc   :  { %p3109_p13 = por %p3108_p12, %p3107_p11 }
 0x4de   :  { %p3111_p1 = por %p3110_p0, %p3109_p13 }
 0x4e0   :  { %p3112_p2 = pnand %p3111_p1, %p3105_p10 }
 0x4e2   :  { %3115 = shalt.err (!%p3112_p2)  }
 0x4e3   :  { %s3116_s16 = scalar_lea.vmem %s803_s14, 64  ;;  %p3121_p4 = scmp.lt.s32.totalorder %s803_s14, %s3806_s25 }
 0x4e4   :  { %p3117_p3 = scmp.ne.s32.totalorder %s803_s14, %s3116_s16  ;;  %p3122_p6 = scmp.lt.s32.totalorder %s3833_s21, %s3116_s16 }
 0x4e6   :  { %p3123_p7 = por %p3122_p6, %p3121_p4 }
 0x4e8   :  { %p3124_p8 = pnand %p3123_p7, %p3117_p3 }
 0x4ea   :  { %3127 = shalt.err (!%p3124_p8)  }
 0x4eb   :  { %805 = dma.hbm_to_vmem [thread:$0]  %s799_s27, 64, %s803_s14, [#allocation2 + $0x1], %s3698_s23, %s3698_s23, %s3699_s24 }
 0x4ec   :  { %3616 = dma.done.wait [#allocation2 + $0x2], 64 }
 0x4ed   :  { %3617 = vsyncadd [#allocation2 + $0x2], 4294967232  ;;  %s810_s11 = sshrl.u32 %s4646_s26, 3  ;;  %s811_s13 = sand.u32 7, %s4646_s26  }
 0x4ee   :  { %s4662_s28 = sld [smem:[#allocation5 + $0x33]]  ;;  %s1733_s29 = sshll.u32 %s810_s11, 5 }
 0x4ef   :  { %s813_s5 = sadd.s32 %s1733_s29, %s811_s13  ;;  %s3747_s1 = smov [#allocation6 + $0xc2]  }
 0x4f0   :  { %s1734_s12 = sshll.u32 %s813_s5, 4  ;;  %s818_s10 = sshll.u32 %s3747_s1, 4  ;;  %s819_s10 = int_to_ptr.vmem [resolvable:$true] %s818_s10 }
 0x4f1   :  { %s815_s17 = scalar_lea.hbm %s4993_s2, %s1734_s12 }
 0x4f2   :  { %s3128_s15 = scalar_lea.hbm %s815_s17, 64  ;;  %p3131_p10 = scmp.lt.u32.totalorder %s815_s17, %s4993_s2 }
 0x4f3   :  { %p3129_p9 = scmp.ne.s32.totalorder %s815_s17, %s3128_s15  ;;  %p3132_p11 = scmp.lt.u32.totalorder %s3824_s18, %s3128_s15 }
 0x4f4   :  { %p3134_p13 = scmp.lt.u32.totalorder %s3128_s15, %s815_s17 }
 0x4f5   :  { %p3133_p12 = por %p3132_p11, %p3131_p10 }
 0x4f7   :  { %p3135_p0 = por %p3134_p13, %p3133_p12 }
 0x4f9   :  { %p3136_p1 = pnand %p3135_p0, %p3129_p9 }
 0x4fb   :  { %3139 = shalt.err (!%p3136_p1)  }
 0x4fc   :  { %s3140_s26 = scalar_lea.vmem %s819_s10, 64  ;;  %p3145_p3 = scmp.lt.s32.totalorder %s819_s10, %s3806_s25 }
 0x4fd   :  { %p3141_p2 = scmp.ne.s32.totalorder %s819_s10, %s3140_s26  ;;  %p3146_p4 = scmp.lt.s32.totalorder %s3833_s21, %s3140_s26 }
 0x4ff   :  { %p3147_p6 = por %p3146_p4, %p3145_p3 }
 0x501   :  { %p3148_p7 = pnand %p3147_p6, %p3141_p2 }
 0x503   :  { %3151 = shalt.err (!%p3148_p7)  }
 0x504   :  { %821 = dma.hbm_to_vmem [thread:$0]  %s815_s17, 64, %s819_s10, [#allocation2 + $0x2], %s3698_s23, %s3698_s23, %s3699_s24 }
 0x505   :  { %3618 = dma.done.wait [#allocation2 + $0x3], 64 }
 0x506   :  { %3619 = vsyncadd [#allocation2 + $0x3], 4294967232  ;;  %s826_s20 = sshrl.u32 %s4662_s28, 3  ;;  %s827_s8 = sand.u32 7, %s4662_s28  }
 0x507   :  { %s4678_s27 = sld [smem:[#allocation5 + $0x34]]  ;;  %s1736_s30 = sshll.u32 %s826_s20, 5 }
 0x508   :  { %s829_s4 = sadd.s32 %s1736_s30, %s827_s8  ;;  %s3748_s16 = smov [#allocation6 + $0xc3]  }
 0x509   :  { %s1737_s6 = sshll.u32 %s829_s4, 4  ;;  %s834_s11 = sshll.u32 %s3748_s16, 4  ;;  %s835_s11 = int_to_ptr.vmem [resolvable:$true] %s834_s11 }
 0x50a   :  { %s831_s5 = scalar_lea.hbm %s4993_s2, %s1737_s6 }
 0x50b   :  { %s3152_s12 = scalar_lea.hbm %s831_s5, 64  ;;  %p3155_p9 = scmp.lt.u32.totalorder %s831_s5, %s4993_s2 }
 0x50c   :  { %p3153_p8 = scmp.ne.s32.totalorder %s831_s5, %s3152_s12  ;;  %p3156_p10 = scmp.lt.u32.totalorder %s3824_s18, %s3152_s12 }
 0x50d   :  { %p3158_p12 = scmp.lt.u32.totalorder %s3152_s12, %s831_s5 }
 0x50e   :  { %p3157_p11 = por %p3156_p10, %p3155_p9 }
 0x510   :  { %p3159_p13 = por %p3158_p12, %p3157_p11 }
 0x512   :  { %p3160_p0 = pnand %p3159_p13, %p3153_p8 }
 0x514   :  { %3163 = shalt.err (!%p3160_p0)  }
 0x515   :  { %s3164_s28 = scalar_lea.vmem %s835_s11, 64  ;;  %p3169_p2 = scmp.lt.s32.totalorder %s835_s11, %s3806_s25 }
 0x516   :  { %p3165_p1 = scmp.ne.s32.totalorder %s835_s11, %s3164_s28  ;;  %p3170_p3 = scmp.lt.s32.totalorder %s3833_s21, %s3164_s28 }
 0x518   :  { %p3171_p4 = por %p3170_p3, %p3169_p2 }
 0x51a   :  { %p3172_p6 = pnand %p3171_p4, %p3165_p1 }
 0x51c   :  { %3175 = shalt.err (!%p3172_p6)  }
 0x51d   :  { %837 = dma.hbm_to_vmem [thread:$0]  %s831_s5, 64, %s835_s11, [#allocation2 + $0x3], %s3698_s23, %s3698_s23, %s3699_s24 }
 0x51e   :  { %3620 = dma.done.wait [#allocation2 + $0x4], 64 }
 0x51f   :  { %3621 = vsyncadd [#allocation2 + $0x4], 4294967232  ;;  %s842_s7 = sshrl.u32 %s4678_s27, 3  ;;  %s843_s9 = sand.u32 7, %s4678_s27  }
 0x520   :  { %s4694_s17 = sld [smem:[#allocation5 + $0x35]]  ;;  %s1739_s15 = sshll.u32 %s842_s7, 5 }
 0x521   :  { %s845_s19 = sadd.s32 %s1739_s15, %s843_s9  ;;  %s3749_s26 = smov [#allocation6 + $0xc4]  }
 0x522   :  { %s1740_s14 = sshll.u32 %s845_s19, 4  ;;  %s850_s20 = sshll.u32 %s3749_s26, 4  ;;  %s851_s20 = int_to_ptr.vmem [resolvable:$true] %s850_s20 }
 0x523   :  { %s847_s4 = scalar_lea.hbm %s4993_s2, %s1740_s14 }
 0x524   :  { %s3176_s6 = scalar_lea.hbm %s847_s4, 64  ;;  %p3179_p8 = scmp.lt.u32.totalorder %s847_s4, %s4993_s2 }
 0x525   :  { %p3177_p7 = scmp.ne.s32.totalorder %s847_s4, %s3176_s6  ;;  %p3180_p9 = scmp.lt.u32.totalorder %s3824_s18, %s3176_s6 }
 0x526   :  { %p3182_p11 = scmp.lt.u32.totalorder %s3176_s6, %s847_s4 }
 0x527   :  { %p3181_p10 = por %p3180_p9, %p3179_p8 }
 0x529   :  { %p3183_p12 = por %p3182_p11, %p3181_p10 }
 0x52b   :  { %p3184_p13 = pnand %p3183_p12, %p3177_p7 }
 0x52d   :  { %3187 = shalt.err (!%p3184_p13)  }
 0x52e   :  { %s3188_s27 = scalar_lea.vmem %s851_s20, 64  ;;  %p3193_p1 = scmp.lt.s32.totalorder %s851_s20, %s3806_s25 }
 0x52f   :  { %p3189_p0 = scmp.ne.s32.totalorder %s851_s20, %s3188_s27  ;;  %p3194_p2 = scmp.lt.s32.totalorder %s3833_s21, %s3188_s27 }
 0x531   :  { %p3195_p3 = por %p3194_p2, %p3193_p1 }
 0x533   :  { %p3196_p4 = pnand %p3195_p3, %p3189_p0 }
 0x535   :  { %3199 = shalt.err (!%p3196_p4)  }
 0x536   :  { %853 = dma.hbm_to_vmem [thread:$0]  %s847_s4, 64, %s851_s20, [#allocation2 + $0x4], %s3698_s23, %s3698_s23, %s3699_s24 }
 0x537   :  { %3622 = dma.done.wait [#allocation2 + $0x5], 64 }
 0x538   :  { %3623 = vsyncadd [#allocation2 + $0x5], 4294967232  ;;  %s858_s13 = sshrl.u32 %s4694_s17, 3  ;;  %s859_s29 = sand.u32 7, %s4694_s17  }
 0x539   :  { %s4710_s5 = sld [smem:[#allocation5 + $0x36]]  ;;  %s1742_s12 = sshll.u32 %s858_s13, 5 }
 0x53a   :  { %s861_s1 = sadd.s32 %s1742_s12, %s859_s29  ;;  %s3750_s28 = smov [#allocation6 + $0xc5]  }
 0x53b   :  { %s1743_s10 = sshll.u32 %s861_s1, 4  ;;  %s866_s7 = sshll.u32 %s3750_s28, 4  ;;  %s867_s7 = int_to_ptr.vmem [resolvable:$true] %s866_s7 }
 0x53c   :  { %s863_s19 = scalar_lea.hbm %s4993_s2, %s1743_s10 }
 0x53d   :  { %s3200_s14 = scalar_lea.hbm %s863_s19, 64  ;;  %p3203_p7 = scmp.lt.u32.totalorder %s863_s19, %s4993_s2 }
 0x53e   :  { %p3201_p6 = scmp.ne.s32.totalorder %s863_s19, %s3200_s14  ;;  %p3204_p8 = scmp.lt.u32.totalorder %s3824_s18, %s3200_s14 }
 0x53f   :  { %p3206_p10 = scmp.lt.u32.totalorder %s3200_s14, %s863_s19 }
 0x540   :  { %p3205_p9 = por %p3204_p8, %p3203_p7 }
 0x542   :  { %p3207_p11 = por %p3206_p10, %p3205_p9 }
 0x544   :  { %p3208_p12 = pnand %p3207_p11, %p3201_p6 }
 0x546   :  { %3211 = shalt.err (!%p3208_p12)  }
 0x547   :  { %s3212_s17 = scalar_lea.vmem %s867_s7, 64  ;;  %p3217_p0 = scmp.lt.s32.totalorder %s867_s7, %s3806_s25 }
 0x548   :  { %p3213_p13 = scmp.ne.s32.totalorder %s867_s7, %s3212_s17  ;;  %p3218_p1 = scmp.lt.s32.totalorder %s3833_s21, %s3212_s17 }
 0x54a   :  { %p3219_p2 = por %p3218_p1, %p3217_p0 }
 0x54c   :  { %p3220_p3 = pnand %p3219_p2, %p3213_p13 }
 0x54e   :  { %3223 = shalt.err (!%p3220_p3)  }
 0x54f   :  { %869 = dma.hbm_to_vmem [thread:$0]  %s863_s19, 64, %s867_s7, [#allocation2 + $0x5], %s3698_s23, %s3698_s23, %s3699_s24 }
 0x550   :  { %3624 = dma.done.wait [#allocation2 + $0x6], 64 }
 0x551   :  { %3625 = vsyncadd [#allocation2 + $0x6], 4294967232  ;;  %s874_s8 = sshrl.u32 %s4710_s5, 3  ;;  %s875_s30 = sand.u32 7, %s4710_s5  }
 0x552   :  { %s4726_s4 = sld [smem:[#allocation5 + $0x37]]  ;;  %s1745_s6 = sshll.u32 %s874_s8, 5 }
 0x553   :  { %s877_s16 = sadd.s32 %s1745_s6, %s875_s30  ;;  %s3751_s27 = smov [#allocation6 + $0xc6]  }
 0x554   :  { %s1746_s11 = sshll.u32 %s877_s16, 4  ;;  %s882_s13 = sshll.u32 %s3751_s27, 4  ;;  %s883_s13 = int_to_ptr.vmem [resolvable:$true] %s882_s13 }
 0x555   :  { %s879_s1 = scalar_lea.hbm %s4993_s2, %s1746_s11 }
 0x556   :  { %s3224_s10 = scalar_lea.hbm %s879_s1, 64  ;;  %p3227_p6 = scmp.lt.u32.totalorder %s879_s1, %s4993_s2 }
 0x557   :  { %p3225_p4 = scmp.ne.s32.totalorder %s879_s1, %s3224_s10  ;;  %p3228_p7 = scmp.lt.u32.totalorder %s3824_s18, %s3224_s10 }
 0x558   :  { %p3230_p9 = scmp.lt.u32.totalorder %s3224_s10, %s879_s1 }
 0x559   :  { %p3229_p8 = por %p3228_p7, %p3227_p6 }
 0x55b   :  { %p3231_p10 = por %p3230_p9, %p3229_p8 }
 0x55d   :  { %p3232_p11 = pnand %p3231_p10, %p3225_p4 }
 0x55f   :  { %3235 = shalt.err (!%p3232_p11)  }
 0x560   :  { %s3236_s5 = scalar_lea.vmem %s883_s13, 64  ;;  %p3241_p13 = scmp.lt.s32.totalorder %s883_s13, %s3806_s25 }
 0x561   :  { %p3237_p12 = scmp.ne.s32.totalorder %s883_s13, %s3236_s5  ;;  %p3242_p0 = scmp.lt.s32.totalorder %s3833_s21, %s3236_s5 }
 0x563   :  { %p3243_p1 = por %p3242_p0, %p3241_p13 }
 0x565   :  { %p3244_p2 = pnand %p3243_p1, %p3237_p12 }
 0x567   :  { %3247 = shalt.err (!%p3244_p2)  }
 0x568   :  { %885 = dma.hbm_to_vmem [thread:$0]  %s879_s1, 64, %s883_s13, [#allocation2 + $0x6], %s3698_s23, %s3698_s23, %s3699_s24 }
 0x569   :  { %3626 = dma.done.wait [#allocation2 + $0x7], 64 }
 0x56a   :  { %3627 = vsyncadd [#allocation2 + $0x7], 4294967232  ;;  %s890_s9 = sshrl.u32 %s4726_s4, 3  ;;  %s891_s15 = sand.u32 7, %s4726_s4  }
 0x56b   :  { %s4742_s19 = sld [smem:[#allocation5 + $0x38]]  ;;  %s1748_s14 = sshll.u32 %s890_s9, 5 }
 0x56c   :  { %s893_s26 = sadd.s32 %s1748_s14, %s891_s15  ;;  %s3752_s17 = smov [#allocation6 + $0xc7]  }
 0x56d   :  { %s1749_s20 = sshll.u32 %s893_s26, 4  ;;  %s898_s8 = sshll.u32 %s3752_s17, 4  ;;  %s899_s8 = int_to_ptr.vmem [resolvable:$true] %s898_s8 }
 0x56e   :  { %s895_s16 = scalar_lea.hbm %s4993_s2, %s1749_s20 }
 0x56f   :  { %s3248_s11 = scalar_lea.hbm %s895_s16, 64  ;;  %p3251_p4 = scmp.lt.u32.totalorder %s895_s16, %s4993_s2 }
 0x570   :  { %p3249_p3 = scmp.ne.s32.totalorder %s895_s16, %s3248_s11  ;;  %p3252_p6 = scmp.lt.u32.totalorder %s3824_s18, %s3248_s11 }
 0x571   :  { %p3254_p8 = scmp.lt.u32.totalorder %s3248_s11, %s895_s16 }
 0x572   :  { %p3253_p7 = por %p3252_p6, %p3251_p4 }
 0x574   :  { %p3255_p9 = por %p3254_p8, %p3253_p7 }
 0x576   :  { %p3256_p10 = pnand %p3255_p9, %p3249_p3 }
 0x578   :  { %3259 = shalt.err (!%p3256_p10)  }
 0x579   :  { %s3260_s4 = scalar_lea.vmem %s899_s8, 64  ;;  %p3265_p12 = scmp.lt.s32.totalorder %s899_s8, %s3806_s25 }
 0x57a   :  { %p3261_p11 = scmp.ne.s32.totalorder %s899_s8, %s3260_s4  ;;  %p3266_p13 = scmp.lt.s32.totalorder %s3833_s21, %s3260_s4 }
 0x57c   :  { %p3267_p0 = por %p3266_p13, %p3265_p12 }
 0x57e   :  { %p3268_p1 = pnand %p3267_p0, %p3261_p11 }
 0x580   :  { %3271 = shalt.err (!%p3268_p1)  }
 0x581   :  { %901 = dma.hbm_to_vmem [thread:$0]  %s895_s16, 64, %s899_s8, [#allocation2 + $0x7], %s3698_s23, %s3698_s23, %s3699_s24 }
 0x582   :  { %3628 = dma.done.wait [#allocation2 + $0x8], 64 }
 0x583   :  { %3629 = vsyncadd [#allocation2 + $0x8], 4294967232  ;;  %s906_s29 = sshrl.u32 %s4742_s19, 3  ;;  %s907_s12 = sand.u32 7, %s4742_s19  }
 0x584   :  { %s4758_s1 = sld [smem:[#allocation5 + $0x39]]  ;;  %s1751_s10 = sshll.u32 %s906_s29, 5 }
 0x585   :  { %s909_s28 = sadd.s32 %s1751_s10, %s907_s12  ;;  %s3753_s5 = smov [#allocation6 + $0xe0]  }
 0x586   :  { %s1752_s7 = sshll.u32 %s909_s28, 4  ;;  %s914_s9 = sshll.u32 %s3753_s5, 4  ;;  %s915_s9 = int_to_ptr.vmem [resolvable:$true] %s914_s9 }
 0x587   :  { %s911_s26 = scalar_lea.hbm %s4993_s2, %s1752_s7 }
 0x588   :  { %s3272_s20 = scalar_lea.hbm %s911_s26, 64  ;;  %p3275_p3 = scmp.lt.u32.totalorder %s911_s26, %s4993_s2 }
 0x589   :  { %p3273_p2 = scmp.ne.s32.totalorder %s911_s26, %s3272_s20  ;;  %p3276_p4 = scmp.lt.u32.totalorder %s3824_s18, %s3272_s20 }
 0x58a   :  { %p3278_p7 = scmp.lt.u32.totalorder %s3272_s20, %s911_s26 }
 0x58b   :  { %p3277_p6 = por %p3276_p4, %p3275_p3 }
 0x58d   :  { %p3279_p8 = por %p3278_p7, %p3277_p6 }
 0x58f   :  { %p3280_p9 = pnand %p3279_p8, %p3273_p2 }
 0x591   :  { %3283 = shalt.err (!%p3280_p9)  }
 0x592   :  { %s3284_s19 = scalar_lea.vmem %s915_s9, 64  ;;  %p3289_p11 = scmp.lt.s32.totalorder %s915_s9, %s3806_s25 }
 0x593   :  { %p3285_p10 = scmp.ne.s32.totalorder %s915_s9, %s3284_s19  ;;  %p3290_p12 = scmp.lt.s32.totalorder %s3833_s21, %s3284_s19 }
 0x595   :  { %p3291_p13 = por %p3290_p12, %p3289_p11 }
 0x597   :  { %p3292_p0 = pnand %p3291_p13, %p3285_p10 }
 0x599   :  { %3295 = shalt.err (!%p3292_p0)  }
 0x59a   :  { %917 = dma.hbm_to_vmem [thread:$0]  %s911_s26, 64, %s915_s9, [#allocation2 + $0x8], %s3698_s23, %s3698_s23, %s3699_s24 }
 0x59b   :  { %3630 = dma.done.wait [#allocation2 + $0x9], 64 }
 0x59c   :  { %3631 = vsyncadd [#allocation2 + $0x9], 4294967232  ;;  %s922_s30 = sshrl.u32 %s4758_s1, 3  ;;  %s923_s6 = sand.u32 7, %s4758_s1  }
 0x59d   :  { %s4774_s16 = sld [smem:[#allocation5 + $0x3a]]  ;;  %s1754_s11 = sshll.u32 %s922_s30, 5 }
 0x59e   :  { %s925_s27 = sadd.s32 %s1754_s11, %s923_s6  ;;  %s3754_s4 = smov [#allocation6 + $0xe1]  }
 0x59f   :  { %s1755_s13 = sshll.u32 %s925_s27, 4  ;;  %s930_s29 = sshll.u32 %s3754_s4, 4  ;;  %s931_s29 = int_to_ptr.vmem [resolvable:$true] %s930_s29 }
 0x5a0   :  { %s927_s28 = scalar_lea.hbm %s4993_s2, %s1755_s13 }
 0x5a1   :  { %s3296_s7 = scalar_lea.hbm %s927_s28, 64  ;;  %p3299_p2 = scmp.lt.u32.totalorder %s927_s28, %s4993_s2 }
 0x5a2   :  { %p3297_p1 = scmp.ne.s32.totalorder %s927_s28, %s3296_s7  ;;  %p3300_p3 = scmp.lt.u32.totalorder %s3824_s18, %s3296_s7 }
 0x5a3   :  { %p3302_p6 = scmp.lt.u32.totalorder %s3296_s7, %s927_s28 }
 0x5a4   :  { %p3301_p4 = por %p3300_p3, %p3299_p2 }
 0x5a6   :  { %p3303_p7 = por %p3302_p6, %p3301_p4 }
 0x5a8   :  { %p3304_p8 = pnand %p3303_p7, %p3297_p1 }
 0x5aa   :  { %3307 = shalt.err (!%p3304_p8)  }
 0x5ab   :  { %s3308_s1 = scalar_lea.vmem %s931_s29, 64  ;;  %p3313_p10 = scmp.lt.s32.totalorder %s931_s29, %s3806_s25 }
 0x5ac   :  { %p3309_p9 = scmp.ne.s32.totalorder %s931_s29, %s3308_s1  ;;  %p3314_p11 = scmp.lt.s32.totalorder %s3833_s21, %s3308_s1 }
 0x5ae   :  { %p3315_p12 = por %p3314_p11, %p3313_p10 }
 0x5b0   :  { %p3316_p13 = pnand %p3315_p12, %p3309_p9 }
 0x5b2   :  { %3319 = shalt.err (!%p3316_p13)  }
 0x5b3   :  { %933 = dma.hbm_to_vmem [thread:$0]  %s927_s28, 64, %s931_s29, [#allocation2 + $0x9], %s3698_s23, %s3698_s23, %s3699_s24 }
 0x5b4   :  { %3632 = dma.done.wait [#allocation2 + $0xa], 64 }
 0x5b5   :  { %3633 = vsyncadd [#allocation2 + $0xa], 4294967232  ;;  %s938_s15 = sshrl.u32 %s4774_s16, 3  ;;  %s939_s14 = sand.u32 7, %s4774_s16  }
 0x5b6   :  { %s4790_s26 = sld [smem:[#allocation5 + $0x3b]]  ;;  %s1757_s20 = sshll.u32 %s938_s15, 5 }
 0x5b7   :  { %s941_s17 = sadd.s32 %s1757_s20, %s939_s14  ;;  %s3755_s19 = smov [#allocation6 + $0xe2]  }
 0x5b8   :  { %s1758_s8 = sshll.u32 %s941_s17, 4  ;;  %s946_s30 = sshll.u32 %s3755_s19, 4  ;;  %s947_s30 = int_to_ptr.vmem [resolvable:$true] %s946_s30 }
 0x5b9   :  { %s943_s27 = scalar_lea.hbm %s4993_s2, %s1758_s8 }
 0x5ba   :  { %s3320_s13 = scalar_lea.hbm %s943_s27, 64  ;;  %p3323_p1 = scmp.lt.u32.totalorder %s943_s27, %s4993_s2 }
 0x5bb   :  { %p3321_p0 = scmp.ne.s32.totalorder %s943_s27, %s3320_s13  ;;  %p3324_p2 = scmp.lt.u32.totalorder %s3824_s18, %s3320_s13 }
 0x5bc   :  { %p3326_p4 = scmp.lt.u32.totalorder %s3320_s13, %s943_s27 }
 0x5bd   :  { %p3325_p3 = por %p3324_p2, %p3323_p1 }
 0x5bf   :  { %p3327_p6 = por %p3326_p4, %p3325_p3 }
 0x5c1   :  { %p3328_p7 = pnand %p3327_p6, %p3321_p0 }
 0x5c3   :  { %3331 = shalt.err (!%p3328_p7)  }
 0x5c4   :  { %s3332_s16 = scalar_lea.vmem %s947_s30, 64  ;;  %p3337_p9 = scmp.lt.s32.totalorder %s947_s30, %s3806_s25 }
 0x5c5   :  { %p3333_p8 = scmp.ne.s32.totalorder %s947_s30, %s3332_s16  ;;  %p3338_p10 = scmp.lt.s32.totalorder %s3833_s21, %s3332_s16 }
 0x5c7   :  { %p3339_p11 = por %p3338_p10, %p3337_p9 }
 0x5c9   :  { %p3340_p12 = pnand %p3339_p11, %p3333_p8 }
 0x5cb   :  { %3343 = shalt.err (!%p3340_p12)  }
 0x5cc   :  { %949 = dma.hbm_to_vmem [thread:$0]  %s943_s27, 64, %s947_s30, [#allocation2 + $0xa], %s3698_s23, %s3698_s23, %s3699_s24 }
 0x5cd   :  { %3634 = dma.done.wait [#allocation2 + $0xb], 64 }
 0x5ce   :  { %3635 = vsyncadd [#allocation2 + $0xb], 4294967232  ;;  %s954_s12 = sshrl.u32 %s4790_s26, 3  ;;  %s955_s10 = sand.u32 7, %s4790_s26  }
 0x5cf   :  { %s4806_s28 = sld [smem:[#allocation5 + $0x3c]]  ;;  %s1760_s7 = sshll.u32 %s954_s12, 5 }
 0x5d0   :  { %s957_s5 = sadd.s32 %s1760_s7, %s955_s10  ;;  %s3756_s1 = smov [#allocation6 + $0xe3]  }
 0x5d1   :  { %s1761_s9 = sshll.u32 %s957_s5, 4  ;;  %s962_s15 = sshll.u32 %s3756_s1, 4  ;;  %s963_s15 = int_to_ptr.vmem [resolvable:$true] %s962_s15 }
 0x5d2   :  { %s959_s17 = scalar_lea.hbm %s4993_s2, %s1761_s9 }
 0x5d3   :  { %s3344_s8 = scalar_lea.hbm %s959_s17, 64  ;;  %p3347_p0 = scmp.lt.u32.totalorder %s959_s17, %s4993_s2 }
 0x5d4   :  { %p3345_p13 = scmp.ne.s32.totalorder %s959_s17, %s3344_s8  ;;  %p3348_p1 = scmp.lt.u32.totalorder %s3824_s18, %s3344_s8 }
 0x5d5   :  { %p3350_p3 = scmp.lt.u32.totalorder %s3344_s8, %s959_s17 }
 0x5d6   :  { %p3349_p2 = por %p3348_p1, %p3347_p0 }
 0x5d8   :  { %p3351_p4 = por %p3350_p3, %p3349_p2 }
 0x5da   :  { %p3352_p6 = pnand %p3351_p4, %p3345_p13 }
 0x5dc   :  { %3355 = shalt.err (!%p3352_p6)  }
 0x5dd   :  { %s3356_s26 = scalar_lea.vmem %s963_s15, 64  ;;  %p3361_p8 = scmp.lt.s32.totalorder %s963_s15, %s3806_s25 }
 0x5de   :  { %p3357_p7 = scmp.ne.s32.totalorder %s963_s15, %s3356_s26  ;;  %p3362_p9 = scmp.lt.s32.totalorder %s3833_s21, %s3356_s26 }
 0x5e0   :  { %p3363_p10 = por %p3362_p9, %p3361_p8 }
 0x5e2   :  { %p3364_p11 = pnand %p3363_p10, %p3357_p7 }
 0x5e4   :  { %3367 = shalt.err (!%p3364_p11)  }
 0x5e5   :  { %965 = dma.hbm_to_vmem [thread:$0]  %s959_s17, 64, %s963_s15, [#allocation2 + $0xb], %s3698_s23, %s3698_s23, %s3699_s24 }
 0x5e6   :  { %3636 = dma.done.wait [#allocation2 + $0xc], 64 }
 0x5e7   :  { %3637 = vsyncadd [#allocation2 + $0xc], 4294967232  ;;  %s970_s6 = sshrl.u32 %s4806_s28, 3  ;;  %s971_s11 = sand.u32 7, %s4806_s28  }
 0x5e8   :  { %s4822_s27 = sld [smem:[#allocation5 + $0x3d]]  ;;  %s1763_s13 = sshll.u32 %s970_s6, 5 }
 0x5e9   :  { %s973_s4 = sadd.s32 %s1763_s13, %s971_s11  ;;  %s3757_s16 = smov [#allocation6 + $0xe4]  }
 0x5ea   :  { %s1764_s29 = sshll.u32 %s973_s4, 4  ;;  %s978_s12 = sshll.u32 %s3757_s16, 4  ;;  %s979_s12 = int_to_ptr.vmem [resolvable:$true] %s978_s12 }
 0x5eb   :  { %s975_s5 = scalar_lea.hbm %s4993_s2, %s1764_s29 }
 0x5ec   :  { %s3368_s9 = scalar_lea.hbm %s975_s5, 64  ;;  %p3371_p13 = scmp.lt.u32.totalorder %s975_s5, %s4993_s2 }
 0x5ed   :  { %p3369_p12 = scmp.ne.s32.totalorder %s975_s5, %s3368_s9  ;;  %p3372_p0 = scmp.lt.u32.totalorder %s3824_s18, %s3368_s9 }
 0x5ee   :  { %p3374_p2 = scmp.lt.u32.totalorder %s3368_s9, %s975_s5 }
 0x5ef   :  { %p3373_p1 = por %p3372_p0, %p3371_p13 }
 0x5f1   :  { %p3375_p3 = por %p3374_p2, %p3373_p1 }
 0x5f3   :  { %p3376_p4 = pnand %p3375_p3, %p3369_p12 }
 0x5f5   :  { %3379 = shalt.err (!%p3376_p4)  }
 0x5f6   :  { %s3380_s28 = scalar_lea.vmem %s979_s12, 64  ;;  %p3385_p7 = scmp.lt.s32.totalorder %s979_s12, %s3806_s25 }
 0x5f7   :  { %p3381_p6 = scmp.ne.s32.totalorder %s979_s12, %s3380_s28  ;;  %p3386_p8 = scmp.lt.s32.totalorder %s3833_s21, %s3380_s28 }
 0x5f9   :  { %p3387_p9 = por %p3386_p8, %p3385_p7 }
 0x5fb   :  { %p3388_p10 = pnand %p3387_p9, %p3381_p6 }
 0x5fd   :  { %3391 = shalt.err (!%p3388_p10)  }
 0x5fe   :  { %981 = dma.hbm_to_vmem [thread:$0]  %s975_s5, 64, %s979_s12, [#allocation2 + $0xc], %s3698_s23, %s3698_s23, %s3699_s24 }
 0x5ff   :  { %3638 = dma.done.wait [#allocation2 + $0xd], 64 }
 0x600   :  { %3639 = vsyncadd [#allocation2 + $0xd], 4294967232  ;;  %s986_s14 = sshrl.u32 %s4822_s27, 3  ;;  %s987_s20 = sand.u32 7, %s4822_s27  }
 0x601   :  { %s4838_s17 = sld [smem:[#allocation5 + $0x3e]]  ;;  %s1766_s8 = sshll.u32 %s986_s14, 5 }
 0x602   :  { %s989_s19 = sadd.s32 %s1766_s8, %s987_s20  ;;  %s3758_s26 = smov [#allocation6 + $0xe5]  }
 0x603   :  { %s1767_s30 = sshll.u32 %s989_s19, 4  ;;  %s994_s6 = sshll.u32 %s3758_s26, 4  ;;  %s995_s6 = int_to_ptr.vmem [resolvable:$true] %s994_s6 }
 0x604   :  { %s991_s4 = scalar_lea.hbm %s4993_s2, %s1767_s30 }
 0x605   :  { %s3392_s29 = scalar_lea.hbm %s991_s4, 64  ;;  %p3395_p12 = scmp.lt.u32.totalorder %s991_s4, %s4993_s2 }
 0x606   :  { %p3393_p11 = scmp.ne.s32.totalorder %s991_s4, %s3392_s29  ;;  %p3396_p13 = scmp.lt.u32.totalorder %s3824_s18, %s3392_s29 }
 0x607   :  { %p3398_p1 = scmp.lt.u32.totalorder %s3392_s29, %s991_s4 }
 0x608   :  { %p3397_p0 = por %p3396_p13, %p3395_p12 }
 0x60a   :  { %p3399_p2 = por %p3398_p1, %p3397_p0 }
 0x60c   :  { %p3400_p3 = pnand %p3399_p2, %p3393_p11 }
 0x60e   :  { %3403 = shalt.err (!%p3400_p3)  }
 0x60f   :  { %s3404_s27 = scalar_lea.vmem %s995_s6, 64  ;;  %p3409_p6 = scmp.lt.s32.totalorder %s995_s6, %s3806_s25 }
 0x610   :  { %p3405_p4 = scmp.ne.s32.totalorder %s995_s6, %s3404_s27  ;;  %p3410_p7 = scmp.lt.s32.totalorder %s3833_s21, %s3404_s27 }
 0x612   :  { %p3411_p8 = por %p3410_p7, %p3409_p6 }
 0x614   :  { %p3412_p9 = pnand %p3411_p8, %p3405_p4 }
 0x616   :  { %3415 = shalt.err (!%p3412_p9)  }
 0x617   :  { %997 = dma.hbm_to_vmem [thread:$0]  %s991_s4, 64, %s995_s6, [#allocation2 + $0xd], %s3698_s23, %s3698_s23, %s3699_s24 }
 0x618   :  { %3640 = dma.done.wait [#allocation2 + $0xe], 64 }
 0x619   :  { %3641 = vsyncadd [#allocation2 + $0xe], 4294967232  ;;  %s1002_s10 = sshrl.u32 %s4838_s17, 3  ;;  %s1003_s7 = sand.u32 7, %s4838_s17  }
 0x61a   :  { %s4854_s5 = sld [smem:[#allocation5 + $0x3f]]  ;;  %s1769_s9 = sshll.u32 %s1002_s10, 5 }
 0x61b   :  { %s1005_s1 = sadd.s32 %s1769_s9, %s1003_s7  ;;  %s3759_s28 = smov [#allocation6 + $0xe6]  }
 0x61c   :  { %s1770_s15 = sshll.u32 %s1005_s1, 4  ;;  %s1010_s14 = sshll.u32 %s3759_s28, 4  ;;  %s1011_s14 = int_to_ptr.vmem [resolvable:$true] %s1010_s14 }
 0x61d   :  { %s1007_s19 = scalar_lea.hbm %s4993_s2, %s1770_s15 }
 0x61e   :  { %s3416_s30 = scalar_lea.hbm %s1007_s19, 64  ;;  %p3419_p11 = scmp.lt.u32.totalorder %s1007_s19, %s4993_s2 }
 0x61f   :  { %p3417_p10 = scmp.ne.s32.totalorder %s1007_s19, %s3416_s30  ;;  %p3420_p12 = scmp.lt.u32.totalorder %s3824_s18, %s3416_s30 }
 0x620   :  { %p3422_p0 = scmp.lt.u32.totalorder %s3416_s30, %s1007_s19 }
 0x621   :  { %p3421_p13 = por %p3420_p12, %p3419_p11 }
 0x623   :  { %p3423_p1 = por %p3422_p0, %p3421_p13 }
 0x625   :  { %p3424_p2 = pnand %p3423_p1, %p3417_p10 }
 0x627   :  { %3427 = shalt.err (!%p3424_p2)  }
 0x628   :  { %s3428_s17 = scalar_lea.vmem %s1011_s14, 64  ;;  %p3433_p4 = scmp.lt.s32.totalorder %s1011_s14, %s3806_s25 }
 0x629   :  { %p3429_p3 = scmp.ne.s32.totalorder %s1011_s14, %s3428_s17  ;;  %p3434_p6 = scmp.lt.s32.totalorder %s3833_s21, %s3428_s17 }
 0x62b   :  { %p3435_p7 = por %p3434_p6, %p3433_p4 }
 0x62d   :  { %p3436_p8 = pnand %p3435_p7, %p3429_p3 }
 0x62f   :  { %3439 = shalt.err (!%p3436_p8)  }
 0x630   :  { %1013 = dma.hbm_to_vmem [thread:$0]  %s1007_s19, 64, %s1011_s14, [#allocation2 + $0xe], %s3698_s23, %s3698_s23, %s3699_s24 }
 0x631   :  { %3642 = dma.done.wait [#allocation2 + $0xf], 64 }
 0x632   :  { %3643 = vsyncadd [#allocation2 + $0xf], 4294967232  ;;  %s1018_s11 = sshrl.u32 %s4854_s5, 3  ;;  %s1019_s13 = sand.u32 7, %s4854_s5  }
 0x633   :  { %s1772_s4 = sshll.u32 %s1018_s11, 5  ;;  %s3760_s16 = smov [#allocation6 + $0xe7]  }
 0x634   :  { %s1021_s29 = sadd.s32 %s1772_s4, %s1019_s13  ;;  %s1026_s12 = sshll.u32 %s3760_s16, 4  ;;  %s1027_s12 = int_to_ptr.vmem [resolvable:$true] %s1026_s12 }
 0x635   :  { %s1773_s27 = sshll.u32 %s1021_s29, 4 }
 0x636   :  { %s1023_s9 = scalar_lea.hbm %s4993_s2, %s1773_s27 }
 0x637   :  { %s3440_s1 = scalar_lea.hbm %s1023_s9, 64  ;;  %p3443_p10 = scmp.lt.u32.totalorder %s1023_s9, %s4993_s2 }
 0x638   :  { %p3441_p9 = scmp.ne.s32.totalorder %s1023_s9, %s3440_s1  ;;  %p3444_p11 = scmp.lt.u32.totalorder %s3824_s18, %s3440_s1 }
 0x639   :  { %p3446_p13 = scmp.lt.u32.totalorder %s3440_s1, %s1023_s9 }
 0x63a   :  { %p3445_p12 = por %p3444_p11, %p3443_p10 }
 0x63c   :  { %p3447_p0 = por %p3446_p13, %p3445_p12 }
 0x63e   :  { %p3448_p1 = pnand %p3447_p0, %p3441_p9 }
 0x640   :  { %3451 = shalt.err (!%p3448_p1)  }
 0x641   :  { %s3452_s5 = scalar_lea.vmem %s1027_s12, 64  ;;  %p3457_p3 = scmp.lt.s32.totalorder %s1027_s12, %s3806_s25 }
 0x642   :  { %p3453_p2 = scmp.ne.s32.totalorder %s1027_s12, %s3452_s5  ;;  %p3458_p4 = scmp.lt.s32.totalorder %s3833_s21, %s3452_s5 }
 0x644   :  { %p3459_p6 = por %p3458_p4, %p3457_p3 }
 0x646   :  { %p3460_p7 = pnand %p3459_p6, %p3453_p2 }
 0x648   :  { %3463 = shalt.err (!%p3460_p7)  }
 0x649   :  { %1029 = dma.hbm_to_vmem [thread:$0]  %s1023_s9, 64, %s1027_s12, [#allocation2 + $0xf], %s3698_s23, %s3698_s23, %s3699_s24 }
 0x64a   :  { %3644 = dma.done.wait [#allocation2], 64 }
 0x64b   :  { %3645 = vsyncadd [#allocation2], 4294967232 }
 0x64c   :  { %3646 = dma.done.wait [#allocation2 + $0x1], 64 }
 0x64d   :  { %3647 = vsyncadd [#allocation2 + $0x1], 4294967232 }
 0x64e   :  { %3648 = dma.done.wait [#allocation2 + $0x2], 64 }
 0x64f   :  { %3649 = vsyncadd [#allocation2 + $0x2], 4294967232 }
 0x650   :  { %3650 = dma.done.wait [#allocation2 + $0x3], 64 }
 0x651   :  { %3651 = vsyncadd [#allocation2 + $0x3], 4294967232 }
 0x652   :  { %3652 = dma.done.wait [#allocation2 + $0x4], 64 }
 0x653   :  { %3653 = vsyncadd [#allocation2 + $0x4], 4294967232 }
 0x654   :  { %3654 = dma.done.wait [#allocation2 + $0x5], 64 }
 0x655   :  { %3655 = vsyncadd [#allocation2 + $0x5], 4294967232 }
 0x656   :  { %3656 = dma.done.wait [#allocation2 + $0x6], 64 }
 0x657   :  { %3657 = vsyncadd [#allocation2 + $0x6], 4294967232 }
 0x658   :  { %3658 = dma.done.wait [#allocation2 + $0x7], 64 }
 0x659   :  { %3659 = vsyncadd [#allocation2 + $0x7], 4294967232 }
 0x65a   :  { %3660 = dma.done.wait [#allocation2 + $0x8], 64 }
 0x65b   :  { %3661 = vsyncadd [#allocation2 + $0x8], 4294967232 }
 0x65c   :  { %3662 = dma.done.wait [#allocation2 + $0x9], 64 }
 0x65d   :  { %3663 = vsyncadd [#allocation2 + $0x9], 4294967232 }
 0x65e   :  { %3664 = dma.done.wait [#allocation2 + $0xa], 64 }
 0x65f   :  { %3665 = vsyncadd [#allocation2 + $0xa], 4294967232 }
 0x660   :  { %3666 = dma.done.wait [#allocation2 + $0xb], 64 }
 0x661   :  { %3667 = vsyncadd [#allocation2 + $0xb], 4294967232 }
 0x662   :  { %3668 = dma.done.wait [#allocation2 + $0xc], 64 }
 0x663   :  { %3669 = vsyncadd [#allocation2 + $0xc], 4294967232 }
 0x664   :  { %3670 = dma.done.wait [#allocation2 + $0xd], 64 }
 0x665   :  { %3671 = vsyncadd [#allocation2 + $0xd], 4294967232 }
 0x666   :  { %3672 = dma.done.wait [#allocation2 + $0xe], 64 }
 0x667   :  { %3673 = vsyncadd [#allocation2 + $0xe], 4294967232 }
 0x668   :  { %3674 = dma.done.wait [#allocation2 + $0xf], 64 }
 0x669   :  { %3675 = vsyncadd [#allocation2 + $0xf], 4294967232 }
 0x66a PF:  { %1065 = sbr.rel (!%p19_p5) target bundleno = 1792 (0x700), region = 9  ;;  %p1777_p8 = scmp.lt.s32.totalorder (%p19_p5), %s4991_s0, 16 }
 0x671   :  { %s4890_s24 = scalar_select %p1777_p8, %s3803_s22, 16 }
 0x673   :  { %p1780_p9 = scmp.le.s32.totalorder %s4890_s24, 0 }
 0x674   :  { %s4895_s14 = smov (!%p1780_p9), 0  }
 0x675   :  { %1569 = sbr.rel (%p1780_p9) target bundleno = 1704 (0x6a8), region = 207 }
 0x67c LB: > { %p1074_p5 = scmp.lt.s32.totalorder %s3684_s14, 0  ;;  %s1075_s20 = ssub.s32 0, %s3684_s14  ;;  %s3684_s14 = sphi %s4895_s14, %s1071_s14  }
 0x67d   : > { %s1781_s8 = smin.u32 %s3684_s14, %s1075_s20  ;;  %s1087_s19 = sld [smem:[#allocation5 + %s3684_s14]] }
 0x67e   : > { %s1077_s30 = sand.u32 15, %s1781_s8   ;;  %s1094_s26 = sshrl.u32 %s3684_s14, 3 }
 0x67f   : > { %s1078_s6 = ssub.s32 0, %s1077_s30  ;;  %s1095_s17 = sand.u32 7, %s3684_s14  }
 0x680   : > { %s4996_s6 = smov (!%p1074_p5, %s1078_s6), %s1077_s30  ;;  %s1786_s11 = sshll.u32 %s1094_s26, 5 }
 0x681   : > { %p1783_p10 = scmp.lt.s32.totalorder %s4996_s6, 0  ;;  %s1084_s13 = sadd.s32 16, %s4996_s6 }
 0x682   : > { %s1097_s12 = sadd.s32 %s1786_s11, %s1095_s17  ;;  %s3466_s23 = scalar_lea.hbm %s4993_s2, 2048 }
 0x683   : > { %s1088_s4 = sshrl.u32 %s1087_s19, 3  ;;  %s1089_s29 = sand.u32 7, %s1087_s19  }
 0x684   : > { %s4998_s13 = smov (!%p1783_p10, %s1084_s13), %s4996_s6  ;;  %s1784_s16 = sshll.u32 %s1088_s4, 5 }
 0x685   : > { %s1091_s27 = sadd.s32 %s1784_s16, %s1089_s29  ;;  %s1098_s15 = scalar_lea.vmem [#allocation6], %s1097_s12 }
 0x686   : > { %s1785_s10 = sshll.u32 %s1091_s27, 4  ;;  %s1101_s28 = sshll.u32 %s1098_s15, 4  ;;  %s4913_s28 = int_to_ptr.vmem [resolvable:$true] %s1101_s28 }
 0x687   : > { %s4911_s1 = scalar_lea.hbm %s4993_s2, %s1785_s10  ;;  %s1099_s5 = scalar_lea.sflag [#allocation2], %s4998_s13 }
 0x688   : > { %s3464_s25 = scalar_lea.hbm %s4911_s1, 64  ;;  %p3467_p12 = scmp.lt.u32.totalorder %s4911_s1, %s4993_s2 }
 0x689   : > { %p3465_p11 = scmp.ne.s32.totalorder %s4911_s1, %s3464_s25  ;;  %p3468_p13 = scmp.lt.u32.totalorder %s3466_s23, %s3464_s25 }
 0x68a   : > { %p3470_p1 = scmp.lt.u32.totalorder %s3464_s25, %s4911_s1 }
 0x68b   : > { %p3469_p0 = por %p3468_p13, %p3467_p12 }
 0x68d   : > { %p3471_p2 = por %p3470_p1, %p3469_p0 }
 0x68f   : > { %p3472_p3 = pnand %p3471_p2, %p3465_p11 }
 0x691   : > { %3475 = shalt.err (!%p3472_p3)  }
 0x692   : > { %s3476_s19 = scalar_lea.vmem %s4913_s28, 64  ;;  %s3761_s30 = smov [#allocation6]  }
 0x693   : > { %p3477_p4 = scmp.ne.s32.totalorder %s4913_s28, %s3476_s19  ;;  %s3478_s26 = sshll.u32 %s3761_s30, 4  ;;  %s3479_s26 = int_to_ptr.vmem [resolvable:$false] %s3478_s26 }
 0x694   : > { %s3480_s6 = scalar_lea.vmem %s3479_s26, 4096  ;;  %p3481_p6 = scmp.lt.s32.totalorder %s4913_s28, %s3479_s26 }
 0x695   : > { %p3482_p7 = scmp.lt.s32.totalorder %s3480_s6, %s3476_s19 }
 0x697   : > { %p3483_p8 = por %p3482_p7, %p3481_p6 }
 0x699   : > { %p3484_p5 = pnand %p3483_p8, %p3477_p4 }
 0x69b   : > { %3487 = shalt.err (!%p3484_p5)  }
 0x69c   : > { %s3762_s17 = smov 128   ;;  %s3763_s11 = smov 1  }
 0x69d   : > { %1104 = dma.hbm_to_vmem [thread:$0]  %s4911_s1, 64, %s4913_s28, %s1099_s5, %s3762_s17, %s3762_s17, %s3763_s11 }
 0x69e   : > { %s1071_s14 = sadd.s32 1, %s3684_s14  }
 0x69f   : > { %p1070_p10 = scmp.ge.s32.totalorder %s1071_s14, %s4890_s24 }
 0x6a1   :  { %1073 = sbr.rel (!%p1070_p10) target bundleno = 1660 (0x67c), region = 213 }
 0x6a8 PF:  { %p1815_p11 = scmp.le.s32.totalorder %s4991_s0, 16 }
 0x6a9   :  { %s4938_s29 = smov (!%p1815_p11), 16  }
 0x6aa   :  { %1574 = sbr.rel (%p1815_p11) target bundleno = 1763 (0x6e3), region = 218 }
 0x6b1 LB: > { %s1112_s16 = sld [smem:[#allocation5 + %s3688_s29]]  ;;  %p1113_p12 = scmp.lt.s32.totalorder %s3688_s29, 0  ;;  %s3688_s29 = sphi %s4938_s29, %s1108_s29  }
 0x6b2   : > { %s1114_s14 = ssub.s32 0, %s3688_s29 }
 0x6b3   : > { %s1788_s12 = smin.u32 %s3688_s29, %s1114_s14 }
 0x6b4   : > { %s1116_s27 = sand.u32 15, %s1788_s12  }
 0x6b5   : > { %s1117_s10 = ssub.s32 0, %s1116_s27 }
 0x6b6   : > { %s5000_s10 = smov (!%p1113_p12, %s1117_s10), %s1116_s27 }
 0x6b7   : > { %p1790_p13 = scmp.lt.s32.totalorder %s5000_s10, 0  ;;  %s1123_s0 = sadd.s32 16, %s5000_s10 }
 0x6b9   : > { %s5002_s0 = smov (!%p1790_p13, %s1123_s0), %s5000_s10 }
 0x6ba   : > { %s4947_s7 = scalar_lea.sflag [#allocation2], %s5002_s0 }
 0x6bb   : > { %3676 = dma.done.wait %s4947_s7, 64 }
 0x6bc   : > { %3677 = vsyncadd %s4947_s7, 4294967232  ;;  %s1128_s9 = sshrl.u32 %s1112_s16, 3  ;;  %s1129_s1 = sand.u32 7, %s1112_s16  }
 0x6bd   : > { %s1791_s15 = sshll.u32 %s1128_s9, 5  ;;  %s1134_s28 = sshrl.u32 %s3688_s29, 3 }
 0x6be   : > { %s1131_s5 = sadd.s32 %s1791_s15, %s1129_s1  ;;  %s1135_s25 = sand.u32 7, %s3688_s29  }
 0x6bf   : > { %s1792_s18 = sshll.u32 %s1131_s5, 4  ;;  %s1793_s21 = sshll.u32 %s1134_s28, 5 }
 0x6c0   : > { %s4956_s8 = scalar_lea.hbm %s4993_s2, %s1792_s18  ;;  %s1137_s19 = sadd.s32 %s1793_s21, %s1135_s25 }
 0x6c1   : > { %s1138_s30 = scalar_lea.vmem [#allocation6], %s1137_s19  ;;  %s3488_s6 = scalar_lea.hbm %s4956_s8, 64 }
 0x6c2   : > { %s1140_s26 = sshll.u32 %s1138_s30, 4  ;;  %p3489_p0 = scmp.ne.s32.totalorder %s4956_s8, %s3488_s6  ;;  %s1141_s26 = int_to_ptr.vmem [resolvable:$true] %s1140_s26 }
 0x6c3   : > { %s3490_s13 = scalar_lea.hbm %s4993_s2, 2048  ;;  %p3491_p1 = scmp.lt.u32.totalorder %s4956_s8, %s4993_s2 }
 0x6c4   : > { %p3492_p2 = scmp.lt.u32.totalorder %s3490_s13, %s3488_s6  ;;  %p3494_p4 = scmp.lt.u32.totalorder %s3488_s6, %s4956_s8 }
 0x6c6   : > { %p3493_p3 = por %p3492_p2, %p3491_p1 }
 0x6c8   : > { %p3495_p6 = por %p3494_p4, %p3493_p3 }
 0x6ca   : > { %p3496_p7 = pnand %p3495_p6, %p3489_p0 }
 0x6cc   : > { %3499 = shalt.err (!%p3496_p7)  }
 0x6cd   : > { %s3500_s14 = scalar_lea.vmem %s1141_s26, 64  ;;  %s3764_s12 = smov [#allocation6]  }
 0x6ce   : > { %p3501_p8 = scmp.ne.s32.totalorder %s1141_s26, %s3500_s14  ;;  %s3502_s27 = sshll.u32 %s3764_s12, 4  ;;  %s3503_s27 = int_to_ptr.vmem [resolvable:$false] %s3502_s27 }
 0x6cf   : > { %s3504_s10 = scalar_lea.vmem %s3503_s27, 4096  ;;  %p3505_p5 = scmp.lt.s32.totalorder %s1141_s26, %s3503_s27 }
 0x6d0   : > { %p3506_p10 = scmp.lt.s32.totalorder %s3504_s10, %s3500_s14 }
 0x6d2   : > { %p3507_p11 = por %p3506_p10, %p3505_p5 }
 0x6d4   : > { %p3508_p12 = pnand %p3507_p11, %p3501_p8 }
 0x6d6   : > { %3511 = shalt.err (!%p3508_p12)  }
 0x6d7   : > { %s3765_s0 = smov 128   ;;  %s3766_s9 = smov 1  }
 0x6d8   : > { %1143 = dma.hbm_to_vmem [thread:$0]  %s4956_s8, 64, %s1141_s26, %s4947_s7, %s3765_s0, %s3765_s0, %s3766_s9 }
 0x6d9   : > { %s1108_s29 = sadd.s32 1, %s3688_s29  }
 0x6da   : > { %p1107_p13 = scmp.ge.s32.totalorder %s1108_s29, %s3803_s22 }
 0x6dc   :  { %1110 = sbr.rel (!%p1107_p13) target bundleno = 1713 (0x6b1), region = 224 }
 0x6e3 PF:  { %1579 = sbr.rel (%p1780_p9) target bundleno = 1792 (0x700), region = 229  ;;  %s3690_s1 = smov (!%p1780_p9), 0  }
 0x6ea LB: > { %s1150_s15 = ssub.s32 %s3803_s22, %s4890_s24  ;;  %s3692_s1 = sphi %s3690_s1, %s1147_s1  }
 0x6eb   : > { %s1151_s28 = sadd.s32 %s3692_s1, %s1150_s15 }
 0x6ec   : > { %p1152_p0 = scmp.lt.s32.totalorder %s1151_s28, 0  ;;  %s1153_s7 = ssub.s32 0, %s1151_s28 }
 0x6ed   : > { %s1795_s5 = smin.u32 %s1153_s7, %s1151_s28 }
 0x6ee   : > { %s1155_s25 = sand.u32 15, %s1795_s5  }
 0x6ef   : > { %s1156_s18 = ssub.s32 0, %s1155_s25 }
 0x6f0   : > { %s5004_s18 = smov (!%p1152_p0, %s1156_s18), %s1155_s25 }
 0x6f1   : > { %p1797_p1 = scmp.lt.s32.totalorder %s5004_s18, 0  ;;  %s1162_s29 = sadd.s32 16, %s5004_s18 }
 0x6f3   : > { %s5006_s29 = smov (!%p1797_p1, %s1162_s29), %s5004_s18 }
 0x6f4   : > { %s1164_s2 = scalar_lea.sflag [#allocation2], %s5006_s29 }
 0x6f5   : > { %3678 = dma.done.wait %s1164_s2, 64 }
 0x6f6   : > { %3679 = vsyncadd %s1164_s2, 4294967232  ;;  %s1147_s1 = sadd.s32 1, %s3692_s1  }
 0x6f7   : > { %p1146_p9 = scmp.ge.s32.totalorder %s1147_s1, %s4890_s24 }
 0x6f9   :  { %1149 = sbr.rel (!%p1146_p9) target bundleno = 1770 (0x6ea), region = 235 }
 0x700 PF:  { %s3767_s21 = smov [#allocation6]  }
 0x701   :  { %s1172_s23 = sshll.u32 %s3767_s21, 4  ;;  %s1173_s23 = int_to_ptr.vmem [resolvable:$true] %s1172_s23 }
 0x702   :  { %s3512_s20 = scalar_lea.vmem %s1173_s23, 4096  ;;  %p3517_p3 = scmp.lt.s32.totalorder %s1173_s23, %s1173_s23 }
 0x703   :  { %p3513_p2 = scmp.ne.s32.totalorder %s1173_s23, %s3512_s20  ;;  %p3518_p4 = scmp.lt.s32.totalorder %s3512_s20, %s3512_s20 }
 0x705   :  { %p3519_p6 = por %p3518_p4, %p3517_p3 }
 0x707   :  { %p3520_p7 = pnand %p3519_p6, %p3513_p2 }
 0x709   :  { %3523 = shalt.err (!%p3520_p7)
}
 0x70a   :  { %s3524_s30 = scalar_lea.hbm %s4994_s3, 4096 }
 0x70b   :  { %p3525_p8 = scmp.ne.s32.totalorder %s4994_s3, %s3524_s30  ;;  %p3528_p5 = scmp.lt.u32.totalorder %s3524_s30, %s4994_s3 }
 0x70d   :  { %p3530_p10 = pnand %p3528_p5, %p3525_p8 }
 0x70f   :  { %3533 = shalt.err (!%p3530_p10)
}
 0x710   :  { %s3768_s17 = smov 512   ;;  %s3769_s11 = smov 32  }
 0x711   :  { %1178 = dma.vmem_to_hbm [thread:$0]  %s1173_s23, 4096, %s4994_s3, [#allocation7], %s3768_s17, %s3768_s17, %s3769_s11  }
 0x712   :  { %3680 = dma.done.wait [#allocation7], 4096  }
 0x713   :  { %3681 = vsyncadd [#allocation7], 4294963200 }
 0x714   :  { %1182 = vsyncpa [#allocation7], 1 }
 0x715   :  { %1183 = vsyncmov [#allocation2] }
 0x718   :  { %s1184_s16 = vpop.sfrf %1183 }
 0x719   :  { %p1798_p11 = scmp.ne.s32.totalorder %s1184_s16, 0 }
 0x71b   :  { %1188 = shalt.err (%p1798_p11)  }
 0x71c   :  { %1190 = vsyncmov [#allocation2 + $0x1] }
 0x71f   :  { %s1191_s14 = vpop.sfrf %1190 }
 0x720   :  { %p1799_p12 = scmp.ne.s32.totalorder %s1191_s14, 0 }
 0x722   :  { %1195 = shalt.err (%p1799_p12)  }
 0x723   :  { %1197 = vsyncmov [#allocation2 + $0x2] }
 0x726   :  { %s1198_s12 = vpop.sfrf %1197 }
 0x727   :  { %p1800_p13 = scmp.ne.s32.totalorder %s1198_s12, 0 }
 0x729   :  { %1202 = shalt.err (%p1800_p13)  }
 0x72a   :  { %1204 = vsyncmov [#allocation2 + $0x3] }
 0x72d   :  { %s1205_s27 = vpop.sfrf %1204 }
 0x72e   :  { %p1801_p0 = scmp.ne.s32.totalorder %s1205_s27, 0 }
 0x730   :  { %1209 = shalt.err (%p1801_p0)  }
 0x731   :  { %1211 = vsyncmov [#allocation2 + $0x4] }
 0x734   :  { %s1212_s3 = vpop.sfrf %1211 }
 0x735   :  { %p1802_p1 = scmp.ne.s32.totalorder %s1212_s3, 0 }
 0x737   :  { %1216 = shalt.err (%p1802_p1)  }
 0x738   :  { %1218 = vsyncmov [#allocation2 + $0x5] }
 0x73b   :  { %s1219_s10 = vpop.sfrf %1218 }
 0x73c   :  { %p1803_p9 = scmp.ne.s32.totalorder %s1219_s10, 0 }
 0x73e   :  { %1223 = shalt.err (%p1803_p9)  }
 0x73f   :  { %1225 = vsyncmov [#allocation2 + $0x6] }
 0x742   :  { %s1226_s0 = vpop.sfrf %1225 }
 0x743   :  { %p1804_p2 = scmp.ne.s32.totalorder %s1226_s0, 0 }
 0x745   :  { %1230 = shalt.err (%p1804_p2)  }
 0x746   :  { %1232 = vsyncmov [#allocation2 + $0x7] }
 0x749   :  { %s1233_s9 = vpop.sfrf %1232 }
 0x74a   :  { %p1805_p3 = scmp.ne.s32.totalorder %s1233_s9, 0 }
 0x74c   :  { %1237 = shalt.err (%p1805_p3)  }
 0x74d   :  { %1239 = vsyncmov [#allocation2 + $0x8] }
 0x750   :  { %s1240_s1 = vpop.sfrf %1239 }
 0x751   :  { %p1806_p4 = scmp.ne.s32.totalorder %s1240_s1, 0 }
 0x753   :  { %1244 = shalt.err (%p1806_p4)  }
 0x754   :  { %1246 = vsyncmov [#allocation2 + $0x9] }
 0x757   :  { %s1247_s15 = vpop.sfrf %1246 }
 0x758   :  { %p1807_p6 = scmp.ne.s32.totalorder %s1247_s15, 0 }
 0x75a   :  { %1251 = shalt.err (%p1807_p6)  }
 0x75b   :  { %1253 = vsyncmov [#allocation2 + $0xa] }
 0x75e   :  { %s1254_s28 = vpop.sfrf %1253 }
 0x75f   :  { %p1808_p7 = scmp.ne.s32.totalorder %s1254_s28, 0 }
 0x761   :  { %1258 = shalt.err (%p1808_p7)  }
 0x762   :  { %1260 = vsyncmov [#allocation2 + $0xb] }
 0x765   :  { %s1261_s7 = vpop.sfrf %1260 }
 0x766   :  { %p1809_p8 = scmp.ne.s32.totalorder %s1261_s7, 0 }
 0x768   :  { %1265 = shalt.err (%p1809_p8)  }
 0x769   :  { %1267 = vsyncmov [#allocation2 + $0xc] }
 0x76c   :  { %s1268_s5 = vpop.sfrf %1267 }
 0x76d   :  { %p1810_p5 = scmp.ne.s32.totalorder %s1268_s5, 0 }
 0x76f   :  { %1272 = shalt.err (%p1810_p5)  }
 0x770   :  { %1274 = vsyncmov [#allocation2 + $0xd] }
 0x773   :  { %s1275_s25 = vpop.sfrf %1274 }
 0x774   :  { %p1811_p10 = scmp.ne.s32.totalorder %s1275_s25, 0 }
 0x776   :  { %1279 = shalt.err (%p1811_p10)  }
 0x777   :  { %1281 = vsyncmov [#allocation2 + $0xe] }
 0x77a   :  { %s1282_s18 = vpop.sfrf %1281 }
 0x77b   :  { %p1812_p11 = scmp.ne.s32.totalorder %s1282_s18, 0 }
 0x77d   :  { %1286 = shalt.err (%p1812_p11)  }
 0x77e   :  { %1288 = vsyncmov [#allocation2 + $0xf] }
 0x781   :  { %s1289_s29 = vpop.sfrf %1288 }
 0x782   :  { %p1813_p12 = scmp.ne.s32.totalorder %s1289_s29, 0 }
 0x784   :  { %1293 = shalt.err (%p1813_p12)  }

</bundles_post_ra>
